<compile_context>
chip_gen: v7x
topology: tpu7x:2x2x1
jax: 0.10.0
libtpu: 0.0.40
codegen_flags: <defaults>
</compile_context>

<pallas_src>
import functools

import jax
import jax.numpy as jnp
from jax import lax
from jax.experimental import pallas as pl
from jax.experimental.pallas import tpu as pltpu

LEAK = 0.2
BN_EPS = 1e-5
KW = 4                           # conv kernel size
PAD = 2                          # ceil((4 - 1) / 2)
ACT_DTYPE = jnp.bfloat16         # inter-layer activation / weight storage dtype
VMEM_LIMIT_BYTES = 48 * 1024 * 1024


def _leaky(y):
    return jnp.where(y >= 0.0, y, LEAK * y)


# ---------------------------------------------------------------------------
# Conv kernel: one image per grid step.
#   mode == "im2col": input is wrapper-packed patches (OH, OW, 16*Cin)  (layer 1)
#   mode == "s2d":    stride-2 layer, input in (2, 2, Hh, Wh, Cin) parity planes
#                     so every tap window is a contiguous slice
#   mode == "plain":  stride-1 layer on a spatially padded (Hp, Wp, Cin) input
#   w_ref: (16*Cin, Cout) bf16 (taps folded into K), b_ref: (1, Cout) f32
#   o_ref: (OH, OW, Cout); optional stat_ref: (2, Cout) = per-image [sum, sumsq]
# ---------------------------------------------------------------------------
def _conv_kernel(x_ref, w_ref, b_ref, o_ref, *stat_refs,
                 mode, oh, ow, apply_act, emit_stats):
    cout = w_ref.shape[-1]
    w = w_ref[...]                       # hoisted: loaded once per grid step
    bias = b_ref[...]                    # (1, Cout) f32
    if emit_stats:
        s1 = jnp.zeros((1, cout), jnp.float32)
        s2 = jnp.zeros((1, cout), jnp.float32)

    # TODO(synk): replace the static row unroll with a fori_loop over TILE_OH row
    #             blocks (M = TILE_OH*OW) once OH exceeds ~16.
    for oy in range(oh):
        if mode == "im2col":
            patches = x_ref[oy]                                   # (OW, 16*Cin)
        else:
            parts = []
            for ky in range(KW):
                for kx in range(KW):
                    if mode == "s2d":
                        win = x_ref[ky % 2, kx % 2, oy + ky // 2,
                                    kx // 2:kx // 2 + ow, :]
                    else:                                         # stride 1
                        win = x_ref[oy + ky, kx:kx + ow, :]
                    parts.append(win)                             # (OW, Cin)
            patches = jnp.concatenate(parts, axis=-1)             # (OW, 16*Cin)

        # Single MXU matmul with the 16 taps folded into K; f32 accumulation.
        acc = jnp.dot(patches, w, preferred_element_type=jnp.float32)  # (OW, Cout)
        y = acc + bias
        if emit_stats:
            # Stats on the biased conv output (bias is zero for BN layers, so this
            # also stays correct if a future config combines bias + BN).
            s1 = s1 + jnp.sum(y, axis=0, keepdims=True)
            s2 = s2 + jnp.sum(y * y, axis=0, keepdims=True)
        if apply_act:
            y = _leaky(y)
        o_ref[oy] = y.astype(o_ref.dtype)

    if emit_stats:
        stat_refs[0][...] = jnp.concatenate([s1, s2], axis=0)


# ---------------------------------------------------------------------------
# pallas_call wrapper
# ---------------------------------------------------------------------------
def conv_pallas(xs, w2d, b2d, *, mode, oh, ow, apply_act, emit_stats, out_dtype):
    n = xs.shape[0]
    cout = w2d.shape[-1]

    x_block = (None,) + tuple(xs.shape[1:])
    nx = len(x_block)
    x_spec = pl.BlockSpec(x_block, lambda i: (i,) + (0,) * (nx - 1))
    w_spec = pl.BlockSpec(tuple(w2d.shape), lambda i: (0, 0))
    b_spec = pl.BlockSpec(tuple(b2d.shape), lambda i: (0, 0))

    o_spec = pl.BlockSpec((None, oh, ow, cout), lambda i: (i, 0, 0, 0))
    o_shape = jax.ShapeDtypeStruct((n, oh, ow, cout), out_dtype)
    if emit_stats:
        out_shape = (o_shape, jax.ShapeDtypeStruct((n, 2, cout), jnp.float32))
        out_specs = (o_spec, pl.BlockSpec((None, 2, cout), lambda i: (i, 0, 0)))
    else:
        out_shape = o_shape
        out_specs = o_spec

    kernel = functools.partial(_conv_kernel, mode=mode, oh=oh, ow=ow,
                               apply_act=apply_act, emit_stats=emit_stats)
    return pl.pallas_call(
        kernel,
        grid=(n,),
        in_specs=[x_spec, w_spec, b_spec],
        out_specs=out_specs,
        out_shape=out_shape,
        compiler_params=pltpu.CompilerParams(
            dimension_semantics=("parallel",),
            vmem_limit_bytes=VMEM_LIMIT_BYTES),
    )(xs, w2d, b2d)


# ---------------------------------------------------------------------------
# Per-layer glue.  Everything between two pallas_calls (BN affine + LeakyReLU,
# spatial pad, layer-1 im2col / stride-2 space-to-depth, bf16 cast) is a single
# fusible XLA elementwise/pad chain -> one HBM pass per layer boundary.
# ---------------------------------------------------------------------------
def conv_layer(x, p):
    """x: (N, H, W, Cin) activation. Returns the post-layer activation
    (N, OH, OW, Cout) with BN + LeakyReLU already applied where configured."""
    n, h, w, c = x.shape
    stride = p["stride"]
    oh = (h + 2 * PAD - KW) // stride + 1
    ow = (w + 2 * PAD - KW) // stride + 1

    if p["prepack"]:
        # Layer-1 im2col-lite in the wrapper (cheap for Cin=3): (N, OH, OW, 48).
        xp = jnp.pad(x, ((0, 0), (PAD, PAD), (PAD, PAD), (0, 0)))
        parts = []
        for ky in range(KW):
            for kx in range(KW):
                parts.append(lax.slice(
                    xp, (0, ky, kx, 0),
                    (n, ky + stride * (oh - 1) + 1,
                     kx + stride * (ow - 1) + 1, c),
                    (1, stride, stride, 1)))
        xs = jnp.concatenate(parts, axis=-1).astype(ACT_DTYPE)
        mode = "im2col"
    elif stride == 2:
        eh, ew = h % 2, w % 2            # make padded extents even (extra rows unused)
        xp = jnp.pad(x, ((0, 0), (PAD, PAD + eh), (PAD, PAD + ew), (0, 0)))
        hp, wp = h + 2 * PAD + eh, w + 2 * PAD + ew
        # space-to-depth parity planes: every in-kernel tap is a contiguous window.
        xs = xp.reshape(n, hp // 2, 2, wp // 2, 2, c).transpose(0, 2, 4, 1, 3, 5)
        xs = xs.astype(ACT_DTYPE)
        mode = "s2d"
    else:
        xs = jnp.pad(x, ((0, 0), (PAD, PAD), (PAD, PAD), (0, 0))).astype(ACT_DTYPE)
        mode = "plain"

    res = conv_pallas(xs, p["w2d"], p["b2d"], mode=mode, oh=oh, ow=ow,
                      apply_act=(p["act"] and not p["bn"]),
                      emit_stats=p["bn"],
                      out_dtype=(jnp.float32 if p["final"] else ACT_DTYPE))
    if not p["bn"]:
        return res

    y, stats = res
    # Training-mode BatchNorm (gamma=1, beta=0, biased variance) finalized from the
    # fused per-image sums; affine + LeakyReLU fuses with the next layer's pad.
    # Note: E[x^2]-E[x]^2 in f32 is fine at these magnitudes/tolerances (see review).
    tot = jnp.sum(stats, axis=0)                     # (2, Cout)
    cnt = float(n * oh * ow)
    mean = tot[0] / cnt
    var = jnp.maximum(tot[1] / cnt - mean * mean, 0.0)
    scale = lax.rsqrt(var + BN_EPS)
    shift = -mean * scale
    y = y.astype(jnp.float32) * scale + shift
    return _leaky(y)


# ---------------------------------------------------------------------------
# Model: parameter construction + forward
# ---------------------------------------------------------------------------
def build_params(key, input_nc=3, ndf=8, n_layers=3):
    """Mirrors NLayerDiscriminator(__init__) with norm_layer=BatchNorm2d."""
    cfgs = [dict(cin=input_nc, cout=ndf, stride=2, use_bias=True, bn=False, act=True)]
    nf_mult = 1
    for n in range(1, n_layers):
        nf_prev, nf_mult = nf_mult, min(2 ** n, 8)
        cfgs.append(dict(cin=ndf * nf_prev, cout=ndf * nf_mult, stride=2,
                         use_bias=False, bn=True, act=True))
    nf_prev, nf_mult = nf_mult, min(2 ** n_layers, 8)
    cfgs.append(dict(cin=ndf * nf_prev, cout=ndf * nf_mult, stride=1,
                     use_bias=False, bn=True, act=True))
    cfgs.append(dict(cin=ndf * nf_mult, cout=1, stride=1,
                     use_bias=True, bn=False, act=False))

    params = []
    for li, cfg in enumerate(cfgs):
        key, kw_, kb_ = jax.random.split(key, 3)
        w = 0.02 * jax.random.normal(kw_, (cfg["cout"], cfg["cin"], KW, KW), jnp.float32)
        b = (0.02 * jax.random.normal(kb_, (cfg["cout"],), jnp.float32)
             if cfg["use_bias"] else None)
        # OIHW -> HWIO -> (16*Cin, Cout), matching the (ky, kx, c) patch-lane order
        # used by the kernel / wrapper im2col.  True Cout (no 128 padding), bf16.
        w2d = jnp.transpose(w, (2, 3, 1, 0)).reshape(KW * KW * cfg["cin"], cfg["cout"])
        b2d = jnp.zeros((1, cfg["cout"]), jnp.float32)
        if b is not None:
            b2d = b2d.at[0].set(b)
        params.append(dict(cfg, weight=w, bias=b,
                           w2d=w2d.astype(ACT_DTYPE), b2d=b2d,
                           prepack=(li == 0),               # Cin=3 layer gets wrapper im2col
                           final=(li == len(cfgs) - 1)))
    return params


def nlayer_discriminator_forward(x_nchw, params):
    x = jnp.transpose(x_nchw.astype(jnp.float32), (0, 2, 3, 1))   # NCHW -> NHWC
    for p in params:
        x = conv_layer(x, p)
    return jnp.transpose(x, (0, 3, 1, 2))                         # NHWC -> NCHW


# Pure-JAX reference (same semantics) for a correctness sanity check.
def reference_forward(x_nchw, params):
    x = jnp.transpose(x_nchw.astype(jnp.float32), (0, 2, 3, 1))
    for p in params:
        w_hwio = jnp.transpose(p["weight"], (2, 3, 1, 0))
        y = lax.conv_general_dilated(
            x, w_hwio, (p["stride"], p["stride"]), ((PAD, PAD), (PAD, PAD)),
            dimension_numbers=("NHWC", "HWIO", "NHWC"))
        if p["bias"] is not None:
            y = y + p["bias"]
        if p["bn"]:
            mean = jnp.mean(y, axis=(0, 1, 2))
            var = jnp.mean((y - mean) ** 2, axis=(0, 1, 2))
            y = (y - mean) / jnp.sqrt(var + BN_EPS)
        if p["act"]:
            y = jnp.where(y >= 0.0, y, LEAK * y)
        x = y
    return jnp.transpose(x, (0, 3, 1, 2))


if __name__ == "__main__":
    key = jax.random.PRNGKey(0)
    kx, kp = jax.random.split(key)

    # small shapes: batch=2, input_nc=3, 16x16 spatial, ndf=8, n_layers=3
    x = jax.random.normal(kx, (2, 3, 16, 16), jnp.float32)
    params = build_params(kp, input_nc=3, ndf=8, n_layers=3)

    fwd = jax.jit(lambda inp: nlayer_discriminator_forward(inp, params))
    out = jax.block_until_ready(fwd(x))

    ref = jax.block_until_ready(reference_forward(x, params))
    assert out.shape == ref.shape, (out.shape, ref.shape)
    # tolerance covers bf16 inter-layer activations + default-precision MXU matmuls
    # versus the f32 XLA-conv reference
    err = float(jnp.max(jnp.abs(out - ref)))
    assert jnp.allclose(out, ref, rtol=5e-2, atol=5e-2), err

    print("KERNEL_OK")
</pallas_src>

<mosaic_0001>
module attributes {stable_mosaic.version = 11 : i64} {
  func.func @_conv_kernel(%arg0: i32, %arg1: memref<1x9x9x48xbf16, #tpu.memory_space<vmem>>, %arg2: memref<48x8xbf16, #tpu.memory_space<vmem>>, %arg3: memref<1x8xf32, #tpu.memory_space<vmem>>, %arg4: memref<1x9x9x8xbf16, #tpu.memory_space<vmem>>) attributes {dimension_semantics = [#tpu.dimension_semantics<parallel>], iteration_bounds = array<i64: 2>, scalar_prefetch = 0 : i64, scratch_operands = 0 : i64, tpu.core_type = #tpu.core_type<tc>, window_params = [{transform_indices = @transform_0, window_bounds = array<i64: 1, 9, 9, 48>}, {pipeline_mode = #tpu.pipeline_mode<synchronous>, transform_indices = @transform_1, window_bounds = array<i64: 48, 8>}, {pipeline_mode = #tpu.pipeline_mode<synchronous>, transform_indices = @transform_2, window_bounds = array<i64: 1, 8>}, {transform_indices = @transform_3, window_bounds = array<i64: 1, 9, 9, 8>}]} {
    %c0 = arith.constant 0 : index
    %c0_0 = arith.constant 0 : index
    %0 = vector.load %arg2[%c0, %c0_0] : memref<48x8xbf16, #tpu.memory_space<vmem>>, vector<48x8xbf16>
    %c0_1 = arith.constant 0 : index
    %c0_2 = arith.constant 0 : index
    %1 = vector.load %arg3[%c0_1, %c0_2] : memref<1x8xf32, #tpu.memory_space<vmem>>, vector<1x8xf32>
    %c0_3 = arith.constant 0 : index
    %c0_4 = arith.constant 0 : index
    %c0_5 = arith.constant 0 : index
    %c0_6 = arith.constant 0 : index
    %2 = vector.load %arg1[%c0_3, %c0_4, %c0_5, %c0_6] : memref<1x9x9x48xbf16, #tpu.memory_space<vmem>>, vector<1x1x9x48xbf16>
    %3 = vector.shape_cast %2 : vector<1x1x9x48xbf16> to vector<9x48xbf16>
    %cst = arith.constant dense<0.000000e+00> : vector<9x8xf32>
    %4 = tpu.matmul %3, %0, %cst {dimension_numbers = #tpu.dot_dimension_numbers<[1], [0], [0], [1], [0, 0, 1, 1], [], []>} : vector<9x48xbf16>, vector<48x8xbf16>, vector<9x8xf32> -> vector<9x8xf32>
    %5 = vector.broadcast %1 : vector<1x8xf32> to vector<9x8xf32>
    %6 = arith.addf %4, %5 : vector<9x8xf32>
    %cst_7 = arith.constant 0.000000e+00 : f32
    %7 = vector.broadcast %cst_7 : f32 to vector<9x8xf32>
    %8 = arith.cmpf oge, %6, %7 : vector<9x8xf32>
    %cst_8 = arith.constant 2.000000e-01 : f32
    %9 = vector.broadcast %cst_8 : f32 to vector<9x8xf32>
    %10 = arith.mulf %9, %6 : vector<9x8xf32>
    %11 = arith.select %8, %6, %10 : vector<9x8xi1>, vector<9x8xf32>
    %12 = arith.truncf %11 : vector<9x8xf32> to vector<9x8xbf16>
    %c0_9 = arith.constant 0 : index
    %c0_10 = arith.constant 0 : index
    %c0_11 = arith.constant 0 : index
    %c0_12 = arith.constant 0 : index
    %13 = vector.load %arg4[%c0_9, %c0_10, %c0_11, %c0_12] : memref<1x9x9x8xbf16, #tpu.memory_space<vmem>>, vector<1x1x9x8xbf16>
    %14 = vector.shape_cast %13 : vector<1x1x9x8xbf16> to vector<9x8xbf16>
    %15 = vector.shape_cast %12 : vector<9x8xbf16> to vector<1x1x9x8xbf16>
    tpu.vector_store %arg4[%c0_9, %c0_10, %c0_11, %c0_12], %15 {strides = array<i32>} : memref<1x9x9x8xbf16, #tpu.memory_space<vmem>>, vector<1x1x9x8xbf16>,
    %c0_13 = arith.constant 0 : index
    %c1 = arith.constant 1 : index
    %c0_14 = arith.constant 0 : index
    %c0_15 = arith.constant 0 : index
    %16 = vector.load %arg1[%c0_13, %c1, %c0_14, %c0_15] : memref<1x9x9x48xbf16, #tpu.memory_space<vmem>>, vector<1x1x9x48xbf16>
    %17 = vector.shape_cast %16 : vector<1x1x9x48xbf16> to vector<9x48xbf16>
    %cst_16 = arith.constant dense<0.000000e+00> : vector<9x8xf32>
    %18 = tpu.matmul %17, %0, %cst_16 {dimension_numbers = #tpu.dot_dimension_numbers<[1], [0], [0], [1], [0, 0, 1, 1], [], []>} : vector<9x48xbf16>, vector<48x8xbf16>, vector<9x8xf32> -> vector<9x8xf32>
    %19 = vector.broadcast %1 : vector<1x8xf32> to vector<9x8xf32>
    %20 = arith.addf %18, %19 : vector<9x8xf32>
    %cst_17 = arith.constant 0.000000e+00 : f32
    %21 = vector.broadcast %cst_17 : f32 to vector<9x8xf32>
    %22 = arith.cmpf oge, %20, %21 : vector<9x8xf32>
    %cst_18 = arith.constant 2.000000e-01 : f32
    %23 = vector.broadcast %cst_18 : f32 to vector<9x8xf32>
    %24 = arith.mulf %23, %20 : vector<9x8xf32>
    %25 = arith.select %22, %20, %24 : vector<9x8xi1>, vector<9x8xf32>
    %26 = arith.truncf %25 : vector<9x8xf32> to vector<9x8xbf16>
    %c0_19 = arith.constant 0 : index
    %c1_20 = arith.constant 1 : index
    %c0_21 = arith.constant 0 : index
    %c0_22 = arith.constant 0 : index
    %27 = vector.load %arg4[%c0_19, %c1_20, %c0_21, %c0_22] : memref<1x9x9x8xbf16, #tpu.memory_space<vmem>>, vector<1x1x9x8xbf16>
    %28 = vector.shape_cast %27 : vector<1x1x9x8xbf16> to vector<9x8xbf16>
    %29 = vector.shape_cast %26 : vector<9x8xbf16> to vector<1x1x9x8xbf16>
    tpu.vector_store %arg4[%c0_19, %c1_20, %c0_21, %c0_22], %29 {strides = array<i32>} : memref<1x9x9x8xbf16, #tpu.memory_space<vmem>>, vector<1x1x9x8xbf16>,
    %c0_23 = arith.constant 0 : index
    %c2 = arith.constant 2 : index
    %c0_24 = arith.constant 0 : index
    %c0_25 = arith.constant 0 : index
    %30 = vector.load %arg1[%c0_23, %c2, %c0_24, %c0_25] : memref<1x9x9x48xbf16, #tpu.memory_space<vmem>>, vector<1x1x9x48xbf16>
    %31 = vector.shape_cast %30 : vector<1x1x9x48xbf16> to vector<9x48xbf16>
    %cst_26 = arith.constant dense<0.000000e+00> : vector<9x8xf32>
    %32 = tpu.matmul %31, %0, %cst_26 {dimension_numbers = #tpu.dot_dimension_numbers<[1], [0], [0], [1], [0, 0, 1, 1], [], []>} : vector<9x48xbf16>, vector<48x8xbf16>, vector<9x8xf32> -> vector<9x8xf32>
    %33 = vector.broadcast %1 : vector<1x8xf32> to vector<9x8xf32>
    %34 = arith.addf %32, %33 : vector<9x8xf32>
    %cst_27 = arith.constant 0.000000e+00 : f32
    %35 = vector.broadcast %cst_27 : f32 to vector<9x8xf32>
    %36 = arith.cmpf oge, %34, %35 : vector<9x8xf32>
    %cst_28 = arith.constant 2.000000e-01 : f32
    %37 = vector.broadcast %cst_28 : f32 to vector<9x8xf32>
    %38 = arith.mulf %37, %34 : vector<9x8xf32>
    %39 = arith.select %36, %34, %38 : vector<9x8xi1>, vector<9x8xf32>
    %40 = arith.truncf %39 : vector<9x8xf32> to vector<9x8xbf16>
    %c0_29 = arith.constant 0 : index
    %c2_30 = arith.constant 2 : index
    %c0_31 = arith.constant 0 : index
    %c0_32 = arith.constant 0 : index
    %41 = vector.load %arg4[%c0_29, %c2_30, %c0_31, %c0_32] : memref<1x9x9x8xbf16, #tpu.memory_space<vmem>>, vector<1x1x9x8xbf16>
    %42 = vector.shape_cast %41 : vector<1x1x9x8xbf16> to vector<9x8xbf16>
    %43 = vector.shape_cast %40 : vector<9x8xbf16> to vector<1x1x9x8xbf16>
    tpu.vector_store %arg4[%c0_29, %c2_30, %c0_31, %c0_32], %43 {strides = array<i32>} : memref<1x9x9x8xbf16, #tpu.memory_space<vmem>>, vector<1x1x9x8xbf16>,
    %c0_33 = arith.constant 0 : index
    %c3 = arith.constant 3 : index
    %c0_34 = arith.constant 0 : index
    %c0_35 = arith.constant 0 : index
    %44 = vector.load %arg1[%c0_33, %c3, %c0_34, %c0_35] : memref<1x9x9x48xbf16, #tpu.memory_space<vmem>>, vector<1x1x9x48xbf16>
    %45 = vector.shape_cast %44 : vector<1x1x9x48xbf16> to vector<9x48xbf16>
    %cst_36 = arith.constant dense<0.000000e+00> : vector<9x8xf32>
    %46 = tpu.matmul %45, %0, %cst_36 {dimension_numbers = #tpu.dot_dimension_numbers<[1], [0], [0], [1], [0, 0, 1, 1], [], []>} : vector<9x48xbf16>, vector<48x8xbf16>, vector<9x8xf32> -> vector<9x8xf32>
    %47 = vector.broadcast %1 : vector<1x8xf32> to vector<9x8xf32>
    %48 = arith.addf %46, %47 : vector<9x8xf32>
    %cst_37 = arith.constant 0.000000e+00 : f32
    %49 = vector.broadcast %cst_37 : f32 to vector<9x8xf32>
    %50 = arith.cmpf oge, %48, %49 : vector<9x8xf32>
    %cst_38 = arith.constant 2.000000e-01 : f32
    %51 = vector.broadcast %cst_38 : f32 to vector<9x8xf32>
    %52 = arith.mulf %51, %48 : vector<9x8xf32>
    %53 = arith.select %50, %48, %52 : vector<9x8xi1>, vector<9x8xf32>
    %54 = arith.truncf %53 : vector<9x8xf32> to vector<9x8xbf16>
    %c0_39 = arith.constant 0 : index
    %c3_40 = arith.constant 3 : index
    %c0_41 = arith.constant 0 : index
    %c0_42 = arith.constant 0 : index
    %55 = vector.load %arg4[%c0_39, %c3_40, %c0_41, %c0_42] : memref<1x9x9x8xbf16, #tpu.memory_space<vmem>>, vector<1x1x9x8xbf16>
    %56 = vector.shape_cast %55 : vector<1x1x9x8xbf16> to vector<9x8xbf16>
    %57 = vector.shape_cast %54 : vector<9x8xbf16> to vector<1x1x9x8xbf16>
    tpu.vector_store %arg4[%c0_39, %c3_40, %c0_41, %c0_42], %57 {strides = array<i32>} : memref<1x9x9x8xbf16, #tpu.memory_space<vmem>>, vector<1x1x9x8xbf16>,
    %c0_43 = arith.constant 0 : index
    %c4 = arith.constant 4 : index
    %c0_44 = arith.constant 0 : index
    %c0_45 = arith.constant 0 : index
    %58 = vector.load %arg1[%c0_43, %c4, %c0_44, %c0_45] : memref<1x9x9x48xbf16, #tpu.memory_space<vmem>>, vector<1x1x9x48xbf16>
    %59 = vector.shape_cast %58 : vector<1x1x9x48xbf16> to vector<9x48xbf16>
    %cst_46 = arith.constant dense<0.000000e+00> : vector<9x8xf32>
    %60 = tpu.matmul %59, %0, %cst_46 {dimension_numbers = #tpu.dot_dimension_numbers<[1], [0], [0], [1], [0, 0, 1, 1], [], []>} : vector<9x48xbf16>, vector<48x8xbf16>, vector<9x8xf32> -> vector<9x8xf32>
    %61 = vector.broadcast %1 : vector<1x8xf32> to vector<9x8xf32>
    %62 = arith.addf %60, %61 : vector<9x8xf32>
    %cst_47 = arith.constant 0.000000e+00 : f32
    %63 = vector.broadcast %cst_47 : f32 to vector<9x8xf32>
    %64 = arith.cmpf oge, %62, %63 : vector<9x8xf32>
    %cst_48 = arith.constant 2.000000e-01 : f32
    %65 = vector.broadcast %cst_48 : f32 to vector<9x8xf32>
    %66 = arith.mulf %65, %62 : vector<9x8xf32>
    %67 = arith.select %64, %62, %66 : vector<9x8xi1>, vector<9x8xf32>
    %68 = arith.truncf %67 : vector<9x8xf32> to vector<9x8xbf16>
    %c0_49 = arith.constant 0 : index
    %c4_50 = arith.constant 4 : index
    %c0_51 = arith.constant 0 : index
    %c0_52 = arith.constant 0 : index
    %69 = vector.load %arg4[%c0_49, %c4_50, %c0_51, %c0_52] : memref<1x9x9x8xbf16, #tpu.memory_space<vmem>>, vector<1x1x9x8xbf16>
    %70 = vector.shape_cast %69 : vector<1x1x9x8xbf16> to vector<9x8xbf16>
    %71 = vector.shape_cast %68 : vector<9x8xbf16> to vector<1x1x9x8xbf16>
    tpu.vector_store %arg4[%c0_49, %c4_50, %c0_51, %c0_52], %71 {strides = array<i32>} : memref<1x9x9x8xbf16, #tpu.memory_space<vmem>>, vector<1x1x9x8xbf16>,
    %c0_53 = arith.constant 0 : index
    %c5 = arith.constant 5 : index
    %c0_54 = arith.constant 0 : index
    %c0_55 = arith.constant 0 : index
    %72 = vector.load %arg1[%c0_53, %c5, %c0_54, %c0_55] : memref<1x9x9x48xbf16, #tpu.memory_space<vmem>>, vector<1x1x9x48xbf16>
    %73 = vector.shape_cast %72 : vector<1x1x9x48xbf16> to vector<9x48xbf16>
    %cst_56 = arith.constant dense<0.000000e+00> : vector<9x8xf32>
    %74 = tpu.matmul %73, %0, %cst_56 {dimension_numbers = #tpu.dot_dimension_numbers<[1], [0], [0], [1], [0, 0, 1, 1], [], []>} : vector<9x48xbf16>, vector<48x8xbf16>, vector<9x8xf32> -> vector<9x8xf32>
    %75 = vector.broadcast %1 : vector<1x8xf32> to vector<9x8xf32>
    %76 = arith.addf %74, %75 : vector<9x8xf32>
    %cst_57 = arith.constant 0.000000e+00 : f32
    %77 = vector.broadcast %cst_57 : f32 to vector<9x8xf32>
    %78 = arith.cmpf oge, %76, %77 : vector<9x8xf32>
    %cst_58 = arith.constant 2.000000e-01 : f32
    %79 = vector.broadcast %cst_58 : f32 to vector<9x8xf32>
    %80 = arith.mulf %79, %76 : vector<9x8xf32>
    %81 = arith.select %78, %76, %80 : vector<9x8xi1>, vector<9x8xf32>
    %82 = arith.truncf %81 : vector<9x8xf32> to vector<9x8xbf16>
    %c0_59 = arith.constant 0 : index
    %c5_60 = arith.constant 5 : index
    %c0_61 = arith.constant 0 : index
    %c0_62 = arith.constant 0 : index
    %83 = vector.load %arg4[%c0_59, %c5_60, %c0_61, %c0_62] : memref<1x9x9x8xbf16, #tpu.memory_space<vmem>>, vector<1x1x9x8xbf16>
    %84 = vector.shape_cast %83 : vector<1x1x9x8xbf16> to vector<9x8xbf16>
    %85 = vector.shape_cast %82 : vector<9x8xbf16> to vector<1x1x9x8xbf16>
    tpu.vector_store %arg4[%c0_59, %c5_60, %c0_61, %c0_62], %85 {strides = array<i32>} : memref<1x9x9x8xbf16, #tpu.memory_space<vmem>>, vector<1x1x9x8xbf16>,
    %c0_63 = arith.constant 0 : index
    %c6 = arith.constant 6 : index
    %c0_64 = arith.constant 0 : index
    %c0_65 = arith.constant 0 : index
    %86 = vector.load %arg1[%c0_63, %c6, %c0_64, %c0_65] : memref<1x9x9x48xbf16, #tpu.memory_space<vmem>>, vector<1x1x9x48xbf16>
    %87 = vector.shape_cast %86 : vector<1x1x9x48xbf16> to vector<9x48xbf16>
    %cst_66 = arith.constant dense<0.000000e+00> : vector<9x8xf32>
    %88 = tpu.matmul %87, %0, %cst_66 {dimension_numbers = #tpu.dot_dimension_numbers<[1], [0], [0], [1], [0, 0, 1, 1], [], []>} : vector<9x48xbf16>, vector<48x8xbf16>, vector<9x8xf32> -> vector<9x8xf32>
    %89 = vector.broadcast %1 : vector<1x8xf32> to vector<9x8xf32>
    %90 = arith.addf %88, %89 : vector<9x8xf32>
    %cst_67 = arith.constant 0.000000e+00 : f32
    %91 = vector.broadcast %cst_67 : f32 to vector<9x8xf32>
    %92 = arith.cmpf oge, %90, %91 : vector<9x8xf32>
    %cst_68 = arith.constant 2.000000e-01 : f32
    %93 = vector.broadcast %cst_68 : f32 to vector<9x8xf32>
    %94 = arith.mulf %93, %90 : vector<9x8xf32>
    %95 = arith.select %92, %90, %94 : vector<9x8xi1>, vector<9x8xf32>
    %96 = arith.truncf %95 : vector<9x8xf32> to vector<9x8xbf16>
    %c0_69 = arith.constant 0 : index
    %c6_70 = arith.constant 6 : index
    %c0_71 = arith.constant 0 : index
    %c0_72 = arith.constant 0 : index
    %97 = vector.load %arg4[%c0_69, %c6_70, %c0_71, %c0_72] : memref<1x9x9x8xbf16, #tpu.memory_space<vmem>>, vector<1x1x9x8xbf16>
    %98 = vector.shape_cast %97 : vector<1x1x9x8xbf16> to vector<9x8xbf16>
    %99 = vector.shape_cast %96 : vector<9x8xbf16> to vector<1x1x9x8xbf16>
    tpu.vector_store %arg4[%c0_69, %c6_70, %c0_71, %c0_72], %99 {strides = array<i32>} : memref<1x9x9x8xbf16, #tpu.memory_space<vmem>>, vector<1x1x9x8xbf16>,
    %c0_73 = arith.constant 0 : index
    %c7 = arith.constant 7 : index
    %c0_74 = arith.constant 0 : index
    %c0_75 = arith.constant 0 : index
    %100 = vector.load %arg1[%c0_73, %c7, %c0_74, %c0_75] : memref<1x9x9x48xbf16, #tpu.memory_space<vmem>>, vector<1x1x9x48xbf16>
    %101 = vector.shape_cast %100 : vector<1x1x9x48xbf16> to vector<9x48xbf16>
    %cst_76 = arith.constant dense<0.000000e+00> : vector<9x8xf32>
    %102 = tpu.matmul %101, %0, %cst_76 {dimension_numbers = #tpu.dot_dimension_numbers<[1], [0], [0], [1], [0, 0, 1, 1], [], []>} : vector<9x48xbf16>, vector<48x8xbf16>, vector<9x8xf32> -> vector<9x8xf32>
    %103 = vector.broadcast %1 : vector<1x8xf32> to vector<9x8xf32>
    %104 = arith.addf %102, %103 : vector<9x8xf32>
    %cst_77 = arith.constant 0.000000e+00 : f32
    %105 = vector.broadcast %cst_77 : f32 to vector<9x8xf32>
    %106 = arith.cmpf oge, %104, %105 : vector<9x8xf32>
    %cst_78 = arith.constant 2.000000e-01 : f32
    %107 = vector.broadcast %cst_78 : f32 to vector<9x8xf32>
    %108 = arith.mulf %107, %104 : vector<9x8xf32>
    %109 = arith.select %106, %104, %108 : vector<9x8xi1>, vector<9x8xf32>
    %110 = arith.truncf %109 : vector<9x8xf32> to vector<9x8xbf16>
    %c0_79 = arith.constant 0 : index
    %c7_80 = arith.constant 7 : index
    %c0_81 = arith.constant 0 : index
    %c0_82 = arith.constant 0 : index
    %111 = vector.load %arg4[%c0_79, %c7_80, %c0_81, %c0_82] : memref<1x9x9x8xbf16, #tpu.memory_space<vmem>>, vector<1x1x9x8xbf16>
    %112 = vector.shape_cast %111 : vector<1x1x9x8xbf16> to vector<9x8xbf16>
    %113 = vector.shape_cast %110 : vector<9x8xbf16> to vector<1x1x9x8xbf16>
    tpu.vector_store %arg4[%c0_79, %c7_80, %c0_81, %c0_82], %113 {strides = array<i32>} : memref<1x9x9x8xbf16, #tpu.memory_space<vmem>>, vector<1x1x9x8xbf16>,
    %c0_83 = arith.constant 0 : index
    %c8 = arith.constant 8 : index
    %c0_84 = arith.constant 0 : index
    %c0_85 = arith.constant 0 : index
    %114 = vector.load %arg1[%c0_83, %c8, %c0_84, %c0_85] : memref<1x9x9x48xbf16, #tpu.memory_space<vmem>>, vector<1x1x9x48xbf16>
    %115 = vector.shape_cast %114 : vector<1x1x9x48xbf16> to vector<9x48xbf16>
    %cst_86 = arith.constant dense<0.000000e+00> : vector<9x8xf32>
    %116 = tpu.matmul %115, %0, %cst_86 {dimension_numbers = #tpu.dot_dimension_numbers<[1], [0], [0], [1], [0, 0, 1, 1], [], []>} : vector<9x48xbf16>, vector<48x8xbf16>, vector<9x8xf32> -> vector<9x8xf32>
    %117 = vector.broadcast %1 : vector<1x8xf32> to vector<9x8xf32>
    %118 = arith.addf %116, %117 : vector<9x8xf32>
    %cst_87 = arith.constant 0.000000e+00 : f32
    %119 = vector.broadcast %cst_87 : f32 to vector<9x8xf32>
    %120 = arith.cmpf oge, %118, %119 : vector<9x8xf32>
    %cst_88 = arith.constant 2.000000e-01 : f32
    %121 = vector.broadcast %cst_88 : f32 to vector<9x8xf32>
    %122 = arith.mulf %121, %118 : vector<9x8xf32>
    %123 = arith.select %120, %118, %122 : vector<9x8xi1>, vector<9x8xf32>
    %124 = arith.truncf %123 : vector<9x8xf32> to vector<9x8xbf16>
    %c0_89 = arith.constant 0 : index
    %c8_90 = arith.constant 8 : index
    %c0_91 = arith.constant 0 : index
    %c0_92 = arith.constant 0 : index
    %125 = vector.load %arg4[%c0_89, %c8_90, %c0_91, %c0_92] : memref<1x9x9x8xbf16, #tpu.memory_space<vmem>>, vector<1x1x9x8xbf16>
    %126 = vector.shape_cast %125 : vector<1x1x9x8xbf16> to vector<9x8xbf16>
    %127 = vector.shape_cast %124 : vector<9x8xbf16> to vector<1x1x9x8xbf16>
    tpu.vector_store %arg4[%c0_89, %c8_90, %c0_91, %c0_92], %127 {strides = array<i32>} : memref<1x9x9x8xbf16, #tpu.memory_space<vmem>>, vector<1x1x9x8xbf16>,
    return
  }
  func.func @transform_0(%arg0: i32) -> (i32, i32, i32, i32) {
    %c0_i32 = arith.constant 0 : i32
    %c0_i32_0 = arith.constant 0 : i32
    %c0_i32_1 = arith.constant 0 : i32
    %c0_i32_2 = arith.constant 0 : i32
    return %arg0, %c0_i32, %c0_i32_0, %c0_i32_1 : i32, i32, i32, i32
  }
  func.func @transform_1(%arg0: i32) -> (i32, i32) {
    %c0_i32 = arith.constant 0 : i32
    %c0_i32_0 = arith.constant 0 : i32
    %c0_i32_1 = arith.constant 0 : i32
    return %c0_i32, %c0_i32_0 : i32, i32
  }
  func.func @transform_2(%arg0: i32) -> (i32, i32) {
    %c0_i32 = arith.constant 0 : i32
    %c0_i32_0 = arith.constant 0 : i32
    %c0_i32_1 = arith.constant 0 : i32
    return %c0_i32, %c0_i32_0 : i32, i32
  }
  func.func @transform_3(%arg0: i32) -> (i32, i32, i32, i32) {
    %c0_i32 = arith.constant 0 : i32
    %c0_i32_0 = arith.constant 0 : i32
    %c0_i32_1 = arith.constant 0 : i32
    %c0_i32_2 = arith.constant 0 : i32
    return %arg0, %c0_i32, %c0_i32_0, %c0_i32_1 : i32, i32, i32, i32
  }
}

module attributes {stable_mosaic.version = 11 : i64} {
  func.func @_conv_kernel(%arg0: i32, %arg1: memref<1x2x2x7x7x8xbf16, #tpu.memory_space<vmem>>, %arg2: memref<128x16xbf16, #tpu.memory_space<vmem>>, %arg3: memref<1x16xf32, #tpu.memory_space<vmem>>, %arg4: memref<1x5x5x16xbf16, #tpu.memory_space<vmem>>, %arg5: memref<1x2x16xf32, #tpu.memory_space<vmem>>) attributes {dimension_semantics = [#tpu.dimension_semantics<parallel>], iteration_bounds = array<i64: 2>, scalar_prefetch = 0 : i64, scratch_operands = 0 : i64, tpu.core_type = #tpu.core_type<tc>, window_params = [{transform_indices = @transform_0, window_bounds = array<i64: 1, 2, 2, 7, 7, 8>}, {pipeline_mode = #tpu.pipeline_mode<synchronous>, transform_indices = @transform_1, window_bounds = array<i64: 128, 16>}, {pipeline_mode = #tpu.pipeline_mode<synchronous>, transform_indices = @transform_2, window_bounds = array<i64: 1, 16>}, {transform_indices = @transform_3, window_bounds = array<i64: 1, 5, 5, 16>}, {transform_indices = @transform_4, window_bounds = array<i64: 1, 2, 16>}]} {
    %c0 = arith.constant 0 : index
    %c0_0 = arith.constant 0 : index
    %0 = vector.load %arg2[%c0, %c0_0] : memref<128x16xbf16, #tpu.memory_space<vmem>>, vector<128x16xbf16>
    %c0_1 = arith.constant 0 : index
    %c0_2 = arith.constant 0 : index
    %1 = vector.load %arg3[%c0_1, %c0_2] : memref<1x16xf32, #tpu.memory_space<vmem>>, vector<1x16xf32>
    %cst = arith.constant 0.000000e+00 : f32
    %2 = vector.broadcast %cst : f32 to vector<1x16xf32>
    %cst_3 = arith.constant 0.000000e+00 : f32
    %3 = vector.broadcast %cst_3 : f32 to vector<1x16xf32>
    %c0_4 = arith.constant 0 : index
    %c0_5 = arith.constant 0 : index
    %c0_6 = arith.constant 0 : index
    %c0_7 = arith.constant 0 : index
    %c0_8 = arith.constant 0 : index
    %c0_9 = arith.constant 0 : index
    %4 = vector.load %arg1[%c0_4, %c0_5, %c0_6, %c0_7, %c0_8, %c0_9] : memref<1x2x2x7x7x8xbf16, #tpu.memory_space<vmem>>, vector<1x1x1x1x5x8xbf16>
    %5 = vector.shape_cast %4 : vector<1x1x1x1x5x8xbf16> to vector<5x8xbf16>
    %c0_10 = arith.constant 0 : index
    %c0_11 = arith.constant 0 : index
    %c1 = arith.constant 1 : index
    %c0_12 = arith.constant 0 : index
    %c0_13 = arith.constant 0 : index
    %c0_14 = arith.constant 0 : index
    %6 = vector.load %arg1[%c0_10, %c0_11, %c1, %c0_12, %c0_13, %c0_14] : memref<1x2x2x7x7x8xbf16, #tpu.memory_space<vmem>>, vector<1x1x1x1x5x8xbf16>
    %7 = vector.shape_cast %6 : vector<1x1x1x1x5x8xbf16> to vector<5x8xbf16>
    %c0_15 = arith.constant 0 : index
    %c0_16 = arith.constant 0 : index
    %c0_17 = arith.constant 0 : index
    %c0_18 = arith.constant 0 : index
    %c1_19 = arith.constant 1 : index
    %c0_20 = arith.constant 0 : index
    %8 = vector.load %arg1[%c0_15, %c0_16, %c0_17, %c0_18, %c1_19, %c0_20] : memref<1x2x2x7x7x8xbf16, #tpu.memory_space<vmem>>, vector<1x1x1x1x5x8xbf16>
    %9 = vector.shape_cast %8 : vector<1x1x1x1x5x8xbf16> to vector<5x8xbf16>
    %c0_21 = arith.constant 0 : index
    %c0_22 = arith.constant 0 : index
    %c1_23 = arith.constant 1 : index
    %c0_24 = arith.constant 0 : index
    %c1_25 = arith.constant 1 : index
    %c0_26 = arith.constant 0 : index
    %10 = vector.load %arg1[%c0_21, %c0_22, %c1_23, %c0_24, %c1_25, %c0_26] : memref<1x2x2x7x7x8xbf16, #tpu.memory_space<vmem>>, vector<1x1x1x1x5x8xbf16>
    %11 = vector.shape_cast %10 : vector<1x1x1x1x5x8xbf16> to vector<5x8xbf16>
    %c0_27 = arith.constant 0 : index
    %c1_28 = arith.constant 1 : index
    %c0_29 = arith.constant 0 : index
    %c0_30 = arith.constant 0 : index
    %c0_31 = arith.constant 0 : index
    %c0_32 = arith.constant 0 : index
    %12 = vector.load %arg1[%c0_27, %c1_28, %c0_29, %c0_30, %c0_31, %c0_32] : memref<1x2x2x7x7x8xbf16, #tpu.memory_space<vmem>>, vector<1x1x1x1x5x8xbf16>
    %13 = vector.shape_cast %12 : vector<1x1x1x1x5x8xbf16> to vector<5x8xbf16>
    %c0_33 = arith.constant 0 : index
    %c1_34 = arith.constant 1 : index
    %c1_35 = arith.constant 1 : index
    %c0_36 = arith.constant 0 : index
    %c0_37 = arith.constant 0 : index
    %c0_38 = arith.constant 0 : index
    %14 = vector.load %arg1[%c0_33, %c1_34, %c1_35, %c0_36, %c0_37, %c0_38] : memref<1x2x2x7x7x8xbf16, #tpu.memory_space<vmem>>, vector<1x1x1x1x5x8xbf16>
    %15 = vector.shape_cast %14 : vector<1x1x1x1x5x8xbf16> to vector<5x8xbf16>
    %c0_39 = arith.constant 0 : index
    %c1_40 = arith.constant 1 : index
    %c0_41 = arith.constant 0 : index
    %c0_42 = arith.constant 0 : index
    %c1_43 = arith.constant 1 : index
    %c0_44 = arith.constant 0 : index
    %16 = vector.load %arg1[%c0_39, %c1_40, %c0_41, %c0_42, %c1_43, %c0_44] : memref<1x2x2x7x7x8xbf16, #tpu.memory_space<vmem>>, vector<1x1x1x1x5x8xbf16>
    %17 = vector.shape_cast %16 : vector<1x1x1x1x5x8xbf16> to vector<5x8xbf16>
    %c0_45 = arith.constant 0 : index
    %c1_46 = arith.constant 1 : index
    %c1_47 = arith.constant 1 : index
    %c0_48 = arith.constant 0 : index
    %c1_49 = arith.constant 1 : index
    %c0_50 = arith.constant 0 : index
    %18 = vector.load %arg1[%c0_45, %c1_46, %c1_47, %c0_48, %c1_49, %c0_50] : memref<1x2x2x7x7x8xbf16, #tpu.memory_space<vmem>>, vector<1x1x1x1x5x8xbf16>
    %19 = vector.shape_cast %18 : vector<1x1x1x1x5x8xbf16> to vector<5x8xbf16>
    %c0_51 = arith.constant 0 : index
    %c0_52 = arith.constant 0 : index
    %c0_53 = arith.constant 0 : index
    %c1_54 = arith.constant 1 : index
    %c0_55 = arith.constant 0 : index
    %c0_56 = arith.constant 0 : index
    %20 = vector.load %arg1[%c0_51, %c0_52, %c0_53, %c1_54, %c0_55, %c0_56] : memref<1x2x2x7x7x8xbf16, #tpu.memory_space<vmem>>, vector<1x1x1x1x5x8xbf16>
    %21 = vector.shape_cast %20 : vector<1x1x1x1x5x8xbf16> to vector<5x8xbf16>
    %c0_57 = arith.constant 0 : index
    %c0_58 = arith.constant 0 : index
    %c1_59 = arith.constant 1 : index
    %c1_60 = arith.constant 1 : index
    %c0_61 = arith.constant 0 : index
    %c0_62 = arith.constant 0 : index
    %22 = vector.load %arg1[%c0_57, %c0_58, %c1_59, %c1_60, %c0_61, %c0_62] : memref<1x2x2x7x7x8xbf16, #tpu.memory_space<vmem>>, vector<1x1x1x1x5x8xbf16>
    %23 = vector.shape_cast %22 : vector<1x1x1x1x5x8xbf16> to vector<5x8xbf16>
    %c0_63 = arith.constant 0 : index
    %c0_64 = arith.constant 0 : index
    %c0_65 = arith.constant 0 : index
    %c1_66 = arith.constant 1 : index
    %c1_67 = arith.constant 1 : index
    %c0_68 = arith.constant 0 : index
    %24 = vector.load %arg1[%c0_63, %c0_64, %c0_65, %c1_66, %c1_67, %c0_68] : memref<1x2x2x7x7x8xbf16, #tpu.memory_space<vmem>>, vector<1x1x1x1x5x8xbf16>
    %25 = vector.shape_cast %24 : vector<1x1x1x1x5x8xbf16> to vector<5x8xbf16>
    %c0_69 = arith.constant 0 : index
    %c0_70 = arith.constant 0 : index
    %c1_71 = arith.constant 1 : index
    %c1_72 = arith.constant 1 : index
    %c1_73 = arith.constant 1 : index
    %c0_74 = arith.constant 0 : index
    %26 = vector.load %arg1[%c0_69, %c0_70, %c1_71, %c1_72, %c1_73, %c0_74] : memref<1x2x2x7x7x8xbf16, #tpu.memory_space<vmem>>, vector<1x1x1x1x5x8xbf16>
    %27 = vector.shape_cast %26 : vector<1x1x1x1x5x8xbf16> to vector<5x8xbf16>
    %c0_75 = arith.constant 0 : index
    %c1_76 = arith.constant 1 : index
    %c0_77 = arith.constant 0 : index
    %c1_78 = arith.constant 1 : index
    %c0_79 = arith.constant 0 : index
    %c0_80 = arith.constant 0 : index
    %28 = vector.load %arg1[%c0_75, %c1_76, %c0_77, %c1_78, %c0_79, %c0_80] : memref<1x2x2x7x7x8xbf16, #tpu.memory_space<vmem>>, vector<1x1x1x1x5x8xbf16>
    %29 = vector.shape_cast %28 : vector<1x1x1x1x5x8xbf16> to vector<5x8xbf16>
    %c0_81 = arith.constant 0 : index
    %c1_82 = arith.constant 1 : index
    %c1_83 = arith.constant 1 : index
    %c1_84 = arith.constant 1 : index
    %c0_85 = arith.constant 0 : index
    %c0_86 = arith.constant 0 : index
    %30 = vector.load %arg1[%c0_81, %c1_82, %c1_83, %c1_84, %c0_85, %c0_86] : memref<1x2x2x7x7x8xbf16, #tpu.memory_space<vmem>>, vector<1x1x1x1x5x8xbf16>
    %31 = vector.shape_cast %30 : vector<1x1x1x1x5x8xbf16> to vector<5x8xbf16>
    %c0_87 = arith.constant 0 : index
    %c1_88 = arith.constant 1 : index
    %c0_89 = arith.constant 0 : index
    %c1_90 = arith.constant 1 : index
    %c1_91 = arith.constant 1 : index
    %c0_92 = arith.constant 0 : index
    %32 = vector.load %arg1[%c0_87, %c1_88, %c0_89, %c1_90, %c1_91, %c0_92] : memref<1x2x2x7x7x8xbf16, #tpu.memory_space<vmem>>, vector<1x1x1x1x5x8xbf16>
    %33 = vector.shape_cast %32 : vector<1x1x1x1x5x8xbf16> to vector<5x8xbf16>
    %c0_93 = arith.constant 0 : index
    %c1_94 = arith.constant 1 : index
    %c1_95 = arith.constant 1 : index
    %c1_96 = arith.constant 1 : index
    %c1_97 = arith.constant 1 : index
    %c0_98 = arith.constant 0 : index
    %34 = vector.load %arg1[%c0_93, %c1_94, %c1_95, %c1_96, %c1_97, %c0_98] : memref<1x2x2x7x7x8xbf16, #tpu.memory_space<vmem>>, vector<1x1x1x1x5x8xbf16>
    %35 = vector.shape_cast %34 : vector<1x1x1x1x5x8xbf16> to vector<5x8xbf16>
    %36 = tpu.concatenate %5, %7, %9, %11, %13, %15, %17, %19, %21, %23, %25, %27, %29, %31, %33, %35 in 1 : vector<5x8xbf16>, vector<5x8xbf16>, vector<5x8xbf16>, vector<5x8xbf16>, vector<5x8xbf16>, vector<5x8xbf16>, vector<5x8xbf16>, vector<5x8xbf16>, vector<5x8xbf16>, vector<5x8xbf16>, vector<5x8xbf16>, vector<5x8xbf16>, vector<5x8xbf16>, vector<5x8xbf16>, vector<5x8xbf16>, vector<5x8xbf16> -> vector<5x128xbf16>
    %cst_99 = arith.constant dense<0.000000e+00> : vector<5x16xf32>
    %37 = tpu.matmul %36, %0, %cst_99 {dimension_numbers = #tpu.dot_dimension_numbers<[1], [0], [0], [1], [0, 0, 1, 1], [], []>} : vector<5x128xbf16>, vector<128x16xbf16>, vector<5x16xf32> -> vector<5x16xf32>
    %38 = vector.broadcast %1 : vector<1x16xf32> to vector<5x16xf32>
    %39 = arith.addf %37, %38 : vector<5x16xf32>
    %cst_100 = arith.constant dense<0.000000e+00> : vector<16xf32>
    %40 = vector.multi_reduction <add>, %39, %cst_100 [0] : vector<5x16xf32> to vector<16xf32>
    %41 = vector.shape_cast %40 : vector<16xf32> to vector<1x16xf32>
    %42 = arith.addf %2, %41 : vector<1x16xf32>
    %43 = arith.mulf %39, %39 : vector<5x16xf32>
    %cst_101 = arith.constant dense<0.000000e+00> : vector<16xf32>
    %44 = vector.multi_reduction <add>, %43, %cst_101 [0] : vector<5x16xf32> to vector<16xf32>
    %45 = vector.shape_cast %44 : vector<16xf32> to vector<1x16xf32>
    %46 = arith.addf %3, %45 : vector<1x16xf32>
    %47 = arith.truncf %39 : vector<5x16xf32> to vector<5x16xbf16>
    %c0_102 = arith.constant 0 : index
    %c0_103 = arith.constant 0 : index
    %c0_104 = arith.constant 0 : index
    %c0_105 = arith.constant 0 : index
    %48 = vector.load %arg4[%c0_102, %c0_103, %c0_104, %c0_105] : memref<1x5x5x16xbf16, #tpu.memory_space<vmem>>, vector<1x1x5x16xbf16>
    %49 = vector.shape_cast %48 : vector<1x1x5x16xbf16> to vector<5x16xbf16>
    %50 = vector.shape_cast %47 : vector<5x16xbf16> to vector<1x1x5x16xbf16>
    tpu.vector_store %arg4[%c0_102, %c0_103, %c0_104, %c0_105], %50 {strides = array<i32>} : memref<1x5x5x16xbf16, #tpu.memory_space<vmem>>, vector<1x1x5x16xbf16>,
    %c0_106 = arith.constant 0 : index
    %c0_107 = arith.constant 0 : index
    %c0_108 = arith.constant 0 : index
    %c1_109 = arith.constant 1 : index
    %c0_110 = arith.constant 0 : index
    %c0_111 = arith.constant 0 : index
    %51 = vector.load %arg1[%c0_106, %c0_107, %c0_108, %c1_109, %c0_110, %c0_111] : memref<1x2x2x7x7x8xbf16, #tpu.memory_space<vmem>>, vector<1x1x1x1x5x8xbf16>
    %52 = vector.shape_cast %51 : vector<1x1x1x1x5x8xbf16> to vector<5x8xbf16>
    %c0_112 = arith.constant 0 : index
    %c0_113 = arith.constant 0 : index
    %c1_114 = arith.constant 1 : index
    %c1_115 = arith.constant 1 : index
    %c0_116 = arith.constant 0 : index
    %c0_117 = arith.constant 0 : index
    %53 = vector.load %arg1[%c0_112, %c0_113, %c1_114, %c1_115, %c0_116, %c0_117] : memref<1x2x2x7x7x8xbf16, #tpu.memory_space<vmem>>, vector<1x1x1x1x5x8xbf16>
    %54 = vector.shape_cast %53 : vector<1x1x1x1x5x8xbf16> to vector<5x8xbf16>
    %c0_118 = arith.constant 0 : index
    %c0_119 = arith.constant 0 : index
    %c0_120 = arith.constant 0 : index
    %c1_121 = arith.constant 1 : index
    %c1_122 = arith.constant 1 : index
    %c0_123 = arith.constant 0 : index
    %55 = vector.load %arg1[%c0_118, %c0_119, %c0_120, %c1_121, %c1_122, %c0_123] : memref<1x2x2x7x7x8xbf16, #tpu.memory_space<vmem>>, vector<1x1x1x1x5x8xbf16>
    %56 = vector.shape_cast %55 : vector<1x1x1x1x5x8xbf16> to vector<5x8xbf16>
    %c0_124 = arith.constant 0 : index
    %c0_125 = arith.constant 0 : index
    %c1_126 = arith.constant 1 : index
    %c1_127 = arith.constant 1 : index
    %c1_128 = arith.constant 1 : index
    %c0_129 = arith.constant 0 : index
    %57 = vector.load %arg1[%c0_124, %c0_125, %c1_126, %c1_127, %c1_128, %c0_129] : memref<1x2x2x7x7x8xbf16, #tpu.memory_space<vmem>>, vector<1x1x1x1x5x8xbf16>
    %58 = vector.shape_cast %57 : vector<1x1x1x1x5x8xbf16> to vector<5x8xbf16>
    %c0_130 = arith.constant 0 : index
    %c1_131 = arith.constant 1 : index
    %c0_132 = arith.constant 0 : index
    %c1_133 = arith.constant 1 : index
    %c0_134 = arith.constant 0 : index
    %c0_135 = arith.constant 0 : index
    %59 = vector.load %arg1[%c0_130, %c1_131, %c0_132, %c1_133, %c0_134, %c0_135] : memref<1x2x2x7x7x8xbf16, #tpu.memory_space<vmem>>, vector<1x1x1x1x5x8xbf16>
    %60 = vector.shape_cast %59 : vector<1x1x1x1x5x8xbf16> to vector<5x8xbf16>
    %c0_136 = arith.constant 0 : index
    %c1_137 = arith.constant 1 : index
    %c1_138 = arith.constant 1 : index
    %c1_139 = arith.constant 1 : index
    %c0_140 = arith.constant 0 : index
    %c0_141 = arith.constant 0 : index
    %61 = vector.load %arg1[%c0_136, %c1_137, %c1_138, %c1_139, %c0_140, %c0_141] : memref<1x2x2x7x7x8xbf16, #tpu.memory_space<vmem>>, vector<1x1x1x1x5x8xbf16>
    %62 = vector.shape_cast %61 : vector<1x1x1x1x5x8xbf16> to vector<5x8xbf16>
    %c0_142 = arith.constant 0 : index
    %c1_143 = arith.constant 1 : index
    %c0_144 = arith.constant 0 : index
    %c1_145 = arith.constant 1 : index
    %c1_146 = arith.constant 1 : index
    %c0_147 = arith.constant 0 : index
    %63 = vector.load %arg1[%c0_142, %c1_143, %c0_144, %c1_145, %c1_146, %c0_147] : memref<1x2x2x7x7x8xbf16, #tpu.memory_space<vmem>>, vector<1x1x1x1x5x8xbf16>
    %64 = vector.shape_cast %63 : vector<1x1x1x1x5x8xbf16> to vector<5x8xbf16>
    %c0_148 = arith.constant 0 : index
    %c1_149 = arith.constant 1 : index
    %c1_150 = arith.constant 1 : index
    %c1_151 = arith.constant 1 : index
    %c1_152 = arith.constant 1 : index
    %c0_153 = arith.constant 0 : index
    %65 = vector.load %arg1[%c0_148, %c1_149, %c1_150, %c1_151, %c1_152, %c0_153] : memref<1x2x2x7x7x8xbf16, #tpu.memory_space<vmem>>, vector<1x1x1x1x5x8xbf16>
    %66 = vector.shape_cast %65 : vector<1x1x1x1x5x8xbf16> to vector<5x8xbf16>
    %c0_154 = arith.constant 0 : index
    %c0_155 = arith.constant 0 : index
    %c0_156 = arith.constant 0 : index
    %c2 = arith.constant 2 : index
    %c0_157 = arith.constant 0 : index
    %c0_158 = arith.constant 0 : index
    %67 = vector.load %arg1[%c0_154, %c0_155, %c0_156, %c2, %c0_157, %c0_158] : memref<1x2x2x7x7x8xbf16, #tpu.memory_space<vmem>>, vector<1x1x1x1x5x8xbf16>
    %68 = vector.shape_cast %67 : vector<1x1x1x1x5x8xbf16> to vector<5x8xbf16>
    %c0_159 = arith.constant 0 : index
    %c0_160 = arith.constant 0 : index
    %c1_161 = arith.constant 1 : index
    %c2_162 = arith.constant 2 : index
    %c0_163 = arith.constant 0 : index
    %c0_164 = arith.constant 0 : index
    %69 = vector.load %arg1[%c0_159, %c0_160, %c1_161, %c2_162, %c0_163, %c0_164] : memref<1x2x2x7x7x8xbf16, #tpu.memory_space<vmem>>, vector<1x1x1x1x5x8xbf16>
    %70 = vector.shape_cast %69 : vector<1x1x1x1x5x8xbf16> to vector<5x8xbf16>
    %c0_165 = arith.constant 0 : index
    %c0_166 = arith.constant 0 : index
    %c0_167 = arith.constant 0 : index
    %c2_168 = arith.constant 2 : index
    %c1_169 = arith.constant 1 : index
    %c0_170 = arith.constant 0 : index
    %71 = vector.load %arg1[%c0_165, %c0_166, %c0_167, %c2_168, %c1_169, %c0_170] : memref<1x2x2x7x7x8xbf16, #tpu.memory_space<vmem>>, vector<1x1x1x1x5x8xbf16>
    %72 = vector.shape_cast %71 : vector<1x1x1x1x5x8xbf16> to vector<5x8xbf16>
    %c0_171 = arith.constant 0 : index
    %c0_172 = arith.constant 0 : index
    %c1_173 = arith.constant 1 : index
    %c2_174 = arith.constant 2 : index
    %c1_175 = arith.constant 1 : index
    %c0_176 = arith.constant 0 : index
    %73 = vector.load %arg1[%c0_171, %c0_172, %c1_173, %c2_174, %c1_175, %c0_176] : memref<1x2x2x7x7x8xbf16, #tpu.memory_space<vmem>>, vector<1x1x1x1x5x8xbf16>
    %74 = vector.shape_cast %73 : vector<1x1x1x1x5x8xbf16> to vector<5x8xbf16>
    %c0_177 = arith.constant 0 : index
    %c1_178 = arith.constant 1 : index
    %c0_179 = arith.constant 0 : index
    %c2_180 = arith.constant 2 : index
    %c0_181 = arith.constant 0 : index
    %c0_182 = arith.constant 0 : index
    %75 = vector.load %arg1[%c0_177, %c1_178, %c0_179, %c2_180, %c0_181, %c0_182] : memref<1x2x2x7x7x8xbf16, #tpu.memory_space<vmem>>, vector<1x1x1x1x5x8xbf16>
    %76 = vector.shape_cast %75 : vector<1x1x1x1x5x8xbf16> to vector<5x8xbf16>
    %c0_183 = arith.constant 0 : index
    %c1_184 = arith.constant 1 : index
    %c1_185 = arith.constant 1 : index
    %c2_186 = arith.constant 2 : index
    %c0_187 = arith.constant 0 : index
    %c0_188 = arith.constant 0 : index
    %77 = vector.load %arg1[%c0_183, %c1_184, %c1_185, %c2_186, %c0_187, %c0_188] : memref<1x2x2x7x7x8xbf16, #tpu.memory_space<vmem>>, vector<1x1x1x1x5x8xbf16>
    %78 = vector.shape_cast %77 : vector<1x1x1x1x5x8xbf16> to vector<5x8xbf16>
    %c0_189 = arith.constant 0 : index
    %c1_190 = arith.constant 1 : index
    %c0_191 = arith.constant 0 : index
    %c2_192 = arith.constant 2 : index
    %c1_193 = arith.constant 1 : index
    %c0_194 = arith.constant 0 : index
    %79 = vector.load %arg1[%c0_189, %c1_190, %c0_191, %c2_192, %c1_193, %c0_194] : memref<1x2x2x7x7x8xbf16, #tpu.memory_space<vmem>>, vector<1x1x1x1x5x8xbf16>
    %80 = vector.shape_cast %79 : vector<1x1x1x1x5x8xbf16> to vector<5x8xbf16>
    %c0_195 = arith.constant 0 : index
    %c1_196 = arith.constant 1 : index
    %c1_197 = arith.constant 1 : index
    %c2_198 = arith.constant 2 : index
    %c1_199 = arith.constant 1 : index
    %c0_200 = arith.constant 0 : index
    %81 = vector.load %arg1[%c0_195, %c1_196, %c1_197, %c2_198, %c1_199, %c0_200] : memref<1x2x2x7x7x8xbf16, #tpu.memory_space<vmem>>, vector<1x1x1x1x5x8xbf16>
    %82 = vector.shape_cast %81 : vector<1x1x1x1x5x8xbf16> to vector<5x8xbf16>
    %83 = tpu.concatenate %52, %54, %56, %58, %60, %62, %64, %66, %68, %70, %72, %74, %76, %78, %80, %82 in 1 : vector<5x8xbf16>, vector<5x8xbf16>, vector<5x8xbf16>, vector<5x8xbf16>, vector<5x8xbf16>, vector<5x8xbf16>, vector<5x8xbf16>, vector<5x8xbf16>, vector<5x8xbf16>, vector<5x8xbf16>, vector<5x8xbf16>, vector<5x8xbf16>, vector<5x8xbf16>, vector<5x8xbf16>, vector<5x8xbf16>, vector<5x8xbf16> -> vector<5x128xbf16>
    %cst_201 = arith.constant dense<0.000000e+00> : vector<5x16xf32>
    %84 = tpu.matmul %83, %0, %cst_201 {dimension_numbers = #tpu.dot_dimension_numbers<[1], [0], [0], [1], [0, 0, 1, 1], [], []>} : vector<5x128xbf16>, vector<128x16xbf16>, vector<5x16xf32> -> vector<5x16xf32>
    %85 = vector.broadcast %1 : vector<1x16xf32> to vector<5x16xf32>
    %86 = arith.addf %84, %85 : vector<5x16xf32>
    %cst_202 = arith.constant dense<0.000000e+00> : vector<16xf32>
    %87 = vector.multi_reduction <add>, %86, %cst_202 [0] : vector<5x16xf32> to vector<16xf32>
    %88 = vector.shape_cast %87 : vector<16xf32> to vector<1x16xf32>
    %89 = arith.addf %42, %88 : vector<1x16xf32>
    %90 = arith.mulf %86, %86 : vector<5x16xf32>
    %cst_203 = arith.constant dense<0.000000e+00> : vector<16xf32>
    %91 = vector.multi_reduction <add>, %90, %cst_203 [0] : vector<5x16xf32> to vector<16xf32>
    %92 = vector.shape_cast %91 : vector<16xf32> to vector<1x16xf32>
    %93 = arith.addf %46, %92 : vector<1x16xf32>
    %94 = arith.truncf %86 : vector<5x16xf32> to vector<5x16xbf16>
    %c0_204 = arith.constant 0 : index
    %c1_205 = arith.constant 1 : index
    %c0_206 = arith.constant 0 : index
    %c0_207 = arith.constant 0 : index
    %95 = vector.load %arg4[%c0_204, %c1_205, %c0_206, %c0_207] : memref<1x5x5x16xbf16, #tpu.memory_space<vmem>>, vector<1x1x5x16xbf16>
    %96 = vector.shape_cast %95 : vector<1x1x5x16xbf16> to vector<5x16xbf16>
    %97 = vector.shape_cast %94 : vector<5x16xbf16> to vector<1x1x5x16xbf16>
    tpu.vector_store %arg4[%c0_204, %c1_205, %c0_206, %c0_207], %97 {strides = array<i32>} : memref<1x5x5x16xbf16, #tpu.memory_space<vmem>>, vector<1x1x5x16xbf16>,
    %c0_208 = arith.constant 0 : index
    %c0_209 = arith.constant 0 : index
    %c0_210 = arith.constant 0 : index
    %c2_211 = arith.constant 2 : index
    %c0_212 = arith.constant 0 : index
    %c0_213 = arith.constant 0 : index
    %98 = vector.load %arg1[%c0_208, %c0_209, %c0_210, %c2_211, %c0_212, %c0_213] : memref<1x2x2x7x7x8xbf16, #tpu.memory_space<vmem>>, vector<1x1x1x1x5x8xbf16>
    %99 = vector.shape_cast %98 : vector<1x1x1x1x5x8xbf16> to vector<5x8xbf16>
    %c0_214 = arith.constant 0 : index
    %c0_215 = arith.constant 0 : index
    %c1_216 = arith.constant 1 : index
    %c2_217 = arith.constant 2 : index
    %c0_218 = arith.constant 0 : index
    %c0_219 = arith.constant 0 : index
    %100 = vector.load %arg1[%c0_214, %c0_215, %c1_216, %c2_217, %c0_218, %c0_219] : memref<1x2x2x7x7x8xbf16, #tpu.memory_space<vmem>>, vector<1x1x1x1x5x8xbf16>
    %101 = vector.shape_cast %100 : vector<1x1x1x1x5x8xbf16> to vector<5x8xbf16>
    %c0_220 = arith.constant 0 : index
    %c0_221 = arith.constant 0 : index
    %c0_222 = arith.constant 0 : index
    %c2_223 = arith.constant 2 : index
    %c1_224 = arith.constant 1 : index
    %c0_225 = arith.constant 0 : index
    %102 = vector.load %arg1[%c0_220, %c0_221, %c0_222, %c2_223, %c1_224, %c0_225] : memref<1x2x2x7x7x8xbf16, #tpu.memory_space<vmem>>, vector<1x1x1x1x5x8xbf16>
    %103 = vector.shape_cast %102 : vector<1x1x1x1x5x8xbf16> to vector<5x8xbf16>
    %c0_226 = arith.constant 0 : index
    %c0_227 = arith.constant 0 : index
    %c1_228 = arith.constant 1 : index
    %c2_229 = arith.constant 2 : index
    %c1_230 = arith.constant 1 : index
    %c0_231 = arith.constant 0 : index
    %104 = vector.load %arg1[%c0_226, %c0_227, %c1_228, %c2_229, %c1_230, %c0_231] : memref<1x2x2x7x7x8xbf16, #tpu.memory_space<vmem>>, vector<1x1x1x1x5x8xbf16>
    %105 = vector.shape_cast %104 : vector<1x1x1x1x5x8xbf16> to vector<5x8xbf16>
    %c0_232 = arith.constant 0 : index
    %c1_233 = arith.constant 1 : index
    %c0_234 = arith.constant 0 : index
    %c2_235 = arith.constant 2 : index
    %c0_236 = arith.constant 0 : index
    %c0_237 = arith.constant 0 : index
    %106 = vector.load %arg1[%c0_232, %c1_233, %c0_234, %c2_235, %c0_236, %c0_237] : memref<1x2x2x7x7x8xbf16, #tpu.memory_space<vmem>>, vector<1x1x1x1x5x8xbf16>
    %107 = vector.shape_cast %106 : vector<1x1x1x1x5x8xbf16> to vector<5x8xbf16>
    %c0_238 = arith.constant 0 : index
    %c1_239 = arith.constant 1 : index
    %c1_240 = arith.constant 1 : index
    %c2_241 = arith.constant 2 : index
    %c0_242 = arith.constant 0 : index
    %c0_243 = arith.constant 0 : index
    %108 = vector.load %arg1[%c0_238, %c1_239, %c1_240, %c2_241, %c0_242, %c0_243] : memref<1x2x2x7x7x8xbf16, #tpu.memory_space<vmem>>, vector<1x1x1x1x5x8xbf16>
    %109 = vector.shape_cast %108 : vector<1x1x1x1x5x8xbf16> to vector<5x8xbf16>
    %c0_244 = arith.constant 0 : index
    %c1_245 = arith.constant 1 : index
    %c0_246 = arith.constant 0 : index
    %c2_247 = arith.constant 2 : index
    %c1_248 = arith.constant 1 : index
    %c0_249 = arith.constant 0 : index
    %110 = vector.load %arg1[%c0_244, %c1_245, %c0_246, %c2_247, %c1_248, %c0_249] : memref<1x2x2x7x7x8xbf16, #tpu.memory_space<vmem>>, vector<1x1x1x1x5x8xbf16>
    %111 = vector.shape_cast %110 : vector<1x1x1x1x5x8xbf16> to vector<5x8xbf16>
    %c0_250 = arith.constant 0 : index
    %c1_251 = arith.constant 1 : index
    %c1_252 = arith.constant 1 : index
    %c2_253 = arith.constant 2 : index
    %c1_254 = arith.constant 1 : index
    %c0_255 = arith.constant 0 : index
    %112 = vector.load %arg1[%c0_250, %c1_251, %c1_252, %c2_253, %c1_254, %c0_255] : memref<1x2x2x7x7x8xbf16, #tpu.memory_space<vmem>>, vector<1x1x1x1x5x8xbf16>
    %113 = vector.shape_cast %112 : vector<1x1x1x1x5x8xbf16> to vector<5x8xbf16>
    %c0_256 = arith.constant 0 : index
    %c0_257 = arith.constant 0 : index
    %c0_258 = arith.constant 0 : index
    %c3 = arith.constant 3 : index
    %c0_259 = arith.constant 0 : index
    %c0_260 = arith.constant 0 : index
    %114 = vector.load %arg1[%c0_256, %c0_257, %c0_258, %c3, %c0_259, %c0_260] : memref<1x2x2x7x7x8xbf16, #tpu.memory_space<vmem>>, vector<1x1x1x1x5x8xbf16>
    %115 = vector.shape_cast %114 : vector<1x1x1x1x5x8xbf16> to vector<5x8xbf16>
    %c0_261 = arith.constant 0 : index
    %c0_262 = arith.constant 0 : index
    %c1_263 = arith.constant 1 : index
    %c3_264 = arith.constant 3 : index
    %c0_265 = arith.constant 0 : index
    %c0_266 = arith.constant 0 : index
    %116 = vector.load %arg1[%c0_261, %c0_262, %c1_263, %c3_264, %c0_265, %c0_266] : memref<1x2x2x7x7x8xbf16, #tpu.memory_space<vmem>>, vector<1x1x1x1x5x8xbf16>
    %117 = vector.shape_cast %116 : vector<1x1x1x1x5x8xbf16> to vector<5x8xbf16>
    %c0_267 = arith.constant 0 : index
    %c0_268 = arith.constant 0 : index
    %c0_269 = arith.constant 0 : index
    %c3_270 = arith.constant 3 : index
    %c1_271 = arith.constant 1 : index
    %c0_272 = arith.constant 0 : index
    %118 = vector.load %arg1[%c0_267, %c0_268, %c0_269, %c3_270, %c1_271, %c0_272] : memref<1x2x2x7x7x8xbf16, #tpu.memory_space<vmem>>, vector<1x1x1x1x5x8xbf16>
    %119 = vector.shape_cast %118 : vector<1x1x1x1x5x8xbf16> to vector<5x8xbf16>
    %c0_273 = arith.constant 0 : index
    %c0_274 = arith.constant 0 : index
    %c1_275 = arith.constant 1 : index
    %c3_276 = arith.constant 3 : index
    %c1_277 = arith.constant 1 : index
    %c0_278 = arith.constant 0 : index
    %120 = vector.load %arg1[%c0_273, %c0_274, %c1_275, %c3_276, %c1_277, %c0_278] : memref<1x2x2x7x7x8xbf16, #tpu.memory_space<vmem>>, vector<1x1x1x1x5x8xbf16>
    %121 = vector.shape_cast %120 : vector<1x1x1x1x5x8xbf16> to vector<5x8xbf16>
    %c0_279 = arith.constant 0 : index
    %c1_280 = arith.constant 1 : index
    %c0_281 = arith.constant 0 : index
    %c3_282 = arith.constant 3 : index
    %c0_283 = arith.constant 0 : index
    %c0_284 = arith.constant 0 : index
    %122 = vector.load %arg1[%c0_279, %c1_280, %c0_281, %c3_282, %c0_283, %c0_284] : memref<1x2x2x7x7x8xbf16, #tpu.memory_space<vmem>>, vector<1x1x1x1x5x8xbf16>
    %123 = vector.shape_cast %122 : vector<1x1x1x1x5x8xbf16> to vector<5x8xbf16>
    %c0_285 = arith.constant 0 : index
    %c1_286 = arith.constant 1 : index
    %c1_287 = arith.constant 1 : index
    %c3_288 = arith.constant 3 : index
    %c0_289 = arith.constant 0 : index
    %c0_290 = arith.constant 0 : index
    %124 = vector.load %arg1[%c0_285, %c1_286, %c1_287, %c3_288, %c0_289, %c0_290] : memref<1x2x2x7x7x8xbf16, #tpu.memory_space<vmem>>, vector<1x1x1x1x5x8xbf16>
    %125 = vector.shape_cast %124 : vector<1x1x1x1x5x8xbf16> to vector<5x8xbf16>
    %c0_291 = arith.constant 0 : index
    %c1_292 = arith.constant 1 : index
    %c0_293 = arith.constant 0 : index
    %c3_294 = arith.constant 3 : index
    %c1_295 = arith.constant 1 : index
    %c0_296 = arith.constant 0 : index
    %126 = vector.load %arg1[%c0_291, %c1_292, %c0_293, %c3_294, %c1_295, %c0_296] : memref<1x2x2x7x7x8xbf16, #tpu.memory_space<vmem>>, vector<1x1x1x1x5x8xbf16>
    %127 = vector.shape_cast %126 : vector<1x1x1x1x5x8xbf16> to vector<5x8xbf16>
    %c0_297 = arith.constant 0 : index
    %c1_298 = arith.constant 1 : index
    %c1_299 = arith.constant 1 : index
    %c3_300 = arith.constant 3 : index
    %c1_301 = arith.constant 1 : index
    %c0_302 = arith.constant 0 : index
    %128 = vector.load %arg1[%c0_297, %c1_298, %c1_299, %c3_300, %c1_301, %c0_302] : memref<1x2x2x7x7x8xbf16, #tpu.memory_space<vmem>>, vector<1x1x1x1x5x8xbf16>
    %129 = vector.shape_cast %128 : vector<1x1x1x1x5x8xbf16> to vector<5x8xbf16>
    %130 = tpu.concatenate %99, %101, %103, %105, %107, %109, %111, %113, %115, %117, %119, %121, %123, %125, %127, %129 in 1 : vector<5x8xbf16>, vector<5x8xbf16>, vector<5x8xbf16>, vector<5x8xbf16>, vector<5x8xbf16>, vector<5x8xbf16>, vector<5x8xbf16>, vector<5x8xbf16>, vector<5x8xbf16>, vector<5x8xbf16>, vector<5x8xbf16>, vector<5x8xbf16>, vector<5x8xbf16>, vector<5x8xbf16>, vector<5x8xbf16>, vector<5x8xbf16> -> vector<5x128xbf16>
    %cst_303 = arith.constant dense<0.000000e+00> : vector<5x16xf32>
    %131 = tpu.matmul %130, %0, %cst_303 {dimension_numbers = #tpu.dot_dimension_numbers<[1], [0], [0], [1], [0, 0, 1, 1], [], []>} : vector<5x128xbf16>, vector<128x16xbf16>, vector<5x16xf32> -> vector<5x16xf32>
    %132 = vector.broadcast %1 : vector<1x16xf32> to vector<5x16xf32>
    %133 = arith.addf %131, %132 : vector<5x16xf32>
    %cst_304 = arith.constant dense<0.000000e+00> : vector<16xf32>
    %134 = vector.multi_reduction <add>, %133, %cst_304 [0] : vector<5x16xf32> to vector<16xf32>
    %135 = vector.shape_cast %134 : vector<16xf32> to vector<1x16xf32>
    %136 = arith.addf %89, %135 : vector<1x16xf32>
    %137 = arith.mulf %133, %133 : vector<5x16xf32>
    %cst_305 = arith.constant dense<0.000000e+00> : vector<16xf32>
    %138 = vector.multi_reduction <add>, %137, %cst_305 [0] : vector<5x16xf32> to vector<16xf32>
    %139 = vector.shape_cast %138 : vector<16xf32> to vector<1x16xf32>
    %140 = arith.addf %93, %139 : vector<1x16xf32>
    %141 = arith.truncf %133 : vector<5x16xf32> to vector<5x16xbf16>
    %c0_306 = arith.constant 0 : index
    %c2_307 = arith.constant 2 : index
    %c0_308 = arith.constant 0 : index
    %c0_309 = arith.constant 0 : index
    %142 = vector.load %arg4[%c0_306, %c2_307, %c0_308, %c0_309] : memref<1x5x5x16xbf16, #tpu.memory_space<vmem>>, vector<1x1x5x16xbf16>
    %143 = vector.shape_cast %142 : vector<1x1x5x16xbf16> to vector<5x16xbf16>
    %144 = vector.shape_cast %141 : vector<5x16xbf16> to vector<1x1x5x16xbf16>
    tpu.vector_store %arg4[%c0_306, %c2_307, %c0_308, %c0_309], %144 {strides = array<i32>} : memref<1x5x5x16xbf16, #tpu.memory_space<vmem>>, vector<1x1x5x16xbf16>,
    %c0_310 = arith.constant 0 : index
    %c0_311 = arith.constant 0 : index
    %c0_312 = arith.constant 0 : index
    %c3_313 = arith.constant 3 : index
    %c0_314 = arith.constant 0 : index
    %c0_315 = arith.constant 0 : index
    %145 = vector.load %arg1[%c0_310, %c0_311, %c0_312, %c3_313, %c0_314, %c0_315] : memref<1x2x2x7x7x8xbf16, #tpu.memory_space<vmem>>, vector<1x1x1x1x5x8xbf16>
    %146 = vector.shape_cast %145 : vector<1x1x1x1x5x8xbf16> to vector<5x8xbf16>
    %c0_316 = arith.constant 0 : index
    %c0_317 = arith.constant 0 : index
    %c1_318 = arith.constant 1 : index
    %c3_319 = arith.constant 3 : index
    %c0_320 = arith.constant 0 : index
    %c0_321 = arith.constant 0 : index
    %147 = vector.load %arg1[%c0_316, %c0_317, %c1_318, %c3_319, %c0_320, %c0_321] : memref<1x2x2x7x7x8xbf16, #tpu.memory_space<vmem>>, vector<1x1x1x1x5x8xbf16>
    %148 = vector.shape_cast %147 : vector<1x1x1x1x5x8xbf16> to vector<5x8xbf16>
    %c0_322 = arith.constant 0 : index
    %c0_323 = arith.constant 0 : index
    %c0_324 = arith.constant 0 : index
    %c3_325 = arith.constant 3 : index
    %c1_326 = arith.constant 1 : index
    %c0_327 = arith.constant 0 : index
    %149 = vector.load %arg1[%c0_322, %c0_323, %c0_324, %c3_325, %c1_326, %c0_327] : memref<1x2x2x7x7x8xbf16, #tpu.memory_space<vmem>>, vector<1x1x1x1x5x8xbf16>
    %150 = vector.shape_cast %149 : vector<1x1x1x1x5x8xbf16> to vector<5x8xbf16>
    %c0_328 = arith.constant 0 : index
    %c0_329 = arith.constant 0 : index
    %c1_330 = arith.constant 1 : index
    %c3_331 = arith.constant 3 : index
    %c1_332 = arith.constant 1 : index
    %c0_333 = arith.constant 0 : index
    %151 = vector.load %arg1[%c0_328, %c0_329, %c1_330, %c3_331, %c1_332, %c0_333] : memref<1x2x2x7x7x8xbf16, #tpu.memory_space<vmem>>, vector<1x1x1x1x5x8xbf16>
    %152 = vector.shape_cast %151 : vector<1x1x1x1x5x8xbf16> to vector<5x8xbf16>
    %c0_334 = arith.constant 0 : index
    %c1_335 = arith.constant 1 : index
    %c0_336 = arith.constant 0 : index
    %c3_337 = arith.constant 3 : index
    %c0_338 = arith.constant 0 : index
    %c0_339 = arith.constant 0 : index
    %153 = vector.load %arg1[%c0_334, %c1_335, %c0_336, %c3_337, %c0_338, %c0_339] : memref<1x2x2x7x7x8xbf16, #tpu.memory_space<vmem>>, vector<1x1x1x1x5x8xbf16>
    %154 = vector.shape_cast %153 : vector<1x1x1x1x5x8xbf16> to vector<5x8xbf16>
    %c0_340 = arith.constant 0 : index
    %c1_341 = arith.constant 1 : index
    %c1_342 = arith.constant 1 : index
    %c3_343 = arith.constant 3 : index
    %c0_344 = arith.constant 0 : index
    %c0_345 = arith.constant 0 : index
    %155 = vector.load %arg1[%c0_340, %c1_341, %c1_342, %c3_343, %c0_344, %c0_345] : memref<1x2x2x7x7x8xbf16, #tpu.memory_space<vmem>>, vector<1x1x1x1x5x8xbf16>
    %156 = vector.shape_cast %155 : vector<1x1x1x1x5x8xbf16> to vector<5x8xbf16>
    %c0_346 = arith.constant 0 : index
    %c1_347 = arith.constant 1 : index
    %c0_348 = arith.constant 0 : index
    %c3_349 = arith.constant 3 : index
    %c1_350 = arith.constant 1 : index
    %c0_351 = arith.constant 0 : index
    %157 = vector.load %arg1[%c0_346, %c1_347, %c0_348, %c3_349, %c1_350, %c0_351] : memref<1x2x2x7x7x8xbf16, #tpu.memory_space<vmem>>, vector<1x1x1x1x5x8xbf16>
    %158 = vector.shape_cast %157 : vector<1x1x1x1x5x8xbf16> to vector<5x8xbf16>
    %c0_352 = arith.constant 0 : index
    %c1_353 = arith.constant 1 : index
    %c1_354 = arith.constant 1 : index
    %c3_355 = arith.constant 3 : index
    %c1_356 = arith.constant 1 : index
    %c0_357 = arith.constant 0 : index
    %159 = vector.load %arg1[%c0_352, %c1_353, %c1_354, %c3_355, %c1_356, %c0_357] : memref<1x2x2x7x7x8xbf16, #tpu.memory_space<vmem>>, vector<1x1x1x1x5x8xbf16>
    %160 = vector.shape_cast %159 : vector<1x1x1x1x5x8xbf16> to vector<5x8xbf16>
    %c0_358 = arith.constant 0 : index
    %c0_359 = arith.constant 0 : index
    %c0_360 = arith.constant 0 : index
    %c4 = arith.constant 4 : index
    %c0_361 = arith.constant 0 : index
    %c0_362 = arith.constant 0 : index
    %161 = vector.load %arg1[%c0_358, %c0_359, %c0_360, %c4, %c0_361, %c0_362] : memref<1x2x2x7x7x8xbf16, #tpu.memory_space<vmem>>, vector<1x1x1x1x5x8xbf16>
    %162 = vector.shape_cast %161 : vector<1x1x1x1x5x8xbf16> to vector<5x8xbf16>
    %c0_363 = arith.constant 0 : index
    %c0_364 = arith.constant 0 : index
    %c1_365 = arith.constant 1 : index
    %c4_366 = arith.constant 4 : index
    %c0_367 = arith.constant 0 : index
    %c0_368 = arith.constant 0 : index
    %163 = vector.load %arg1[%c0_363, %c0_364, %c1_365, %c4_366, %c0_367, %c0_368] : memref<1x2x2x7x7x8xbf16, #tpu.memory_space<vmem>>, vector<1x1x1x1x5x8xbf16>
    %164 = vector.shape_cast %163 : vector<1x1x1x1x5x8xbf16> to vector<5x8xbf16>
    %c0_369 = arith.constant 0 : index
    %c0_370 = arith.constant 0 : index
    %c0_371 = arith.constant 0 : index
    %c4_372 = arith.constant 4 : index
    %c1_373 = arith.constant 1 : index
    %c0_374 = arith.constant 0 : index
    %165 = vector.load %arg1[%c0_369, %c0_370, %c0_371, %c4_372, %c1_373, %c0_374] : memref<1x2x2x7x7x8xbf16, #tpu.memory_space<vmem>>, vector<1x1x1x1x5x8xbf16>
    %166 = vector.shape_cast %165 : vector<1x1x1x1x5x8xbf16> to vector<5x8xbf16>
    %c0_375 = arith.constant 0 : index
    %c0_376 = arith.constant 0 : index
    %c1_377 = arith.constant 1 : index
    %c4_378 = arith.constant 4 : index
    %c1_379 = arith.constant 1 : index
    %c0_380 = arith.constant 0 : index
    %167 = vector.load %arg1[%c0_375, %c0_376, %c1_377, %c4_378, %c1_379, %c0_380] : memref<1x2x2x7x7x8xbf16, #tpu.memory_space<vmem>>, vector<1x1x1x1x5x8xbf16>
    %168 = vector.shape_cast %167 : vector<1x1x1x1x5x8xbf16> to vector<5x8xbf16>
    %c0_381 = arith.constant 0 : index
    %c1_382 = arith.constant 1 : index
    %c0_383 = arith.constant 0 : index
    %c4_384 = arith.constant 4 : index
    %c0_385 = arith.constant 0 : index
    %c0_386 = arith.constant 0 : index
    %169 = vector.load %arg1[%c0_381, %c1_382, %c0_383, %c4_384, %c0_385, %c0_386] : memref<1x2x2x7x7x8xbf16, #tpu.memory_space<vmem>>, vector<1x1x1x1x5x8xbf16>
    %170 = vector.shape_cast %169 : vector<1x1x1x1x5x8xbf16> to vector<5x8xbf16>
    %c0_387 = arith.constant 0 : index
    %c1_388 = arith.constant 1 : index
    %c1_389 = arith.constant 1 : index
    %c4_390 = arith.constant 4 : index
    %c0_391 = arith.constant 0 : index
    %c0_392 = arith.constant 0 : index
    %171 = vector.load %arg1[%c0_387, %c1_388, %c1_389, %c4_390, %c0_391, %c0_392] : memref<1x2x2x7x7x8xbf16, #tpu.memory_space<vmem>>, vector<1x1x1x1x5x8xbf16>
    %172 = vector.shape_cast %171 : vector<1x1x1x1x5x8xbf16> to vector<5x8xbf16>
    %c0_393 = arith.constant 0 : index
    %c1_394 = arith.constant 1 : index
    %c0_395 = arith.constant 0 : index
    %c4_396 = arith.constant 4 : index
    %c1_397 = arith.constant 1 : index
    %c0_398 = arith.constant 0 : index
    %173 = vector.load %arg1[%c0_393, %c1_394, %c0_395, %c4_396, %c1_397, %c0_398] : memref<1x2x2x7x7x8xbf16, #tpu.memory_space<vmem>>, vector<1x1x1x1x5x8xbf16>
    %174 = vector.shape_cast %173 : vector<1x1x1x1x5x8xbf16> to vector<5x8xbf16>
    %c0_399 = arith.constant 0 : index
    %c1_400 = arith.constant 1 : index
    %c1_401 = arith.constant 1 : index
    %c4_402 = arith.constant 4 : index
    %c1_403 = arith.constant 1 : index
    %c0_404 = arith.constant 0 : index
    %175 = vector.load %arg1[%c0_399, %c1_400, %c1_401, %c4_402, %c1_403, %c0_404] : memref<1x2x2x7x7x8xbf16, #tpu.memory_space<vmem>>, vector<1x1x1x1x5x8xbf16>
    %176 = vector.shape_cast %175 : vector<1x1x1x1x5x8xbf16> to vector<5x8xbf16>
    %177 = tpu.concatenate %146, %148, %150, %152, %154, %156, %158, %160, %162, %164, %166, %168, %170, %172, %174, %176 in 1 : vector<5x8xbf16>, vector<5x8xbf16>, vector<5x8xbf16>, vector<5x8xbf16>, vector<5x8xbf16>, vector<5x8xbf16>, vector<5x8xbf16>, vector<5x8xbf16>, vector<5x8xbf16>, vector<5x8xbf16>, vector<5x8xbf16>, vector<5x8xbf16>, vector<5x8xbf16>, vector<5x8xbf16>, vector<5x8xbf16>, vector<5x8xbf16> -> vector<5x128xbf16>
    %cst_405 = arith.constant dense<0.000000e+00> : vector<5x16xf32>
    %178 = tpu.matmul %177, %0, %cst_405 {dimension_numbers = #tpu.dot_dimension_numbers<[1], [0], [0], [1], [0, 0, 1, 1], [], []>} : vector<5x128xbf16>, vector<128x16xbf16>, vector<5x16xf32> -> vector<5x16xf32>
    %179 = vector.broadcast %1 : vector<1x16xf32> to vector<5x16xf32>
    %180 = arith.addf %178, %179 : vector<5x16xf32>
    %cst_406 = arith.constant dense<0.000000e+00> : vector<16xf32>
    %181 = vector.multi_reduction <add>, %180, %cst_406 [0] : vector<5x16xf32> to vector<16xf32>
    %182 = vector.shape_cast %181 : vector<16xf32> to vector<1x16xf32>
    %183 = arith.addf %136, %182 : vector<1x16xf32>
    %184 = arith.mulf %180, %180 : vector<5x16xf32>
    %cst_407 = arith.constant dense<0.000000e+00> : vector<16xf32>
    %185 = vector.multi_reduction <add>, %184, %cst_407 [0] : vector<5x16xf32> to vector<16xf32>
    %186 = vector.shape_cast %185 : vector<16xf32> to vector<1x16xf32>
    %187 = arith.addf %140, %186 : vector<1x16xf32>
    %188 = arith.truncf %180 : vector<5x16xf32> to vector<5x16xbf16>
    %c0_408 = arith.constant 0 : index
    %c3_409 = arith.constant 3 : index
    %c0_410 = arith.constant 0 : index
    %c0_411 = arith.constant 0 : index
    %189 = vector.load %arg4[%c0_408, %c3_409, %c0_410, %c0_411] : memref<1x5x5x16xbf16, #tpu.memory_space<vmem>>, vector<1x1x5x16xbf16>
    %190 = vector.shape_cast %189 : vector<1x1x5x16xbf16> to vector<5x16xbf16>
    %191 = vector.shape_cast %188 : vector<5x16xbf16> to vector<1x1x5x16xbf16>
    tpu.vector_store %arg4[%c0_408, %c3_409, %c0_410, %c0_411], %191 {strides = array<i32>} : memref<1x5x5x16xbf16, #tpu.memory_space<vmem>>, vector<1x1x5x16xbf16>,
    %c0_412 = arith.constant 0 : index
    %c0_413 = arith.constant 0 : index
    %c0_414 = arith.constant 0 : index
    %c4_415 = arith.constant 4 : index
    %c0_416 = arith.constant 0 : index
    %c0_417 = arith.constant 0 : index
    %192 = vector.load %arg1[%c0_412, %c0_413, %c0_414, %c4_415, %c0_416, %c0_417] : memref<1x2x2x7x7x8xbf16, #tpu.memory_space<vmem>>, vector<1x1x1x1x5x8xbf16>
    %193 = vector.shape_cast %192 : vector<1x1x1x1x5x8xbf16> to vector<5x8xbf16>
    %c0_418 = arith.constant 0 : index
    %c0_419 = arith.constant 0 : index
    %c1_420 = arith.constant 1 : index
    %c4_421 = arith.constant 4 : index
    %c0_422 = arith.constant 0 : index
    %c0_423 = arith.constant 0 : index
    %194 = vector.load %arg1[%c0_418, %c0_419, %c1_420, %c4_421, %c0_422, %c0_423] : memref<1x2x2x7x7x8xbf16, #tpu.memory_space<vmem>>, vector<1x1x1x1x5x8xbf16>
    %195 = vector.shape_cast %194 : vector<1x1x1x1x5x8xbf16> to vector<5x8xbf16>
    %c0_424 = arith.constant 0 : index
    %c0_425 = arith.constant 0 : index
    %c0_426 = arith.constant 0 : index
    %c4_427 = arith.constant 4 : index
    %c1_428 = arith.constant 1 : index
    %c0_429 = arith.constant 0 : index
    %196 = vector.load %arg1[%c0_424, %c0_425, %c0_426, %c4_427, %c1_428, %c0_429] : memref<1x2x2x7x7x8xbf16, #tpu.memory_space<vmem>>, vector<1x1x1x1x5x8xbf16>
    %197 = vector.shape_cast %196 : vector<1x1x1x1x5x8xbf16> to vector<5x8xbf16>
    %c0_430 = arith.constant 0 : index
    %c0_431 = arith.constant 0 : index
    %c1_432 = arith.constant 1 : index
    %c4_433 = arith.constant 4 : index
    %c1_434 = arith.constant 1 : index
    %c0_435 = arith.constant 0 : index
    %198 = vector.load %arg1[%c0_430, %c0_431, %c1_432, %c4_433, %c1_434, %c0_435] : memref<1x2x2x7x7x8xbf16, #tpu.memory_space<vmem>>, vector<1x1x1x1x5x8xbf16>
    %199 = vector.shape_cast %198 : vector<1x1x1x1x5x8xbf16> to vector<5x8xbf16>
    %c0_436 = arith.constant 0 : index
    %c1_437 = arith.constant 1 : index
    %c0_438 = arith.constant 0 : index
    %c4_439 = arith.constant 4 : index
    %c0_440 = arith.constant 0 : index
    %c0_441 = arith.constant 0 : index
    %200 = vector.load %arg1[%c0_436, %c1_437, %c0_438, %c4_439, %c0_440, %c0_441] : memref<1x2x2x7x7x8xbf16, #tpu.memory_space<vmem>>, vector<1x1x1x1x5x8xbf16>
    %201 = vector.shape_cast %200 : vector<1x1x1x1x5x8xbf16> to vector<5x8xbf16>
    %c0_442 = arith.constant 0 : index
    %c1_443 = arith.constant 1 : index
    %c1_444 = arith.constant 1 : index
    %c4_445 = arith.constant 4 : index
    %c0_446 = arith.constant 0 : index
    %c0_447 = arith.constant 0 : index
    %202 = vector.load %arg1[%c0_442, %c1_443, %c1_444, %c4_445, %c0_446, %c0_447] : memref<1x2x2x7x7x8xbf16, #tpu.memory_space<vmem>>, vector<1x1x1x1x5x8xbf16>
    %203 = vector.shape_cast %202 : vector<1x1x1x1x5x8xbf16> to vector<5x8xbf16>
    %c0_448 = arith.constant 0 : index
    %c1_449 = arith.constant 1 : index
    %c0_450 = arith.constant 0 : index
    %c4_451 = arith.constant 4 : index
    %c1_452 = arith.constant 1 : index
    %c0_453 = arith.constant 0 : index
    %204 = vector.load %arg1[%c0_448, %c1_449, %c0_450, %c4_451, %c1_452, %c0_453] : memref<1x2x2x7x7x8xbf16, #tpu.memory_space<vmem>>, vector<1x1x1x1x5x8xbf16>
    %205 = vector.shape_cast %204 : vector<1x1x1x1x5x8xbf16> to vector<5x8xbf16>
    %c0_454 = arith.constant 0 : index
    %c1_455 = arith.constant 1 : index
    %c1_456 = arith.constant 1 : index
    %c4_457 = arith.constant 4 : index
    %c1_458 = arith.constant 1 : index
    %c0_459 = arith.constant 0 : index
    %206 = vector.load %arg1[%c0_454, %c1_455, %c1_456, %c4_457, %c1_458, %c0_459] : memref<1x2x2x7x7x8xbf16, #tpu.memory_space<vmem>>, vector<1x1x1x1x5x8xbf16>
    %207 = vector.shape_cast %206 : vector<1x1x1x1x5x8xbf16> to vector<5x8xbf16>
    %c0_460 = arith.constant 0 : index
    %c0_461 = arith.constant 0 : index
    %c0_462 = arith.constant 0 : index
    %c5 = arith.constant 5 : index
    %c0_463 = arith.constant 0 : index
    %c0_464 = arith.constant 0 : index
    %208 = vector.load %arg1[%c0_460, %c0_461, %c0_462, %c5, %c0_463, %c0_464] : memref<1x2x2x7x7x8xbf16, #tpu.memory_space<vmem>>, vector<1x1x1x1x5x8xbf16>
    %209 = vector.shape_cast %208 : vector<1x1x1x1x5x8xbf16> to vector<5x8xbf16>
    %c0_465 = arith.constant 0 : index
    %c0_466 = arith.constant 0 : index
    %c1_467 = arith.constant 1 : index
    %c5_468 = arith.constant 5 : index
    %c0_469 = arith.constant 0 : index
    %c0_470 = arith.constant 0 : index
    %210 = vector.load %arg1[%c0_465, %c0_466, %c1_467, %c5_468, %c0_469, %c0_470] : memref<1x2x2x7x7x8xbf16, #tpu.memory_space<vmem>>, vector<1x1x1x1x5x8xbf16>
    %211 = vector.shape_cast %210 : vector<1x1x1x1x5x8xbf16> to vector<5x8xbf16>
    %c0_471 = arith.constant 0 : index
    %c0_472 = arith.constant 0 : index
    %c0_473 = arith.constant 0 : index
    %c5_474 = arith.constant 5 : index
    %c1_475 = arith.constant 1 : index
    %c0_476 = arith.constant 0 : index
    %212 = vector.load %arg1[%c0_471, %c0_472, %c0_473, %c5_474, %c1_475, %c0_476] : memref<1x2x2x7x7x8xbf16, #tpu.memory_space<vmem>>, vector<1x1x1x1x5x8xbf16>
    %213 = vector.shape_cast %212 : vector<1x1x1x1x5x8xbf16> to vector<5x8xbf16>
    %c0_477 = arith.constant 0 : index
    %c0_478 = arith.constant 0 : index
    %c1_479 = arith.constant 1 : index
    %c5_480 = arith.constant 5 : index
    %c1_481 = arith.constant 1 : index
    %c0_482 = arith.constant 0 : index
    %214 = vector.load %arg1[%c0_477, %c0_478, %c1_479, %c5_480, %c1_481, %c0_482] : memref<1x2x2x7x7x8xbf16, #tpu.memory_space<vmem>>, vector<1x1x1x1x5x8xbf16>
    %215 = vector.shape_cast %214 : vector<1x1x1x1x5x8xbf16> to vector<5x8xbf16>
    %c0_483 = arith.constant 0 : index
    %c1_484 = arith.constant 1 : index
    %c0_485 = arith.constant 0 : index
    %c5_486 = arith.constant 5 : index
    %c0_487 = arith.constant 0 : index
    %c0_488 = arith.constant 0 : index
    %216 = vector.load %arg1[%c0_483, %c1_484, %c0_485, %c5_486, %c0_487, %c0_488] : memref<1x2x2x7x7x8xbf16, #tpu.memory_space<vmem>>, vector<1x1x1x1x5x8xbf16>
    %217 = vector.shape_cast %216 : vector<1x1x1x1x5x8xbf16> to vector<5x8xbf16>
    %c0_489 = arith.constant 0 : index
    %c1_490 = arith.constant 1 : index
    %c1_491 = arith.constant 1 : index
    %c5_492 = arith.constant 5 : index
    %c0_493 = arith.constant 0 : index
    %c0_494 = arith.constant 0 : index
    %218 = vector.load %arg1[%c0_489, %c1_490, %c1_491, %c5_492, %c0_493, %c0_494] : memref<1x2x2x7x7x8xbf16, #tpu.memory_space<vmem>>, vector<1x1x1x1x5x8xbf16>
    %219 = vector.shape_cast %218 : vector<1x1x1x1x5x8xbf16> to vector<5x8xbf16>
    %c0_495 = arith.constant 0 : index
    %c1_496 = arith.constant 1 : index
    %c0_497 = arith.constant 0 : index
    %c5_498 = arith.constant 5 : index
    %c1_499 = arith.constant 1 : index
    %c0_500 = arith.constant 0 : index
    %220 = vector.load %arg1[%c0_495, %c1_496, %c0_497, %c5_498, %c1_499, %c0_500] : memref<1x2x2x7x7x8xbf16, #tpu.memory_space<vmem>>, vector<1x1x1x1x5x8xbf16>
    %221 = vector.shape_cast %220 : vector<1x1x1x1x5x8xbf16> to vector<5x8xbf16>
    %c0_501 = arith.constant 0 : index
    %c1_502 = arith.constant 1 : index
    %c1_503 = arith.constant 1 : index
    %c5_504 = arith.constant 5 : index
    %c1_505 = arith.constant 1 : index
    %c0_506 = arith.constant 0 : index
    %222 = vector.load %arg1[%c0_501, %c1_502, %c1_503, %c5_504, %c1_505, %c0_506] : memref<1x2x2x7x7x8xbf16, #tpu.memory_space<vmem>>, vector<1x1x1x1x5x8xbf16>
    %223 = vector.shape_cast %222 : vector<1x1x1x1x5x8xbf16> to vector<5x8xbf16>
    %224 = tpu.concatenate %193, %195, %197, %199, %201, %203, %205, %207, %209, %211, %213, %215, %217, %219, %221, %223 in 1 : vector<5x8xbf16>, vector<5x8xbf16>, vector<5x8xbf16>, vector<5x8xbf16>, vector<5x8xbf16>, vector<5x8xbf16>, vector<5x8xbf16>, vector<5x8xbf16>, vector<5x8xbf16>, vector<5x8xbf16>, vector<5x8xbf16>, vector<5x8xbf16>, vector<5x8xbf16>, vector<5x8xbf16>, vector<5x8xbf16>, vector<5x8xbf16> -> vector<5x128xbf16>
    %cst_507 = arith.constant dense<0.000000e+00> : vector<5x16xf32>
    %225 = tpu.matmul %224, %0, %cst_507 {dimension_numbers = #tpu.dot_dimension_numbers<[1], [0], [0], [1], [0, 0, 1, 1], [], []>} : vector<5x128xbf16>, vector<128x16xbf16>, vector<5x16xf32> -> vector<5x16xf32>
    %226 = vector.broadcast %1 : vector<1x16xf32> to vector<5x16xf32>
    %227 = arith.addf %225, %226 : vector<5x16xf32>
    %cst_508 = arith.constant dense<0.000000e+00> : vector<16xf32>
    %228 = vector.multi_reduction <add>, %227, %cst_508 [0] : vector<5x16xf32> to vector<16xf32>
    %229 = vector.shape_cast %228 : vector<16xf32> to vector<1x16xf32>
    %230 = arith.addf %183, %229 : vector<1x16xf32>
    %231 = arith.mulf %227, %227 : vector<5x16xf32>
    %cst_509 = arith.constant dense<0.000000e+00> : vector<16xf32>
    %232 = vector.multi_reduction <add>, %231, %cst_509 [0] : vector<5x16xf32> to vector<16xf32>
    %233 = vector.shape_cast %232 : vector<16xf32> to vector<1x16xf32>
    %234 = arith.addf %187, %233 : vector<1x16xf32>
    %235 = arith.truncf %227 : vector<5x16xf32> to vector<5x16xbf16>
    %c0_510 = arith.constant 0 : index
    %c4_511 = arith.constant 4 : index
    %c0_512 = arith.constant 0 : index
    %c0_513 = arith.constant 0 : index
    %236 = vector.load %arg4[%c0_510, %c4_511, %c0_512, %c0_513] : memref<1x5x5x16xbf16, #tpu.memory_space<vmem>>, vector<1x1x5x16xbf16>
    %237 = vector.shape_cast %236 : vector<1x1x5x16xbf16> to vector<5x16xbf16>
    %238 = vector.shape_cast %235 : vector<5x16xbf16> to vector<1x1x5x16xbf16>
    tpu.vector_store %arg4[%c0_510, %c4_511, %c0_512, %c0_513], %238 {strides = array<i32>} : memref<1x5x5x16xbf16, #tpu.memory_space<vmem>>, vector<1x1x5x16xbf16>,
    %239 = tpu.concatenate %230, %234 in 0 : vector<1x16xf32>, vector<1x16xf32> -> vector<2x16xf32>
    %c0_514 = arith.constant 0 : index
    %c0_515 = arith.constant 0 : index
    %c0_516 = arith.constant 0 : index
    %240 = vector.load %arg5[%c0_514, %c0_515, %c0_516] : memref<1x2x16xf32, #tpu.memory_space<vmem>>, vector<1x2x16xf32>
    %241 = vector.shape_cast %240 : vector<1x2x16xf32> to vector<2x16xf32>
    %242 = vector.shape_cast %239 : vector<2x16xf32> to vector<1x2x16xf32>
    tpu.vector_store %arg5[%c0_514, %c0_515, %c0_516], %242 {strides = array<i32>} : memref<1x2x16xf32, #tpu.memory_space<vmem>>, vector<1x2x16xf32>,
    return
  }
  func.func @transform_0(%arg0: i32) -> (i32, i32, i32, i32, i32, i32) {
    %c0_i32 = arith.constant 0 : i32
    %c0_i32_0 = arith.constant 0 : i32
    %c0_i32_1 = arith.constant 0 : i32
    %c0_i32_2 = arith.constant 0 : i32
    %c0_i32_3 = arith.constant 0 : i32
    %c0_i32_4 = arith.constant 0 : i32
    return %arg0, %c0_i32, %c0_i32_0, %c0_i32_1, %c0_i32_2, %c0_i32_3 : i32, i32, i32, i32, i32, i32
  }
  func.func @transform_1(%arg0: i32) -> (i32, i32) {
    %c0_i32 = arith.constant 0 : i32
    %c0_i32_0 = arith.constant 0 : i32
    %c0_i32_1 = arith.constant 0 : i32
    return %c0_i32, %c0_i32_0 : i32, i32
  }
  func.func @transform_2(%arg0: i32) -> (i32, i32) {
    %c0_i32 = arith.constant 0 : i32
    %c0_i32_0 = arith.constant 0 : i32
    %c0_i32_1 = arith.constant 0 : i32
    return %c0_i32, %c0_i32_0 : i32, i32
  }
  func.func @transform_3(%arg0: i32) -> (i32, i32, i32, i32) {
    %c0_i32 = arith.constant 0 : i32
    %c0_i32_0 = arith.constant 0 : i32
    %c0_i32_1 = arith.constant 0 : i32
    %c0_i32_2 = arith.constant 0 : i32
    return %arg0, %c0_i32, %c0_i32_0, %c0_i32_1 : i32, i32, i32, i32
  }
  func.func @transform_4(%arg0: i32) -> (i32, i32, i32) {
    %c0_i32 = arith.constant 0 : i32
    %c0_i32_0 = arith.constant 0 : i32
    %c0_i32_1 = arith.constant 0 : i32
    return %arg0, %c0_i32, %c0_i32_0 : i32, i32, i32
  }
}

module attributes {stable_mosaic.version = 11 : i64} {
  func.func @_conv_kernel(%arg0: i32, %arg1: memref<1x2x2x5x5x16xbf16, #tpu.memory_space<vmem>>, %arg2: memref<256x32xbf16, #tpu.memory_space<vmem>>, %arg3: memref<1x32xf32, #tpu.memory_space<vmem>>, %arg4: memref<1x3x3x32xbf16, #tpu.memory_space<vmem>>, %arg5: memref<1x2x32xf32, #tpu.memory_space<vmem>>) attributes {dimension_semantics = [#tpu.dimension_semantics<parallel>], iteration_bounds = array<i64: 2>, scalar_prefetch = 0 : i64, scratch_operands = 0 : i64, tpu.core_type = #tpu.core_type<tc>, window_params = [{transform_indices = @transform_0, window_bounds = array<i64: 1, 2, 2, 5, 5, 16>}, {pipeline_mode = #tpu.pipeline_mode<synchronous>, transform_indices = @transform_1, window_bounds = array<i64: 256, 32>}, {pipeline_mode = #tpu.pipeline_mode<synchronous>, transform_indices = @transform_2, window_bounds = array<i64: 1, 32>}, {transform_indices = @transform_3, window_bounds = array<i64: 1, 3, 3, 32>}, {transform_indices = @transform_4, window_bounds = array<i64: 1, 2, 32>}]} {
    %c0 = arith.constant 0 : index
    %c0_0 = arith.constant 0 : index
    %0 = vector.load %arg2[%c0, %c0_0] : memref<256x32xbf16, #tpu.memory_space<vmem>>, vector<256x32xbf16>
    %c0_1 = arith.constant 0 : index
    %c0_2 = arith.constant 0 : index
    %1 = vector.load %arg3[%c0_1, %c0_2] : memref<1x32xf32, #tpu.memory_space<vmem>>, vector<1x32xf32>
    %cst = arith.constant 0.000000e+00 : f32
    %2 = vector.broadcast %cst : f32 to vector<1x32xf32>
    %cst_3 = arith.constant 0.000000e+00 : f32
    %3 = vector.broadcast %cst_3 : f32 to vector<1x32xf32>
    %c0_4 = arith.constant 0 : index
    %c0_5 = arith.constant 0 : index
    %c0_6 = arith.constant 0 : index
    %c0_7 = arith.constant 0 : index
    %c0_8 = arith.constant 0 : index
    %c0_9 = arith.constant 0 : index
    %4 = vector.load %arg1[%c0_4, %c0_5, %c0_6, %c0_7, %c0_8, %c0_9] : memref<1x2x2x5x5x16xbf16, #tpu.memory_space<vmem>>, vector<1x1x1x1x3x16xbf16>
    %5 = vector.shape_cast %4 : vector<1x1x1x1x3x16xbf16> to vector<3x16xbf16>
    %c0_10 = arith.constant 0 : index
    %c0_11 = arith.constant 0 : index
    %c1 = arith.constant 1 : index
    %c0_12 = arith.constant 0 : index
    %c0_13 = arith.constant 0 : index
    %c0_14 = arith.constant 0 : index
    %6 = vector.load %arg1[%c0_10, %c0_11, %c1, %c0_12, %c0_13, %c0_14] : memref<1x2x2x5x5x16xbf16, #tpu.memory_space<vmem>>, vector<1x1x1x1x3x16xbf16>
    %7 = vector.shape_cast %6 : vector<1x1x1x1x3x16xbf16> to vector<3x16xbf16>
    %c0_15 = arith.constant 0 : index
    %c0_16 = arith.constant 0 : index
    %c0_17 = arith.constant 0 : index
    %c0_18 = arith.constant 0 : index
    %c1_19 = arith.constant 1 : index
    %c0_20 = arith.constant 0 : index
    %8 = vector.load %arg1[%c0_15, %c0_16, %c0_17, %c0_18, %c1_19, %c0_20] : memref<1x2x2x5x5x16xbf16, #tpu.memory_space<vmem>>, vector<1x1x1x1x3x16xbf16>
    %9 = vector.shape_cast %8 : vector<1x1x1x1x3x16xbf16> to vector<3x16xbf16>
    %c0_21 = arith.constant 0 : index
    %c0_22 = arith.constant 0 : index
    %c1_23 = arith.constant 1 : index
    %c0_24 = arith.constant 0 : index
    %c1_25 = arith.constant 1 : index
    %c0_26 = arith.constant 0 : index
    %10 = vector.load %arg1[%c0_21, %c0_22, %c1_23, %c0_24, %c1_25, %c0_26] : memref<1x2x2x5x5x16xbf16, #tpu.memory_space<vmem>>, vector<1x1x1x1x3x16xbf16>
    %11 = vector.shape_cast %10 : vector<1x1x1x1x3x16xbf16> to vector<3x16xbf16>
    %c0_27 = arith.constant 0 : index
    %c1_28 = arith.constant 1 : index
    %c0_29 = arith.constant 0 : index
    %c0_30 = arith.constant 0 : index
    %c0_31 = arith.constant 0 : index
    %c0_32 = arith.constant 0 : index
    %12 = vector.load %arg1[%c0_27, %c1_28, %c0_29, %c0_30, %c0_31, %c0_32] : memref<1x2x2x5x5x16xbf16, #tpu.memory_space<vmem>>, vector<1x1x1x1x3x16xbf16>
    %13 = vector.shape_cast %12 : vector<1x1x1x1x3x16xbf16> to vector<3x16xbf16>
    %c0_33 = arith.constant 0 : index
    %c1_34 = arith.constant 1 : index
    %c1_35 = arith.constant 1 : index
    %c0_36 = arith.constant 0 : index
    %c0_37 = arith.constant 0 : index
    %c0_38 = arith.constant 0 : index
    %14 = vector.load %arg1[%c0_33, %c1_34, %c1_35, %c0_36, %c0_37, %c0_38] : memref<1x2x2x5x5x16xbf16, #tpu.memory_space<vmem>>, vector<1x1x1x1x3x16xbf16>
    %15 = vector.shape_cast %14 : vector<1x1x1x1x3x16xbf16> to vector<3x16xbf16>
    %c0_39 = arith.constant 0 : index
    %c1_40 = arith.constant 1 : index
    %c0_41 = arith.constant 0 : index
    %c0_42 = arith.constant 0 : index
    %c1_43 = arith.constant 1 : index
    %c0_44 = arith.constant 0 : index
    %16 = vector.load %arg1[%c0_39, %c1_40, %c0_41, %c0_42, %c1_43, %c0_44] : memref<1x2x2x5x5x16xbf16, #tpu.memory_space<vmem>>, vector<1x1x1x1x3x16xbf16>
    %17 = vector.shape_cast %16 : vector<1x1x1x1x3x16xbf16> to vector<3x16xbf16>
    %c0_45 = arith.constant 0 : index
    %c1_46 = arith.constant 1 : index
    %c1_47 = arith.constant 1 : index
    %c0_48 = arith.constant 0 : index
    %c1_49 = arith.constant 1 : index
    %c0_50 = arith.constant 0 : index
    %18 = vector.load %arg1[%c0_45, %c1_46, %c1_47, %c0_48, %c1_49, %c0_50] : memref<1x2x2x5x5x16xbf16, #tpu.memory_space<vmem>>, vector<1x1x1x1x3x16xbf16>
    %19 = vector.shape_cast %18 : vector<1x1x1x1x3x16xbf16> to vector<3x16xbf16>
    %c0_51 = arith.constant 0 : index
    %c0_52 = arith.constant 0 : index
    %c0_53 = arith.constant 0 : index
    %c1_54 = arith.constant 1 : index
    %c0_55 = arith.constant 0 : index
    %c0_56 = arith.constant 0 : index
    %20 = vector.load %arg1[%c0_51, %c0_52, %c0_53, %c1_54, %c0_55, %c0_56] : memref<1x2x2x5x5x16xbf16, #tpu.memory_space<vmem>>, vector<1x1x1x1x3x16xbf16>
    %21 = vector.shape_cast %20 : vector<1x1x1x1x3x16xbf16> to vector<3x16xbf16>
    %c0_57 = arith.constant 0 : index
    %c0_58 = arith.constant 0 : index
    %c1_59 = arith.constant 1 : index
    %c1_60 = arith.constant 1 : index
    %c0_61 = arith.constant 0 : index
    %c0_62 = arith.constant 0 : index
    %22 = vector.load %arg1[%c0_57, %c0_58, %c1_59, %c1_60, %c0_61, %c0_62] : memref<1x2x2x5x5x16xbf16, #tpu.memory_space<vmem>>, vector<1x1x1x1x3x16xbf16>
    %23 = vector.shape_cast %22 : vector<1x1x1x1x3x16xbf16> to vector<3x16xbf16>
    %c0_63 = arith.constant 0 : index
    %c0_64 = arith.constant 0 : index
    %c0_65 = arith.constant 0 : index
    %c1_66 = arith.constant 1 : index
    %c1_67 = arith.constant 1 : index
    %c0_68 = arith.constant 0 : index
    %24 = vector.load %arg1[%c0_63, %c0_64, %c0_65, %c1_66, %c1_67, %c0_68] : memref<1x2x2x5x5x16xbf16, #tpu.memory_space<vmem>>, vector<1x1x1x1x3x16xbf16>
    %25 = vector.shape_cast %24 : vector<1x1x1x1x3x16xbf16> to vector<3x16xbf16>
    %c0_69 = arith.constant 0 : index
    %c0_70 = arith.constant 0 : index
    %c1_71 = arith.constant 1 : index
    %c1_72 = arith.constant 1 : index
    %c1_73 = arith.constant 1 : index
    %c0_74 = arith.constant 0 : index
    %26 = vector.load %arg1[%c0_69, %c0_70, %c1_71, %c1_72, %c1_73, %c0_74] : memref<1x2x2x5x5x16xbf16, #tpu.memory_space<vmem>>, vector<1x1x1x1x3x16xbf16>
    %27 = vector.shape_cast %26 : vector<1x1x1x1x3x16xbf16> to vector<3x16xbf16>
    %c0_75 = arith.constant 0 : index
    %c1_76 = arith.constant 1 : index
    %c0_77 = arith.constant 0 : index
    %c1_78 = arith.constant 1 : index
    %c0_79 = arith.constant 0 : index
    %c0_80 = arith.constant 0 : index
    %28 = vector.load %arg1[%c0_75, %c1_76, %c0_77, %c1_78, %c0_79, %c0_80] : memref<1x2x2x5x5x16xbf16, #tpu.memory_space<vmem>>, vector<1x1x1x1x3x16xbf16>
    %29 = vector.shape_cast %28 : vector<1x1x1x1x3x16xbf16> to vector<3x16xbf16>
    %c0_81 = arith.constant 0 : index
    %c1_82 = arith.constant 1 : index
    %c1_83 = arith.constant 1 : index
    %c1_84 = arith.constant 1 : index
    %c0_85 = arith.constant 0 : index
    %c0_86 = arith.constant 0 : index
    %30 = vector.load %arg1[%c0_81, %c1_82, %c1_83, %c1_84, %c0_85, %c0_86] : memref<1x2x2x5x5x16xbf16, #tpu.memory_space<vmem>>, vector<1x1x1x1x3x16xbf16>
    %31 = vector.shape_cast %30 : vector<1x1x1x1x3x16xbf16> to vector<3x16xbf16>
    %c0_87 = arith.constant 0 : index
    %c1_88 = arith.constant 1 : index
    %c0_89 = arith.constant 0 : index
    %c1_90 = arith.constant 1 : index
    %c1_91 = arith.constant 1 : index
    %c0_92 = arith.constant 0 : index
    %32 = vector.load %arg1[%c0_87, %c1_88, %c0_89, %c1_90, %c1_91, %c0_92] : memref<1x2x2x5x5x16xbf16, #tpu.memory_space<vmem>>, vector<1x1x1x1x3x16xbf16>
    %33 = vector.shape_cast %32 : vector<1x1x1x1x3x16xbf16> to vector<3x16xbf16>
    %c0_93 = arith.constant 0 : index
    %c1_94 = arith.constant 1 : index
    %c1_95 = arith.constant 1 : index
    %c1_96 = arith.constant 1 : index
    %c1_97 = arith.constant 1 : index
    %c0_98 = arith.constant 0 : index
    %34 = vector.load %arg1[%c0_93, %c1_94, %c1_95, %c1_96, %c1_97, %c0_98] : memref<1x2x2x5x5x16xbf16, #tpu.memory_space<vmem>>, vector<1x1x1x1x3x16xbf16>
    %35 = vector.shape_cast %34 : vector<1x1x1x1x3x16xbf16> to vector<3x16xbf16>
    %36 = tpu.concatenate %5, %7, %9, %11, %13, %15, %17, %19, %21, %23, %25, %27, %29, %31, %33, %35 in 1 : vector<3x16xbf16>, vector<3x16xbf16>, vector<3x16xbf16>, vector<3x16xbf16>, vector<3x16xbf16>, vector<3x16xbf16>, vector<3x16xbf16>, vector<3x16xbf16>, vector<3x16xbf16>, vector<3x16xbf16>, vector<3x16xbf16>, vector<3x16xbf16>, vector<3x16xbf16>, vector<3x16xbf16>, vector<3x16xbf16>, vector<3x16xbf16> -> vector<3x256xbf16>
    %cst_99 = arith.constant dense<0.000000e+00> : vector<3x32xf32>
    %37 = tpu.matmul %36, %0, %cst_99 {dimension_numbers = #tpu.dot_dimension_numbers<[1], [0], [0], [1], [0, 0, 1, 1], [], []>} : vector<3x256xbf16>, vector<256x32xbf16>, vector<3x32xf32> -> vector<3x32xf32>
    %38 = vector.broadcast %1 : vector<1x32xf32> to vector<3x32xf32>
    %39 = arith.addf %37, %38 : vector<3x32xf32>
    %cst_100 = arith.constant dense<0.000000e+00> : vector<32xf32>
    %40 = vector.multi_reduction <add>, %39, %cst_100 [0] : vector<3x32xf32> to vector<32xf32>
    %41 = vector.shape_cast %40 : vector<32xf32> to vector<1x32xf32>
    %42 = arith.addf %2, %41 : vector<1x32xf32>
    %43 = arith.mulf %39, %39 : vector<3x32xf32>
    %cst_101 = arith.constant dense<0.000000e+00> : vector<32xf32>
    %44 = vector.multi_reduction <add>, %43, %cst_101 [0] : vector<3x32xf32> to vector<32xf32>
    %45 = vector.shape_cast %44 : vector<32xf32> to vector<1x32xf32>
    %46 = arith.addf %3, %45 : vector<1x32xf32>
    %47 = arith.truncf %39 : vector<3x32xf32> to vector<3x32xbf16>
    %c0_102 = arith.constant 0 : index
    %c0_103 = arith.constant 0 : index
    %c0_104 = arith.constant 0 : index
    %c0_105 = arith.constant 0 : index
    %48 = vector.load %arg4[%c0_102, %c0_103, %c0_104, %c0_105] : memref<1x3x3x32xbf16, #tpu.memory_space<vmem>>, vector<1x1x3x32xbf16>
    %49 = vector.shape_cast %48 : vector<1x1x3x32xbf16> to vector<3x32xbf16>
    %50 = vector.shape_cast %47 : vector<3x32xbf16> to vector<1x1x3x32xbf16>
    tpu.vector_store %arg4[%c0_102, %c0_103, %c0_104, %c0_105], %50 {strides = array<i32>} : memref<1x3x3x32xbf16, #tpu.memory_space<vmem>>, vector<1x1x3x32xbf16>,
    %c0_106 = arith.constant 0 : index
    %c0_107 = arith.constant 0 : index
    %c0_108 = arith.constant 0 : index
    %c1_109 = arith.constant 1 : index
    %c0_110 = arith.constant 0 : index
    %c0_111 = arith.constant 0 : index
    %51 = vector.load %arg1[%c0_106, %c0_107, %c0_108, %c1_109, %c0_110, %c0_111] : memref<1x2x2x5x5x16xbf16, #tpu.memory_space<vmem>>, vector<1x1x1x1x3x16xbf16>
    %52 = vector.shape_cast %51 : vector<1x1x1x1x3x16xbf16> to vector<3x16xbf16>
    %c0_112 = arith.constant 0 : index
    %c0_113 = arith.constant 0 : index
    %c1_114 = arith.constant 1 : index
    %c1_115 = arith.constant 1 : index
    %c0_116 = arith.constant 0 : index
    %c0_117 = arith.constant 0 : index
    %53 = vector.load %arg1[%c0_112, %c0_113, %c1_114, %c1_115, %c0_116, %c0_117] : memref<1x2x2x5x5x16xbf16, #tpu.memory_space<vmem>>, vector<1x1x1x1x3x16xbf16>
    %54 = vector.shape_cast %53 : vector<1x1x1x1x3x16xbf16> to vector<3x16xbf16>
    %c0_118 = arith.constant 0 : index
    %c0_119 = arith.constant 0 : index
    %c0_120 = arith.constant 0 : index
    %c1_121 = arith.constant 1 : index
    %c1_122 = arith.constant 1 : index
    %c0_123 = arith.constant 0 : index
    %55 = vector.load %arg1[%c0_118, %c0_119, %c0_120, %c1_121, %c1_122, %c0_123] : memref<1x2x2x5x5x16xbf16, #tpu.memory_space<vmem>>, vector<1x1x1x1x3x16xbf16>
    %56 = vector.shape_cast %55 : vector<1x1x1x1x3x16xbf16> to vector<3x16xbf16>
    %c0_124 = arith.constant 0 : index
    %c0_125 = arith.constant 0 : index
    %c1_126 = arith.constant 1 : index
    %c1_127 = arith.constant 1 : index
    %c1_128 = arith.constant 1 : index
    %c0_129 = arith.constant 0 : index
    %57 = vector.load %arg1[%c0_124, %c0_125, %c1_126, %c1_127, %c1_128, %c0_129] : memref<1x2x2x5x5x16xbf16, #tpu.memory_space<vmem>>, vector<1x1x1x1x3x16xbf16>
    %58 = vector.shape_cast %57 : vector<1x1x1x1x3x16xbf16> to vector<3x16xbf16>
    %c0_130 = arith.constant 0 : index
    %c1_131 = arith.constant 1 : index
    %c0_132 = arith.constant 0 : index
    %c1_133 = arith.constant 1 : index
    %c0_134 = arith.constant 0 : index
    %c0_135 = arith.constant 0 : index
    %59 = vector.load %arg1[%c0_130, %c1_131, %c0_132, %c1_133, %c0_134, %c0_135] : memref<1x2x2x5x5x16xbf16, #tpu.memory_space<vmem>>, vector<1x1x1x1x3x16xbf16>
    %60 = vector.shape_cast %59 : vector<1x1x1x1x3x16xbf16> to vector<3x16xbf16>
    %c0_136 = arith.constant 0 : index
    %c1_137 = arith.constant 1 : index
    %c1_138 = arith.constant 1 : index
    %c1_139 = arith.constant 1 : index
    %c0_140 = arith.constant 0 : index
    %c0_141 = arith.constant 0 : index
    %61 = vector.load %arg1[%c0_136, %c1_137, %c1_138, %c1_139, %c0_140, %c0_141] : memref<1x2x2x5x5x16xbf16, #tpu.memory_space<vmem>>, vector<1x1x1x1x3x16xbf16>
    %62 = vector.shape_cast %61 : vector<1x1x1x1x3x16xbf16> to vector<3x16xbf16>
    %c0_142 = arith.constant 0 : index
    %c1_143 = arith.constant 1 : index
    %c0_144 = arith.constant 0 : index
    %c1_145 = arith.constant 1 : index
    %c1_146 = arith.constant 1 : index
    %c0_147 = arith.constant 0 : index
    %63 = vector.load %arg1[%c0_142, %c1_143, %c0_144, %c1_145, %c1_146, %c0_147] : memref<1x2x2x5x5x16xbf16, #tpu.memory_space<vmem>>, vector<1x1x1x1x3x16xbf16>
    %64 = vector.shape_cast %63 : vector<1x1x1x1x3x16xbf16> to vector<3x16xbf16>
    %c0_148 = arith.constant 0 : index
    %c1_149 = arith.constant 1 : index
    %c1_150 = arith.constant 1 : index
    %c1_151 = arith.constant 1 : index
    %c1_152 = arith.constant 1 : index
    %c0_153 = arith.constant 0 : index
    %65 = vector.load %arg1[%c0_148, %c1_149, %c1_150, %c1_151, %c1_152, %c0_153] : memref<1x2x2x5x5x16xbf16, #tpu.memory_space<vmem>>, vector<1x1x1x1x3x16xbf16>
    %66 = vector.shape_cast %65 : vector<1x1x1x1x3x16xbf16> to vector<3x16xbf16>
    %c0_154 = arith.constant 0 : index
    %c0_155 = arith.constant 0 : index
    %c0_156 = arith.constant 0 : index
    %c2 = arith.constant 2 : index
    %c0_157 = arith.constant 0 : index
    %c0_158 = arith.constant 0 : index
    %67 = vector.load %arg1[%c0_154, %c0_155, %c0_156, %c2, %c0_157, %c0_158] : memref<1x2x2x5x5x16xbf16, #tpu.memory_space<vmem>>, vector<1x1x1x1x3x16xbf16>
    %68 = vector.shape_cast %67 : vector<1x1x1x1x3x16xbf16> to vector<3x16xbf16>
    %c0_159 = arith.constant 0 : index
    %c0_160 = arith.constant 0 : index
    %c1_161 = arith.constant 1 : index
    %c2_162 = arith.constant 2 : index
    %c0_163 = arith.constant 0 : index
    %c0_164 = arith.constant 0 : index
    %69 = vector.load %arg1[%c0_159, %c0_160, %c1_161, %c2_162, %c0_163, %c0_164] : memref<1x2x2x5x5x16xbf16, #tpu.memory_space<vmem>>, vector<1x1x1x1x3x16xbf16>
    %70 = vector.shape_cast %69 : vector<1x1x1x1x3x16xbf16> to vector<3x16xbf16>
    %c0_165 = arith.constant 0 : index
    %c0_166 = arith.constant 0 : index
    %c0_167 = arith.constant 0 : index
    %c2_168 = arith.constant 2 : index
    %c1_169 = arith.constant 1 : index
    %c0_170 = arith.constant 0 : index
    %71 = vector.load %arg1[%c0_165, %c0_166, %c0_167, %c2_168, %c1_169, %c0_170] : memref<1x2x2x5x5x16xbf16, #tpu.memory_space<vmem>>, vector<1x1x1x1x3x16xbf16>
    %72 = vector.shape_cast %71 : vector<1x1x1x1x3x16xbf16> to vector<3x16xbf16>
    %c0_171 = arith.constant 0 : index
    %c0_172 = arith.constant 0 : index
    %c1_173 = arith.constant 1 : index
    %c2_174 = arith.constant 2 : index
    %c1_175 = arith.constant 1 : index
    %c0_176 = arith.constant 0 : index
    %73 = vector.load %arg1[%c0_171, %c0_172, %c1_173, %c2_174, %c1_175, %c0_176] : memref<1x2x2x5x5x16xbf16, #tpu.memory_space<vmem>>, vector<1x1x1x1x3x16xbf16>
    %74 = vector.shape_cast %73 : vector<1x1x1x1x3x16xbf16> to vector<3x16xbf16>
    %c0_177 = arith.constant 0 : index
    %c1_178 = arith.constant 1 : index
    %c0_179 = arith.constant 0 : index
    %c2_180 = arith.constant 2 : index
    %c0_181 = arith.constant 0 : index
    %c0_182 = arith.constant 0 : index
    %75 = vector.load %arg1[%c0_177, %c1_178, %c0_179, %c2_180, %c0_181, %c0_182] : memref<1x2x2x5x5x16xbf16, #tpu.memory_space<vmem>>, vector<1x1x1x1x3x16xbf16>
    %76 = vector.shape_cast %75 : vector<1x1x1x1x3x16xbf16> to vector<3x16xbf16>
    %c0_183 = arith.constant 0 : index
    %c1_184 = arith.constant 1 : index
    %c1_185 = arith.constant 1 : index
    %c2_186 = arith.constant 2 : index
    %c0_187 = arith.constant 0 : index
    %c0_188 = arith.constant 0 : index
    %77 = vector.load %arg1[%c0_183, %c1_184, %c1_185, %c2_186, %c0_187, %c0_188] : memref<1x2x2x5x5x16xbf16, #tpu.memory_space<vmem>>, vector<1x1x1x1x3x16xbf16>
    %78 = vector.shape_cast %77 : vector<1x1x1x1x3x16xbf16> to vector<3x16xbf16>
    %c0_189 = arith.constant 0 : index
    %c1_190 = arith.constant 1 : index
    %c0_191 = arith.constant 0 : index
    %c2_192 = arith.constant 2 : index
    %c1_193 = arith.constant 1 : index
    %c0_194 = arith.constant 0 : index
    %79 = vector.load %arg1[%c0_189, %c1_190, %c0_191, %c2_192, %c1_193, %c0_194] : memref<1x2x2x5x5x16xbf16, #tpu.memory_space<vmem>>, vector<1x1x1x1x3x16xbf16>
    %80 = vector.shape_cast %79 : vector<1x1x1x1x3x16xbf16> to vector<3x16xbf16>
    %c0_195 = arith.constant 0 : index
    %c1_196 = arith.constant 1 : index
    %c1_197 = arith.constant 1 : index
    %c2_198 = arith.constant 2 : index
    %c1_199 = arith.constant 1 : index
    %c0_200 = arith.constant 0 : index
    %81 = vector.load %arg1[%c0_195, %c1_196, %c1_197, %c2_198, %c1_199, %c0_200] : memref<1x2x2x5x5x16xbf16, #tpu.memory_space<vmem>>, vector<1x1x1x1x3x16xbf16>
    %82 = vector.shape_cast %81 : vector<1x1x1x1x3x16xbf16> to vector<3x16xbf16>
    %83 = tpu.concatenate %52, %54, %56, %58, %60, %62, %64, %66, %68, %70, %72, %74, %76, %78, %80, %82 in 1 : vector<3x16xbf16>, vector<3x16xbf16>, vector<3x16xbf16>, vector<3x16xbf16>, vector<3x16xbf16>, vector<3x16xbf16>, vector<3x16xbf16>, vector<3x16xbf16>, vector<3x16xbf16>, vector<3x16xbf16>, vector<3x16xbf16>, vector<3x16xbf16>, vector<3x16xbf16>, vector<3x16xbf16>, vector<3x16xbf16>, vector<3x16xbf16> -> vector<3x256xbf16>
    %cst_201 = arith.constant dense<0.000000e+00> : vector<3x32xf32>
    %84 = tpu.matmul %83, %0, %cst_201 {dimension_numbers = #tpu.dot_dimension_numbers<[1], [0], [0], [1], [0, 0, 1, 1], [], []>} : vector<3x256xbf16>, vector<256x32xbf16>, vector<3x32xf32> -> vector<3x32xf32>
    %85 = vector.broadcast %1 : vector<1x32xf32> to vector<3x32xf32>
    %86 = arith.addf %84, %85 : vector<3x32xf32>
    %cst_202 = arith.constant dense<0.000000e+00> : vector<32xf32>
    %87 = vector.multi_reduction <add>, %86, %cst_202 [0] : vector<3x32xf32> to vector<32xf32>
    %88 = vector.shape_cast %87 : vector<32xf32> to vector<1x32xf32>
    %89 = arith.addf %42, %88 : vector<1x32xf32>
    %90 = arith.mulf %86, %86 : vector<3x32xf32>
    %cst_203 = arith.constant dense<0.000000e+00> : vector<32xf32>
    %91 = vector.multi_reduction <add>, %90, %cst_203 [0] : vector<3x32xf32> to vector<32xf32>
    %92 = vector.shape_cast %91 : vector<32xf32> to vector<1x32xf32>
    %93 = arith.addf %46, %92 : vector<1x32xf32>
    %94 = arith.truncf %86 : vector<3x32xf32> to vector<3x32xbf16>
    %c0_204 = arith.constant 0 : index
    %c1_205 = arith.constant 1 : index
    %c0_206 = arith.constant 0 : index
    %c0_207 = arith.constant 0 : index
    %95 = vector.load %arg4[%c0_204, %c1_205, %c0_206, %c0_207] : memref<1x3x3x32xbf16, #tpu.memory_space<vmem>>, vector<1x1x3x32xbf16>
    %96 = vector.shape_cast %95 : vector<1x1x3x32xbf16> to vector<3x32xbf16>
    %97 = vector.shape_cast %94 : vector<3x32xbf16> to vector<1x1x3x32xbf16>
    tpu.vector_store %arg4[%c0_204, %c1_205, %c0_206, %c0_207], %97 {strides = array<i32>} : memref<1x3x3x32xbf16, #tpu.memory_space<vmem>>, vector<1x1x3x32xbf16>,
    %c0_208 = arith.constant 0 : index
    %c0_209 = arith.constant 0 : index
    %c0_210 = arith.constant 0 : index
    %c2_211 = arith.constant 2 : index
    %c0_212 = arith.constant 0 : index
    %c0_213 = arith.constant 0 : index
    %98 = vector.load %arg1[%c0_208, %c0_209, %c0_210, %c2_211, %c0_212, %c0_213] : memref<1x2x2x5x5x16xbf16, #tpu.memory_space<vmem>>, vector<1x1x1x1x3x16xbf16>
    %99 = vector.shape_cast %98 : vector<1x1x1x1x3x16xbf16> to vector<3x16xbf16>
    %c0_214 = arith.constant 0 : index
    %c0_215 = arith.constant 0 : index
    %c1_216 = arith.constant 1 : index
    %c2_217 = arith.constant 2 : index
    %c0_218 = arith.constant 0 : index
    %c0_219 = arith.constant 0 : index
    %100 = vector.load %arg1[%c0_214, %c0_215, %c1_216, %c2_217, %c0_218, %c0_219] : memref<1x2x2x5x5x16xbf16, #tpu.memory_space<vmem>>, vector<1x1x1x1x3x16xbf16>
    %101 = vector.shape_cast %100 : vector<1x1x1x1x3x16xbf16> to vector<3x16xbf16>
    %c0_220 = arith.constant 0 : index
    %c0_221 = arith.constant 0 : index
    %c0_222 = arith.constant 0 : index
    %c2_223 = arith.constant 2 : index
    %c1_224 = arith.constant 1 : index
    %c0_225 = arith.constant 0 : index
    %102 = vector.load %arg1[%c0_220, %c0_221, %c0_222, %c2_223, %c1_224, %c0_225] : memref<1x2x2x5x5x16xbf16, #tpu.memory_space<vmem>>, vector<1x1x1x1x3x16xbf16>
    %103 = vector.shape_cast %102 : vector<1x1x1x1x3x16xbf16> to vector<3x16xbf16>
    %c0_226 = arith.constant 0 : index
    %c0_227 = arith.constant 0 : index
    %c1_228 = arith.constant 1 : index
    %c2_229 = arith.constant 2 : index
    %c1_230 = arith.constant 1 : index
    %c0_231 = arith.constant 0 : index
    %104 = vector.load %arg1[%c0_226, %c0_227, %c1_228, %c2_229, %c1_230, %c0_231] : memref<1x2x2x5x5x16xbf16, #tpu.memory_space<vmem>>, vector<1x1x1x1x3x16xbf16>
    %105 = vector.shape_cast %104 : vector<1x1x1x1x3x16xbf16> to vector<3x16xbf16>
    %c0_232 = arith.constant 0 : index
    %c1_233 = arith.constant 1 : index
    %c0_234 = arith.constant 0 : index
    %c2_235 = arith.constant 2 : index
    %c0_236 = arith.constant 0 : index
    %c0_237 = arith.constant 0 : index
    %106 = vector.load %arg1[%c0_232, %c1_233, %c0_234, %c2_235, %c0_236, %c0_237] : memref<1x2x2x5x5x16xbf16, #tpu.memory_space<vmem>>, vector<1x1x1x1x3x16xbf16>
    %107 = vector.shape_cast %106 : vector<1x1x1x1x3x16xbf16> to vector<3x16xbf16>
    %c0_238 = arith.constant 0 : index
    %c1_239 = arith.constant 1 : index
    %c1_240 = arith.constant 1 : index
    %c2_241 = arith.constant 2 : index
    %c0_242 = arith.constant 0 : index
    %c0_243 = arith.constant 0 : index
    %108 = vector.load %arg1[%c0_238, %c1_239, %c1_240, %c2_241, %c0_242, %c0_243] : memref<1x2x2x5x5x16xbf16, #tpu.memory_space<vmem>>, vector<1x1x1x1x3x16xbf16>
    %109 = vector.shape_cast %108 : vector<1x1x1x1x3x16xbf16> to vector<3x16xbf16>
    %c0_244 = arith.constant 0 : index
    %c1_245 = arith.constant 1 : index
    %c0_246 = arith.constant 0 : index
    %c2_247 = arith.constant 2 : index
    %c1_248 = arith.constant 1 : index
    %c0_249 = arith.constant 0 : index
    %110 = vector.load %arg1[%c0_244, %c1_245, %c0_246, %c2_247, %c1_248, %c0_249] : memref<1x2x2x5x5x16xbf16, #tpu.memory_space<vmem>>, vector<1x1x1x1x3x16xbf16>
    %111 = vector.shape_cast %110 : vector<1x1x1x1x3x16xbf16> to vector<3x16xbf16>
    %c0_250 = arith.constant 0 : index
    %c1_251 = arith.constant 1 : index
    %c1_252 = arith.constant 1 : index
    %c2_253 = arith.constant 2 : index
    %c1_254 = arith.constant 1 : index
    %c0_255 = arith.constant 0 : index
    %112 = vector.load %arg1[%c0_250, %c1_251, %c1_252, %c2_253, %c1_254, %c0_255] : memref<1x2x2x5x5x16xbf16, #tpu.memory_space<vmem>>, vector<1x1x1x1x3x16xbf16>
    %113 = vector.shape_cast %112 : vector<1x1x1x1x3x16xbf16> to vector<3x16xbf16>
    %c0_256 = arith.constant 0 : index
    %c0_257 = arith.constant 0 : index
    %c0_258 = arith.constant 0 : index
    %c3 = arith.constant 3 : index
    %c0_259 = arith.constant 0 : index
    %c0_260 = arith.constant 0 : index
    %114 = vector.load %arg1[%c0_256, %c0_257, %c0_258, %c3, %c0_259, %c0_260] : memref<1x2x2x5x5x16xbf16, #tpu.memory_space<vmem>>, vector<1x1x1x1x3x16xbf16>
    %115 = vector.shape_cast %114 : vector<1x1x1x1x3x16xbf16> to vector<3x16xbf16>
    %c0_261 = arith.constant 0 : index
    %c0_262 = arith.constant 0 : index
    %c1_263 = arith.constant 1 : index
    %c3_264 = arith.constant 3 : index
    %c0_265 = arith.constant 0 : index
    %c0_266 = arith.constant 0 : index
    %116 = vector.load %arg1[%c0_261, %c0_262, %c1_263, %c3_264, %c0_265, %c0_266] : memref<1x2x2x5x5x16xbf16, #tpu.memory_space<vmem>>, vector<1x1x1x1x3x16xbf16>
    %117 = vector.shape_cast %116 : vector<1x1x1x1x3x16xbf16> to vector<3x16xbf16>
    %c0_267 = arith.constant 0 : index
    %c0_268 = arith.constant 0 : index
    %c0_269 = arith.constant 0 : index
    %c3_270 = arith.constant 3 : index
    %c1_271 = arith.constant 1 : index
    %c0_272 = arith.constant 0 : index
    %118 = vector.load %arg1[%c0_267, %c0_268, %c0_269, %c3_270, %c1_271, %c0_272] : memref<1x2x2x5x5x16xbf16, #tpu.memory_space<vmem>>, vector<1x1x1x1x3x16xbf16>
    %119 = vector.shape_cast %118 : vector<1x1x1x1x3x16xbf16> to vector<3x16xbf16>
    %c0_273 = arith.constant 0 : index
    %c0_274 = arith.constant 0 : index
    %c1_275 = arith.constant 1 : index
    %c3_276 = arith.constant 3 : index
    %c1_277 = arith.constant 1 : index
    %c0_278 = arith.constant 0 : index
    %120 = vector.load %arg1[%c0_273, %c0_274, %c1_275, %c3_276, %c1_277, %c0_278] : memref<1x2x2x5x5x16xbf16, #tpu.memory_space<vmem>>, vector<1x1x1x1x3x16xbf16>
    %121 = vector.shape_cast %120 : vector<1x1x1x1x3x16xbf16> to vector<3x16xbf16>
    %c0_279 = arith.constant 0 : index
    %c1_280 = arith.constant 1 : index
    %c0_281 = arith.constant 0 : index
    %c3_282 = arith.constant 3 : index
    %c0_283 = arith.constant 0 : index
    %c0_284 = arith.constant 0 : index
    %122 = vector.load %arg1[%c0_279, %c1_280, %c0_281, %c3_282, %c0_283, %c0_284] : memref<1x2x2x5x5x16xbf16, #tpu.memory_space<vmem>>, vector<1x1x1x1x3x16xbf16>
    %123 = vector.shape_cast %122 : vector<1x1x1x1x3x16xbf16> to vector<3x16xbf16>
    %c0_285 = arith.constant 0 : index
    %c1_286 = arith.constant 1 : index
    %c1_287 = arith.constant 1 : index
    %c3_288 = arith.constant 3 : index
    %c0_289 = arith.constant 0 : index
    %c0_290 = arith.constant 0 : index
    %124 = vector.load %arg1[%c0_285, %c1_286, %c1_287, %c3_288, %c0_289, %c0_290] : memref<1x2x2x5x5x16xbf16, #tpu.memory_space<vmem>>, vector<1x1x1x1x3x16xbf16>
    %125 = vector.shape_cast %124 : vector<1x1x1x1x3x16xbf16> to vector<3x16xbf16>
    %c0_291 = arith.constant 0 : index
    %c1_292 = arith.constant 1 : index
    %c0_293 = arith.constant 0 : index
    %c3_294 = arith.constant 3 : index
    %c1_295 = arith.constant 1 : index
    %c0_296 = arith.constant 0 : index
    %126 = vector.load %arg1[%c0_291, %c1_292, %c0_293, %c3_294, %c1_295, %c0_296] : memref<1x2x2x5x5x16xbf16, #tpu.memory_space<vmem>>, vector<1x1x1x1x3x16xbf16>
    %127 = vector.shape_cast %126 : vector<1x1x1x1x3x16xbf16> to vector<3x16xbf16>
    %c0_297 = arith.constant 0 : index
    %c1_298 = arith.constant 1 : index
    %c1_299 = arith.constant 1 : index
    %c3_300 = arith.constant 3 : index
    %c1_301 = arith.constant 1 : index
    %c0_302 = arith.constant 0 : index
    %128 = vector.load %arg1[%c0_297, %c1_298, %c1_299, %c3_300, %c1_301, %c0_302] : memref<1x2x2x5x5x16xbf16, #tpu.memory_space<vmem>>, vector<1x1x1x1x3x16xbf16>
    %129 = vector.shape_cast %128 : vector<1x1x1x1x3x16xbf16> to vector<3x16xbf16>
    %130 = tpu.concatenate %99, %101, %103, %105, %107, %109, %111, %113, %115, %117, %119, %121, %123, %125, %127, %129 in 1 : vector<3x16xbf16>, vector<3x16xbf16>, vector<3x16xbf16>, vector<3x16xbf16>, vector<3x16xbf16>, vector<3x16xbf16>, vector<3x16xbf16>, vector<3x16xbf16>, vector<3x16xbf16>, vector<3x16xbf16>, vector<3x16xbf16>, vector<3x16xbf16>, vector<3x16xbf16>, vector<3x16xbf16>, vector<3x16xbf16>, vector<3x16xbf16> -> vector<3x256xbf16>
    %cst_303 = arith.constant dense<0.000000e+00> : vector<3x32xf32>
    %131 = tpu.matmul %130, %0, %cst_303 {dimension_numbers = #tpu.dot_dimension_numbers<[1], [0], [0], [1], [0, 0, 1, 1], [], []>} : vector<3x256xbf16>, vector<256x32xbf16>, vector<3x32xf32> -> vector<3x32xf32>
    %132 = vector.broadcast %1 : vector<1x32xf32> to vector<3x32xf32>
    %133 = arith.addf %131, %132 : vector<3x32xf32>
    %cst_304 = arith.constant dense<0.000000e+00> : vector<32xf32>
    %134 = vector.multi_reduction <add>, %133, %cst_304 [0] : vector<3x32xf32> to vector<32xf32>
    %135 = vector.shape_cast %134 : vector<32xf32> to vector<1x32xf32>
    %136 = arith.addf %89, %135 : vector<1x32xf32>
    %137 = arith.mulf %133, %133 : vector<3x32xf32>
    %cst_305 = arith.constant dense<0.000000e+00> : vector<32xf32>
    %138 = vector.multi_reduction <add>, %137, %cst_305 [0] : vector<3x32xf32> to vector<32xf32>
    %139 = vector.shape_cast %138 : vector<32xf32> to vector<1x32xf32>
    %140 = arith.addf %93, %139 : vector<1x32xf32>
    %141 = arith.truncf %133 : vector<3x32xf32> to vector<3x32xbf16>
    %c0_306 = arith.constant 0 : index
    %c2_307 = arith.constant 2 : index
    %c0_308 = arith.constant 0 : index
    %c0_309 = arith.constant 0 : index
    %142 = vector.load %arg4[%c0_306, %c2_307, %c0_308, %c0_309] : memref<1x3x3x32xbf16, #tpu.memory_space<vmem>>, vector<1x1x3x32xbf16>
    %143 = vector.shape_cast %142 : vector<1x1x3x32xbf16> to vector<3x32xbf16>
    %144 = vector.shape_cast %141 : vector<3x32xbf16> to vector<1x1x3x32xbf16>
    tpu.vector_store %arg4[%c0_306, %c2_307, %c0_308, %c0_309], %144 {strides = array<i32>} : memref<1x3x3x32xbf16, #tpu.memory_space<vmem>>, vector<1x1x3x32xbf16>,
    %145 = tpu.concatenate %136, %140 in 0 : vector<1x32xf32>, vector<1x32xf32> -> vector<2x32xf32>
    %c0_310 = arith.constant 0 : index
    %c0_311 = arith.constant 0 : index
    %c0_312 = arith.constant 0 : index
    %146 = vector.load %arg5[%c0_310, %c0_311, %c0_312] : memref<1x2x32xf32, #tpu.memory_space<vmem>>, vector<1x2x32xf32>
    %147 = vector.shape_cast %146 : vector<1x2x32xf32> to vector<2x32xf32>
    %148 = vector.shape_cast %145 : vector<2x32xf32> to vector<1x2x32xf32>
    tpu.vector_store %arg5[%c0_310, %c0_311, %c0_312], %148 {strides = array<i32>} : memref<1x2x32xf32, #tpu.memory_space<vmem>>, vector<1x2x32xf32>,
    return
  }
  func.func @transform_0(%arg0: i32) -> (i32, i32, i32, i32, i32, i32) {
    %c0_i32 = arith.constant 0 : i32
    %c0_i32_0 = arith.constant 0 : i32
    %c0_i32_1 = arith.constant 0 : i32
    %c0_i32_2 = arith.constant 0 : i32
    %c0_i32_3 = arith.constant 0 : i32
    %c0_i32_4 = arith.constant 0 : i32
    return %arg0, %c0_i32, %c0_i32_0, %c0_i32_1, %c0_i32_2, %c0_i32_3 : i32, i32, i32, i32, i32, i32
  }
  func.func @transform_1(%arg0: i32) -> (i32, i32) {
    %c0_i32 = arith.constant 0 : i32
    %c0_i32_0 = arith.constant 0 : i32
    %c0_i32_1 = arith.constant 0 : i32
    return %c0_i32, %c0_i32_0 : i32, i32
  }
  func.func @transform_2(%arg0: i32) -> (i32, i32) {
    %c0_i32 = arith.constant 0 : i32
    %c0_i32_0 = arith.constant 0 : i32
    %c0_i32_1 = arith.constant 0 : i32
    return %c0_i32, %c0_i32_0 : i32, i32
  }
  func.func @transform_3(%arg0: i32) -> (i32, i32, i32, i32) {
    %c0_i32 = arith.constant 0 : i32
    %c0_i32_0 = arith.constant 0 : i32
    %c0_i32_1 = arith.constant 0 : i32
    %c0_i32_2 = arith.constant 0 : i32
    return %arg0, %c0_i32, %c0_i32_0, %c0_i32_1 : i32, i32, i32, i32
  }
  func.func @transform_4(%arg0: i32) -> (i32, i32, i32) {
    %c0_i32 = arith.constant 0 : i32
    %c0_i32_0 = arith.constant 0 : i32
    %c0_i32_1 = arith.constant 0 : i32
    return %arg0, %c0_i32, %c0_i32_0 : i32, i32, i32
  }
}

module attributes {stable_mosaic.version = 11 : i64} {
  func.func @_conv_kernel(%arg0: i32, %arg1: memref<1x7x7x32xbf16, #tpu.memory_space<vmem>>, %arg2: memref<512x64xbf16, #tpu.memory_space<vmem>>, %arg3: memref<1x64xf32, #tpu.memory_space<vmem>>, %arg4: memref<1x4x4x64xbf16, #tpu.memory_space<vmem>>, %arg5: memref<1x2x64xf32, #tpu.memory_space<vmem>>) attributes {dimension_semantics = [#tpu.dimension_semantics<parallel>], iteration_bounds = array<i64: 2>, scalar_prefetch = 0 : i64, scratch_operands = 0 : i64, tpu.core_type = #tpu.core_type<tc>, window_params = [{transform_indices = @transform_0, window_bounds = array<i64: 1, 7, 7, 32>}, {pipeline_mode = #tpu.pipeline_mode<synchronous>, transform_indices = @transform_1, window_bounds = array<i64: 512, 64>}, {pipeline_mode = #tpu.pipeline_mode<synchronous>, transform_indices = @transform_2, window_bounds = array<i64: 1, 64>}, {transform_indices = @transform_3, window_bounds = array<i64: 1, 4, 4, 64>}, {transform_indices = @transform_4, window_bounds = array<i64: 1, 2, 64>}]} {
    %c0 = arith.constant 0 : index
    %c0_0 = arith.constant 0 : index
    %0 = vector.load %arg2[%c0, %c0_0] : memref<512x64xbf16, #tpu.memory_space<vmem>>, vector<512x64xbf16>
    %c0_1 = arith.constant 0 : index
    %c0_2 = arith.constant 0 : index
    %1 = vector.load %arg3[%c0_1, %c0_2] : memref<1x64xf32, #tpu.memory_space<vmem>>, vector<1x64xf32>
    %cst = arith.constant 0.000000e+00 : f32
    %2 = vector.broadcast %cst : f32 to vector<1x64xf32>
    %cst_3 = arith.constant 0.000000e+00 : f32
    %3 = vector.broadcast %cst_3 : f32 to vector<1x64xf32>
    %c0_4 = arith.constant 0 : index
    %c0_5 = arith.constant 0 : index
    %c0_6 = arith.constant 0 : index
    %c0_7 = arith.constant 0 : index
    %4 = vector.load %arg1[%c0_4, %c0_5, %c0_6, %c0_7] : memref<1x7x7x32xbf16, #tpu.memory_space<vmem>>, vector<1x1x4x32xbf16>
    %5 = vector.shape_cast %4 : vector<1x1x4x32xbf16> to vector<4x32xbf16>
    %c0_8 = arith.constant 0 : index
    %c0_9 = arith.constant 0 : index
    %c1 = arith.constant 1 : index
    %c0_10 = arith.constant 0 : index
    %6 = vector.load %arg1[%c0_8, %c0_9, %c1, %c0_10] : memref<1x7x7x32xbf16, #tpu.memory_space<vmem>>, vector<1x1x4x32xbf16>
    %7 = vector.shape_cast %6 : vector<1x1x4x32xbf16> to vector<4x32xbf16>
    %c0_11 = arith.constant 0 : index
    %c0_12 = arith.constant 0 : index
    %c2 = arith.constant 2 : index
    %c0_13 = arith.constant 0 : index
    %8 = vector.load %arg1[%c0_11, %c0_12, %c2, %c0_13] : memref<1x7x7x32xbf16, #tpu.memory_space<vmem>>, vector<1x1x4x32xbf16>
    %9 = vector.shape_cast %8 : vector<1x1x4x32xbf16> to vector<4x32xbf16>
    %c0_14 = arith.constant 0 : index
    %c0_15 = arith.constant 0 : index
    %c3 = arith.constant 3 : index
    %c0_16 = arith.constant 0 : index
    %10 = vector.load %arg1[%c0_14, %c0_15, %c3, %c0_16] : memref<1x7x7x32xbf16, #tpu.memory_space<vmem>>, vector<1x1x4x32xbf16>
    %11 = vector.shape_cast %10 : vector<1x1x4x32xbf16> to vector<4x32xbf16>
    %c0_17 = arith.constant 0 : index
    %c1_18 = arith.constant 1 : index
    %c0_19 = arith.constant 0 : index
    %c0_20 = arith.constant 0 : index
    %12 = vector.load %arg1[%c0_17, %c1_18, %c0_19, %c0_20] : memref<1x7x7x32xbf16, #tpu.memory_space<vmem>>, vector<1x1x4x32xbf16>
    %13 = vector.shape_cast %12 : vector<1x1x4x32xbf16> to vector<4x32xbf16>
    %c0_21 = arith.constant 0 : index
    %c1_22 = arith.constant 1 : index
    %c1_23 = arith.constant 1 : index
    %c0_24 = arith.constant 0 : index
    %14 = vector.load %arg1[%c0_21, %c1_22, %c1_23, %c0_24] : memref<1x7x7x32xbf16, #tpu.memory_space<vmem>>, vector<1x1x4x32xbf16>
    %15 = vector.shape_cast %14 : vector<1x1x4x32xbf16> to vector<4x32xbf16>
    %c0_25 = arith.constant 0 : index
    %c1_26 = arith.constant 1 : index
    %c2_27 = arith.constant 2 : index
    %c0_28 = arith.constant 0 : index
    %16 = vector.load %arg1[%c0_25, %c1_26, %c2_27, %c0_28] : memref<1x7x7x32xbf16, #tpu.memory_space<vmem>>, vector<1x1x4x32xbf16>
    %17 = vector.shape_cast %16 : vector<1x1x4x32xbf16> to vector<4x32xbf16>
    %c0_29 = arith.constant 0 : index
    %c1_30 = arith.constant 1 : index
    %c3_31 = arith.constant 3 : index
    %c0_32 = arith.constant 0 : index
    %18 = vector.load %arg1[%c0_29, %c1_30, %c3_31, %c0_32] : memref<1x7x7x32xbf16, #tpu.memory_space<vmem>>, vector<1x1x4x32xbf16>
    %19 = vector.shape_cast %18 : vector<1x1x4x32xbf16> to vector<4x32xbf16>
    %c0_33 = arith.constant 0 : index
    %c2_34 = arith.constant 2 : index
    %c0_35 = arith.constant 0 : index
    %c0_36 = arith.constant 0 : index
    %20 = vector.load %arg1[%c0_33, %c2_34, %c0_35, %c0_36] : memref<1x7x7x32xbf16, #tpu.memory_space<vmem>>, vector<1x1x4x32xbf16>
    %21 = vector.shape_cast %20 : vector<1x1x4x32xbf16> to vector<4x32xbf16>
    %c0_37 = arith.constant 0 : index
    %c2_38 = arith.constant 2 : index
    %c1_39 = arith.constant 1 : index
    %c0_40 = arith.constant 0 : index
    %22 = vector.load %arg1[%c0_37, %c2_38, %c1_39, %c0_40] : memref<1x7x7x32xbf16, #tpu.memory_space<vmem>>, vector<1x1x4x32xbf16>
    %23 = vector.shape_cast %22 : vector<1x1x4x32xbf16> to vector<4x32xbf16>
    %c0_41 = arith.constant 0 : index
    %c2_42 = arith.constant 2 : index
    %c2_43 = arith.constant 2 : index
    %c0_44 = arith.constant 0 : index
    %24 = vector.load %arg1[%c0_41, %c2_42, %c2_43, %c0_44] : memref<1x7x7x32xbf16, #tpu.memory_space<vmem>>, vector<1x1x4x32xbf16>
    %25 = vector.shape_cast %24 : vector<1x1x4x32xbf16> to vector<4x32xbf16>
    %c0_45 = arith.constant 0 : index
    %c2_46 = arith.constant 2 : index
    %c3_47 = arith.constant 3 : index
    %c0_48 = arith.constant 0 : index
    %26 = vector.load %arg1[%c0_45, %c2_46, %c3_47, %c0_48] : memref<1x7x7x32xbf16, #tpu.memory_space<vmem>>, vector<1x1x4x32xbf16>
    %27 = vector.shape_cast %26 : vector<1x1x4x32xbf16> to vector<4x32xbf16>
    %c0_49 = arith.constant 0 : index
    %c3_50 = arith.constant 3 : index
    %c0_51 = arith.constant 0 : index
    %c0_52 = arith.constant 0 : index
    %28 = vector.load %arg1[%c0_49, %c3_50, %c0_51, %c0_52] : memref<1x7x7x32xbf16, #tpu.memory_space<vmem>>, vector<1x1x4x32xbf16>
    %29 = vector.shape_cast %28 : vector<1x1x4x32xbf16> to vector<4x32xbf16>
    %c0_53 = arith.constant 0 : index
    %c3_54 = arith.constant 3 : index
    %c1_55 = arith.constant 1 : index
    %c0_56 = arith.constant 0 : index
    %30 = vector.load %arg1[%c0_53, %c3_54, %c1_55, %c0_56] : memref<1x7x7x32xbf16, #tpu.memory_space<vmem>>, vector<1x1x4x32xbf16>
    %31 = vector.shape_cast %30 : vector<1x1x4x32xbf16> to vector<4x32xbf16>
    %c0_57 = arith.constant 0 : index
    %c3_58 = arith.constant 3 : index
    %c2_59 = arith.constant 2 : index
    %c0_60 = arith.constant 0 : index
    %32 = vector.load %arg1[%c0_57, %c3_58, %c2_59, %c0_60] : memref<1x7x7x32xbf16, #tpu.memory_space<vmem>>, vector<1x1x4x32xbf16>
    %33 = vector.shape_cast %32 : vector<1x1x4x32xbf16> to vector<4x32xbf16>
    %c0_61 = arith.constant 0 : index
    %c3_62 = arith.constant 3 : index
    %c3_63 = arith.constant 3 : index
    %c0_64 = arith.constant 0 : index
    %34 = vector.load %arg1[%c0_61, %c3_62, %c3_63, %c0_64] : memref<1x7x7x32xbf16, #tpu.memory_space<vmem>>, vector<1x1x4x32xbf16>
    %35 = vector.shape_cast %34 : vector<1x1x4x32xbf16> to vector<4x32xbf16>
    %36 = tpu.concatenate %5, %7, %9, %11, %13, %15, %17, %19, %21, %23, %25, %27, %29, %31, %33, %35 in 1 : vector<4x32xbf16>, vector<4x32xbf16>, vector<4x32xbf16>, vector<4x32xbf16>, vector<4x32xbf16>, vector<4x32xbf16>, vector<4x32xbf16>, vector<4x32xbf16>, vector<4x32xbf16>, vector<4x32xbf16>, vector<4x32xbf16>, vector<4x32xbf16>, vector<4x32xbf16>, vector<4x32xbf16>, vector<4x32xbf16>, vector<4x32xbf16> -> vector<4x512xbf16>
    %cst_65 = arith.constant dense<0.000000e+00> : vector<4x64xf32>
    %37 = tpu.matmul %36, %0, %cst_65 {dimension_numbers = #tpu.dot_dimension_numbers<[1], [0], [0], [1], [0, 0, 1, 1], [], []>} : vector<4x512xbf16>, vector<512x64xbf16>, vector<4x64xf32> -> vector<4x64xf32>
    %38 = vector.broadcast %1 : vector<1x64xf32> to vector<4x64xf32>
    %39 = arith.addf %37, %38 : vector<4x64xf32>
    %cst_66 = arith.constant dense<0.000000e+00> : vector<64xf32>
    %40 = vector.multi_reduction <add>, %39, %cst_66 [0] : vector<4x64xf32> to vector<64xf32>
    %41 = vector.shape_cast %40 : vector<64xf32> to vector<1x64xf32>
    %42 = arith.addf %2, %41 : vector<1x64xf32>
    %43 = arith.mulf %39, %39 : vector<4x64xf32>
    %cst_67 = arith.constant dense<0.000000e+00> : vector<64xf32>
    %44 = vector.multi_reduction <add>, %43, %cst_67 [0] : vector<4x64xf32> to vector<64xf32>
    %45 = vector.shape_cast %44 : vector<64xf32> to vector<1x64xf32>
    %46 = arith.addf %3, %45 : vector<1x64xf32>
    %47 = arith.truncf %39 : vector<4x64xf32> to vector<4x64xbf16>
    %c0_68 = arith.constant 0 : index
    %c0_69 = arith.constant 0 : index
    %c0_70 = arith.constant 0 : index
    %c0_71 = arith.constant 0 : index
    %48 = vector.load %arg4[%c0_68, %c0_69, %c0_70, %c0_71] : memref<1x4x4x64xbf16, #tpu.memory_space<vmem>>, vector<1x1x4x64xbf16>
    %49 = vector.shape_cast %48 : vector<1x1x4x64xbf16> to vector<4x64xbf16>
    %50 = vector.shape_cast %47 : vector<4x64xbf16> to vector<1x1x4x64xbf16>
    tpu.vector_store %arg4[%c0_68, %c0_69, %c0_70, %c0_71], %50 {strides = array<i32>} : memref<1x4x4x64xbf16, #tpu.memory_space<vmem>>, vector<1x1x4x64xbf16>,
    %c0_72 = arith.constant 0 : index
    %c1_73 = arith.constant 1 : index
    %c0_74 = arith.constant 0 : index
    %c0_75 = arith.constant 0 : index
    %51 = vector.load %arg1[%c0_72, %c1_73, %c0_74, %c0_75] : memref<1x7x7x32xbf16, #tpu.memory_space<vmem>>, vector<1x1x4x32xbf16>
    %52 = vector.shape_cast %51 : vector<1x1x4x32xbf16> to vector<4x32xbf16>
    %c0_76 = arith.constant 0 : index
    %c1_77 = arith.constant 1 : index
    %c1_78 = arith.constant 1 : index
    %c0_79 = arith.constant 0 : index
    %53 = vector.load %arg1[%c0_76, %c1_77, %c1_78, %c0_79] : memref<1x7x7x32xbf16, #tpu.memory_space<vmem>>, vector<1x1x4x32xbf16>
    %54 = vector.shape_cast %53 : vector<1x1x4x32xbf16> to vector<4x32xbf16>
    %c0_80 = arith.constant 0 : index
    %c1_81 = arith.constant 1 : index
    %c2_82 = arith.constant 2 : index
    %c0_83 = arith.constant 0 : index
    %55 = vector.load %arg1[%c0_80, %c1_81, %c2_82, %c0_83] : memref<1x7x7x32xbf16, #tpu.memory_space<vmem>>, vector<1x1x4x32xbf16>
    %56 = vector.shape_cast %55 : vector<1x1x4x32xbf16> to vector<4x32xbf16>
    %c0_84 = arith.constant 0 : index
    %c1_85 = arith.constant 1 : index
    %c3_86 = arith.constant 3 : index
    %c0_87 = arith.constant 0 : index
    %57 = vector.load %arg1[%c0_84, %c1_85, %c3_86, %c0_87] : memref<1x7x7x32xbf16, #tpu.memory_space<vmem>>, vector<1x1x4x32xbf16>
    %58 = vector.shape_cast %57 : vector<1x1x4x32xbf16> to vector<4x32xbf16>
    %c0_88 = arith.constant 0 : index
    %c2_89 = arith.constant 2 : index
    %c0_90 = arith.constant 0 : index
    %c0_91 = arith.constant 0 : index
    %59 = vector.load %arg1[%c0_88, %c2_89, %c0_90, %c0_91] : memref<1x7x7x32xbf16, #tpu.memory_space<vmem>>, vector<1x1x4x32xbf16>
    %60 = vector.shape_cast %59 : vector<1x1x4x32xbf16> to vector<4x32xbf16>
    %c0_92 = arith.constant 0 : index
    %c2_93 = arith.constant 2 : index
    %c1_94 = arith.constant 1 : index
    %c0_95 = arith.constant 0 : index
    %61 = vector.load %arg1[%c0_92, %c2_93, %c1_94, %c0_95] : memref<1x7x7x32xbf16, #tpu.memory_space<vmem>>, vector<1x1x4x32xbf16>
    %62 = vector.shape_cast %61 : vector<1x1x4x32xbf16> to vector<4x32xbf16>
    %c0_96 = arith.constant 0 : index
    %c2_97 = arith.constant 2 : index
    %c2_98 = arith.constant 2 : index
    %c0_99 = arith.constant 0 : index
    %63 = vector.load %arg1[%c0_96, %c2_97, %c2_98, %c0_99] : memref<1x7x7x32xbf16, #tpu.memory_space<vmem>>, vector<1x1x4x32xbf16>
    %64 = vector.shape_cast %63 : vector<1x1x4x32xbf16> to vector<4x32xbf16>
    %c0_100 = arith.constant 0 : index
    %c2_101 = arith.constant 2 : index
    %c3_102 = arith.constant 3 : index
    %c0_103 = arith.constant 0 : index
    %65 = vector.load %arg1[%c0_100, %c2_101, %c3_102, %c0_103] : memref<1x7x7x32xbf16, #tpu.memory_space<vmem>>, vector<1x1x4x32xbf16>
    %66 = vector.shape_cast %65 : vector<1x1x4x32xbf16> to vector<4x32xbf16>
    %c0_104 = arith.constant 0 : index
    %c3_105 = arith.constant 3 : index
    %c0_106 = arith.constant 0 : index
    %c0_107 = arith.constant 0 : index
    %67 = vector.load %arg1[%c0_104, %c3_105, %c0_106, %c0_107] : memref<1x7x7x32xbf16, #tpu.memory_space<vmem>>, vector<1x1x4x32xbf16>
    %68 = vector.shape_cast %67 : vector<1x1x4x32xbf16> to vector<4x32xbf16>
    %c0_108 = arith.constant 0 : index
    %c3_109 = arith.constant 3 : index
    %c1_110 = arith.constant 1 : index
    %c0_111 = arith.constant 0 : index
    %69 = vector.load %arg1[%c0_108, %c3_109, %c1_110, %c0_111] : memref<1x7x7x32xbf16, #tpu.memory_space<vmem>>, vector<1x1x4x32xbf16>
    %70 = vector.shape_cast %69 : vector<1x1x4x32xbf16> to vector<4x32xbf16>
    %c0_112 = arith.constant 0 : index
    %c3_113 = arith.constant 3 : index
    %c2_114 = arith.constant 2 : index
    %c0_115 = arith.constant 0 : index
    %71 = vector.load %arg1[%c0_112, %c3_113, %c2_114, %c0_115] : memref<1x7x7x32xbf16, #tpu.memory_space<vmem>>, vector<1x1x4x32xbf16>
    %72 = vector.shape_cast %71 : vector<1x1x4x32xbf16> to vector<4x32xbf16>
    %c0_116 = arith.constant 0 : index
    %c3_117 = arith.constant 3 : index
    %c3_118 = arith.constant 3 : index
    %c0_119 = arith.constant 0 : index
    %73 = vector.load %arg1[%c0_116, %c3_117, %c3_118, %c0_119] : memref<1x7x7x32xbf16, #tpu.memory_space<vmem>>, vector<1x1x4x32xbf16>
    %74 = vector.shape_cast %73 : vector<1x1x4x32xbf16> to vector<4x32xbf16>
    %c0_120 = arith.constant 0 : index
    %c4 = arith.constant 4 : index
    %c0_121 = arith.constant 0 : index
    %c0_122 = arith.constant 0 : index
    %75 = vector.load %arg1[%c0_120, %c4, %c0_121, %c0_122] : memref<1x7x7x32xbf16, #tpu.memory_space<vmem>>, vector<1x1x4x32xbf16>
    %76 = vector.shape_cast %75 : vector<1x1x4x32xbf16> to vector<4x32xbf16>
    %c0_123 = arith.constant 0 : index
    %c4_124 = arith.constant 4 : index
    %c1_125 = arith.constant 1 : index
    %c0_126 = arith.constant 0 : index
    %77 = vector.load %arg1[%c0_123, %c4_124, %c1_125, %c0_126] : memref<1x7x7x32xbf16, #tpu.memory_space<vmem>>, vector<1x1x4x32xbf16>
    %78 = vector.shape_cast %77 : vector<1x1x4x32xbf16> to vector<4x32xbf16>
    %c0_127 = arith.constant 0 : index
    %c4_128 = arith.constant 4 : index
    %c2_129 = arith.constant 2 : index
    %c0_130 = arith.constant 0 : index
    %79 = vector.load %arg1[%c0_127, %c4_128, %c2_129, %c0_130] : memref<1x7x7x32xbf16, #tpu.memory_space<vmem>>, vector<1x1x4x32xbf16>
    %80 = vector.shape_cast %79 : vector<1x1x4x32xbf16> to vector<4x32xbf16>
    %c0_131 = arith.constant 0 : index
    %c4_132 = arith.constant 4 : index
    %c3_133 = arith.constant 3 : index
    %c0_134 = arith.constant 0 : index
    %81 = vector.load %arg1[%c0_131, %c4_132, %c3_133, %c0_134] : memref<1x7x7x32xbf16, #tpu.memory_space<vmem>>, vector<1x1x4x32xbf16>
    %82 = vector.shape_cast %81 : vector<1x1x4x32xbf16> to vector<4x32xbf16>
    %83 = tpu.concatenate %52, %54, %56, %58, %60, %62, %64, %66, %68, %70, %72, %74, %76, %78, %80, %82 in 1 : vector<4x32xbf16>, vector<4x32xbf16>, vector<4x32xbf16>, vector<4x32xbf16>, vector<4x32xbf16>, vector<4x32xbf16>, vector<4x32xbf16>, vector<4x32xbf16>, vector<4x32xbf16>, vector<4x32xbf16>, vector<4x32xbf16>, vector<4x32xbf16>, vector<4x32xbf16>, vector<4x32xbf16>, vector<4x32xbf16>, vector<4x32xbf16> -> vector<4x512xbf16>
    %cst_135 = arith.constant dense<0.000000e+00> : vector<4x64xf32>
    %84 = tpu.matmul %83, %0, %cst_135 {dimension_numbers = #tpu.dot_dimension_numbers<[1], [0], [0], [1], [0, 0, 1, 1], [], []>} : vector<4x512xbf16>, vector<512x64xbf16>, vector<4x64xf32> -> vector<4x64xf32>
    %85 = vector.broadcast %1 : vector<1x64xf32> to vector<4x64xf32>
    %86 = arith.addf %84, %85 : vector<4x64xf32>
    %cst_136 = arith.constant dense<0.000000e+00> : vector<64xf32>
    %87 = vector.multi_reduction <add>, %86, %cst_136 [0] : vector<4x64xf32> to vector<64xf32>
    %88 = vector.shape_cast %87 : vector<64xf32> to vector<1x64xf32>
    %89 = arith.addf %42, %88 : vector<1x64xf32>
    %90 = arith.mulf %86, %86 : vector<4x64xf32>
    %cst_137 = arith.constant dense<0.000000e+00> : vector<64xf32>
    %91 = vector.multi_reduction <add>, %90, %cst_137 [0] : vector<4x64xf32> to vector<64xf32>
    %92 = vector.shape_cast %91 : vector<64xf32> to vector<1x64xf32>
    %93 = arith.addf %46, %92 : vector<1x64xf32>
    %94 = arith.truncf %86 : vector<4x64xf32> to vector<4x64xbf16>
    %c0_138 = arith.constant 0 : index
    %c1_139 = arith.constant 1 : index
    %c0_140 = arith.constant 0 : index
    %c0_141 = arith.constant 0 : index
    %95 = vector.load %arg4[%c0_138, %c1_139, %c0_140, %c0_141] : memref<1x4x4x64xbf16, #tpu.memory_space<vmem>>, vector<1x1x4x64xbf16>
    %96 = vector.shape_cast %95 : vector<1x1x4x64xbf16> to vector<4x64xbf16>
    %97 = vector.shape_cast %94 : vector<4x64xbf16> to vector<1x1x4x64xbf16>
    tpu.vector_store %arg4[%c0_138, %c1_139, %c0_140, %c0_141], %97 {strides = array<i32>} : memref<1x4x4x64xbf16, #tpu.memory_space<vmem>>, vector<1x1x4x64xbf16>,
    %c0_142 = arith.constant 0 : index
    %c2_143 = arith.constant 2 : index
    %c0_144 = arith.constant 0 : index
    %c0_145 = arith.constant 0 : index
    %98 = vector.load %arg1[%c0_142, %c2_143, %c0_144, %c0_145] : memref<1x7x7x32xbf16, #tpu.memory_space<vmem>>, vector<1x1x4x32xbf16>
    %99 = vector.shape_cast %98 : vector<1x1x4x32xbf16> to vector<4x32xbf16>
    %c0_146 = arith.constant 0 : index
    %c2_147 = arith.constant 2 : index
    %c1_148 = arith.constant 1 : index
    %c0_149 = arith.constant 0 : index
    %100 = vector.load %arg1[%c0_146, %c2_147, %c1_148, %c0_149] : memref<1x7x7x32xbf16, #tpu.memory_space<vmem>>, vector<1x1x4x32xbf16>
    %101 = vector.shape_cast %100 : vector<1x1x4x32xbf16> to vector<4x32xbf16>
    %c0_150 = arith.constant 0 : index
    %c2_151 = arith.constant 2 : index
    %c2_152 = arith.constant 2 : index
    %c0_153 = arith.constant 0 : index
    %102 = vector.load %arg1[%c0_150, %c2_151, %c2_152, %c0_153] : memref<1x7x7x32xbf16, #tpu.memory_space<vmem>>, vector<1x1x4x32xbf16>
    %103 = vector.shape_cast %102 : vector<1x1x4x32xbf16> to vector<4x32xbf16>
    %c0_154 = arith.constant 0 : index
    %c2_155 = arith.constant 2 : index
    %c3_156 = arith.constant 3 : index
    %c0_157 = arith.constant 0 : index
    %104 = vector.load %arg1[%c0_154, %c2_155, %c3_156, %c0_157] : memref<1x7x7x32xbf16, #tpu.memory_space<vmem>>, vector<1x1x4x32xbf16>
    %105 = vector.shape_cast %104 : vector<1x1x4x32xbf16> to vector<4x32xbf16>
    %c0_158 = arith.constant 0 : index
    %c3_159 = arith.constant 3 : index
    %c0_160 = arith.constant 0 : index
    %c0_161 = arith.constant 0 : index
    %106 = vector.load %arg1[%c0_158, %c3_159, %c0_160, %c0_161] : memref<1x7x7x32xbf16, #tpu.memory_space<vmem>>, vector<1x1x4x32xbf16>
    %107 = vector.shape_cast %106 : vector<1x1x4x32xbf16> to vector<4x32xbf16>
    %c0_162 = arith.constant 0 : index
    %c3_163 = arith.constant 3 : index
    %c1_164 = arith.constant 1 : index
    %c0_165 = arith.constant 0 : index
    %108 = vector.load %arg1[%c0_162, %c3_163, %c1_164, %c0_165] : memref<1x7x7x32xbf16, #tpu.memory_space<vmem>>, vector<1x1x4x32xbf16>
    %109 = vector.shape_cast %108 : vector<1x1x4x32xbf16> to vector<4x32xbf16>
    %c0_166 = arith.constant 0 : index
    %c3_167 = arith.constant 3 : index
    %c2_168 = arith.constant 2 : index
    %c0_169 = arith.constant 0 : index
    %110 = vector.load %arg1[%c0_166, %c3_167, %c2_168, %c0_169] : memref<1x7x7x32xbf16, #tpu.memory_space<vmem>>, vector<1x1x4x32xbf16>
    %111 = vector.shape_cast %110 : vector<1x1x4x32xbf16> to vector<4x32xbf16>
    %c0_170 = arith.constant 0 : index
    %c3_171 = arith.constant 3 : index
    %c3_172 = arith.constant 3 : index
    %c0_173 = arith.constant 0 : index
    %112 = vector.load %arg1[%c0_170, %c3_171, %c3_172, %c0_173] : memref<1x7x7x32xbf16, #tpu.memory_space<vmem>>, vector<1x1x4x32xbf16>
    %113 = vector.shape_cast %112 : vector<1x1x4x32xbf16> to vector<4x32xbf16>
    %c0_174 = arith.constant 0 : index
    %c4_175 = arith.constant 4 : index
    %c0_176 = arith.constant 0 : index
    %c0_177 = arith.constant 0 : index
    %114 = vector.load %arg1[%c0_174, %c4_175, %c0_176, %c0_177] : memref<1x7x7x32xbf16, #tpu.memory_space<vmem>>, vector<1x1x4x32xbf16>
    %115 = vector.shape_cast %114 : vector<1x1x4x32xbf16> to vector<4x32xbf16>
    %c0_178 = arith.constant 0 : index
    %c4_179 = arith.constant 4 : index
    %c1_180 = arith.constant 1 : index
    %c0_181 = arith.constant 0 : index
    %116 = vector.load %arg1[%c0_178, %c4_179, %c1_180, %c0_181] : memref<1x7x7x32xbf16, #tpu.memory_space<vmem>>, vector<1x1x4x32xbf16>
    %117 = vector.shape_cast %116 : vector<1x1x4x32xbf16> to vector<4x32xbf16>
    %c0_182 = arith.constant 0 : index
    %c4_183 = arith.constant 4 : index
    %c2_184 = arith.constant 2 : index
    %c0_185 = arith.constant 0 : index
    %118 = vector.load %arg1[%c0_182, %c4_183, %c2_184, %c0_185] : memref<1x7x7x32xbf16, #tpu.memory_space<vmem>>, vector<1x1x4x32xbf16>
    %119 = vector.shape_cast %118 : vector<1x1x4x32xbf16> to vector<4x32xbf16>
    %c0_186 = arith.constant 0 : index
    %c4_187 = arith.constant 4 : index
    %c3_188 = arith.constant 3 : index
    %c0_189 = arith.constant 0 : index
    %120 = vector.load %arg1[%c0_186, %c4_187, %c3_188, %c0_189] : memref<1x7x7x32xbf16, #tpu.memory_space<vmem>>, vector<1x1x4x32xbf16>
    %121 = vector.shape_cast %120 : vector<1x1x4x32xbf16> to vector<4x32xbf16>
    %c0_190 = arith.constant 0 : index
    %c5 = arith.constant 5 : index
    %c0_191 = arith.constant 0 : index
    %c0_192 = arith.constant 0 : index
    %122 = vector.load %arg1[%c0_190, %c5, %c0_191, %c0_192] : memref<1x7x7x32xbf16, #tpu.memory_space<vmem>>, vector<1x1x4x32xbf16>
    %123 = vector.shape_cast %122 : vector<1x1x4x32xbf16> to vector<4x32xbf16>
    %c0_193 = arith.constant 0 : index
    %c5_194 = arith.constant 5 : index
    %c1_195 = arith.constant 1 : index
    %c0_196 = arith.constant 0 : index
    %124 = vector.load %arg1[%c0_193, %c5_194, %c1_195, %c0_196] : memref<1x7x7x32xbf16, #tpu.memory_space<vmem>>, vector<1x1x4x32xbf16>
    %125 = vector.shape_cast %124 : vector<1x1x4x32xbf16> to vector<4x32xbf16>
    %c0_197 = arith.constant 0 : index
    %c5_198 = arith.constant 5 : index
    %c2_199 = arith.constant 2 : index
    %c0_200 = arith.constant 0 : index
    %126 = vector.load %arg1[%c0_197, %c5_198, %c2_199, %c0_200] : memref<1x7x7x32xbf16, #tpu.memory_space<vmem>>, vector<1x1x4x32xbf16>
    %127 = vector.shape_cast %126 : vector<1x1x4x32xbf16> to vector<4x32xbf16>
    %c0_201 = arith.constant 0 : index
    %c5_202 = arith.constant 5 : index
    %c3_203 = arith.constant 3 : index
    %c0_204 = arith.constant 0 : index
    %128 = vector.load %arg1[%c0_201, %c5_202, %c3_203, %c0_204] : memref<1x7x7x32xbf16, #tpu.memory_space<vmem>>, vector<1x1x4x32xbf16>
    %129 = vector.shape_cast %128 : vector<1x1x4x32xbf16> to vector<4x32xbf16>
    %130 = tpu.concatenate %99, %101, %103, %105, %107, %109, %111, %113, %115, %117, %119, %121, %123, %125, %127, %129 in 1 : vector<4x32xbf16>, vector<4x32xbf16>, vector<4x32xbf16>, vector<4x32xbf16>, vector<4x32xbf16>, vector<4x32xbf16>, vector<4x32xbf16>, vector<4x32xbf16>, vector<4x32xbf16>, vector<4x32xbf16>, vector<4x32xbf16>, vector<4x32xbf16>, vector<4x32xbf16>, vector<4x32xbf16>, vector<4x32xbf16>, vector<4x32xbf16> -> vector<4x512xbf16>
    %cst_205 = arith.constant dense<0.000000e+00> : vector<4x64xf32>
    %131 = tpu.matmul %130, %0, %cst_205 {dimension_numbers = #tpu.dot_dimension_numbers<[1], [0], [0], [1], [0, 0, 1, 1], [], []>} : vector<4x512xbf16>, vector<512x64xbf16>, vector<4x64xf32> -> vector<4x64xf32>
    %132 = vector.broadcast %1 : vector<1x64xf32> to vector<4x64xf32>
    %133 = arith.addf %131, %132 : vector<4x64xf32>
    %cst_206 = arith.constant dense<0.000000e+00> : vector<64xf32>
    %134 = vector.multi_reduction <add>, %133, %cst_206 [0] : vector<4x64xf32> to vector<64xf32>
    %135 = vector.shape_cast %134 : vector<64xf32> to vector<1x64xf32>
    %136 = arith.addf %89, %135 : vector<1x64xf32>
    %137 = arith.mulf %133, %133 : vector<4x64xf32>
    %cst_207 = arith.constant dense<0.000000e+00> : vector<64xf32>
    %138 = vector.multi_reduction <add>, %137, %cst_207 [0] : vector<4x64xf32> to vector<64xf32>
    %139 = vector.shape_cast %138 : vector<64xf32> to vector<1x64xf32>
    %140 = arith.addf %93, %139 : vector<1x64xf32>
    %141 = arith.truncf %133 : vector<4x64xf32> to vector<4x64xbf16>
    %c0_208 = arith.constant 0 : index
    %c2_209 = arith.constant 2 : index
    %c0_210 = arith.constant 0 : index
    %c0_211 = arith.constant 0 : index
    %142 = vector.load %arg4[%c0_208, %c2_209, %c0_210, %c0_211] : memref<1x4x4x64xbf16, #tpu.memory_space<vmem>>, vector<1x1x4x64xbf16>
    %143 = vector.shape_cast %142 : vector<1x1x4x64xbf16> to vector<4x64xbf16>
    %144 = vector.shape_cast %141 : vector<4x64xbf16> to vector<1x1x4x64xbf16>
    tpu.vector_store %arg4[%c0_208, %c2_209, %c0_210, %c0_211], %144 {strides = array<i32>} : memref<1x4x4x64xbf16, #tpu.memory_space<vmem>>, vector<1x1x4x64xbf16>,
    %c0_212 = arith.constant 0 : index
    %c3_213 = arith.constant 3 : index
    %c0_214 = arith.constant 0 : index
    %c0_215 = arith.constant 0 : index
    %145 = vector.load %arg1[%c0_212, %c3_213, %c0_214, %c0_215] : memref<1x7x7x32xbf16, #tpu.memory_space<vmem>>, vector<1x1x4x32xbf16>
    %146 = vector.shape_cast %145 : vector<1x1x4x32xbf16> to vector<4x32xbf16>
    %c0_216 = arith.constant 0 : index
    %c3_217 = arith.constant 3 : index
    %c1_218 = arith.constant 1 : index
    %c0_219 = arith.constant 0 : index
    %147 = vector.load %arg1[%c0_216, %c3_217, %c1_218, %c0_219] : memref<1x7x7x32xbf16, #tpu.memory_space<vmem>>, vector<1x1x4x32xbf16>
    %148 = vector.shape_cast %147 : vector<1x1x4x32xbf16> to vector<4x32xbf16>
    %c0_220 = arith.constant 0 : index
    %c3_221 = arith.constant 3 : index
    %c2_222 = arith.constant 2 : index
    %c0_223 = arith.constant 0 : index
    %149 = vector.load %arg1[%c0_220, %c3_221, %c2_222, %c0_223] : memref<1x7x7x32xbf16, #tpu.memory_space<vmem>>, vector<1x1x4x32xbf16>
    %150 = vector.shape_cast %149 : vector<1x1x4x32xbf16> to vector<4x32xbf16>
    %c0_224 = arith.constant 0 : index
    %c3_225 = arith.constant 3 : index
    %c3_226 = arith.constant 3 : index
    %c0_227 = arith.constant 0 : index
    %151 = vector.load %arg1[%c0_224, %c3_225, %c3_226, %c0_227] : memref<1x7x7x32xbf16, #tpu.memory_space<vmem>>, vector<1x1x4x32xbf16>
    %152 = vector.shape_cast %151 : vector<1x1x4x32xbf16> to vector<4x32xbf16>
    %c0_228 = arith.constant 0 : index
    %c4_229 = arith.constant 4 : index
    %c0_230 = arith.constant 0 : index
    %c0_231 = arith.constant 0 : index
    %153 = vector.load %arg1[%c0_228, %c4_229, %c0_230, %c0_231] : memref<1x7x7x32xbf16, #tpu.memory_space<vmem>>, vector<1x1x4x32xbf16>
    %154 = vector.shape_cast %153 : vector<1x1x4x32xbf16> to vector<4x32xbf16>
    %c0_232 = arith.constant 0 : index
    %c4_233 = arith.constant 4 : index
    %c1_234 = arith.constant 1 : index
    %c0_235 = arith.constant 0 : index
    %155 = vector.load %arg1[%c0_232, %c4_233, %c1_234, %c0_235] : memref<1x7x7x32xbf16, #tpu.memory_space<vmem>>, vector<1x1x4x32xbf16>
    %156 = vector.shape_cast %155 : vector<1x1x4x32xbf16> to vector<4x32xbf16>
    %c0_236 = arith.constant 0 : index
    %c4_237 = arith.constant 4 : index
    %c2_238 = arith.constant 2 : index
    %c0_239 = arith.constant 0 : index
    %157 = vector.load %arg1[%c0_236, %c4_237, %c2_238, %c0_239] : memref<1x7x7x32xbf16, #tpu.memory_space<vmem>>, vector<1x1x4x32xbf16>
    %158 = vector.shape_cast %157 : vector<1x1x4x32xbf16> to vector<4x32xbf16>
    %c0_240 = arith.constant 0 : index
    %c4_241 = arith.constant 4 : index
    %c3_242 = arith.constant 3 : index
    %c0_243 = arith.constant 0 : index
    %159 = vector.load %arg1[%c0_240, %c4_241, %c3_242, %c0_243] : memref<1x7x7x32xbf16, #tpu.memory_space<vmem>>, vector<1x1x4x32xbf16>
    %160 = vector.shape_cast %159 : vector<1x1x4x32xbf16> to vector<4x32xbf16>
    %c0_244 = arith.constant 0 : index
    %c5_245 = arith.constant 5 : index
    %c0_246 = arith.constant 0 : index
    %c0_247 = arith.constant 0 : index
    %161 = vector.load %arg1[%c0_244, %c5_245, %c0_246, %c0_247] : memref<1x7x7x32xbf16, #tpu.memory_space<vmem>>, vector<1x1x4x32xbf16>
    %162 = vector.shape_cast %161 : vector<1x1x4x32xbf16> to vector<4x32xbf16>
    %c0_248 = arith.constant 0 : index
    %c5_249 = arith.constant 5 : index
    %c1_250 = arith.constant 1 : index
    %c0_251 = arith.constant 0 : index
    %163 = vector.load %arg1[%c0_248, %c5_249, %c1_250, %c0_251] : memref<1x7x7x32xbf16, #tpu.memory_space<vmem>>, vector<1x1x4x32xbf16>
    %164 = vector.shape_cast %163 : vector<1x1x4x32xbf16> to vector<4x32xbf16>
    %c0_252 = arith.constant 0 : index
    %c5_253 = arith.constant 5 : index
    %c2_254 = arith.constant 2 : index
    %c0_255 = arith.constant 0 : index
    %165 = vector.load %arg1[%c0_252, %c5_253, %c2_254, %c0_255] : memref<1x7x7x32xbf16, #tpu.memory_space<vmem>>, vector<1x1x4x32xbf16>
    %166 = vector.shape_cast %165 : vector<1x1x4x32xbf16> to vector<4x32xbf16>
    %c0_256 = arith.constant 0 : index
    %c5_257 = arith.constant 5 : index
    %c3_258 = arith.constant 3 : index
    %c0_259 = arith.constant 0 : index
    %167 = vector.load %arg1[%c0_256, %c5_257, %c3_258, %c0_259] : memref<1x7x7x32xbf16, #tpu.memory_space<vmem>>, vector<1x1x4x32xbf16>
    %168 = vector.shape_cast %167 : vector<1x1x4x32xbf16> to vector<4x32xbf16>
    %c0_260 = arith.constant 0 : index
    %c6 = arith.constant 6 : index
    %c0_261 = arith.constant 0 : index
    %c0_262 = arith.constant 0 : index
    %169 = vector.load %arg1[%c0_260, %c6, %c0_261, %c0_262] : memref<1x7x7x32xbf16, #tpu.memory_space<vmem>>, vector<1x1x4x32xbf16>
    %170 = vector.shape_cast %169 : vector<1x1x4x32xbf16> to vector<4x32xbf16>
    %c0_263 = arith.constant 0 : index
    %c6_264 = arith.constant 6 : index
    %c1_265 = arith.constant 1 : index
    %c0_266 = arith.constant 0 : index
    %171 = vector.load %arg1[%c0_263, %c6_264, %c1_265, %c0_266] : memref<1x7x7x32xbf16, #tpu.memory_space<vmem>>, vector<1x1x4x32xbf16>
    %172 = vector.shape_cast %171 : vector<1x1x4x32xbf16> to vector<4x32xbf16>
    %c0_267 = arith.constant 0 : index
    %c6_268 = arith.constant 6 : index
    %c2_269 = arith.constant 2 : index
    %c0_270 = arith.constant 0 : index
    %173 = vector.load %arg1[%c0_267, %c6_268, %c2_269, %c0_270] : memref<1x7x7x32xbf16, #tpu.memory_space<vmem>>, vector<1x1x4x32xbf16>
    %174 = vector.shape_cast %173 : vector<1x1x4x32xbf16> to vector<4x32xbf16>
    %c0_271 = arith.constant 0 : index
    %c6_272 = arith.constant 6 : index
    %c3_273 = arith.constant 3 : index
    %c0_274 = arith.constant 0 : index
    %175 = vector.load %arg1[%c0_271, %c6_272, %c3_273, %c0_274] : memref<1x7x7x32xbf16, #tpu.memory_space<vmem>>, vector<1x1x4x32xbf16>
    %176 = vector.shape_cast %175 : vector<1x1x4x32xbf16> to vector<4x32xbf16>
    %177 = tpu.concatenate %146, %148, %150, %152, %154, %156, %158, %160, %162, %164, %166, %168, %170, %172, %174, %176 in 1 : vector<4x32xbf16>, vector<4x32xbf16>, vector<4x32xbf16>, vector<4x32xbf16>, vector<4x32xbf16>, vector<4x32xbf16>, vector<4x32xbf16>, vector<4x32xbf16>, vector<4x32xbf16>, vector<4x32xbf16>, vector<4x32xbf16>, vector<4x32xbf16>, vector<4x32xbf16>, vector<4x32xbf16>, vector<4x32xbf16>, vector<4x32xbf16> -> vector<4x512xbf16>
    %cst_275 = arith.constant dense<0.000000e+00> : vector<4x64xf32>
    %178 = tpu.matmul %177, %0, %cst_275 {dimension_numbers = #tpu.dot_dimension_numbers<[1], [0], [0], [1], [0, 0, 1, 1], [], []>} : vector<4x512xbf16>, vector<512x64xbf16>, vector<4x64xf32> -> vector<4x64xf32>
    %179 = vector.broadcast %1 : vector<1x64xf32> to vector<4x64xf32>
    %180 = arith.addf %178, %179 : vector<4x64xf32>
    %cst_276 = arith.constant dense<0.000000e+00> : vector<64xf32>
    %181 = vector.multi_reduction <add>, %180, %cst_276 [0] : vector<4x64xf32> to vector<64xf32>
    %182 = vector.shape_cast %181 : vector<64xf32> to vector<1x64xf32>
    %183 = arith.addf %136, %182 : vector<1x64xf32>
    %184 = arith.mulf %180, %180 : vector<4x64xf32>
    %cst_277 = arith.constant dense<0.000000e+00> : vector<64xf32>
    %185 = vector.multi_reduction <add>, %184, %cst_277 [0] : vector<4x64xf32> to vector<64xf32>
    %186 = vector.shape_cast %185 : vector<64xf32> to vector<1x64xf32>
    %187 = arith.addf %140, %186 : vector<1x64xf32>
    %188 = arith.truncf %180 : vector<4x64xf32> to vector<4x64xbf16>
    %c0_278 = arith.constant 0 : index
    %c3_279 = arith.constant 3 : index
    %c0_280 = arith.constant 0 : index
    %c0_281 = arith.constant 0 : index
    %189 = vector.load %arg4[%c0_278, %c3_279, %c0_280, %c0_281] : memref<1x4x4x64xbf16, #tpu.memory_space<vmem>>, vector<1x1x4x64xbf16>
    %190 = vector.shape_cast %189 : vector<1x1x4x64xbf16> to vector<4x64xbf16>
    %191 = vector.shape_cast %188 : vector<4x64xbf16> to vector<1x1x4x64xbf16>
    tpu.vector_store %arg4[%c0_278, %c3_279, %c0_280, %c0_281], %191 {strides = array<i32>} : memref<1x4x4x64xbf16, #tpu.memory_space<vmem>>, vector<1x1x4x64xbf16>,
    %192 = tpu.concatenate %183, %187 in 0 : vector<1x64xf32>, vector<1x64xf32> -> vector<2x64xf32>
    %c0_282 = arith.constant 0 : index
    %c0_283 = arith.constant 0 : index
    %c0_284 = arith.constant 0 : index
    %193 = vector.load %arg5[%c0_282, %c0_283, %c0_284] : memref<1x2x64xf32, #tpu.memory_space<vmem>>, vector<1x2x64xf32>
    %194 = vector.shape_cast %193 : vector<1x2x64xf32> to vector<2x64xf32>
    %195 = vector.shape_cast %192 : vector<2x64xf32> to vector<1x2x64xf32>
    tpu.vector_store %arg5[%c0_282, %c0_283, %c0_284], %195 {strides = array<i32>} : memref<1x2x64xf32, #tpu.memory_space<vmem>>, vector<1x2x64xf32>,
    return
  }
  func.func @transform_0(%arg0: i32) -> (i32, i32, i32, i32) {
    %c0_i32 = arith.constant 0 : i32
    %c0_i32_0 = arith.constant 0 : i32
    %c0_i32_1 = arith.constant 0 : i32
    %c0_i32_2 = arith.constant 0 : i32
    return %arg0, %c0_i32, %c0_i32_0, %c0_i32_1 : i32, i32, i32, i32
  }
  func.func @transform_1(%arg0: i32) -> (i32, i32) {
    %c0_i32 = arith.constant 0 : i32
    %c0_i32_0 = arith.constant 0 : i32
    %c0_i32_1 = arith.constant 0 : i32
    return %c0_i32, %c0_i32_0 : i32, i32
  }
  func.func @transform_2(%arg0: i32) -> (i32, i32) {
    %c0_i32 = arith.constant 0 : i32
    %c0_i32_0 = arith.constant 0 : i32
    %c0_i32_1 = arith.constant 0 : i32
    return %c0_i32, %c0_i32_0 : i32, i32
  }
  func.func @transform_3(%arg0: i32) -> (i32, i32, i32, i32) {
    %c0_i32 = arith.constant 0 : i32
    %c0_i32_0 = arith.constant 0 : i32
    %c0_i32_1 = arith.constant 0 : i32
    %c0_i32_2 = arith.constant 0 : i32
    return %arg0, %c0_i32, %c0_i32_0, %c0_i32_1 : i32, i32, i32, i32
  }
  func.func @transform_4(%arg0: i32) -> (i32, i32, i32) {
    %c0_i32 = arith.constant 0 : i32
    %c0_i32_0 = arith.constant 0 : i32
    %c0_i32_1 = arith.constant 0 : i32
    return %arg0, %c0_i32, %c0_i32_0 : i32, i32, i32
  }
}

module attributes {stable_mosaic.version = 11 : i64} {
  func.func @_conv_kernel(%arg0: i32, %arg1: memref<1x8x8x64xbf16, #tpu.memory_space<vmem>>, %arg2: memref<1024x1xbf16, #tpu.memory_space<vmem>>, %arg3: memref<1x1xf32, #tpu.memory_space<vmem>>, %arg4: memref<1x5x5x1xf32, #tpu.memory_space<vmem>>) attributes {dimension_semantics = [#tpu.dimension_semantics<parallel>], iteration_bounds = array<i64: 2>, scalar_prefetch = 0 : i64, scratch_operands = 0 : i64, tpu.core_type = #tpu.core_type<tc>, window_params = [{transform_indices = @transform_0, window_bounds = array<i64: 1, 8, 8, 64>}, {pipeline_mode = #tpu.pipeline_mode<synchronous>, transform_indices = @transform_1, window_bounds = array<i64: 1024, 1>}, {pipeline_mode = #tpu.pipeline_mode<synchronous>, transform_indices = @transform_2, window_bounds = array<i64: 1, 1>}, {transform_indices = @transform_3, window_bounds = array<i64: 1, 5, 5, 1>}]} {
    %c0 = arith.constant 0 : index
    %c0_0 = arith.constant 0 : index
    %0 = vector.load %arg2[%c0, %c0_0] : memref<1024x1xbf16, #tpu.memory_space<vmem>>, vector<1024x1xbf16>
    %c0_1 = arith.constant 0 : index
    %c0_2 = arith.constant 0 : index
    %1 = vector.load %arg3[%c0_1, %c0_2] : memref<1x1xf32, #tpu.memory_space<vmem>>, vector<1x1xf32>
    %c0_3 = arith.constant 0 : index
    %c0_4 = arith.constant 0 : index
    %c0_5 = arith.constant 0 : index
    %c0_6 = arith.constant 0 : index
    %2 = vector.load %arg1[%c0_3, %c0_4, %c0_5, %c0_6] : memref<1x8x8x64xbf16, #tpu.memory_space<vmem>>, vector<1x1x5x64xbf16>
    %3 = vector.shape_cast %2 : vector<1x1x5x64xbf16> to vector<5x64xbf16>
    %c0_7 = arith.constant 0 : index
    %c0_8 = arith.constant 0 : index
    %c1 = arith.constant 1 : index
    %c0_9 = arith.constant 0 : index
    %4 = vector.load %arg1[%c0_7, %c0_8, %c1, %c0_9] : memref<1x8x8x64xbf16, #tpu.memory_space<vmem>>, vector<1x1x5x64xbf16>
    %5 = vector.shape_cast %4 : vector<1x1x5x64xbf16> to vector<5x64xbf16>
    %c0_10 = arith.constant 0 : index
    %c0_11 = arith.constant 0 : index
    %c2 = arith.constant 2 : index
    %c0_12 = arith.constant 0 : index
    %6 = vector.load %arg1[%c0_10, %c0_11, %c2, %c0_12] : memref<1x8x8x64xbf16, #tpu.memory_space<vmem>>, vector<1x1x5x64xbf16>
    %7 = vector.shape_cast %6 : vector<1x1x5x64xbf16> to vector<5x64xbf16>
    %c0_13 = arith.constant 0 : index
    %c0_14 = arith.constant 0 : index
    %c3 = arith.constant 3 : index
    %c0_15 = arith.constant 0 : index
    %8 = vector.load %arg1[%c0_13, %c0_14, %c3, %c0_15] : memref<1x8x8x64xbf16, #tpu.memory_space<vmem>>, vector<1x1x5x64xbf16>
    %9 = vector.shape_cast %8 : vector<1x1x5x64xbf16> to vector<5x64xbf16>
    %c0_16 = arith.constant 0 : index
    %c1_17 = arith.constant 1 : index
    %c0_18 = arith.constant 0 : index
    %c0_19 = arith.constant 0 : index
    %10 = vector.load %arg1[%c0_16, %c1_17, %c0_18, %c0_19] : memref<1x8x8x64xbf16, #tpu.memory_space<vmem>>, vector<1x1x5x64xbf16>
    %11 = vector.shape_cast %10 : vector<1x1x5x64xbf16> to vector<5x64xbf16>
    %c0_20 = arith.constant 0 : index
    %c1_21 = arith.constant 1 : index
    %c1_22 = arith.constant 1 : index
    %c0_23 = arith.constant 0 : index
    %12 = vector.load %arg1[%c0_20, %c1_21, %c1_22, %c0_23] : memref<1x8x8x64xbf16, #tpu.memory_space<vmem>>, vector<1x1x5x64xbf16>
    %13 = vector.shape_cast %12 : vector<1x1x5x64xbf16> to vector<5x64xbf16>
    %c0_24 = arith.constant 0 : index
    %c1_25 = arith.constant 1 : index
    %c2_26 = arith.constant 2 : index
    %c0_27 = arith.constant 0 : index
    %14 = vector.load %arg1[%c0_24, %c1_25, %c2_26, %c0_27] : memref<1x8x8x64xbf16, #tpu.memory_space<vmem>>, vector<1x1x5x64xbf16>
    %15 = vector.shape_cast %14 : vector<1x1x5x64xbf16> to vector<5x64xbf16>
    %c0_28 = arith.constant 0 : index
    %c1_29 = arith.constant 1 : index
    %c3_30 = arith.constant 3 : index
    %c0_31 = arith.constant 0 : index
    %16 = vector.load %arg1[%c0_28, %c1_29, %c3_30, %c0_31] : memref<1x8x8x64xbf16, #tpu.memory_space<vmem>>, vector<1x1x5x64xbf16>
    %17 = vector.shape_cast %16 : vector<1x1x5x64xbf16> to vector<5x64xbf16>
    %c0_32 = arith.constant 0 : index
    %c2_33 = arith.constant 2 : index
    %c0_34 = arith.constant 0 : index
    %c0_35 = arith.constant 0 : index
    %18 = vector.load %arg1[%c0_32, %c2_33, %c0_34, %c0_35] : memref<1x8x8x64xbf16, #tpu.memory_space<vmem>>, vector<1x1x5x64xbf16>
    %19 = vector.shape_cast %18 : vector<1x1x5x64xbf16> to vector<5x64xbf16>
    %c0_36 = arith.constant 0 : index
    %c2_37 = arith.constant 2 : index
    %c1_38 = arith.constant 1 : index
    %c0_39 = arith.constant 0 : index
    %20 = vector.load %arg1[%c0_36, %c2_37, %c1_38, %c0_39] : memref<1x8x8x64xbf16, #tpu.memory_space<vmem>>, vector<1x1x5x64xbf16>
    %21 = vector.shape_cast %20 : vector<1x1x5x64xbf16> to vector<5x64xbf16>
    %c0_40 = arith.constant 0 : index
    %c2_41 = arith.constant 2 : index
    %c2_42 = arith.constant 2 : index
    %c0_43 = arith.constant 0 : index
    %22 = vector.load %arg1[%c0_40, %c2_41, %c2_42, %c0_43] : memref<1x8x8x64xbf16, #tpu.memory_space<vmem>>, vector<1x1x5x64xbf16>
    %23 = vector.shape_cast %22 : vector<1x1x5x64xbf16> to vector<5x64xbf16>
    %c0_44 = arith.constant 0 : index
    %c2_45 = arith.constant 2 : index
    %c3_46 = arith.constant 3 : index
    %c0_47 = arith.constant 0 : index
    %24 = vector.load %arg1[%c0_44, %c2_45, %c3_46, %c0_47] : memref<1x8x8x64xbf16, #tpu.memory_space<vmem>>, vector<1x1x5x64xbf16>
    %25 = vector.shape_cast %24 : vector<1x1x5x64xbf16> to vector<5x64xbf16>
    %c0_48 = arith.constant 0 : index
    %c3_49 = arith.constant 3 : index
    %c0_50 = arith.constant 0 : index
    %c0_51 = arith.constant 0 : index
    %26 = vector.load %arg1[%c0_48, %c3_49, %c0_50, %c0_51] : memref<1x8x8x64xbf16, #tpu.memory_space<vmem>>, vector<1x1x5x64xbf16>
    %27 = vector.shape_cast %26 : vector<1x1x5x64xbf16> to vector<5x64xbf16>
    %c0_52 = arith.constant 0 : index
    %c3_53 = arith.constant 3 : index
    %c1_54 = arith.constant 1 : index
    %c0_55 = arith.constant 0 : index
    %28 = vector.load %arg1[%c0_52, %c3_53, %c1_54, %c0_55] : memref<1x8x8x64xbf16, #tpu.memory_space<vmem>>, vector<1x1x5x64xbf16>
    %29 = vector.shape_cast %28 : vector<1x1x5x64xbf16> to vector<5x64xbf16>
    %c0_56 = arith.constant 0 : index
    %c3_57 = arith.constant 3 : index
    %c2_58 = arith.constant 2 : index
    %c0_59 = arith.constant 0 : index
    %30 = vector.load %arg1[%c0_56, %c3_57, %c2_58, %c0_59] : memref<1x8x8x64xbf16, #tpu.memory_space<vmem>>, vector<1x1x5x64xbf16>
    %31 = vector.shape_cast %30 : vector<1x1x5x64xbf16> to vector<5x64xbf16>
    %c0_60 = arith.constant 0 : index
    %c3_61 = arith.constant 3 : index
    %c3_62 = arith.constant 3 : index
    %c0_63 = arith.constant 0 : index
    %32 = vector.load %arg1[%c0_60, %c3_61, %c3_62, %c0_63] : memref<1x8x8x64xbf16, #tpu.memory_space<vmem>>, vector<1x1x5x64xbf16>
    %33 = vector.shape_cast %32 : vector<1x1x5x64xbf16> to vector<5x64xbf16>
    %34 = tpu.concatenate %3, %5, %7, %9, %11, %13, %15, %17, %19, %21, %23, %25, %27, %29, %31, %33 in 1 : vector<5x64xbf16>, vector<5x64xbf16>, vector<5x64xbf16>, vector<5x64xbf16>, vector<5x64xbf16>, vector<5x64xbf16>, vector<5x64xbf16>, vector<5x64xbf16>, vector<5x64xbf16>, vector<5x64xbf16>, vector<5x64xbf16>, vector<5x64xbf16>, vector<5x64xbf16>, vector<5x64xbf16>, vector<5x64xbf16>, vector<5x64xbf16> -> vector<5x1024xbf16>
    %cst = arith.constant dense<0.000000e+00> : vector<5x1xf32>
    %35 = tpu.matmul %34, %0, %cst {dimension_numbers = #tpu.dot_dimension_numbers<[1], [0], [0], [1], [0, 0, 1, 1], [], []>} : vector<5x1024xbf16>, vector<1024x1xbf16>, vector<5x1xf32> -> vector<5x1xf32>
    %36 = vector.broadcast %1 : vector<1x1xf32> to vector<5x1xf32>
    %37 = arith.addf %35, %36 : vector<5x1xf32>
    %c0_64 = arith.constant 0 : index
    %c0_65 = arith.constant 0 : index
    %c0_66 = arith.constant 0 : index
    %c0_67 = arith.constant 0 : index
    %38 = vector.load %arg4[%c0_64, %c0_65, %c0_66, %c0_67] : memref<1x5x5x1xf32, #tpu.memory_space<vmem>>, vector<1x1x5x1xf32>
    %39 = vector.shape_cast %38 : vector<1x1x5x1xf32> to vector<5x1xf32>
    %40 = vector.shape_cast %37 : vector<5x1xf32> to vector<1x1x5x1xf32>
    tpu.vector_store %arg4[%c0_64, %c0_65, %c0_66, %c0_67], %40 {strides = array<i32>} : memref<1x5x5x1xf32, #tpu.memory_space<vmem>>, vector<1x1x5x1xf32>,
    %c0_68 = arith.constant 0 : index
    %c1_69 = arith.constant 1 : index
    %c0_70 = arith.constant 0 : index
    %c0_71 = arith.constant 0 : index
    %41 = vector.load %arg1[%c0_68, %c1_69, %c0_70, %c0_71] : memref<1x8x8x64xbf16, #tpu.memory_space<vmem>>, vector<1x1x5x64xbf16>
    %42 = vector.shape_cast %41 : vector<1x1x5x64xbf16> to vector<5x64xbf16>
    %c0_72 = arith.constant 0 : index
    %c1_73 = arith.constant 1 : index
    %c1_74 = arith.constant 1 : index
    %c0_75 = arith.constant 0 : index
    %43 = vector.load %arg1[%c0_72, %c1_73, %c1_74, %c0_75] : memref<1x8x8x64xbf16, #tpu.memory_space<vmem>>, vector<1x1x5x64xbf16>
    %44 = vector.shape_cast %43 : vector<1x1x5x64xbf16> to vector<5x64xbf16>
    %c0_76 = arith.constant 0 : index
    %c1_77 = arith.constant 1 : index
    %c2_78 = arith.constant 2 : index
    %c0_79 = arith.constant 0 : index
    %45 = vector.load %arg1[%c0_76, %c1_77, %c2_78, %c0_79] : memref<1x8x8x64xbf16, #tpu.memory_space<vmem>>, vector<1x1x5x64xbf16>
    %46 = vector.shape_cast %45 : vector<1x1x5x64xbf16> to vector<5x64xbf16>
    %c0_80 = arith.constant 0 : index
    %c1_81 = arith.constant 1 : index
    %c3_82 = arith.constant 3 : index
    %c0_83 = arith.constant 0 : index
    %47 = vector.load %arg1[%c0_80, %c1_81, %c3_82, %c0_83] : memref<1x8x8x64xbf16, #tpu.memory_space<vmem>>, vector<1x1x5x64xbf16>
    %48 = vector.shape_cast %47 : vector<1x1x5x64xbf16> to vector<5x64xbf16>
    %c0_84 = arith.constant 0 : index
    %c2_85 = arith.constant 2 : index
    %c0_86 = arith.constant 0 : index
    %c0_87 = arith.constant 0 : index
    %49 = vector.load %arg1[%c0_84, %c2_85, %c0_86, %c0_87] : memref<1x8x8x64xbf16, #tpu.memory_space<vmem>>, vector<1x1x5x64xbf16>
    %50 = vector.shape_cast %49 : vector<1x1x5x64xbf16> to vector<5x64xbf16>
    %c0_88 = arith.constant 0 : index
    %c2_89 = arith.constant 2 : index
    %c1_90 = arith.constant 1 : index
    %c0_91 = arith.constant 0 : index
    %51 = vector.load %arg1[%c0_88, %c2_89, %c1_90, %c0_91] : memref<1x8x8x64xbf16, #tpu.memory_space<vmem>>, vector<1x1x5x64xbf16>
    %52 = vector.shape_cast %51 : vector<1x1x5x64xbf16> to vector<5x64xbf16>
    %c0_92 = arith.constant 0 : index
    %c2_93 = arith.constant 2 : index
    %c2_94 = arith.constant 2 : index
    %c0_95 = arith.constant 0 : index
    %53 = vector.load %arg1[%c0_92, %c2_93, %c2_94, %c0_95] : memref<1x8x8x64xbf16, #tpu.memory_space<vmem>>, vector<1x1x5x64xbf16>
    %54 = vector.shape_cast %53 : vector<1x1x5x64xbf16> to vector<5x64xbf16>
    %c0_96 = arith.constant 0 : index
    %c2_97 = arith.constant 2 : index
    %c3_98 = arith.constant 3 : index
    %c0_99 = arith.constant 0 : index
    %55 = vector.load %arg1[%c0_96, %c2_97, %c3_98, %c0_99] : memref<1x8x8x64xbf16, #tpu.memory_space<vmem>>, vector<1x1x5x64xbf16>
    %56 = vector.shape_cast %55 : vector<1x1x5x64xbf16> to vector<5x64xbf16>
    %c0_100 = arith.constant 0 : index
    %c3_101 = arith.constant 3 : index
    %c0_102 = arith.constant 0 : index
    %c0_103 = arith.constant 0 : index
    %57 = vector.load %arg1[%c0_100, %c3_101, %c0_102, %c0_103] : memref<1x8x8x64xbf16, #tpu.memory_space<vmem>>, vector<1x1x5x64xbf16>
    %58 = vector.shape_cast %57 : vector<1x1x5x64xbf16> to vector<5x64xbf16>
    %c0_104 = arith.constant 0 : index
    %c3_105 = arith.constant 3 : index
    %c1_106 = arith.constant 1 : index
    %c0_107 = arith.constant 0 : index
    %59 = vector.load %arg1[%c0_104, %c3_105, %c1_106, %c0_107] : memref<1x8x8x64xbf16, #tpu.memory_space<vmem>>, vector<1x1x5x64xbf16>
    %60 = vector.shape_cast %59 : vector<1x1x5x64xbf16> to vector<5x64xbf16>
    %c0_108 = arith.constant 0 : index
    %c3_109 = arith.constant 3 : index
    %c2_110 = arith.constant 2 : index
    %c0_111 = arith.constant 0 : index
    %61 = vector.load %arg1[%c0_108, %c3_109, %c2_110, %c0_111] : memref<1x8x8x64xbf16, #tpu.memory_space<vmem>>, vector<1x1x5x64xbf16>
    %62 = vector.shape_cast %61 : vector<1x1x5x64xbf16> to vector<5x64xbf16>
    %c0_112 = arith.constant 0 : index
    %c3_113 = arith.constant 3 : index
    %c3_114 = arith.constant 3 : index
    %c0_115 = arith.constant 0 : index
    %63 = vector.load %arg1[%c0_112, %c3_113, %c3_114, %c0_115] : memref<1x8x8x64xbf16, #tpu.memory_space<vmem>>, vector<1x1x5x64xbf16>
    %64 = vector.shape_cast %63 : vector<1x1x5x64xbf16> to vector<5x64xbf16>
    %c0_116 = arith.constant 0 : index
    %c4 = arith.constant 4 : index
    %c0_117 = arith.constant 0 : index
    %c0_118 = arith.constant 0 : index
    %65 = vector.load %arg1[%c0_116, %c4, %c0_117, %c0_118] : memref<1x8x8x64xbf16, #tpu.memory_space<vmem>>, vector<1x1x5x64xbf16>
    %66 = vector.shape_cast %65 : vector<1x1x5x64xbf16> to vector<5x64xbf16>
    %c0_119 = arith.constant 0 : index
    %c4_120 = arith.constant 4 : index
    %c1_121 = arith.constant 1 : index
    %c0_122 = arith.constant 0 : index
    %67 = vector.load %arg1[%c0_119, %c4_120, %c1_121, %c0_122] : memref<1x8x8x64xbf16, #tpu.memory_space<vmem>>, vector<1x1x5x64xbf16>
    %68 = vector.shape_cast %67 : vector<1x1x5x64xbf16> to vector<5x64xbf16>
    %c0_123 = arith.constant 0 : index
    %c4_124 = arith.constant 4 : index
    %c2_125 = arith.constant 2 : index
    %c0_126 = arith.constant 0 : index
    %69 = vector.load %arg1[%c0_123, %c4_124, %c2_125, %c0_126] : memref<1x8x8x64xbf16, #tpu.memory_space<vmem>>, vector<1x1x5x64xbf16>
    %70 = vector.shape_cast %69 : vector<1x1x5x64xbf16> to vector<5x64xbf16>
    %c0_127 = arith.constant 0 : index
    %c4_128 = arith.constant 4 : index
    %c3_129 = arith.constant 3 : index
    %c0_130 = arith.constant 0 : index
    %71 = vector.load %arg1[%c0_127, %c4_128, %c3_129, %c0_130] : memref<1x8x8x64xbf16, #tpu.memory_space<vmem>>, vector<1x1x5x64xbf16>
    %72 = vector.shape_cast %71 : vector<1x1x5x64xbf16> to vector<5x64xbf16>
    %73 = tpu.concatenate %42, %44, %46, %48, %50, %52, %54, %56, %58, %60, %62, %64, %66, %68, %70, %72 in 1 : vector<5x64xbf16>, vector<5x64xbf16>, vector<5x64xbf16>, vector<5x64xbf16>, vector<5x64xbf16>, vector<5x64xbf16>, vector<5x64xbf16>, vector<5x64xbf16>, vector<5x64xbf16>, vector<5x64xbf16>, vector<5x64xbf16>, vector<5x64xbf16>, vector<5x64xbf16>, vector<5x64xbf16>, vector<5x64xbf16>, vector<5x64xbf16> -> vector<5x1024xbf16>
    %cst_131 = arith.constant dense<0.000000e+00> : vector<5x1xf32>
    %74 = tpu.matmul %73, %0, %cst_131 {dimension_numbers = #tpu.dot_dimension_numbers<[1], [0], [0], [1], [0, 0, 1, 1], [], []>} : vector<5x1024xbf16>, vector<1024x1xbf16>, vector<5x1xf32> -> vector<5x1xf32>
    %75 = vector.broadcast %1 : vector<1x1xf32> to vector<5x1xf32>
    %76 = arith.addf %74, %75 : vector<5x1xf32>
    %c0_132 = arith.constant 0 : index
    %c1_133 = arith.constant 1 : index
    %c0_134 = arith.constant 0 : index
    %c0_135 = arith.constant 0 : index
    %77 = vector.load %arg4[%c0_132, %c1_133, %c0_134, %c0_135] : memref<1x5x5x1xf32, #tpu.memory_space<vmem>>, vector<1x1x5x1xf32>
    %78 = vector.shape_cast %77 : vector<1x1x5x1xf32> to vector<5x1xf32>
    %79 = vector.shape_cast %76 : vector<5x1xf32> to vector<1x1x5x1xf32>
    tpu.vector_store %arg4[%c0_132, %c1_133, %c0_134, %c0_135], %79 {strides = array<i32>} : memref<1x5x5x1xf32, #tpu.memory_space<vmem>>, vector<1x1x5x1xf32>,
    %c0_136 = arith.constant 0 : index
    %c2_137 = arith.constant 2 : index
    %c0_138 = arith.constant 0 : index
    %c0_139 = arith.constant 0 : index
    %80 = vector.load %arg1[%c0_136, %c2_137, %c0_138, %c0_139] : memref<1x8x8x64xbf16, #tpu.memory_space<vmem>>, vector<1x1x5x64xbf16>
    %81 = vector.shape_cast %80 : vector<1x1x5x64xbf16> to vector<5x64xbf16>
    %c0_140 = arith.constant 0 : index
    %c2_141 = arith.constant 2 : index
    %c1_142 = arith.constant 1 : index
    %c0_143 = arith.constant 0 : index
    %82 = vector.load %arg1[%c0_140, %c2_141, %c1_142, %c0_143] : memref<1x8x8x64xbf16, #tpu.memory_space<vmem>>, vector<1x1x5x64xbf16>
    %83 = vector.shape_cast %82 : vector<1x1x5x64xbf16> to vector<5x64xbf16>
    %c0_144 = arith.constant 0 : index
    %c2_145 = arith.constant 2 : index
    %c2_146 = arith.constant 2 : index
    %c0_147 = arith.constant 0 : index
    %84 = vector.load %arg1[%c0_144, %c2_145, %c2_146, %c0_147] : memref<1x8x8x64xbf16, #tpu.memory_space<vmem>>, vector<1x1x5x64xbf16>
    %85 = vector.shape_cast %84 : vector<1x1x5x64xbf16> to vector<5x64xbf16>
    %c0_148 = arith.constant 0 : index
    %c2_149 = arith.constant 2 : index
    %c3_150 = arith.constant 3 : index
    %c0_151 = arith.constant 0 : index
    %86 = vector.load %arg1[%c0_148, %c2_149, %c3_150, %c0_151] : memref<1x8x8x64xbf16, #tpu.memory_space<vmem>>, vector<1x1x5x64xbf16>
    %87 = vector.shape_cast %86 : vector<1x1x5x64xbf16> to vector<5x64xbf16>
    %c0_152 = arith.constant 0 : index
    %c3_153 = arith.constant 3 : index
    %c0_154 = arith.constant 0 : index
    %c0_155 = arith.constant 0 : index
    %88 = vector.load %arg1[%c0_152, %c3_153, %c0_154, %c0_155] : memref<1x8x8x64xbf16, #tpu.memory_space<vmem>>, vector<1x1x5x64xbf16>
    %89 = vector.shape_cast %88 : vector<1x1x5x64xbf16> to vector<5x64xbf16>
    %c0_156 = arith.constant 0 : index
    %c3_157 = arith.constant 3 : index
    %c1_158 = arith.constant 1 : index
    %c0_159 = arith.constant 0 : index
    %90 = vector.load %arg1[%c0_156, %c3_157, %c1_158, %c0_159] : memref<1x8x8x64xbf16, #tpu.memory_space<vmem>>, vector<1x1x5x64xbf16>
    %91 = vector.shape_cast %90 : vector<1x1x5x64xbf16> to vector<5x64xbf16>
    %c0_160 = arith.constant 0 : index
    %c3_161 = arith.constant 3 : index
    %c2_162 = arith.constant 2 : index
    %c0_163 = arith.constant 0 : index
    %92 = vector.load %arg1[%c0_160, %c3_161, %c2_162, %c0_163] : memref<1x8x8x64xbf16, #tpu.memory_space<vmem>>, vector<1x1x5x64xbf16>
    %93 = vector.shape_cast %92 : vector<1x1x5x64xbf16> to vector<5x64xbf16>
    %c0_164 = arith.constant 0 : index
    %c3_165 = arith.constant 3 : index
    %c3_166 = arith.constant 3 : index
    %c0_167 = arith.constant 0 : index
    %94 = vector.load %arg1[%c0_164, %c3_165, %c3_166, %c0_167] : memref<1x8x8x64xbf16, #tpu.memory_space<vmem>>, vector<1x1x5x64xbf16>
    %95 = vector.shape_cast %94 : vector<1x1x5x64xbf16> to vector<5x64xbf16>
    %c0_168 = arith.constant 0 : index
    %c4_169 = arith.constant 4 : index
    %c0_170 = arith.constant 0 : index
    %c0_171 = arith.constant 0 : index
    %96 = vector.load %arg1[%c0_168, %c4_169, %c0_170, %c0_171] : memref<1x8x8x64xbf16, #tpu.memory_space<vmem>>, vector<1x1x5x64xbf16>
    %97 = vector.shape_cast %96 : vector<1x1x5x64xbf16> to vector<5x64xbf16>
    %c0_172 = arith.constant 0 : index
    %c4_173 = arith.constant 4 : index
    %c1_174 = arith.constant 1 : index
    %c0_175 = arith.constant 0 : index
    %98 = vector.load %arg1[%c0_172, %c4_173, %c1_174, %c0_175] : memref<1x8x8x64xbf16, #tpu.memory_space<vmem>>, vector<1x1x5x64xbf16>
    %99 = vector.shape_cast %98 : vector<1x1x5x64xbf16> to vector<5x64xbf16>
    %c0_176 = arith.constant 0 : index
    %c4_177 = arith.constant 4 : index
    %c2_178 = arith.constant 2 : index
    %c0_179 = arith.constant 0 : index
    %100 = vector.load %arg1[%c0_176, %c4_177, %c2_178, %c0_179] : memref<1x8x8x64xbf16, #tpu.memory_space<vmem>>, vector<1x1x5x64xbf16>
    %101 = vector.shape_cast %100 : vector<1x1x5x64xbf16> to vector<5x64xbf16>
    %c0_180 = arith.constant 0 : index
    %c4_181 = arith.constant 4 : index
    %c3_182 = arith.constant 3 : index
    %c0_183 = arith.constant 0 : index
    %102 = vector.load %arg1[%c0_180, %c4_181, %c3_182, %c0_183] : memref<1x8x8x64xbf16, #tpu.memory_space<vmem>>, vector<1x1x5x64xbf16>
    %103 = vector.shape_cast %102 : vector<1x1x5x64xbf16> to vector<5x64xbf16>
    %c0_184 = arith.constant 0 : index
    %c5 = arith.constant 5 : index
    %c0_185 = arith.constant 0 : index
    %c0_186 = arith.constant 0 : index
    %104 = vector.load %arg1[%c0_184, %c5, %c0_185, %c0_186] : memref<1x8x8x64xbf16, #tpu.memory_space<vmem>>, vector<1x1x5x64xbf16>
    %105 = vector.shape_cast %104 : vector<1x1x5x64xbf16> to vector<5x64xbf16>
    %c0_187 = arith.constant 0 : index
    %c5_188 = arith.constant 5 : index
    %c1_189 = arith.constant 1 : index
    %c0_190 = arith.constant 0 : index
    %106 = vector.load %arg1[%c0_187, %c5_188, %c1_189, %c0_190] : memref<1x8x8x64xbf16, #tpu.memory_space<vmem>>, vector<1x1x5x64xbf16>
    %107 = vector.shape_cast %106 : vector<1x1x5x64xbf16> to vector<5x64xbf16>
    %c0_191 = arith.constant 0 : index
    %c5_192 = arith.constant 5 : index
    %c2_193 = arith.constant 2 : index
    %c0_194 = arith.constant 0 : index
    %108 = vector.load %arg1[%c0_191, %c5_192, %c2_193, %c0_194] : memref<1x8x8x64xbf16, #tpu.memory_space<vmem>>, vector<1x1x5x64xbf16>
    %109 = vector.shape_cast %108 : vector<1x1x5x64xbf16> to vector<5x64xbf16>
    %c0_195 = arith.constant 0 : index
    %c5_196 = arith.constant 5 : index
    %c3_197 = arith.constant 3 : index
    %c0_198 = arith.constant 0 : index
    %110 = vector.load %arg1[%c0_195, %c5_196, %c3_197, %c0_198] : memref<1x8x8x64xbf16, #tpu.memory_space<vmem>>, vector<1x1x5x64xbf16>
    %111 = vector.shape_cast %110 : vector<1x1x5x64xbf16> to vector<5x64xbf16>
    %112 = tpu.concatenate %81, %83, %85, %87, %89, %91, %93, %95, %97, %99, %101, %103, %105, %107, %109, %111 in 1 : vector<5x64xbf16>, vector<5x64xbf16>, vector<5x64xbf16>, vector<5x64xbf16>, vector<5x64xbf16>, vector<5x64xbf16>, vector<5x64xbf16>, vector<5x64xbf16>, vector<5x64xbf16>, vector<5x64xbf16>, vector<5x64xbf16>, vector<5x64xbf16>, vector<5x64xbf16>, vector<5x64xbf16>, vector<5x64xbf16>, vector<5x64xbf16> -> vector<5x1024xbf16>
    %cst_199 = arith.constant dense<0.000000e+00> : vector<5x1xf32>
    %113 = tpu.matmul %112, %0, %cst_199 {dimension_numbers = #tpu.dot_dimension_numbers<[1], [0], [0], [1], [0, 0, 1, 1], [], []>} : vector<5x1024xbf16>, vector<1024x1xbf16>, vector<5x1xf32> -> vector<5x1xf32>
    %114 = vector.broadcast %1 : vector<1x1xf32> to vector<5x1xf32>
    %115 = arith.addf %113, %114 : vector<5x1xf32>
    %c0_200 = arith.constant 0 : index
    %c2_201 = arith.constant 2 : index
    %c0_202 = arith.constant 0 : index
    %c0_203 = arith.constant 0 : index
    %116 = vector.load %arg4[%c0_200, %c2_201, %c0_202, %c0_203] : memref<1x5x5x1xf32, #tpu.memory_space<vmem>>, vector<1x1x5x1xf32>
    %117 = vector.shape_cast %116 : vector<1x1x5x1xf32> to vector<5x1xf32>
    %118 = vector.shape_cast %115 : vector<5x1xf32> to vector<1x1x5x1xf32>
    tpu.vector_store %arg4[%c0_200, %c2_201, %c0_202, %c0_203], %118 {strides = array<i32>} : memref<1x5x5x1xf32, #tpu.memory_space<vmem>>, vector<1x1x5x1xf32>,
    %c0_204 = arith.constant 0 : index
    %c3_205 = arith.constant 3 : index
    %c0_206 = arith.constant 0 : index
    %c0_207 = arith.constant 0 : index
    %119 = vector.load %arg1[%c0_204, %c3_205, %c0_206, %c0_207] : memref<1x8x8x64xbf16, #tpu.memory_space<vmem>>, vector<1x1x5x64xbf16>
    %120 = vector.shape_cast %119 : vector<1x1x5x64xbf16> to vector<5x64xbf16>
    %c0_208 = arith.constant 0 : index
    %c3_209 = arith.constant 3 : index
    %c1_210 = arith.constant 1 : index
    %c0_211 = arith.constant 0 : index
    %121 = vector.load %arg1[%c0_208, %c3_209, %c1_210, %c0_211] : memref<1x8x8x64xbf16, #tpu.memory_space<vmem>>, vector<1x1x5x64xbf16>
    %122 = vector.shape_cast %121 : vector<1x1x5x64xbf16> to vector<5x64xbf16>
    %c0_212 = arith.constant 0 : index
    %c3_213 = arith.constant 3 : index
    %c2_214 = arith.constant 2 : index
    %c0_215 = arith.constant 0 : index
    %123 = vector.load %arg1[%c0_212, %c3_213, %c2_214, %c0_215] : memref<1x8x8x64xbf16, #tpu.memory_space<vmem>>, vector<1x1x5x64xbf16>
    %124 = vector.shape_cast %123 : vector<1x1x5x64xbf16> to vector<5x64xbf16>
    %c0_216 = arith.constant 0 : index
    %c3_217 = arith.constant 3 : index
    %c3_218 = arith.constant 3 : index
    %c0_219 = arith.constant 0 : index
    %125 = vector.load %arg1[%c0_216, %c3_217, %c3_218, %c0_219] : memref<1x8x8x64xbf16, #tpu.memory_space<vmem>>, vector<1x1x5x64xbf16>
    %126 = vector.shape_cast %125 : vector<1x1x5x64xbf16> to vector<5x64xbf16>
    %c0_220 = arith.constant 0 : index
    %c4_221 = arith.constant 4 : index
    %c0_222 = arith.constant 0 : index
    %c0_223 = arith.constant 0 : index
    %127 = vector.load %arg1[%c0_220, %c4_221, %c0_222, %c0_223] : memref<1x8x8x64xbf16, #tpu.memory_space<vmem>>, vector<1x1x5x64xbf16>
    %128 = vector.shape_cast %127 : vector<1x1x5x64xbf16> to vector<5x64xbf16>
    %c0_224 = arith.constant 0 : index
    %c4_225 = arith.constant 4 : index
    %c1_226 = arith.constant 1 : index
    %c0_227 = arith.constant 0 : index
    %129 = vector.load %arg1[%c0_224, %c4_225, %c1_226, %c0_227] : memref<1x8x8x64xbf16, #tpu.memory_space<vmem>>, vector<1x1x5x64xbf16>
    %130 = vector.shape_cast %129 : vector<1x1x5x64xbf16> to vector<5x64xbf16>
    %c0_228 = arith.constant 0 : index
    %c4_229 = arith.constant 4 : index
    %c2_230 = arith.constant 2 : index
    %c0_231 = arith.constant 0 : index
    %131 = vector.load %arg1[%c0_228, %c4_229, %c2_230, %c0_231] : memref<1x8x8x64xbf16, #tpu.memory_space<vmem>>, vector<1x1x5x64xbf16>
    %132 = vector.shape_cast %131 : vector<1x1x5x64xbf16> to vector<5x64xbf16>
    %c0_232 = arith.constant 0 : index
    %c4_233 = arith.constant 4 : index
    %c3_234 = arith.constant 3 : index
    %c0_235 = arith.constant 0 : index
    %133 = vector.load %arg1[%c0_232, %c4_233, %c3_234, %c0_235] : memref<1x8x8x64xbf16, #tpu.memory_space<vmem>>, vector<1x1x5x64xbf16>
    %134 = vector.shape_cast %133 : vector<1x1x5x64xbf16> to vector<5x64xbf16>
    %c0_236 = arith.constant 0 : index
    %c5_237 = arith.constant 5 : index
    %c0_238 = arith.constant 0 : index
    %c0_239 = arith.constant 0 : index
    %135 = vector.load %arg1[%c0_236, %c5_237, %c0_238, %c0_239] : memref<1x8x8x64xbf16, #tpu.memory_space<vmem>>, vector<1x1x5x64xbf16>
    %136 = vector.shape_cast %135 : vector<1x1x5x64xbf16> to vector<5x64xbf16>
    %c0_240 = arith.constant 0 : index
    %c5_241 = arith.constant 5 : index
    %c1_242 = arith.constant 1 : index
    %c0_243 = arith.constant 0 : index
    %137 = vector.load %arg1[%c0_240, %c5_241, %c1_242, %c0_243] : memref<1x8x8x64xbf16, #tpu.memory_space<vmem>>, vector<1x1x5x64xbf16>
    %138 = vector.shape_cast %137 : vector<1x1x5x64xbf16> to vector<5x64xbf16>
    %c0_244 = arith.constant 0 : index
    %c5_245 = arith.constant 5 : index
    %c2_246 = arith.constant 2 : index
    %c0_247 = arith.constant 0 : index
    %139 = vector.load %arg1[%c0_244, %c5_245, %c2_246, %c0_247] : memref<1x8x8x64xbf16, #tpu.memory_space<vmem>>, vector<1x1x5x64xbf16>
    %140 = vector.shape_cast %139 : vector<1x1x5x64xbf16> to vector<5x64xbf16>
    %c0_248 = arith.constant 0 : index
    %c5_249 = arith.constant 5 : index
    %c3_250 = arith.constant 3 : index
    %c0_251 = arith.constant 0 : index
    %141 = vector.load %arg1[%c0_248, %c5_249, %c3_250, %c0_251] : memref<1x8x8x64xbf16, #tpu.memory_space<vmem>>, vector<1x1x5x64xbf16>
    %142 = vector.shape_cast %141 : vector<1x1x5x64xbf16> to vector<5x64xbf16>
    %c0_252 = arith.constant 0 : index
    %c6 = arith.constant 6 : index
    %c0_253 = arith.constant 0 : index
    %c0_254 = arith.constant 0 : index
    %143 = vector.load %arg1[%c0_252, %c6, %c0_253, %c0_254] : memref<1x8x8x64xbf16, #tpu.memory_space<vmem>>, vector<1x1x5x64xbf16>
    %144 = vector.shape_cast %143 : vector<1x1x5x64xbf16> to vector<5x64xbf16>
    %c0_255 = arith.constant 0 : index
    %c6_256 = arith.constant 6 : index
    %c1_257 = arith.constant 1 : index
    %c0_258 = arith.constant 0 : index
    %145 = vector.load %arg1[%c0_255, %c6_256, %c1_257, %c0_258] : memref<1x8x8x64xbf16, #tpu.memory_space<vmem>>, vector<1x1x5x64xbf16>
    %146 = vector.shape_cast %145 : vector<1x1x5x64xbf16> to vector<5x64xbf16>
    %c0_259 = arith.constant 0 : index
    %c6_260 = arith.constant 6 : index
    %c2_261 = arith.constant 2 : index
    %c0_262 = arith.constant 0 : index
    %147 = vector.load %arg1[%c0_259, %c6_260, %c2_261, %c0_262] : memref<1x8x8x64xbf16, #tpu.memory_space<vmem>>, vector<1x1x5x64xbf16>
    %148 = vector.shape_cast %147 : vector<1x1x5x64xbf16> to vector<5x64xbf16>
    %c0_263 = arith.constant 0 : index
    %c6_264 = arith.constant 6 : index
    %c3_265 = arith.constant 3 : index
    %c0_266 = arith.constant 0 : index
    %149 = vector.load %arg1[%c0_263, %c6_264, %c3_265, %c0_266] : memref<1x8x8x64xbf16, #tpu.memory_space<vmem>>, vector<1x1x5x64xbf16>
    %150 = vector.shape_cast %149 : vector<1x1x5x64xbf16> to vector<5x64xbf16>
    %151 = tpu.concatenate %120, %122, %124, %126, %128, %130, %132, %134, %136, %138, %140, %142, %144, %146, %148, %150 in 1 : vector<5x64xbf16>, vector<5x64xbf16>, vector<5x64xbf16>, vector<5x64xbf16>, vector<5x64xbf16>, vector<5x64xbf16>, vector<5x64xbf16>, vector<5x64xbf16>, vector<5x64xbf16>, vector<5x64xbf16>, vector<5x64xbf16>, vector<5x64xbf16>, vector<5x64xbf16>, vector<5x64xbf16>, vector<5x64xbf16>, vector<5x64xbf16> -> vector<5x1024xbf16>
    %cst_267 = arith.constant dense<0.000000e+00> : vector<5x1xf32>
    %152 = tpu.matmul %151, %0, %cst_267 {dimension_numbers = #tpu.dot_dimension_numbers<[1], [0], [0], [1], [0, 0, 1, 1], [], []>} : vector<5x1024xbf16>, vector<1024x1xbf16>, vector<5x1xf32> -> vector<5x1xf32>
    %153 = vector.broadcast %1 : vector<1x1xf32> to vector<5x1xf32>
    %154 = arith.addf %152, %153 : vector<5x1xf32>
    %c0_268 = arith.constant 0 : index
    %c3_269 = arith.constant 3 : index
    %c0_270 = arith.constant 0 : index
    %c0_271 = arith.constant 0 : index
    %155 = vector.load %arg4[%c0_268, %c3_269, %c0_270, %c0_271] : memref<1x5x5x1xf32, #tpu.memory_space<vmem>>, vector<1x1x5x1xf32>
    %156 = vector.shape_cast %155 : vector<1x1x5x1xf32> to vector<5x1xf32>
    %157 = vector.shape_cast %154 : vector<5x1xf32> to vector<1x1x5x1xf32>
    tpu.vector_store %arg4[%c0_268, %c3_269, %c0_270, %c0_271], %157 {strides = array<i32>} : memref<1x5x5x1xf32, #tpu.memory_space<vmem>>, vector<1x1x5x1xf32>,
    %c0_272 = arith.constant 0 : index
    %c4_273 = arith.constant 4 : index
    %c0_274 = arith.constant 0 : index
    %c0_275 = arith.constant 0 : index
    %158 = vector.load %arg1[%c0_272, %c4_273, %c0_274, %c0_275] : memref<1x8x8x64xbf16, #tpu.memory_space<vmem>>, vector<1x1x5x64xbf16>
    %159 = vector.shape_cast %158 : vector<1x1x5x64xbf16> to vector<5x64xbf16>
    %c0_276 = arith.constant 0 : index
    %c4_277 = arith.constant 4 : index
    %c1_278 = arith.constant 1 : index
    %c0_279 = arith.constant 0 : index
    %160 = vector.load %arg1[%c0_276, %c4_277, %c1_278, %c0_279] : memref<1x8x8x64xbf16, #tpu.memory_space<vmem>>, vector<1x1x5x64xbf16>
    %161 = vector.shape_cast %160 : vector<1x1x5x64xbf16> to vector<5x64xbf16>
    %c0_280 = arith.constant 0 : index
    %c4_281 = arith.constant 4 : index
    %c2_282 = arith.constant 2 : index
    %c0_283 = arith.constant 0 : index
    %162 = vector.load %arg1[%c0_280, %c4_281, %c2_282, %c0_283] : memref<1x8x8x64xbf16, #tpu.memory_space<vmem>>, vector<1x1x5x64xbf16>
    %163 = vector.shape_cast %162 : vector<1x1x5x64xbf16> to vector<5x64xbf16>
    %c0_284 = arith.constant 0 : index
    %c4_285 = arith.constant 4 : index
    %c3_286 = arith.constant 3 : index
    %c0_287 = arith.constant 0 : index
    %164 = vector.load %arg1[%c0_284, %c4_285, %c3_286, %c0_287] : memref<1x8x8x64xbf16, #tpu.memory_space<vmem>>, vector<1x1x5x64xbf16>
    %165 = vector.shape_cast %164 : vector<1x1x5x64xbf16> to vector<5x64xbf16>
    %c0_288 = arith.constant 0 : index
    %c5_289 = arith.constant 5 : index
    %c0_290 = arith.constant 0 : index
    %c0_291 = arith.constant 0 : index
    %166 = vector.load %arg1[%c0_288, %c5_289, %c0_290, %c0_291] : memref<1x8x8x64xbf16, #tpu.memory_space<vmem>>, vector<1x1x5x64xbf16>
    %167 = vector.shape_cast %166 : vector<1x1x5x64xbf16> to vector<5x64xbf16>
    %c0_292 = arith.constant 0 : index
    %c5_293 = arith.constant 5 : index
    %c1_294 = arith.constant 1 : index
    %c0_295 = arith.constant 0 : index
    %168 = vector.load %arg1[%c0_292, %c5_293, %c1_294, %c0_295] : memref<1x8x8x64xbf16, #tpu.memory_space<vmem>>, vector<1x1x5x64xbf16>
    %169 = vector.shape_cast %168 : vector<1x1x5x64xbf16> to vector<5x64xbf16>
    %c0_296 = arith.constant 0 : index
    %c5_297 = arith.constant 5 : index
    %c2_298 = arith.constant 2 : index
    %c0_299 = arith.constant 0 : index
    %170 = vector.load %arg1[%c0_296, %c5_297, %c2_298, %c0_299] : memref<1x8x8x64xbf16, #tpu.memory_space<vmem>>, vector<1x1x5x64xbf16>
    %171 = vector.shape_cast %170 : vector<1x1x5x64xbf16> to vector<5x64xbf16>
    %c0_300 = arith.constant 0 : index
    %c5_301 = arith.constant 5 : index
    %c3_302 = arith.constant 3 : index
    %c0_303 = arith.constant 0 : index
    %172 = vector.load %arg1[%c0_300, %c5_301, %c3_302, %c0_303] : memref<1x8x8x64xbf16, #tpu.memory_space<vmem>>, vector<1x1x5x64xbf16>
    %173 = vector.shape_cast %172 : vector<1x1x5x64xbf16> to vector<5x64xbf16>
    %c0_304 = arith.constant 0 : index
    %c6_305 = arith.constant 6 : index
    %c0_306 = arith.constant 0 : index
    %c0_307 = arith.constant 0 : index
    %174 = vector.load %arg1[%c0_304, %c6_305, %c0_306, %c0_307] : memref<1x8x8x64xbf16, #tpu.memory_space<vmem>>, vector<1x1x5x64xbf16>
    %175 = vector.shape_cast %174 : vector<1x1x5x64xbf16> to vector<5x64xbf16>
    %c0_308 = arith.constant 0 : index
    %c6_309 = arith.constant 6 : index
    %c1_310 = arith.constant 1 : index
    %c0_311 = arith.constant 0 : index
    %176 = vector.load %arg1[%c0_308, %c6_309, %c1_310, %c0_311] : memref<1x8x8x64xbf16, #tpu.memory_space<vmem>>, vector<1x1x5x64xbf16>
    %177 = vector.shape_cast %176 : vector<1x1x5x64xbf16> to vector<5x64xbf16>
    %c0_312 = arith.constant 0 : index
    %c6_313 = arith.constant 6 : index
    %c2_314 = arith.constant 2 : index
    %c0_315 = arith.constant 0 : index
    %178 = vector.load %arg1[%c0_312, %c6_313, %c2_314, %c0_315] : memref<1x8x8x64xbf16, #tpu.memory_space<vmem>>, vector<1x1x5x64xbf16>
    %179 = vector.shape_cast %178 : vector<1x1x5x64xbf16> to vector<5x64xbf16>
    %c0_316 = arith.constant 0 : index
    %c6_317 = arith.constant 6 : index
    %c3_318 = arith.constant 3 : index
    %c0_319 = arith.constant 0 : index
    %180 = vector.load %arg1[%c0_316, %c6_317, %c3_318, %c0_319] : memref<1x8x8x64xbf16, #tpu.memory_space<vmem>>, vector<1x1x5x64xbf16>
    %181 = vector.shape_cast %180 : vector<1x1x5x64xbf16> to vector<5x64xbf16>
    %c0_320 = arith.constant 0 : index
    %c7 = arith.constant 7 : index
    %c0_321 = arith.constant 0 : index
    %c0_322 = arith.constant 0 : index
    %182 = vector.load %arg1[%c0_320, %c7, %c0_321, %c0_322] : memref<1x8x8x64xbf16, #tpu.memory_space<vmem>>, vector<1x1x5x64xbf16>
    %183 = vector.shape_cast %182 : vector<1x1x5x64xbf16> to vector<5x64xbf16>
    %c0_323 = arith.constant 0 : index
    %c7_324 = arith.constant 7 : index
    %c1_325 = arith.constant 1 : index
    %c0_326 = arith.constant 0 : index
    %184 = vector.load %arg1[%c0_323, %c7_324, %c1_325, %c0_326] : memref<1x8x8x64xbf16, #tpu.memory_space<vmem>>, vector<1x1x5x64xbf16>
    %185 = vector.shape_cast %184 : vector<1x1x5x64xbf16> to vector<5x64xbf16>
    %c0_327 = arith.constant 0 : index
    %c7_328 = arith.constant 7 : index
    %c2_329 = arith.constant 2 : index
    %c0_330 = arith.constant 0 : index
    %186 = vector.load %arg1[%c0_327, %c7_328, %c2_329, %c0_330] : memref<1x8x8x64xbf16, #tpu.memory_space<vmem>>, vector<1x1x5x64xbf16>
    %187 = vector.shape_cast %186 : vector<1x1x5x64xbf16> to vector<5x64xbf16>
    %c0_331 = arith.constant 0 : index
    %c7_332 = arith.constant 7 : index
    %c3_333 = arith.constant 3 : index
    %c0_334 = arith.constant 0 : index
    %188 = vector.load %arg1[%c0_331, %c7_332, %c3_333, %c0_334] : memref<1x8x8x64xbf16, #tpu.memory_space<vmem>>, vector<1x1x5x64xbf16>
    %189 = vector.shape_cast %188 : vector<1x1x5x64xbf16> to vector<5x64xbf16>
    %190 = tpu.concatenate %159, %161, %163, %165, %167, %169, %171, %173, %175, %177, %179, %181, %183, %185, %187, %189 in 1 : vector<5x64xbf16>, vector<5x64xbf16>, vector<5x64xbf16>, vector<5x64xbf16>, vector<5x64xbf16>, vector<5x64xbf16>, vector<5x64xbf16>, vector<5x64xbf16>, vector<5x64xbf16>, vector<5x64xbf16>, vector<5x64xbf16>, vector<5x64xbf16>, vector<5x64xbf16>, vector<5x64xbf16>, vector<5x64xbf16>, vector<5x64xbf16> -> vector<5x1024xbf16>
    %cst_335 = arith.constant dense<0.000000e+00> : vector<5x1xf32>
    %191 = tpu.matmul %190, %0, %cst_335 {dimension_numbers = #tpu.dot_dimension_numbers<[1], [0], [0], [1], [0, 0, 1, 1], [], []>} : vector<5x1024xbf16>, vector<1024x1xbf16>, vector<5x1xf32> -> vector<5x1xf32>
    %192 = vector.broadcast %1 : vector<1x1xf32> to vector<5x1xf32>
    %193 = arith.addf %191, %192 : vector<5x1xf32>
    %c0_336 = arith.constant 0 : index
    %c4_337 = arith.constant 4 : index
    %c0_338 = arith.constant 0 : index
    %c0_339 = arith.constant 0 : index
    %194 = vector.load %arg4[%c0_336, %c4_337, %c0_338, %c0_339] : memref<1x5x5x1xf32, #tpu.memory_space<vmem>>, vector<1x1x5x1xf32>
    %195 = vector.shape_cast %194 : vector<1x1x5x1xf32> to vector<5x1xf32>
    %196 = vector.shape_cast %193 : vector<5x1xf32> to vector<1x1x5x1xf32>
    tpu.vector_store %arg4[%c0_336, %c4_337, %c0_338, %c0_339], %196 {strides = array<i32>} : memref<1x5x5x1xf32, #tpu.memory_space<vmem>>, vector<1x1x5x1xf32>,
    return
  }
  func.func @transform_0(%arg0: i32) -> (i32, i32, i32, i32) {
    %c0_i32 = arith.constant 0 : i32
    %c0_i32_0 = arith.constant 0 : i32
    %c0_i32_1 = arith.constant 0 : i32
    %c0_i32_2 = arith.constant 0 : i32
    return %arg0, %c0_i32, %c0_i32_0, %c0_i32_1 : i32, i32, i32, i32
  }
  func.func @transform_1(%arg0: i32) -> (i32, i32) {
    %c0_i32 = arith.constant 0 : i32
    %c0_i32_0 = arith.constant 0 : i32
    %c0_i32_1 = arith.constant 0 : i32
    return %c0_i32, %c0_i32_0 : i32, i32
  }
  func.func @transform_2(%arg0: i32) -> (i32, i32) {
    %c0_i32 = arith.constant 0 : i32
    %c0_i32_0 = arith.constant 0 : i32
    %c0_i32_1 = arith.constant 0 : i32
    return %c0_i32, %c0_i32_0 : i32, i32
  }
  func.func @transform_3(%arg0: i32) -> (i32, i32, i32, i32) {
    %c0_i32 = arith.constant 0 : i32
    %c0_i32_0 = arith.constant 0 : i32
    %c0_i32_1 = arith.constant 0 : i32
    %c0_i32_2 = arith.constant 0 : i32
    return %arg0, %c0_i32, %c0_i32_0, %c0_i32_1 : i32, i32, i32, i32
  }
}

</mosaic_0001>

<bundles_post_ra>
// kernel: _lambda_.5
= control target key start
LH: loop header
LB: loop body
LE: loop exit
PB: predicated region body
PF: predicated region fallthrough
CT: control target
= control target key end

     0   :  { %s1186_s12 = smov 0   ;;  %s1400_s0 = inlined_call_operand.vmem [shape: bf16[2,9,9,48], index: 0, kind: input, shape index: {}]   ;;  %s1401_s1 = inlined_call_operand.vmem [shape: bf16[48,8], index: 1, kind: input, shape index: {}]   ;;  %s1402_s2 = inlined_call_operand.vmem [shape: f32[1,8], index: 2, kind: input, shape index: {}]   ;;  %s1403_s3 = inlined_call_operand.vmem [shape: bf16[2,9,9,8], index: 3, kind: output, shape index: {}]  }
   0x1 LB: > { %s900_s13 = sadd.s32 4294967295, %s1162_s12   ;;  %p904_p0 = scmp.ge.s32.totalorder %s1162_s12, 1  ;;  %s1162_s12 = sphi %s1186_s12, %s13_s12  }
   0x2   : > { %p137_p1 = scmp.lt.s32.totalorder %s1162_s12, 3 }
   0x4   : > { %p138_p2 = pnand %p904_p0, %p137_p1 }
   0x5   : > { %v1197_v0 = vld [vmem:[%s1401_s1] sm:$0xff] (!%p138_p2)   ;;  %v1164_v1 = vmov (!%p138_p2), 0.0   ;;  %v1205_v2 = vld [vmem:[%s1401_s1 + $0x8] sm:$0xff] (!%p138_p2)   ;;  %p161_p3 = scmp.lt.s32.totalorder (!%p138_p2), %s900_s13, 1  ;;  %vm1165_vm0 = vmmov (!%p138_p2), 0   ;;  %v1220_v3 = vld [vmem:[%s1401_s1 + $0x10] sm:$0xff] (!%p138_p2)  }
   0x6   : > { %141 = sbr.rel (%p138_p2) target bundleno = 289 (0x121), region = 32  ;;  %1043 = vmatprep.subr.bf16.mxu0 (!%p138_p2), %v1164_v1  ;;  %1053 = vmatprep.subr.bf16.mxu1 (!%p138_p2), %v1164_v1  ;;  %vm210_vm1 = vcmask (!%p138_p2), 392192   ;;  %v1312_v13 = vld [vmem:[%s1402_s2] ss:$0 sm:$0xff] (!%p138_p2)  ;;  %vm271_vm4 = vcmask (!%p138_p2), 57344   ;;  %vm269_vm6 = vcmask (!%p138_p2), 60416  }
   0x7   : > { %1044 = vmatpush3.bf16.msra.mxu0 (!%p138_p2), %v1197_v0  ;;  %1054 = vmatpush3.bf16.msra.mxu1 (!%p138_p2), %v1197_v0  ;;  %vm272_vm5 = vsmask.f32 (!%p138_p2), 256 }
   0x8   : > { %1045 = vmatprep.subr.bf16.mxu0 (!%p138_p2), %v1164_v1  ;;  %1049 = vmatprep.mubr.msk.bf16.mxu0 (!%p138_p2), %vm1165_vm0, %v1164_v1  ;;  %vm1325_vm9 = vmand (!%p138_p2), %vm271_vm4, %vm272_vm5 }
   0x9   : > { %1055 = vmatprep.subr.bf16.mxu1 (!%p138_p2), %v1164_v1  ;;  %1059 = vmatprep.mubr.msk.bf16.mxu1 (!%p138_p2), %vm1165_vm0, %v1164_v1 }
   0xb   : > { %1046 = vmatpush3.bf16.msra.mxu0 (!%p138_p2), %v1205_v2  ;;  %1056 = vmatpush3.bf16.msra.mxu1 (!%p138_p2), %v1205_v2 }
   0xc   : > { %1047 = vmatprep.subr.bf16.mxu0 (!%p138_p2), %v1164_v1  ;;  %1057 = vmatprep.subr.bf16.mxu1 (!%p138_p2), %v1164_v1 }
   0xd   : > { %s1407_s13 = smov (!%p161_p3, %s900_s13), 1 }
   0xe   : > { %s1133_s20 = smul.u32 72, %s1407_s13 }
   0xf   : > { %1048 = vmatpush3.bf16.msra.mxu0 %v1220_v3  ;;  %1058 = vmatpush3.bf16.msra.mxu1 %v1220_v3 }
  0x10   : > { %s1231_s23 = scalar_lea.vmem %s1400_s0, %s1133_s20  ;;  %1063 = vmatprep.subr.bf16.mxu0 %v1164_v1  ;;  %1073 = vmatprep.subr.bf16.mxu1 %v1164_v1  ;;  %s1322_s28 = scalar_lea.vmem %s1403_s3, %s1133_s20 }
  0x11   : > { %v1147_v4 = vld [vmem:[%s1231_s23] sm:$0x1f]   ;;  %v1148_v5 = vld [vmem:[%s1231_s23 + $0x8] sm:$0x1f]   ;;  %v1149_v6 = vld [vmem:[%s1231_s23 + $0x10] sm:$0x1f]  }
  0x12   : > { %1050 = vmatmul.mubr.msk.bf16.vlgmr.msra.gmra.mrb[0].mxu0 %vm210_vm1, %v1147_v4  ;;  %1060 = vmatmul.mubr.msk.bf16.vlgmr.msra.gmra.mrb[0].mxu1 %vm210_vm1, %v1148_v5  ;;  %v1150_v7 = vld [vmem:[%s1231_s23 + $0x18] sm:$0x1f]   ;;  %v1151_v8 = vld [vmem:[%s1231_s23 + $0x20] sm:$0x1f]   ;;  %v1152_v9 = vld [vmem:[%s1231_s23 + $0x28] sm:$0x1f]  }
  0x13   : > { %1064 = vmatpush3.bf16.msra.mxu0 %v1197_v0  ;;  %1074 = vmatpush3.bf16.msra.mxu1 %v1197_v0  ;;  %v1153_v10 = vld [vmem:[%s1231_s23 + $0x30] sm:$0x1f]   ;;  %v1154_v11 = vld [vmem:[%s1231_s23 + $0x38] sm:$0x1f]   ;;  %v1155_v12 = vld [vmem:[%s1231_s23 + $0x40] sm:$0x1f]  }
  0x14   : > { %1065 = vmatprep.subr.bf16.mxu0 %v1164_v1  ;;  %1069 = vmatprep.mubr.msk.bf16.mxu0 %vm1165_vm0, %v1164_v1  ;;  %v274_v35 = vld [vmem:[%s1322_s28 + $0x4] sm:$0x1]  ;;  %v922_v39 = vld [vmem:[%s1322_s28 + $0xc] sm:$0x1]  ;;  %v931_v63 = vld [vmem:[%s1322_s28 + $0x14] sm:$0x1] }
  0x15   : > { %1075 = vmatprep.subr.bf16.mxu1 %v1164_v1  ;;  %1079 = vmatprep.mubr.msk.bf16.mxu1 %vm1165_vm0, %v1164_v1 }
  0x17   : > { %1066 = vmatpush3.bf16.msra.mxu0 %v1205_v2  ;;  %1076 = vmatpush3.bf16.msra.mxu1 %v1205_v2 }
  0x18   : > { %1067 = vmatprep.subr.bf16.mxu0 %v1164_v1  ;;  %1077 = vmatprep.subr.bf16.mxu1 %v1164_v1 }
  0x1b   : > { %1068 = vmatpush3.bf16.msra.mxu0 %v1220_v3  ;;  %1078 = vmatpush3.bf16.msra.mxu1 %v1220_v3 }
  0x1c   : > { %1083 = vmatprep.subr.bf16.mxu0 %v1164_v1  ;;  %1093 = vmatprep.subr.bf16.mxu1 %v1164_v1 }
  0x1e   : > { %1070 = vmatmul.mubr.msk.bf16.vlgmr.msra.gmra.mrb[4].mxu0 %vm210_vm1, %v1149_v6  ;;  %1080 = vmatmul.mubr.msk.bf16.vlgmr.msra.gmra.mrb[4].mxu1 %vm210_vm1, %v1150_v7 }
  0x1f   : > { %1084 = vmatpush3.bf16.msra.mxu0 %v1197_v0  ;;  %1094 = vmatpush3.bf16.msra.mxu1 %v1197_v0 }
  0x20   : > { %1085 = vmatprep.subr.bf16.mxu0 %v1164_v1  ;;  %1089 = vmatprep.mubr.msk.bf16.mxu0 %vm1165_vm0, %v1164_v1 }
  0x21   : > { %1095 = vmatprep.subr.bf16.mxu1 %v1164_v1  ;;  %1099 = vmatprep.mubr.msk.bf16.mxu1 %vm1165_vm0, %v1164_v1 }
  0x23   : > { %1086 = vmatpush3.bf16.msra.mxu0 %v1205_v2  ;;  %1096 = vmatpush3.bf16.msra.mxu1 %v1205_v2 }
  0x24   : > { %1087 = vmatprep.subr.bf16.mxu0 %v1164_v1  ;;  %1097 = vmatprep.subr.bf16.mxu1 %v1164_v1 }
  0x27   : > { %1088 = vmatpush3.bf16.msra.mxu0 %v1220_v3  ;;  %1098 = vmatpush3.bf16.msra.mxu1 %v1220_v3 }
  0x28   : > { %1103 = vmatprep.subr.bf16.mxu0 %v1164_v1  ;;  %1113 = vmatprep.subr.bf16.mxu1 %v1164_v1 }
  0x2a   : > { %1090 = vmatmul.mubr.msk.bf16.vlgmr.msra.gmra.mrb[8].mxu0 %vm210_vm1, %v1151_v8  ;;  %1100 = vmatmul.mubr.msk.bf16.vlgmr.msra.gmra.mrb[8].mxu1 %vm210_vm1, %v1152_v9 }
  0x2b   : > { %1104 = vmatpush3.bf16.msra.mxu0 %v1197_v0  ;;  %1114 = vmatpush3.bf16.msra.mxu1 %v1197_v0 }
  0x2c   : > { %1105 = vmatprep.subr.bf16.mxu0 %v1164_v1  ;;  %1109 = vmatprep.mubr.msk.bf16.mxu0 %vm1165_vm0, %v1164_v1 }
  0x2d   : > { %1115 = vmatprep.subr.bf16.mxu1 %v1164_v1  ;;  %1119 = vmatprep.mubr.msk.bf16.mxu1 %vm1165_vm0, %v1164_v1 }
  0x2f   : > { %1106 = vmatpush3.bf16.msra.mxu0 %v1205_v2  ;;  %1116 = vmatpush3.bf16.msra.mxu1 %v1205_v2 }
  0x30   : > { %1107 = vmatprep.subr.bf16.mxu0 %v1164_v1  ;;  %1117 = vmatprep.subr.bf16.mxu1 %v1164_v1 }
  0x33   : > { %1108 = vmatpush3.bf16.msra.mxu0 %v1220_v3  ;;  %1118 = vmatpush3.bf16.msra.mxu1 %v1220_v3 }
  0x34   : > { %1123 = vmatprep.subr.bf16.mxu0 %v1164_v1 }
  0x36   : > { %1110 = vmatmul.mubr.msk.bf16.vlgmr.msra.gmra.mrb[12].mxu0 %vm210_vm1, %v1153_v10  ;;  %1120 = vmatmul.mubr.msk.bf16.vlgmr.msra.gmra.mrb[12].mxu1 %vm210_vm1, %v1154_v11 }
  0x37   : > { %1124 = vmatpush3.bf16.msra.mxu0 %v1197_v0  ;;  %1129 = vmatprep.mubr.msk.bf16.mxu0 %vm1165_vm0, %v1164_v1 }
  0x38   : > { %1125 = vmatprep.subr.bf16.mxu0 %v1164_v1 }
  0x3b   : > { %1126 = vmatpush3.bf16.msra.mxu0 %v1205_v2 }
  0x3c   : > { %1127 = vmatprep.subr.bf16.mxu0 %v1164_v1 }
  0x3f   : > { %1128 = vmatpush3.bf16.msra.mxu0 %v1220_v3  ;;  %v940_v3 = vld [vmem:[%s1322_s28 + $0x1c] sm:$0x1] }
  0x42   : > { %1130 = vmatmul.mubr.msk.bf16.vlgmr.msra.gmra.mrb[16].mxu0 %vm210_vm1, %v1155_v12 }
  0xe5   : > { %v248_v14 = vpop.f32.mrb[0].mxu0  ;;  %v322_v15 = vpop.f32.mrb[0].mxu1 }
  0xe6   : > { %v249_v16 = vadd.f32 %v1312_v13, %v248_v14  ;;  %v1051_v17 = vpop.f32.mrb[1].mxu0  ;;  %v323_v18 = vadd.f32 %v1312_v13, %v322_v15  ;;  %v1061_v19 = vpop.f32.mrb[1].mxu1 }
  0xe7   : > { %v251_v20 = vpop.f32.mrb[2].mxu0  ;;  %v325_v21 = vpop.f32.mrb[2].mxu1 }
  0xe8   : > { %vm255_vm2 = vcmp.ge.f32.partialorder %v249_v16, 0.0  ;;  %v257_v22 = vmul.f32 0.2, %v249_v16  ;;  %v252_v23 = vadd.f32 %v1312_v13, %v251_v20  ;;  %v1052_v24 = vpop.f32.mrb[3].mxu0  ;;  %vm329_vm3 = vcmp.ge.f32.partialorder %v323_v18, 0.0  ;;  %v1062_v25 = vpop.f32.mrb[3].mxu1 }
  0xe9   : > { %v331_v26 = vmul.f32 0.2, %v323_v18  ;;  %v326_v27 = vadd.f32 %v1312_v13, %v325_v21 }
  0xea   : > { %v259_v28 = vsel %vm255_vm2, %v249_v16, %v257_v22  ;;  %vm256_vm7 = vcmp.ge.f32.partialorder %v252_v23, 0.0  ;;  %v258_v29 = vmul.f32 0.2, %v252_v23 }
  0xeb   : > { %v989_v30 = vpack.c.bf16 %v259_v28, %v259_v28  ;;  %v333_v31 = vsel %vm329_vm3, %v323_v18, %v331_v26  ;;  %vm330_vm8 = vcmp.ge.f32.partialorder %v326_v27, 0.0  ;;  %v332_v32 = vmul.f32 0.2, %v326_v27  ;;  %v949_v28 = vld [vmem:[%s1322_s28 + $0x24] sm:$0x1] }
  0xec   : > { %v260_v33 = vsel %vm256_vm7, %v252_v23, %v258_v29  ;;  %v991_v36 = vpack.c.bf16 %v333_v31, %v333_v31 }
  0xed   : > { %270 = vst.msk [vmem:[%s1322_s28] sm:$0xf] %vm269_vm6, %v989_v30  ;;  %v990_v37 = vpack.c.bf16 %v260_v33, %v260_v33  ;;  %v334_v38 = vsel %vm330_vm8, %v326_v27, %v332_v32  ;;  %v958_v32 = vld [vmem:[%s1322_s28 + $0x2c] sm:$0x1] }
  0xee   : > { %921 = vst.msk [vmem:[%s1322_s28 + $0x8] sm:$0xf] %vm269_vm6, %v991_v36  ;;  %v992_v40 = vpack.c.bf16 %v334_v38, %v334_v38 }
  0xef   : > { %v275_v41 = vsel %vm1325_vm9, %v990_v37, %v274_v35 }
  0xf0   : > { %276 = vst [vmem:[%s1322_s28 + $0x4] sm:$0x1] %v275_v41  ;;  %v346_v42 = vsel %vm1325_vm9, %v992_v40, %v922_v39 }
  0xf1   : > { %923 = vst [vmem:[%s1322_s28 + $0xc] sm:$0x1] %v346_v42  ;;  %v393_v43 = vpop.f32.mrb[4].mxu0  ;;  %v464_v44 = vpop.f32.mrb[4].mxu1 }
  0xf2   : > { %v394_v45 = vadd.f32 %v1312_v13, %v393_v43  ;;  %v1071_v46 = vpop.f32.mrb[5].mxu0  ;;  %v465_v47 = vadd.f32 %v1312_v13, %v464_v44  ;;  %v1081_v48 = vpop.f32.mrb[5].mxu1 }
  0xf3   : > { %v396_v49 = vpop.f32.mrb[6].mxu0  ;;  %v467_v50 = vpop.f32.mrb[6].mxu1 }
  0xf4   : > { %vm400_vm10 = vcmp.ge.f32.partialorder %v394_v45, 0.0  ;;  %v402_v51 = vmul.f32 0.2, %v394_v45  ;;  %v397_v52 = vadd.f32 %v1312_v13, %v396_v49  ;;  %v1072_v53 = vpop.f32.mrb[7].mxu0  ;;  %vm471_vm11 = vcmp.ge.f32.partialorder %v465_v47, 0.0  ;;  %v1082_v54 = vpop.f32.mrb[7].mxu1 }
  0xf5   : > { %v473_v55 = vmul.f32 0.2, %v465_v47  ;;  %v468_v56 = vadd.f32 %v1312_v13, %v467_v50 }
  0xf6   : > { %v404_v57 = vsel %vm400_vm10, %v394_v45, %v402_v51  ;;  %vm401_vm12 = vcmp.ge.f32.partialorder %v397_v52, 0.0  ;;  %v403_v58 = vmul.f32 0.2, %v397_v52 }
  0xf7   : > { %v993_v59 = vpack.c.bf16 %v404_v57, %v404_v57  ;;  %v475_v60 = vsel %vm471_vm11, %v465_v47, %v473_v55  ;;  %vm472_vm13 = vcmp.ge.f32.partialorder %v468_v56, 0.0  ;;  %v474_v61 = vmul.f32 0.2, %v468_v56  ;;  %v967_v57 = vld [vmem:[%s1322_s28 + $0x34] sm:$0x1] }
  0xf8   : > { %v405_v62 = vsel %vm401_vm12, %v397_v52, %v403_v58  ;;  %v995_v0 = vpack.c.bf16 %v475_v60, %v475_v60 }
  0xf9   : > { %930 = vst.msk [vmem:[%s1322_s28 + $0x10] sm:$0xf] %vm269_vm6, %v993_v59  ;;  %v994_v1 = vpack.c.bf16 %v405_v62, %v405_v62  ;;  %v476_v2 = vsel %vm472_vm13, %v468_v56, %v474_v61  ;;  %v976_v61 = vld [vmem:[%s1322_s28 + $0x3c] sm:$0x1] }
  0xfa   : > { %939 = vst.msk [vmem:[%s1322_s28 + $0x18] sm:$0xf] %vm269_vm6, %v995_v0  ;;  %v996_v4 = vpack.c.bf16 %v476_v2, %v476_v2 }
  0xfb   : > { %v417_v5 = vsel %vm1325_vm9, %v994_v1, %v931_v63 }
  0xfc   : > { %932 = vst [vmem:[%s1322_s28 + $0x14] sm:$0x1] %v417_v5  ;;  %v488_v6 = vsel %vm1325_vm9, %v996_v4, %v940_v3 }
  0xfd   : > { %941 = vst [vmem:[%s1322_s28 + $0x1c] sm:$0x1] %v488_v6  ;;  %v535_v7 = vpop.f32.mrb[8].mxu0  ;;  %v606_v8 = vpop.f32.mrb[8].mxu1 }
  0xfe   : > { %v536_v9 = vadd.f32 %v1312_v13, %v535_v7  ;;  %v1091_v10 = vpop.f32.mrb[9].mxu0  ;;  %v607_v11 = vadd.f32 %v1312_v13, %v606_v8  ;;  %v1101_v12 = vpop.f32.mrb[9].mxu1 }
  0xff   : > { %v538_v14 = vpop.f32.mrb[10].mxu0  ;;  %v609_v15 = vpop.f32.mrb[10].mxu1  ;;  %v985_v12 = vld [vmem:[%s1322_s28 + $0x44] sm:$0x1] }
 0x100   : > { %vm542_vm14 = vcmp.ge.f32.partialorder %v536_v9, 0.0  ;;  %v544_v16 = vmul.f32 0.2, %v536_v9  ;;  %v539_v17 = vadd.f32 %v1312_v13, %v538_v14  ;;  %v1092_v18 = vpop.f32.mrb[11].mxu0  ;;  %vm613_vm15 = vcmp.ge.f32.partialorder %v607_v11, 0.0  ;;  %v1102_v19 = vpop.f32.mrb[11].mxu1 }
 0x101   : > { %v615_v20 = vmul.f32 0.2, %v607_v11  ;;  %v610_v21 = vadd.f32 %v1312_v13, %v609_v15 }
 0x102   : > { %v546_v22 = vsel %vm542_vm14, %v536_v9, %v544_v16  ;;  %vm543_vm0 = vcmp.ge.f32.partialorder %v539_v17, 0.0  ;;  %v545_v23 = vmul.f32 0.2, %v539_v17 }
 0x103   : > { %v997_v24 = vpack.c.bf16 %v546_v22, %v546_v22  ;;  %v617_v25 = vsel %vm613_vm15, %v607_v11, %v615_v20  ;;  %vm614_vm1 = vcmp.ge.f32.partialorder %v610_v21, 0.0  ;;  %v616_v26 = vmul.f32 0.2, %v610_v21 }
 0x104   : > { %v547_v27 = vsel %vm543_vm0, %v539_v17, %v545_v23  ;;  %v999_v29 = vpack.c.bf16 %v617_v25, %v617_v25 }
 0x105   : > { %948 = vst.msk [vmem:[%s1322_s28 + $0x20] sm:$0xf] %vm269_vm6, %v997_v24  ;;  %v998_v30 = vpack.c.bf16 %v547_v27, %v547_v27  ;;  %v618_v31 = vsel %vm614_vm1, %v610_v21, %v616_v26 }
 0x106   : > { %957 = vst.msk [vmem:[%s1322_s28 + $0x28] sm:$0xf] %vm269_vm6, %v999_v29  ;;  %v1000_v33 = vpack.c.bf16 %v618_v31, %v618_v31 }
 0x107   : > { %v559_v35 = vsel %vm1325_vm9, %v998_v30, %v949_v28 }
 0x108   : > { %950 = vst [vmem:[%s1322_s28 + $0x24] sm:$0x1] %v559_v35  ;;  %v630_v36 = vsel %vm1325_vm9, %v1000_v33, %v958_v32 }
 0x109   : > { %959 = vst [vmem:[%s1322_s28 + $0x2c] sm:$0x1] %v630_v36  ;;  %v677_v37 = vpop.f32.mrb[12].mxu0  ;;  %v748_v38 = vpop.f32.mrb[12].mxu1 }
 0x10a   : > { %v678_v39 = vadd.f32 %v1312_v13, %v677_v37  ;;  %v1111_v40 = vpop.f32.mrb[13].mxu0  ;;  %v749_v41 = vadd.f32 %v1312_v13, %v748_v38  ;;  %v1121_v42 = vpop.f32.mrb[13].mxu1 }
 0x10b   : > { %v680_v43 = vpop.f32.mrb[14].mxu0  ;;  %v751_v44 = vpop.f32.mrb[14].mxu1 }
 0x10c   : > { %vm684_vm2 = vcmp.ge.f32.partialorder %v678_v39, 0.0  ;;  %v686_v45 = vmul.f32 0.2, %v678_v39  ;;  %v681_v46 = vadd.f32 %v1312_v13, %v680_v43  ;;  %v1112_v47 = vpop.f32.mrb[15].mxu0  ;;  %vm755_vm3 = vcmp.ge.f32.partialorder %v749_v41, 0.0  ;;  %v1122_v48 = vpop.f32.mrb[15].mxu1 }
 0x10d   : > { %v757_v49 = vmul.f32 0.2, %v749_v41  ;;  %v752_v50 = vadd.f32 %v1312_v13, %v751_v44 }
 0x10e   : > { %v688_v51 = vsel %vm684_vm2, %v678_v39, %v686_v45  ;;  %vm685_vm4 = vcmp.ge.f32.partialorder %v681_v46, 0.0  ;;  %v687_v52 = vmul.f32 0.2, %v681_v46 }
 0x10f   : > { %v1001_v53 = vpack.c.bf16 %v688_v51, %v688_v51  ;;  %v759_v54 = vsel %vm755_vm3, %v749_v41, %v757_v49  ;;  %vm756_vm5 = vcmp.ge.f32.partialorder %v752_v50, 0.0  ;;  %v758_v55 = vmul.f32 0.2, %v752_v50 }
 0x110   : > { %v689_v56 = vsel %vm685_vm4, %v681_v46, %v687_v52  ;;  %v1003_v58 = vpack.c.bf16 %v759_v54, %v759_v54 }
 0x111   : > { %966 = vst.msk [vmem:[%s1322_s28 + $0x30] sm:$0xf] %vm269_vm6, %v1001_v53  ;;  %v1002_v59 = vpack.c.bf16 %v689_v56, %v689_v56  ;;  %v760_v60 = vsel %vm756_vm5, %v752_v50, %v758_v55 }
 0x112   : > { %975 = vst.msk [vmem:[%s1322_s28 + $0x38] sm:$0xf] %vm269_vm6, %v1003_v58  ;;  %v1004_v62 = vpack.c.bf16 %v760_v60, %v760_v60 }
 0x113   : > { %v701_v63 = vsel %vm1325_vm9, %v1002_v59, %v967_v57 }
 0x114   : > { %968 = vst [vmem:[%s1322_s28 + $0x34] sm:$0x1] %v701_v63  ;;  %v772_v0 = vsel %vm1325_vm9, %v1004_v62, %v976_v61 }
 0x115   : > { %977 = vst [vmem:[%s1322_s28 + $0x3c] sm:$0x1] %v772_v0  ;;  %v819_v1 = vpop.f32.mrb[16].mxu0 }
 0x116   : > { %v820_v2 = vadd.f32 %v1312_v13, %v819_v1  ;;  %v1131_v3 = vpop.f32.mrb[17].mxu0 }
 0x117   : > { %v822_v4 = vpop.f32.mrb[18].mxu0 }
 0x118   : > { %vm826_vm7 = vcmp.ge.f32.partialorder %v820_v2, 0.0  ;;  %v828_v5 = vmul.f32 0.2, %v820_v2  ;;  %v823_v6 = vadd.f32 %v1312_v13, %v822_v4  ;;  %v1132_v7 = vpop.f32.mrb[19].mxu0 }
 0x11a   : > { %v830_v8 = vsel %vm826_vm7, %v820_v2, %v828_v5  ;;  %vm827_vm8 = vcmp.ge.f32.partialorder %v823_v6, 0.0  ;;  %v829_v9 = vmul.f32 0.2, %v823_v6 }
 0x11b   : > { %v1005_v10 = vpack.c.bf16 %v830_v8, %v830_v8 }
 0x11c   : > { %v831_v11 = vsel %vm827_vm8, %v823_v6, %v829_v9 }
 0x11d   : > { %984 = vst.msk [vmem:[%s1322_s28 + $0x40] sm:$0xf] %vm269_vm6, %v1005_v10  ;;  %v1006_v14 = vpack.c.bf16 %v831_v11, %v831_v11 }
 0x11f   : > { %v843_v15 = vsel %vm1325_vm9, %v1006_v14, %v985_v12 }
 0x120   : > { %986 = vst [vmem:[%s1322_s28 + $0x44] sm:$0x1] %v843_v15 }
 0x121 PF: > { %s13_s12 = sadd.s32 1, %s1162_s12  }
 0x122   : > { %p10_p4 = scmp.ge.s32.totalorder %s13_s12, 4  }
 0x124   :  { %12 = sbr.rel (!%p10_p4) target bundleno = 1 (0x1), region = 78 }

// kernel: _lambda_.6
= control target key start
LH: loop header
LB: loop body
LE: loop exit
PB: predicated region body
PF: predicated region fallthrough
CT: control target
= control target key end

     0   :  { %s1851_s15 = smov 0   ;;  %s2275_s0 = inlined_call_operand.vmem [shape: bf16[2,2,2,7,7,8], index: 0, kind: input, shape index: {}]   ;;  %s2276_s1 = inlined_call_operand.vmem [shape: bf16[128,16], index: 1, kind: input, shape index: {}]   ;;  %s2277_s2 = inlined_call_operand.vmem [shape: f32[1,16], index: 2, kind: input, shape index: {}]   ;;  %s2278_s3 = inlined_call_operand.vmem [shape: bf16[2,5,5,16], index: 3, kind: output, shape index: {0}]   ;;  %s2279_s4 = inlined_call_operand.vmem [shape: f32[2,2,16], index: 4, kind: output, shape index: {1}]  }
   0x1 LB: > { %s1472_s16 = sadd.s32 4294967295, %s1807_s15   ;;  %p1476_p0 = scmp.ge.s32.totalorder %s1807_s15, 1  ;;  %s1807_s15 = sphi %s1851_s15, %s15_s15  }
   0x2   : > { %p165_p1 = scmp.lt.s32.totalorder %s1807_s15, 3 }
   0x4   : > { %p166_p2 = pnand %p1476_p0, %p165_p1 }
   0x5   : > { %p195_p3 = scmp.lt.s32.totalorder (!%p166_p2), %s1472_s16, 1  ;;  %v1862_v0 = vld [vmem:[%s2276_s1] sm:$0xff] (!%p166_p2)   ;;  %v1809_v1 = vmov (!%p166_p2), 0.0   ;;  %v1872_v2 = vld [vmem:[%s2276_s1 + $0x8] sm:$0xff] (!%p166_p2)   ;;  %v1887_v3 = vld [vmem:[%s2276_s1 + $0x10] sm:$0xff] (!%p166_p2)   ;;  %s1810_s27 = smov (!%p166_p2), 32  }
   0x6   : > { %169 = sbr.rel (%p166_p2) target bundleno = 515 (0x203), region = 32  ;;  %1623 = vmatprep.subr.bf16.mxu0 (!%p166_p2), %v1809_v1  ;;  %1643 = vmatprep.subr.bf16.mxu1 (!%p166_p2), %v1809_v1  ;;  %s1811_s28 = smov (!%p166_p2), 8   ;;  %v1902_v8 = vld [vmem:[%s2276_s1 + $0x18] sm:$0xff] (!%p166_p2)   ;;  %v1926_v35 = vld [vmem:[%s2276_s1 + $0x20] sm:$0xff] (!%p166_p2)   ;;  %v1937_v40 = vld [vmem:[%s2276_s1 + $0x28] sm:$0xff] (!%p166_p2)   ;;  %vm1825_vm0 = vmmov (!%p166_p2), 0  }
   0x7   : > { %1624 = vmatpush3.bf16.msra.mxu0 (!%p166_p2), %v1862_v0  ;;  %1644 = vmatpush3.bf16.msra.mxu1 (!%p166_p2), %v1862_v0  ;;  %s1812_s5 = smov (!%p166_p2), 64   ;;  %s1813_s6 = smov (!%p166_p2), 40   ;;  %v1955_v49 = vld [vmem:[%s2276_s1 + $0x30] sm:$0xff] (!%p166_p2)   ;;  %v1965_v54 = vld [vmem:[%s2276_s1 + $0x38] sm:$0xff] (!%p166_p2)   ;;  %vm352_vm1 = vcmask (!%p166_p2), 64512   ;;  %vm356_vm2 = vcmask (!%p166_p2), 130048  }
   0x8   : > { %1625 = vmatprep.subr.bf16.mxu0 (!%p166_p2), %v1809_v1  ;;  %1645 = vmatprep.subr.bf16.mxu1 (!%p166_p2), %v1809_v1  ;;  %s1814_s7 = smov (!%p166_p2), 24   ;;  %s1815_s8 = smov (!%p166_p2), 72   ;;  %vm359_vm3 = vcmask (!%p166_p2), 195584   ;;  %vm362_vm4 = vcmask (!%p166_p2), 261120   ;;  %vm365_vm5 = vcmask (!%p166_p2), 326656   ;;  %vm368_vm6 = vcmask (!%p166_p2), 392192  }
   0x9   : > { %s1816_s9 = smov (!%p166_p2), 48   ;;  %s1817_s12 = smov (!%p166_p2), 16   ;;  %1639 = vmatprep.mubr.msk.bf16.mxu0 (!%p166_p2), %vm1825_vm0, %v1809_v1  ;;  %1659 = vmatprep.mubr.msk.bf16.mxu1 (!%p166_p2), %vm1825_vm0, %v1809_v1  ;;  %vm371_vm7 = vcmask (!%p166_p2), 457728   ;;  %vm374_vm8 = vcmask (!%p166_p2), 523264   ;;  %vm377_vm9 = vcmask (!%p166_p2), 588800   ;;  %vm380_vm10 = vcmask (!%p166_p2), 654336  }
   0xa   : > { %s1818_s17 = smov (!%p166_p2), 80   ;;  %s1819_s18 = smov (!%p166_p2), 56   ;;  %vm383_vm11 = vcmask (!%p166_p2), 719872   ;;  %vm386_vm12 = vcmask (!%p166_p2), 785408   ;;  %vm389_vm13 = vcmask (!%p166_p2), 850944   ;;  %vm392_vm14 = vcmask (!%p166_p2), 916480  }
   0xb   : > { %1626 = vmatpush3.bf16.msra.mxu0 (!%p166_p2), %v1872_v2  ;;  %1646 = vmatpush3.bf16.msra.mxu1 (!%p166_p2), %v1872_v2  ;;  %s1820_s19 = smov (!%p166_p2), 96   ;;  %s1821_s22 = smov (!%p166_p2), 88   ;;  %vm395_vm15 = vcmask (!%p166_p2), 982016  }
   0xc   : > { %1627 = vmatprep.subr.bf16.mxu0 (!%p166_p2), %v1809_v1  ;;  %1647 = vmatprep.subr.bf16.mxu1 (!%p166_p2), %v1809_v1  ;;  %s1822_s26 = smov (!%p166_p2), 112   ;;  %s1823_s29 = smov (!%p166_p2), 104  }
   0xd   : > { %s2283_s16 = smov (!%p195_p3, %s1472_s16), 1  ;;  %s1824_s30 = smov 120  }
   0xe   : > { %s1723_s21 = smul.u32 112, %s2283_s16  ;;  %s1479_s14 = sshll.u32 %s2283_s16, 1 }
   0xf   : > { %1628 = vmatpush3.bf16.msra.mxu0 %v1887_v3  ;;  %1648 = vmatpush3.bf16.msra.mxu1 %v1887_v3 }
  0x10   : > { %s1881_s24 = scalar_lea.vmem %s2275_s0, %s1723_s21  ;;  %1629 = vmatprep.subr.bf16.mxu0 %v1809_v1  ;;  %1649 = vmatprep.subr.bf16.mxu1 %v1809_v1 }
  0x11   : > { %v1750_v4 = vld [vmem:[%s1881_s24 + $0x38] ss:$0 sps:$4 sm:$0x77]   ;;  %v1751_v5 = vld [vmem:[%s1881_s24 + $0x1c] ss:$0 sps:$4 sm:$0x77]  }
  0x12   : > { %271 = vrot.lane.b32.xlu1 %v1750_v4, %s1810_s27  ;;  %v1752_v6 = vld [vmem:[%s1881_s24 + $0x4] ss:$0 sps:$4 sm:$0x77]   ;;  %245 = vrot.lane.b32.xlu0 %v1751_v5, %s1811_s28  ;;  %v1753_v7 = vld [vmem:[%s1881_s24 + $0x54] ss:$0 sps:$4 sm:$0x77]  }
  0x13   : > { %v260_v9 = vshrl.u32 %v1751_v5, 16  ;;  %v262_v10 = vshll.u32 %v1751_v5, 16  ;;  %v281_v11 = vshll.u32 %v1750_v4, 16  ;;  %v1907_v12 = vld [vmem:[%s1881_s24] sm:$0x7]  ;;  %v309_v13 = vshll.u32 %v1752_v6, 16  ;;  %1630 = vmatpush3.bf16.msra.mxu0 %v1902_v8  ;;  %1650 = vmatpush3.bf16.msra.mxu1 %v1902_v8 }
  0x14   : > { %v279_v15 = vshrl.u32 %v1750_v4, 16  ;;  %v1488_v16 = vcombine.low %v1907_v12, %v1907_v12  ;;  %v1754_v17 = vld [vmem:[%s1881_s24 + $0x20] ss:$0 sps:$4 sm:$0x77]   ;;  %v290_v19 = vshll.u32 %v1753_v7, 16  ;;  %1631 = vmatprep.subr.bf16.mxu0 %v1809_v1  ;;  %v307_v23 = vshrl.u32 %v1752_v6, 16  ;;  %1651 = vmatprep.subr.bf16.mxu1 %v1809_v1 }
  0x15   : > { %v264_v14 = vrot.slane %v262_v10, 1  ;;  %v283_v18 = vrot.slane %v281_v11, 1  ;;  %v311_v24 = vrot.slane %v309_v13, 1  ;;  %v1756_v27 = vld [vmem:[%s1881_s24 + $0x3c] ss:$0 sps:$4 sm:$0x77]  }
  0x16   : > { %299 = vrot.lane.b32.xlu1 %v1752_v6, %s1812_s5  ;;  %276 = vrot.lane.b32.xlu0 %v1753_v7, %s1813_s6  ;;  %v251_v21 = vshrl.u32 %v1488_v16, 16  ;;  %v253_v22 = vshll.u32 %v1488_v16, 16  ;;  %v288_v28 = vshrl.u32 %v1753_v7, 16  ;;  %v292_v29 = vrot.slane %v290_v19, 1  ;;  %v1931_v39 = vld [vmem:[%s1881_s24 + $0x4] sm:$0x7] }
  0x17   : > { %v265_v20 = vor.u32 %v264_v14, %v260_v9  ;;  %v284_v25 = vor.u32 %v283_v18, %v279_v15  ;;  %v318_v30 = vshll.u32 %v1754_v17, 16  ;;  %v312_v32 = vor.u32 %v311_v24, %v307_v23  ;;  %v1757_v38 = vld [vmem:[%s1881_s24 + $0x58] ss:$0 sps:$4 sm:$0x77]   ;;  %1632 = vmatpush3.bf16.msra.mxu0 %v1926_v35  ;;  %1652 = vmatpush3.bf16.msra.mxu1 %v1926_v35  ;;  %v1959_v53 = vld [vmem:[%s1881_s24 + $0x8] sm:$0x7] }
  0x18   : > { %v255_v26 = vrot.slane %v253_v22, 1  ;;  %v316_v33 = vshrl.u32 %v1754_v17, 16  ;;  %v337_v34 = vshll.u32 %v1756_v27, 16  ;;  %v293_v36 = vor.u32 %v292_v29, %v288_v28  ;;  %1633 = vmatprep.subr.bf16.mxu0 %v1809_v1  ;;  %1653 = vmatprep.subr.bf16.mxu1 %v1809_v1  ;;  %v1758_v43 = vld [vmem:[%s1881_s24 + $0x20] ss:$0 sps:$4 sm:$0x77]  }
  0x19   : > { %v320_v37 = vrot.slane %v318_v30, 1  ;;  %v335_v41 = vshrl.u32 %v1756_v27, 16  ;;  %v346_v45 = vshll.u32 %v1757_v38, 16  ;;  %v1513_v46 = vcombine.low %v1931_v39, %v1931_v39  ;;  %v1760_v4 = vld [vmem:[%s1881_s24 + $0x3c] ss:$0 sps:$4 sm:$0x77]  }
  0x1a   : > { %266 = vrot.lane.b32.xlu1 %v265_v20, %s1814_s7  ;;  %304 = vrot.lane.b32.xlu0 %v1754_v17, %s1815_s8  ;;  %v256_v31 = vor.u32 %v255_v26, %v251_v21  ;;  %v339_v42 = vrot.slane %v337_v34, 1  ;;  %v550_v48 = vshll.u32 %v1758_v43, 16  ;;  %v344_v50 = vshrl.u32 %v1757_v38, 16  ;;  %v1761_v5 = vld [vmem:[%s1881_s24 + $0x24] ss:$0 sps:$4 sm:$0x77]  }
  0x1b   : > { %v321_v44 = vor.u32 %v320_v37, %v316_v33  ;;  %1634 = vmatpush3.bf16.msra.mxu0 %v1937_v40  ;;  %1654 = vmatpush3.bf16.msra.mxu1 %v1937_v40  ;;  %v348_v51 = vrot.slane %v346_v45, 1  ;;  %v541_v52 = vshll.u32 %v1513_v46, 16  ;;  %v548_v55 = vshrl.u32 %v1758_v43, 16  ;;  %v1762_v11 = vld [vmem:[%s1881_s24 + $0x58] ss:$0 sps:$4 sm:$0x77]  }
  0x1c   : > { %1635 = vmatprep.subr.bf16.mxu0 %v1809_v1  ;;  %1655 = vmatprep.subr.bf16.mxu1 %v1809_v1  ;;  %v340_v47 = vor.u32 %v339_v42, %v335_v41  ;;  %v552_v56 = vrot.slane %v550_v48, 1  ;;  %v539_v58 = vshrl.u32 %v1513_v46, 16  ;;  %v1531_v60 = vcombine.low %v1959_v53, %v1959_v53  ;;  %v1764_v23 = vld [vmem:[%s1881_s24 + $0x40] ss:$0 sps:$4 sm:$0x77]  }
  0x1d   : > { %v349_v57 = vor.u32 %v348_v51, %v344_v50  ;;  %v543_v59 = vrot.slane %v541_v52, 1  ;;  %v569_v6 = vshll.u32 %v1760_v4, 16  ;;  %v766_v10 = vshll.u32 %v1761_v5, 16  ;;  %v1765_v26 = vld [vmem:[%s1881_s24 + $0x8] ss:$0 sps:$4 sm:$0x77]  }
  0x1e   : > { %285 = vrot.lane.b32.xlu1 %v284_v25, %s1816_s9  ;;  %257 = vrot.lane.b32.xlu0 %v256_v31, %s1817_s12  ;;  %v553_v61 = vor.u32 %v552_v56, %v548_v55  ;;  %v757_v63 = vshll.u32 %v1531_v60, 16  ;;  %v755_v7 = vshrl.u32 %v1531_v60, 16  ;;  %v567_v13 = vshrl.u32 %v1760_v4, 16  ;;  %v1768_v46 = vld [vmem:[%s1881_s24 + $0xc] ss:$0 sps:$4 sm:$0x77]  }
  0x1f   : > { %1636 = vmatpush3.bf16.msra.mxu0 %v1955_v49  ;;  %1656 = vmatpush3.bf16.msra.mxu1 %v1955_v49  ;;  %v544_v62 = vor.u32 %v543_v59, %v539_v58  ;;  %v571_v14 = vrot.slane %v569_v6, 1  ;;  %v578_v15 = vshll.u32 %v1762_v11, 16  ;;  %v764_v17 = vshrl.u32 %v1761_v5, 16  ;;  %v1769_v50 = vld [vmem:[%s1881_s24 + $0x40] ss:$0 sps:$4 sm:$0x77]  }
  0x20   : > { %1637 = vmatprep.subr.bf16.mxu0 %v1809_v1  ;;  %1657 = vmatprep.subr.bf16.mxu1 %v1809_v1  ;;  %v759_v9 = vrot.slane %v757_v63, 1  ;;  %v768_v18 = vrot.slane %v766_v10, 1  ;;  %v576_v20 = vshrl.u32 %v1762_v11, 16  ;;  %v785_v25 = vshll.u32 %v1764_v23, 16 }
  0x21   : > { %v572_v19 = vor.u32 %v571_v14, %v567_v13  ;;  %v580_v21 = vrot.slane %v578_v15, 1  ;;  %v597_v28 = vshll.u32 %v1765_v26, 16  ;;  %v783_v29 = vshrl.u32 %v1764_v23, 16  ;;  %v1770_v51 = vld [vmem:[%s1881_s24 + $0x28] ss:$0 sps:$4 sm:$0x77]  }
  0x22   : > { %313 = vrot.lane.b32.xlu1 %v312_v32, %s1818_s17  ;;  %294 = vrot.lane.b32.xlu0 %v293_v36, %s1819_s18  ;;  %v760_v16 = vor.u32 %v759_v9, %v755_v7  ;;  %v769_v22 = vor.u32 %v768_v18, %v764_v17  ;;  %v787_v30 = vrot.slane %v785_v25, 1  ;;  %v1767_v32 = vld [vmem:[%s1881_s24 + $0x24] ss:$0 sps:$4 sm:$0x77]   ;;  %v595_v33 = vshrl.u32 %v1765_v26, 16 }
  0x23   : > { %1638 = vmatpush3.bf16.msra.mxu0 %v1965_v54  ;;  %1658 = vmatpush3.bf16.msra.mxu1 %v1965_v54  ;;  %v581_v24 = vor.u32 %v580_v21, %v576_v20  ;;  %v599_v34 = vrot.slane %v597_v28, 1  ;;  %v606_v36 = vshll.u32 %v1767_v32, 16  ;;  %v813_v48 = vshll.u32 %v1768_v46, 16  ;;  %v1771_v58 = vld [vmem:[%s1881_s24 + $0x5c] ss:$0 sps:$4 sm:$0x77]  }
  0x24   : > { %1663 = vmatprep.subr.bf16.mxu0 %v1809_v1  ;;  %1683 = vmatprep.subr.bf16.mxu1 %v1809_v1  ;;  %v788_v37 = vor.u32 %v787_v30, %v783_v29  ;;  %v625_v52 = vshll.u32 %v1769_v50, 16  ;;  %v811_v55 = vshrl.u32 %v1768_v46, 16  ;;  %v623_v59 = vshrl.u32 %v1769_v50, 16  ;;  %v1773_v13 = vld [vmem:[%s1881_s24 + $0x60] ss:$0 sps:$4 sm:$0x77]  }
  0x25   : > { %v600_v42 = vor.u32 %v599_v34, %v595_v33  ;;  %v815_v56 = vrot.slane %v813_v48, 1  ;;  %v632_v7 = vshrl.u32 %v1771_v58, 16  ;;  %v2020_v14 = vld [vmem:[%s1881_s24 + $0xc] sm:$0x7] }
  0x26   : > { %327 = vrot.lane.b32.xlu1 %v1756_v27, %s1820_s19  ;;  %322 = vrot.lane.b32.xlu0 %v321_v44, %s1821_s22  ;;  %v1766_v27 = vld [vmem:[%s1881_s24 + $0x5c] ss:$0 sps:$4 sm:$0x77]   ;;  %v608_v44 = vrot.slane %v606_v36, 1  ;;  %v627_v60 = vrot.slane %v625_v52, 1  ;;  %v1549_v20 = vcombine.low %v2020_v14, %v2020_v14 }
  0x27   : > { %v794_v31 = vshll.u32 %v1766_v27, 16  ;;  %v816_v63 = vor.u32 %v815_v56, %v811_v55  ;;  %v1774_v18 = vld [vmem:[%s1881_s24 + $0x28] ss:$0 sps:$4 sm:$0x77]  }
  0x28   : > { %v628_v6 = vor.u32 %v627_v60, %v623_v59  ;;  %v973_v25 = vshll.u32 %v1549_v20, 16  ;;  %v971_v30 = vshrl.u32 %v1549_v20, 16  ;;  %v1780_v59 = vld [vmem:[%s1881_s24 + $0x48] ss:$0 sps:$4 sm:$0x77]  }
  0x29   : > { %v796_v41 = vrot.slane %v794_v31, 1 }
  0x2a   : > { %341 = vrot.lane.b32.xlu1 %v340_v47, %s1822_s26  ;;  %332 = vrot.lane.b32.xlu0 %v1757_v38, %s1823_s29  ;;  %v792_v38 = vshrl.u32 %v1766_v27, 16  ;;  %v975_v31 = vrot.slane %v973_v25, 1 }
  0x2c   : > { %v797_v45 = vor.u32 %v796_v41, %v792_v38  ;;  %v976_v34 = vor.u32 %v975_v31, %v971_v30  ;;  %v1777_v38 = vld [vmem:[%s1881_s24 + $0x2c] ss:$0 sps:$4 sm:$0x77]   ;;  %v1789_v31 = vld [vmem:[%s1881_s24 + $0x48] ss:$0 sps:$4 sm:$0x77]  }
  0x2e   : > { %533 = vrot.lane.b32.xlu1 %v1758_v43, %s1811_s28  ;;  %350 = vrot.lane.b32.xlu0 %v349_v57, %s1824_s30  ;;  %v604_v43 = vshrl.u32 %v1767_v32, 16  ;;  %v822_v57 = vshll.u32 %v1770_v51, 16 }
  0x30   : > { %v609_v47 = vor.u32 %v608_v44, %v604_v43  ;;  %v1198_v44 = vshll.u32 %v1777_v38, 16 }
  0x32   : > { %554 = vrot.lane.b32.xlu1 %v553_v61, %s1814_s7  ;;  %545 = vrot.lane.b32.xlu0 %v544_v62, %s1817_s12  ;;  %v634_v61 = vshll.u32 %v1771_v58, 16  ;;  %v1772_v62 = vld [vmem:[%s1881_s24 + $0x44] ss:$0 sps:$4 sm:$0x77]   ;;  %v1200_v52 = vrot.slane %v1198_v44, 1 }
  0x33   : > { %v841_v10 = vshll.u32 %v1772_v62, 16 }
  0x34   : > { %v636_v9 = vrot.slane %v634_v61, 1  ;;  %v1217_v61 = vshll.u32 %v1780_v59, 16 }
  0x35   : > { %v843_v17 = vrot.slane %v841_v10, 1 }
  0x36   : > { %559 = vrot.lane.b32.xlu1 %v1760_v4, %s1810_s27  ;;  %749 = vrot.lane.b32.xlu0 %v1761_v5, %s1811_s28  ;;  %v820_v4 = vshrl.u32 %v1770_v51, 16  ;;  %v824_v5 = vrot.slane %v822_v57, 1  ;;  %v637_v15 = vor.u32 %v636_v9, %v632_v7  ;;  %v1784_v9 = vld [vmem:[%s1881_s24 + $0x2c] ss:$0 sps:$4 sm:$0x77]  }
  0x3a   : > { %564 = vrot.lane.b32.xlu1 %v1762_v11, %s1813_s6  ;;  %761 = vrot.lane.b32.xlu0 %v760_v16, %s1817_s12  ;;  %v825_v11 = vor.u32 %v824_v5, %v820_v4  ;;  %v839_v16 = vshrl.u32 %v1772_v62, 16  ;;  %v1215_v5 = vshrl.u32 %v1780_v59, 16 }
  0x3c   : > { %v844_v21 = vor.u32 %v843_v17, %v839_v16 }
  0x3e   : > { %573 = vrot.lane.b32.xlu1 %v572_v19, %s1816_s9  ;;  %770 = vrot.lane.b32.xlu0 %v769_v22, %s1814_s7  ;;  %v850_v19 = vshll.u32 %v1773_v13, 16  ;;  %v982_v22 = vshll.u32 %v1774_v18, 16 }
  0x40   : > { %v984_v28 = vrot.slane %v982_v22, 1 }
  0x42   : > { %582 = vrot.lane.b32.xlu1 %v581_v24, %s1819_s18  ;;  %775 = vrot.lane.b32.xlu0 %v1764_v23, %s1810_s27  ;;  %v848_v23 = vshrl.u32 %v1773_v13, 16  ;;  %v852_v24 = vrot.slane %v850_v19, 1 }
  0x44   : > { %v853_v29 = vor.u32 %v852_v24, %v848_v23 }
  0x46   : > { %587 = vrot.lane.b32.xlu1 %v1765_v26, %s1812_s5  ;;  %780 = vrot.lane.b32.xlu0 %v1766_v27, %s1813_s6  ;;  %v2030_v26 = vld [vmem:[%s1881_s24 + $0x10] sm:$0x7]  ;;  %v980_v27 = vshrl.u32 %v1774_v18, 16 }
  0x48   : > { %v985_v33 = vor.u32 %v984_v28, %v980_v27  ;;  %v1787_v27 = vld [vmem:[%s1881_s24 + $0x14] ss:$0 sps:$4 sm:$0x77]  }
  0x4a   : > { %592 = vrot.lane.b32.xlu1 %v1767_v32, %s1815_s8  ;;  %789 = vrot.lane.b32.xlu0 %v788_v37, %s1816_s9  ;;  %v1567_v32 = vcombine.low %v2030_v26, %v2030_v26  ;;  %v1776_v37 = vld [vmem:[%s1881_s24 + $0x44] ss:$0 sps:$4 sm:$0x77]  }
  0x4b   : > { %v1001_v41 = vshll.u32 %v1776_v37, 16 }
  0x4c   : > { %v1189_v36 = vshll.u32 %v1567_v32, 16 }
  0x4e   : > { %601 = vrot.lane.b32.xlu1 %v600_v42, %s1818_s17  ;;  %798 = vrot.lane.b32.xlu0 %v797_v45, %s1819_s18  ;;  %v1187_v42 = vshrl.u32 %v1567_v32, 16  ;;  %v1191_v43 = vrot.slane %v1189_v36, 1  ;;  %v1778_v45 = vld [vmem:[%s1881_s24 + $0x60] ss:$0 sps:$4 sm:$0x77]   ;;  %v1243_v36 = vshrl.u32 %v1787_v27, 16 }
  0x4f   : > { %v1010_v48 = vshll.u32 %v1778_v45, 16  ;;  %v1008_v56 = vshrl.u32 %v1778_v45, 16 }
  0x51   : > { %v1012_v57 = vrot.slane %v1010_v48, 1 }
  0x52   : > { %610 = vrot.lane.b32.xlu1 %v609_v47, %s1821_s22  ;;  %803 = vrot.lane.b32.xlu0 %v1768_v46, %s1812_s5  ;;  %v999_v46 = vshrl.u32 %v1776_v37, 16  ;;  %v1003_v47 = vrot.slane %v1001_v41, 1 }
  0x53   : > { %v1013_v60 = vor.u32 %v1012_v57, %v1008_v56 }
  0x54   : > { %v1004_v55 = vor.u32 %v1003_v47, %v999_v46  ;;  %v1055_v46 = vshrl.u32 %v1789_v31, 16 }
  0x56   : > { %615 = vrot.lane.b32.xlu1 %v1769_v50, %s1820_s19  ;;  %808 = vrot.lane.b32.xlu0 %v1770_v51, %s1815_s8  ;;  %v1192_v50 = vor.u32 %v1191_v43, %v1187_v42  ;;  %v1196_v51 = vshrl.u32 %v1777_v38, 16  ;;  %v1792_v42 = vld [vmem:[%s1881_s24 + $0x64] ss:$0 sps:$4 sm:$0x77]  }
  0x57   : > { %v1066_v48 = vshll.u32 %v1792_v42, 16 }
  0x5a   : > { %620 = vrot.lane.b32.xlu1 %v1771_v58, %s1823_s29  ;;  %817 = vrot.lane.b32.xlu0 %v816_v63, %s1818_s17  ;;  %v1201_v58 = vor.u32 %v1200_v52, %v1196_v51  ;;  %v1782_v63 = vld [vmem:[%s1881_s24 + $0x64] ss:$0 sps:$4 sm:$0x77]  }
  0x5b   : > { %v1226_v7 = vshll.u32 %v1782_v63, 16  ;;  %v1224_v16 = vshrl.u32 %v1782_v63, 16 }
  0x5d   : > { %v1228_v17 = vrot.slane %v1226_v7, 1  ;;  %v1797_v7 = vld [vmem:[%s1881_s24 + $0x68] ss:$0 sps:$4 sm:$0x77]  }
  0x5e   : > { %629 = vrot.lane.b32.xlu1 %v628_v6, %s1822_s26  ;;  %826 = vrot.lane.b32.xlu0 %v825_v11, %s1821_s22  ;;  %v1219_v6 = vrot.slane %v1217_v61, 1 }
  0x5f   : > { %v1229_v23 = vor.u32 %v1228_v17, %v1224_v16 }
  0x62   : > { %638 = vrot.lane.b32.xlu1 %v637_v15, %s1824_s30  ;;  %831 = vrot.lane.b32.xlu0 %v1772_v62, %s1820_s19  ;;  %v1781_v62 = vld [vmem:[%s1881_s24 + $0x10] ss:$0 sps:$4 sm:$0x77]   ;;  %v1220_v15 = vor.u32 %v1219_v6, %v1215_v5 }
  0x63   : > { %v1029_v4 = vshll.u32 %v1781_v62, 16  ;;  %v1027_v10 = vshrl.u32 %v1781_v62, 16 }
  0x65   : > { %v1031_v11 = vrot.slane %v1029_v4, 1 }
  0x66   : > { %845 = vrot.lane.b32.xlu1 %v844_v21, %s1822_s26  ;;  %836 = vrot.lane.b32.xlu0 %v1773_v13, %s1823_s29  ;;  %v1038_v13 = vshll.u32 %v1784_v9, 16  ;;  %v1036_v21 = vshrl.u32 %v1784_v9, 16 }
  0x67   : > { %v1032_v20 = vor.u32 %v1031_v11, %v1027_v10 }
  0x68   : > { %v1040_v22 = vrot.slane %v1038_v13, 1 }
  0x6a   : > { %965 = vrot.lane.b32.xlu1 %v1774_v18, %s1811_s28  ;;  %854 = vrot.lane.b32.xlu0 %v853_v29, %s1824_s30  ;;  %v1041_v28 = vor.u32 %v1040_v22, %v1036_v21  ;;  %v1245_v29 = vshll.u32 %v1787_v27, 16 }
  0x6e   : > { %986 = vrot.lane.b32.xlu1 %v985_v33, %s1814_s7  ;;  %977 = vrot.lane.b32.xlu0 %v976_v34, %s1817_s12  ;;  %v1790_v33 = vld [vmem:[%s1881_s24 + $0x30] ss:$0 sps:$4 sm:$0x77]   ;;  %v1057_v34 = vshll.u32 %v1789_v31, 16 }
  0x70   : > { %v1059_v47 = vrot.slane %v1057_v34, 1 }
  0x72   : > { %991 = vrot.lane.b32.xlu1 %v1776_v37, %s1810_s27  ;;  %1181 = vrot.lane.b32.xlu0 %v1777_v38, %s1811_s28  ;;  %v1247_v37 = vrot.slane %v1245_v29, 1  ;;  %v1254_v38 = vshll.u32 %v1790_v33, 16 }
  0x74   : > { %v1248_v52 = vor.u32 %v1247_v37, %v1243_v36  ;;  %v1256_v56 = vrot.slane %v1254_v38, 1 }
  0x76   : > { %996 = vrot.lane.b32.xlu1 %v1778_v45, %s1813_s6  ;;  %1193 = vrot.lane.b32.xlu0 %v1192_v50, %s1817_s12  ;;  %v1795_v50 = vld [vmem:[%s1881_s24 + $0x4c] ss:$0 sps:$4 sm:$0x77]  }
  0x77   : > { %v1273_v4 = vshll.u32 %v1795_v50, 16  ;;  %v1271_v17 = vshrl.u32 %v1795_v50, 16 }
  0x7a   : > { %1005 = vrot.lane.b32.xlu1 %v1004_v55, %s1816_s9  ;;  %1202 = vrot.lane.b32.xlu0 %v1201_v58, %s1814_s7  ;;  %v1252_v55 = vshrl.u32 %v1790_v33, 16 }
  0x7c   : > { %v1257_v6 = vor.u32 %v1256_v56, %v1252_v55 }
  0x7e   : > { %1014 = vrot.lane.b32.xlu1 %v1013_v60, %s1819_s18  ;;  %1207 = vrot.lane.b32.xlu0 %v1780_v59, %s1810_s27  ;;  %v1064_v60 = vshrl.u32 %v1792_v42, 16 }
  0x82   : > { %1019 = vrot.lane.b32.xlu1 %v1781_v62, %s1812_s5  ;;  %1212 = vrot.lane.b32.xlu0 %v1782_v63, %s1813_s6  ;;  %v1060_v62 = vor.u32 %v1059_v47, %v1055_v46  ;;  %v1068_v63 = vrot.slane %v1066_v48, 1 }
  0x84   : > { %v272_v18 = vpop.permute.xlu1 %271  ;;  %v246_v19 = vpop.permute.xlu0 %245  ;;  %v1069_v16 = vor.u32 %v1068_v63, %v1064_v60 }
  0x85   : > { %v355_v43 = vsel %vm352_vm1, %v1907_v12, %v246_v19 }
  0x86   : > { %1024 = vrot.lane.b32.xlu1 %v1784_v9, %s1815_s8  ;;  %1221 = vrot.lane.b32.xlu0 %v1220_v15, %s1816_s9 }
  0x88   : > { %v300_v24 = vpop.permute.xlu1 %299  ;;  %v277_v25 = vpop.permute.xlu0 %276 }
  0x8a   : > { %1033 = vrot.lane.b32.xlu1 %v1032_v20, %s1818_s17  ;;  %1230 = vrot.lane.b32.xlu0 %v1229_v23, %s1819_s18  ;;  %v1282_v20 = vshll.u32 %v1797_v7, 16 }
  0x8c   : > { %v267_v30 = vpop.permute.xlu1 %266  ;;  %v305_v32 = vpop.permute.xlu0 %304 }
  0x8e   : > { %1042 = vrot.lane.b32.xlu1 %v1041_v28, %s1821_s22  ;;  %1235 = vrot.lane.b32.xlu0 %v1787_v27, %s1812_s5  ;;  %v1280_v27 = vshrl.u32 %v1797_v7, 16  ;;  %v1284_v28 = vrot.slane %v1282_v20, 1 }
  0x90   : > { %v286_v41 = vpop.permute.xlu1 %285  ;;  %v258_v44 = vpop.permute.xlu0 %257 }
  0x91   : > { %v358_v45 = vsel %vm356_vm2, %v355_v43, %v258_v44 }
  0x92   : > { %1047 = vrot.lane.b32.xlu1 %v1789_v31, %s1820_s19  ;;  %v361_v51 = vsel %vm359_vm3, %v358_v45, %v267_v30  ;;  %1240 = vrot.lane.b32.xlu0 %v1790_v33, %s1815_s8  ;;  %v1285_v33 = vor.u32 %v1284_v28, %v1280_v27  ;;  %s1724_s8 = smul.u32 20, %s2283_s16 }
  0x93   : > { %v364_v12 = vsel %vm362_vm4, %v361_v51, %v272_v18  ;;  %v1275_v18 = vrot.slane %v1273_v4, 1 }
  0x94   : > { %v314_v57 = vpop.permute.xlu1 %313  ;;  %v367_v58 = vsel %vm365_vm5, %v364_v12, %v277_v25  ;;  %v295_v59 = vpop.permute.xlu0 %294  ;;  %s2227_s13 = scalar_lea.vmem %s2278_s3, %s1724_s8 }
  0x95   : > { %v370_v61 = vsel %vm368_vm6, %v367_v58, %v286_v41  ;;  %v1276_v25 = vor.u32 %v1275_v18, %v1271_v17 }
  0x96   : > { %1052 = vrot.lane.b32.xlu1 %v1792_v42, %s1823_s29  ;;  %v373_v5 = vsel %vm371_vm7, %v370_v61, %v295_v59  ;;  %1249 = vrot.lane.b32.xlu0 %v1248_v52, %s1818_s17 }
  0x97   : > { %v376_v9 = vsel %vm374_vm8, %v373_v5, %v300_v24 }
  0x98   : > { %v328_v10 = vpop.permute.xlu1 %327  ;;  %v379_v11 = vsel %vm377_vm9, %v376_v9, %v305_v32  ;;  %v323_v13 = vpop.permute.xlu0 %322 }
  0x99   : > { %v382_v15 = vsel %vm380_vm10, %v379_v11, %v314_v57 }
  0x9a   : > { %1061 = vrot.lane.b32.xlu1 %v1060_v62, %s1822_s26  ;;  %v385_v19 = vsel %vm383_vm11, %v382_v15, %v323_v13  ;;  %1258 = vrot.lane.b32.xlu0 %v1257_v6, %s1821_s22 }
  0x9b   : > { %v388_v22 = vsel %vm386_vm12, %v385_v19, %v328_v10 }
  0x9c   : > { %v342_v21 = vpop.permute.xlu1 %341  ;;  %v333_v23 = vpop.permute.xlu0 %332 }
  0x9d   : > { %v391_v24 = vsel %vm389_vm13, %v388_v22, %v333_v23 }
  0x9e   : > { %1070 = vrot.lane.b32.xlu1 %v1069_v16, %s1824_s30  ;;  %1263 = vrot.lane.b32.xlu0 %v1795_v50, %s1820_s19  ;;  %v394_v31 = vsel %vm392_vm14, %v391_v24, %v342_v21  ;;  %s208_s19 = scalar_lea.vmem %s2279_s4, %s1479_s14 }
  0xa0   : > { %v534_v29 = vpop.permute.xlu1 %533  ;;  %v351_v30 = vpop.permute.xlu0 %350 }
  0xa1   : > { %v397_v32 = vsel %vm395_vm15, %v394_v31, %v351_v30  ;;  %v642_v56 = vsel %vm352_vm1, %v1931_v39, %v534_v29 }
  0xa2   : > { %1277 = vrot.lane.b32.xlu1 %v1276_v25, %s1822_s26  ;;  %1268 = vrot.lane.b32.xlu0 %v1797_v7, %s1823_s29 }
  0xa3   : > { %1640 = vmatmul.mubr.bf16.vlgmr.msra.gmra.mrb[0].mxu0 %v397_v32 }
  0xa4   : > { %v555_v34 = vpop.permute.xlu1 %554  ;;  %1664 = vmatpush3.bf16.msra.mxu0 %v1862_v0  ;;  %1679 = vmatprep.mubr.msk.bf16.mxu0 %vm1825_vm0, %v1809_v1  ;;  %v546_v36 = vpop.permute.xlu0 %545 }
  0xa5   : > { %1665 = vmatprep.subr.bf16.mxu0 %v1809_v1  ;;  %v644_v58 = vsel %vm356_vm2, %v642_v56, %v546_v36 }
  0xa6   : > { %1286 = vrot.lane.b32.xlu0 %v1285_v33, %s1824_s30  ;;  %v646_v60 = vsel %vm359_vm3, %v644_v58, %v555_v34 }
  0xa8   : > { %v560_v37 = vpop.permute.xlu1 %559  ;;  %1666 = vmatpush3.bf16.msra.mxu0 %v1872_v2  ;;  %v750_v38 = vpop.permute.xlu0 %749 }
  0xa9   : > { %1667 = vmatprep.subr.bf16.mxu0 %v1809_v1  ;;  %v648_v62 = vsel %vm362_vm4, %v646_v60, %v560_v37  ;;  %v858_v39 = vsel %vm352_vm1, %v1959_v53, %v750_v38 }
  0xac   : > { %v565_v41 = vpop.permute.xlu1 %564  ;;  %1668 = vmatpush3.bf16.msra.mxu0 %v1887_v3  ;;  %v762_v42 = vpop.permute.xlu0 %761 }
  0xad   : > { %1669 = vmatprep.subr.bf16.mxu0 %v1809_v1  ;;  %v650_v63 = vsel %vm365_vm5, %v648_v62, %v565_v41  ;;  %v860_v10 = vsel %vm356_vm2, %v858_v39, %v762_v42 }
  0xb0   : > { %v574_v43 = vpop.permute.xlu1 %573  ;;  %1670 = vmatpush3.bf16.msra.mxu0 %v1902_v8  ;;  %v771_v44 = vpop.permute.xlu0 %770 }
  0xb1   : > { %1671 = vmatprep.subr.bf16.mxu0 %v1809_v1  ;;  %v652_v4 = vsel %vm368_vm6, %v650_v63, %v574_v43  ;;  %v862_v13 = vsel %vm359_vm3, %v860_v10, %v771_v44  ;;  %v1798_v44 = vld [vmem:[%s2276_s1] sm:$0xff]  }
  0xb4   : > { %v583_v45 = vpop.permute.xlu1 %582  ;;  %1672 = vmatpush3.bf16.msra.mxu0 %v1926_v35  ;;  %v776_v46 = vpop.permute.xlu0 %775 }
  0xb5   : > { %1673 = vmatprep.subr.bf16.mxu0 %v1809_v1  ;;  %v654_v6 = vsel %vm371_vm7, %v652_v4, %v583_v45  ;;  %v864_v17 = vsel %vm362_vm4, %v862_v13, %v776_v46 }
  0xb8   : > { %v588_v47 = vpop.permute.xlu1 %587  ;;  %1674 = vmatpush3.bf16.msra.mxu0 %v1937_v40  ;;  %v781_v48 = vpop.permute.xlu0 %780 }
  0xb9   : > { %1675 = vmatprep.subr.bf16.mxu0 %v1809_v1  ;;  %v656_v9 = vsel %vm374_vm8, %v654_v6, %v588_v47  ;;  %v866_v20 = vsel %vm365_vm5, %v864_v17, %v781_v48  ;;  %v1800_v48 = vld [vmem:[%s2276_s1 + $0x10] sm:$0xff]  }
  0xbc   : > { %v593_v50 = vpop.permute.xlu1 %592  ;;  %1676 = vmatpush3.bf16.msra.mxu0 %v1955_v49  ;;  %v790_v51 = vpop.permute.xlu0 %789 }
  0xbd   : > { %1677 = vmatprep.subr.bf16.mxu0 %v1809_v1  ;;  %v658_v11 = vsel %vm377_vm9, %v656_v9, %v593_v50  ;;  %v868_v21 = vsel %vm368_vm6, %v866_v20, %v790_v51 }
  0xc0   : > { %v602_v52 = vpop.permute.xlu1 %601  ;;  %1678 = vmatpush3.bf16.msra.mxu0 %v1965_v54  ;;  %v799_v55 = vpop.permute.xlu0 %798 }
  0xc1   : > { %1703 = vmatprep.subr.bf16.mxu0 %v1809_v1  ;;  %v660_v15 = vsel %vm380_vm10, %v658_v11, %v602_v52  ;;  %v870_v23 = vsel %vm371_vm7, %v868_v21, %v799_v55 }
  0xc4   : > { %v611_v12 = vpop.permute.xlu1 %610  ;;  %v804_v57 = vpop.permute.xlu0 %803 }
  0xc5   : > { %v662_v18 = vsel %vm383_vm11, %v660_v15, %v611_v12  ;;  %v872_v27 = vsel %vm374_vm8, %v870_v23, %v804_v57 }
  0xc8   : > { %v616_v59 = vpop.permute.xlu1 %615  ;;  %v809_v61 = vpop.permute.xlu0 %808 }
  0xc9   : > { %v664_v53 = vsel %vm386_vm12, %v662_v18, %v616_v59  ;;  %v874_v30 = vsel %vm377_vm9, %v872_v27, %v809_v61 }
  0xcc   : > { %v621_v5 = vpop.permute.xlu1 %620  ;;  %v818_v7 = vpop.permute.xlu0 %817 }
  0xcd   : > { %v666_v22 = vsel %vm389_vm13, %v664_v53, %v621_v5  ;;  %v876_v31 = vsel %vm380_vm10, %v874_v30, %v818_v7 }
  0xd0   : > { %v630_v16 = vpop.permute.xlu1 %629  ;;  %v827_v19 = vpop.permute.xlu0 %826 }
  0xd1   : > { %v668_v24 = vsel %vm392_vm14, %v666_v22, %v630_v16  ;;  %v878_v32 = vsel %vm383_vm11, %v876_v31, %v827_v19 }
  0xd4   : > { %v639_v25 = vpop.permute.xlu1 %638  ;;  %v832_v28 = vpop.permute.xlu0 %831 }
  0xd5   : > { %v670_v29 = vsel %vm395_vm15, %v668_v24, %v639_v25  ;;  %v880_v34 = vsel %vm386_vm12, %v878_v32, %v832_v28 }
  0xd6   : > { %1660 = vmatmul.mubr.bf16.vlgmr.msra.gmra.mrb[0].mxu1 %v670_v29 }
  0xd7   : > { %1684 = vmatpush3.bf16.msra.mxu1 %v1862_v0  ;;  %1699 = vmatprep.mubr.msk.bf16.mxu1 %vm1825_vm0, %v1809_v1 }
  0xd8   : > { %v846_v33 = vpop.permute.xlu1 %845  ;;  %1685 = vmatprep.subr.bf16.mxu1 %v1809_v1  ;;  %v837_v36 = vpop.permute.xlu0 %836 }
  0xd9   : > { %v882_v37 = vsel %vm389_vm13, %v880_v34, %v837_v36 }
  0xda   : > { %v884_v0 = vsel %vm392_vm14, %v882_v37, %v846_v33 }
  0xdb   : > { %1686 = vmatpush3.bf16.msra.mxu1 %v1872_v2 }
  0xdc   : > { %v966_v38 = vpop.permute.xlu1 %965  ;;  %1687 = vmatprep.subr.bf16.mxu1 %v1809_v1  ;;  %v855_v41 = vpop.permute.xlu0 %854 }
  0xdd   : > { %v886_v42 = vsel %vm395_vm15, %v884_v0, %v855_v41  ;;  %v1074_v60 = vsel %vm352_vm1, %v2020_v14, %v966_v38  ;;  %v2222_v41 = vld [vmem:[%s2277_s2] ss:$0 sm:$0xff] }
  0xde   : > { %1680 = vmatmul.mubr.bf16.vlgmr.msra.gmra.mrb[4].mxu0 %v886_v42 }
  0xdf   : > { %1688 = vmatpush3.bf16.msra.mxu1 %v1887_v3  ;;  %1704 = vmatpush3.bf16.msra.mxu0 %v1798_v44  ;;  %v1799_v3 = vld [vmem:[%s2276_s1 + $0x8] sm:$0xff]  }
  0xe0   : > { %v987_v43 = vpop.permute.xlu1 %986  ;;  %1689 = vmatprep.subr.bf16.mxu1 %v1809_v1  ;;  %v978_v2 = vpop.permute.xlu0 %977  ;;  %1705 = vmatprep.subr.bf16.mxu0 %v1809_v1 }
  0xe1   : > { %1719 = vmatprep.mubr.msk.bf16.mxu0 %vm1825_vm0, %v1809_v1  ;;  %vm512_vm0 = vcmask 124928  }
  0xe3   : > { %1690 = vmatpush3.bf16.msra.mxu1 %v1902_v8  ;;  %1706 = vmatpush3.bf16.msra.mxu0 %v1799_v3 }
  0xe4   : > { %v992_v45 = vpop.permute.xlu1 %991  ;;  %1691 = vmatprep.subr.bf16.mxu1 %v1809_v1  ;;  %v1182_v46 = vpop.permute.xlu0 %1181  ;;  %1707 = vmatprep.subr.bf16.mxu0 %v1809_v1 }
  0xe5   : > { %v1290_v14 = vsel %vm352_vm1, %v2030_v26, %v1182_v46  ;;  %vm513_vm1 = vsmask.f32 2304 }
  0xe7   : > { %1692 = vmatpush3.bf16.msra.mxu1 %v1926_v35  ;;  %1708 = vmatpush3.bf16.msra.mxu0 %v1800_v48 }
  0xe8   : > { %v997_v47 = vpop.permute.xlu1 %996  ;;  %1693 = vmatprep.subr.bf16.mxu1 %v1809_v1  ;;  %v1194_v50 = vpop.permute.xlu0 %1193  ;;  %1709 = vmatprep.subr.bf16.mxu0 %v1809_v1 }
  0xe9   : > { %v1292_v10 = vsel %vm356_vm2, %v1290_v14, %v1194_v50 }
  0xeb   : > { %1694 = vmatpush3.bf16.msra.mxu1 %v1937_v40  ;;  %1710 = vmatpush3.bf16.msra.mxu0 %v1902_v8 }
  0xec   : > { %v1006_v51 = vpop.permute.xlu1 %1005  ;;  %1695 = vmatprep.subr.bf16.mxu1 %v1809_v1  ;;  %v1203_v52 = vpop.permute.xlu0 %1202  ;;  %1711 = vmatprep.subr.bf16.mxu0 %v1809_v1 }
  0xed   : > { %v1294_v13 = vsel %vm359_vm3, %v1292_v10, %v1203_v52 }
  0xef   : > { %1696 = vmatpush3.bf16.msra.mxu1 %v1955_v49  ;;  %1712 = vmatpush3.bf16.msra.mxu0 %v1926_v35 }
  0xf0   : > { %v1015_v55 = vpop.permute.xlu1 %1014  ;;  %1697 = vmatprep.subr.bf16.mxu1 %v1809_v1  ;;  %v1208_v56 = vpop.permute.xlu0 %1207  ;;  %1713 = vmatprep.subr.bf16.mxu0 %v1809_v1 }
  0xf1   : > { %v1296_v17 = vsel %vm362_vm4, %v1294_v13, %v1208_v56 }
  0xf3   : > { %1698 = vmatpush3.bf16.msra.mxu1 %v1965_v54  ;;  %1714 = vmatpush3.bf16.msra.mxu0 %v1937_v40  ;;  %v1076_v40 = vsel %vm356_vm2, %v1074_v60, %v978_v2  ;;  %vm2230_vm2 = vmand %vm512_vm0, %vm513_vm1  ;;  %v1520_v60 = vld [vmem:[%s2227_s13 + $0x4] sm:$0x7] }
  0xf4   : > { %v1020_v12 = vpop.permute.xlu1 %1019  ;;  %v1213_v8 = vpop.permute.xlu0 %1212  ;;  %1715 = vmatprep.subr.bf16.mxu0 %v1809_v1  ;;  %v1078_v4 = vsel %vm359_vm3, %v1076_v40, %v987_v43  ;;  %vm493_vm3 = vcmask 126976  }
  0xf5   : > { %v1298_v20 = vsel %vm365_vm5, %v1296_v17, %v1213_v8 }
  0xf7   : > { %1716 = vmatpush3.bf16.msra.mxu0 %v1955_v49  ;;  %v1080_v49 = vsel %vm362_vm4, %v1078_v4, %v992_v45  ;;  %v515_v45 = vld [vmem:[%s2227_s13] sm:$0x7]  ;;  %vm1382_vm4 = vcmask 1040384  }
  0xf8   : > { %v1025_v57 = vpop.permute.xlu1 %1024  ;;  %v1222_v58 = vpop.permute.xlu0 %1221  ;;  %1717 = vmatprep.subr.bf16.mxu0 %v1809_v1  ;;  %v1082_v6 = vsel %vm365_vm5, %v1080_v49, %v997_v47  ;;  %vm1384_vm5 = vcmask 123904  }
  0xf9   : > { %v1084_v1 = vsel %vm368_vm6, %v1082_v6, %v1006_v51  ;;  %v1300_v53 = vsel %vm368_vm6, %v1298_v20, %v1222_v58 }
  0xfb   : > { %1718 = vmatpush3.bf16.msra.mxu0 %v1965_v54  ;;  %v1086_v54 = vsel %vm371_vm7, %v1084_v1, %v1015_v55 }
  0xfc   : > { %v1034_v35 = vpop.permute.xlu1 %1033  ;;  %v1231_v59 = vpop.permute.xlu0 %1230  ;;  %v1088_v9 = vsel %vm374_vm8, %v1086_v54, %v1020_v12 }
  0xfd   : > { %v1090_v11 = vsel %vm377_vm9, %v1088_v9, %v1025_v57  ;;  %v1302_v22 = vsel %vm371_vm7, %v1300_v53, %v1231_v59 }
  0xfe   : > { %v1092_v15 = vsel %vm380_vm10, %v1090_v11, %v1034_v35 }
 0x100   : > { %v1043_v61 = vpop.permute.xlu1 %1042  ;;  %v1236_v62 = vpop.permute.xlu0 %1235 }
 0x101   : > { %v1094_v18 = vsel %vm383_vm11, %v1092_v15, %v1043_v61  ;;  %v1304_v25 = vsel %vm374_vm8, %v1302_v22, %v1236_v62 }
 0x104   : > { %v1048_v63 = vpop.permute.xlu1 %1047  ;;  %v1241_v5 = vpop.permute.xlu0 %1240 }
 0x105   : > { %v1096_v26 = vsel %vm386_vm12, %v1094_v18, %v1048_v63  ;;  %v1306_v29 = vsel %vm377_vm9, %v1304_v25, %v1241_v5 }
 0x108   : > { %v1053_v7 = vpop.permute.xlu1 %1052  ;;  %v1250_v39 = vpop.permute.xlu0 %1249 }
 0x109   : > { %v1098_v21 = vsel %vm389_vm13, %v1096_v26, %v1053_v7  ;;  %v1308_v30 = vsel %vm380_vm10, %v1306_v29, %v1250_v39 }
 0x10c   : > { %v1062_v16 = vpop.permute.xlu1 %1061  ;;  %v1259_v19 = vpop.permute.xlu0 %1258 }
 0x10d   : > { %v1100_v23 = vsel %vm392_vm14, %v1098_v21, %v1062_v16  ;;  %v1310_v31 = vsel %vm383_vm11, %v1308_v30, %v1259_v19 }
 0x110   : > { %v1071_v24 = vpop.permute.xlu1 %1070  ;;  %v1264_v28 = vpop.permute.xlu0 %1263 }
 0x111   : > { %v1102_v27 = vsel %vm395_vm15, %v1100_v23, %v1071_v24  ;;  %v1312_v32 = vsel %vm386_vm12, %v1310_v31, %v1264_v28  ;;  %v1538_v23 = vld [vmem:[%s2227_s13 + $0x8] sm:$0x7] }
 0x112   : > { %1700 = vmatmul.mubr.bf16.vlgmr.msra.gmra.mrb[4].mxu1 %v1102_v27 }
 0x114   : > { %v1269_v33 = vpop.permute.xlu0 %1268  ;;  %v1278_v36 = vpop.permute.xlu1 %1277 }
 0x115   : > { %v1314_v34 = vsel %vm389_vm13, %v1312_v32, %v1269_v33 }
 0x116   : > { %v1316_v37 = vsel %vm392_vm14, %v1314_v34, %v1278_v36 }
 0x118   : > { %v1287_v38 = vpop.permute.xlu0 %1286 }
 0x119   : > { %v1318_v0 = vsel %vm395_vm15, %v1316_v37, %v1287_v38 }
 0x11a   : > { %1720 = vmatmul.mubr.bf16.vlgmr.msra.gmra.mrb[8].mxu0 %v1318_v0 }
 0x176   : > { %v487_v42 = vpop.f32.mrb[0].mxu0 }
 0x177   : > { %v488_v43 = vadd.f32 %v2222_v41, %v487_v42  ;;  %v1641_v44 = vpop.f32.mrb[1].mxu0 }
 0x178   : > { %v490_v3 = vpop.f32.mrb[2].mxu0 }
 0x179   : > { %v511_v46 = vpack.c.bf16 %v488_v43, %v488_v43  ;;  %v1642_v47 = vpop.f32.mrb[3].mxu0  ;;  %v502_v50 = vmul.f32 %v488_v43, %v488_v43  ;;  %v494_v51 = vsel %vm493_vm3, %v488_v43, 0.0 }
 0x17a   : > { %v495_v55 = vrot.slane %v494_v51, 4 }
 0x17b   : > { %v516_v48 = vsel %vm2230_vm2, %v511_v46, %v515_v45  ;;  %v503_v52 = vsel %vm493_vm3, %v502_v50, 0.0 }
 0x17c   : > { %517 = vst [vmem:[%s2227_s13] sm:$0x7] %v516_v48  ;;  %v504_v56 = vrot.slane %v503_v52, 4  ;;  %v496_v12 = vadd.f32 %v495_v55, %v494_v51 }
 0x17e   : > { %v505_v8 = vadd.f32 %v504_v56, %v503_v52  ;;  %v497_v59 = vrot.slane %v496_v12, 2 }
 0x180   : > { %v506_v62 = vrot.slane %v505_v8, 2  ;;  %v498_v7 = vadd.f32 %v497_v59, %v496_v12 }
 0x182   : > { %v507_v14 = vadd.f32 %v506_v62, %v505_v8  ;;  %v499_v13 = vrot.slane %v498_v7, 1  ;;  %v1556_v8 = vld [vmem:[%s2227_s13 + $0xc] sm:$0x7] }
 0x184   : > { %v508_v19 = vrot.slane %v507_v14, 1  ;;  %v500_v28 = vadd.f32 %v499_v13, %v498_v7 }
 0x186   : > { %v509_v36 = vadd.f32 %v508_v19, %v507_v14 }
 0x1a9   : > { %v706_v57 = vpop.f32.mrb[0].mxu1 }
 0x1aa   : > { %v707_v58 = vadd.f32 %v2222_v41, %v706_v57  ;;  %v1661_v35 = vpop.f32.mrb[1].mxu1 }
 0x1ab   : > { %v709_v61 = vpop.f32.mrb[2].mxu1 }
 0x1ac   : > { %v712_v40 = vsel %vm493_vm3, %v707_v58, 0.0  ;;  %v720_v63 = vmul.f32 %v707_v58, %v707_v58  ;;  %v729_v4 = vpack.c.bf16 %v707_v58, %v707_v58  ;;  %v1662_v5 = vpop.f32.mrb[3].mxu1 }
 0x1ad   : > { %v713_v49 = vrot.slane %v712_v40, 4 }
 0x1ae   : > { %v721_v6 = vsel %vm493_vm3, %v720_v63, 0.0  ;;  %v732_v1 = vsel %vm2230_vm2, %v729_v4, %v1520_v60 }
 0x1af   : > { %v714_v54 = vadd.f32 %v713_v49, %v712_v40  ;;  %v722_v39 = vrot.slane %v721_v6, 4  ;;  %1521 = vst [vmem:[%s2227_s13 + $0x4] sm:$0x7] %v732_v1 }
 0x1b1   : > { %v715_v9 = vrot.slane %v714_v54, 2  ;;  %v723_v10 = vadd.f32 %v722_v39, %v721_v6  ;;  %v922_v11 = vpop.f32.mrb[4].mxu0 }
 0x1b2   : > { %v923_v17 = vadd.f32 %v2222_v41, %v922_v11  ;;  %v1681_v18 = vpop.f32.mrb[5].mxu0 }
 0x1b3   : > { %v716_v15 = vadd.f32 %v715_v9, %v714_v54  ;;  %v724_v16 = vrot.slane %v723_v10, 2  ;;  %v925_v20 = vpop.f32.mrb[6].mxu0 }
 0x1b4   : > { %v928_v21 = vsel %vm493_vm3, %v923_v17, 0.0  ;;  %v936_v22 = vmul.f32 %v923_v17, %v923_v17  ;;  %v1682_v24 = vpop.f32.mrb[7].mxu0  ;;  %v945_v27 = vpack.c.bf16 %v923_v17, %v923_v17 }
 0x1b5   : > { %v717_v26 = vrot.slane %v716_v15, 1  ;;  %v725_v53 = vadd.f32 %v724_v16, %v723_v10  ;;  %v929_v25 = vrot.slane %v928_v21, 4 }
 0x1b6   : > { %v937_v31 = vsel %vm493_vm3, %v936_v22, 0.0  ;;  %v948_v34 = vsel %vm2230_vm2, %v945_v27, %v1538_v23 }
 0x1b7   : > { %v718_v29 = vadd.f32 %v717_v26, %v716_v15  ;;  %v726_v30 = vrot.slane %v725_v53, 1  ;;  %v930_v32 = vadd.f32 %v929_v25, %v928_v21  ;;  %v938_v33 = vrot.slane %v937_v31, 4  ;;  %1539 = vst [vmem:[%s2227_s13 + $0x8] sm:$0x7] %v948_v34  ;;  %v1574_v15 = vld [vmem:[%s2227_s13 + $0x10] sm:$0x7] }
 0x1b9   : > { %v719_v37 = vadd.f32 %v718_v29, %v500_v28  ;;  %v727_v38 = vadd.f32 %v726_v30, %v725_v53  ;;  %v931_v0 = vrot.slane %v930_v32, 2  ;;  %v939_v42 = vadd.f32 %v938_v33, %v937_v31 }
 0x1bb   : > { %v728_v43 = vadd.f32 %v727_v38, %v509_v36  ;;  %v932_v44 = vadd.f32 %v931_v0, %v930_v32  ;;  %v940_v45 = vrot.slane %v939_v42, 2 }
 0x1bd   : > { %v933_v3 = vrot.slane %v932_v44, 1  ;;  %v941_v46 = vadd.f32 %v940_v45, %v939_v42 }
 0x1bf   : > { %v934_v47 = vadd.f32 %v933_v3, %v932_v44  ;;  %v942_v48 = vrot.slane %v941_v46, 1 }
 0x1c1   : > { %v935_v50 = vadd.f32 %v934_v47, %v719_v37  ;;  %v943_v51 = vadd.f32 %v942_v48, %v941_v46 }
 0x1c3   : > { %v944_v52 = vadd.f32 %v943_v51, %v728_v43 }
 0x1e5   : > { %v1138_v55 = vpop.f32.mrb[4].mxu1 }
 0x1e6   : > { %v1139_v56 = vadd.f32 %v2222_v41, %v1138_v55  ;;  %v1701_v12 = vpop.f32.mrb[5].mxu1 }
 0x1e7   : > { %v1141_v57 = vpop.f32.mrb[6].mxu1 }
 0x1e8   : > { %v1144_v58 = vsel %vm493_vm3, %v1139_v56, 0.0  ;;  %v1152_v35 = vmul.f32 %v1139_v56, %v1139_v56  ;;  %v1161_v59 = vpack.c.bf16 %v1139_v56, %v1139_v56  ;;  %v1702_v60 = vpop.f32.mrb[7].mxu1 }
 0x1e9   : > { %v1145_v61 = vrot.slane %v1144_v58, 4 }
 0x1ea   : > { %v1153_v62 = vsel %vm493_vm3, %v1152_v35, 0.0  ;;  %v1164_v40 = vsel %vm2230_vm2, %v1161_v59, %v1556_v8 }
 0x1eb   : > { %v1146_v63 = vadd.f32 %v1145_v61, %v1144_v58  ;;  %v1154_v4 = vrot.slane %v1153_v62, 4  ;;  %1557 = vst [vmem:[%s2227_s13 + $0xc] sm:$0x7] %v1164_v40 }
 0x1ed   : > { %v1147_v5 = vrot.slane %v1146_v63, 2  ;;  %v1155_v49 = vadd.f32 %v1154_v4, %v1153_v62  ;;  %v1354_v6 = vpop.f32.mrb[8].mxu0 }
 0x1ee   : > { %v1355_v54 = vadd.f32 %v2222_v41, %v1354_v6  ;;  %v1721_v39 = vpop.f32.mrb[9].mxu0 }
 0x1ef   : > { %v1148_v1 = vadd.f32 %v1147_v5, %v1146_v63  ;;  %v1156_v7 = vrot.slane %v1155_v49, 2  ;;  %v1357_v14 = vpop.f32.mrb[10].mxu0 }
 0x1f0   : > { %v1360_v11 = vsel %vm493_vm3, %v1355_v54, 0.0  ;;  %v1368_v13 = vmul.f32 %v1355_v54, %v1355_v54  ;;  %v1722_v16 = vpop.f32.mrb[11].mxu0  ;;  %v1377_v18 = vpack.c.bf16 %v1355_v54, %v1355_v54 }
 0x1f1   : > { %v1149_v9 = vrot.slane %v1148_v1, 1  ;;  %v1157_v10 = vadd.f32 %v1156_v7, %v1155_v49  ;;  %v1361_v17 = vrot.slane %v1360_v11, 4 }
 0x1f2   : > { %v1369_v26 = vsel %vm493_vm3, %v1368_v13, 0.0  ;;  %v1380_v41 = vsel %vm2230_vm2, %v1377_v18, %v1574_v15 }
 0x1f3   : > { %v1150_v19 = vadd.f32 %v1149_v9, %v1148_v1  ;;  %v1158_v20 = vrot.slane %v1157_v10, 1  ;;  %v1362_v53 = vadd.f32 %v1361_v17, %v1360_v11  ;;  %v1370_v21 = vrot.slane %v1369_v26, 4  ;;  %1575 = vst [vmem:[%s2227_s13 + $0x10] sm:$0x7] %v1380_v41 }
 0x1f5   : > { %v1151_v22 = vadd.f32 %v1150_v19, %v935_v50  ;;  %v1159_v23 = vadd.f32 %v1158_v20, %v1157_v10  ;;  %v1363_v24 = vrot.slane %v1362_v53, 2  ;;  %v1371_v25 = vadd.f32 %v1370_v21, %v1369_v26 }
 0x1f7   : > { %v1160_v27 = vadd.f32 %v1159_v23, %v944_v52  ;;  %v1364_v28 = vadd.f32 %v1363_v24, %v1362_v53  ;;  %v1372_v29 = vrot.slane %v1371_v25, 2 }
 0x1f9   : > { %v1365_v30 = vrot.slane %v1364_v28, 1  ;;  %v1373_v31 = vadd.f32 %v1372_v29, %v1371_v25 }
 0x1fb   : > { %v1366_v32 = vadd.f32 %v1365_v30, %v1364_v28  ;;  %v1374_v33 = vrot.slane %v1373_v31, 1 }
 0x1fd   : > { %v1367_v34 = vadd.f32 %v1366_v32, %v1151_v22  ;;  %v1375_v36 = vadd.f32 %v1374_v33, %v1373_v31 }
 0x1ff   : > { %v1376_v2 = vadd.f32 %v1375_v36, %v1160_v27 }
 0x201   : > { %v1383_v37 = vsel %vm1382_vm4, %v1367_v34, %v1376_v2 }
 0x202   : > { %1385 = vst.msk [vmem:[%s208_s19] sm:$0x3] %vm1384_vm5, %v1383_v37 }
 0x203 PF: > { %s15_s15 = sadd.s32 1, %s1807_s15  }
 0x204   : > { %p12_p4 = scmp.ge.s32.totalorder %s15_s15, 4  }
 0x206   :  { %14 = sbr.rel (!%p12_p4) target bundleno = 1 (0x1), region = 101 }

// kernel: _lambda_.7
= control target key start
LH: loop header
LB: loop body
LE: loop exit
PB: predicated region body
PF: predicated region fallthrough
CT: control target
= control target key end

     0   :  { %s1331_s15 = smov 0   ;;  %s1663_s0 = inlined_call_operand.vmem [shape: bf16[2,2,2,5,5,16], index: 0, kind: input, shape index: {}]   ;;  %s1664_s1 = inlined_call_operand.vmem [shape: bf16[256,32], index: 1, kind: input, shape index: {}]   ;;  %s1665_s2 = inlined_call_operand.vmem [shape: f32[1,32], index: 2, kind: input, shape index: {}]   ;;  %s1666_s3 = inlined_call_operand.vmem [shape: bf16[2,3,3,32], index: 3, kind: output, shape index: {0}]   ;;  %s1667_s4 = inlined_call_operand.vmem [shape: f32[2,2,32], index: 4, kind: output, shape index: {1}]  }
   0x1 LB: > { %s1090_s16 = sadd.s32 4294967295, %s1297_s15   ;;  %p1094_p0 = scmp.ge.s32.totalorder %s1297_s15, 1  ;;  %s1297_s15 = sphi %s1331_s15, %s15_s15  }
   0x2   : > { %p165_p1 = scmp.lt.s32.totalorder %s1297_s15, 3 }
   0x4   : > { %p166_p2 = pnand %p1094_p0, %p165_p1 }
   0x5   : > { %p195_p3 = scmp.lt.s32.totalorder (!%p166_p2), %s1090_s16, 1  ;;  %v1342_v0 = vld [vmem:[%s1664_s1 + $0x40] sm:$0xff] (!%p166_p2)   ;;  %v1354_v2 = vld [vmem:[%s1664_s1 + $0x48] sm:$0xff] (!%p166_p2)   ;;  %v1370_v4 = vld [vmem:[%s1664_s1 + $0x50] sm:$0xff] (!%p166_p2)   ;;  %s1299_s7 = smov (!%p166_p2), 16   ;;  %vm366_vm0 = vcmask (!%p166_p2), 130048  }
   0x6   : > { %169 = sbr.rel (%p166_p2) target bundleno = 452 (0x1c4), region = 32  ;;  %v1347_v1 = vld [vmem:[%s1664_s1] sm:$0xff] (!%p166_p2)   ;;  %1168 = vmatprep.subr.bf16.mxu0 (!%p166_p2), %v1342_v0  ;;  %1190 = vmatprep.subr.bf16.mxu1 (!%p166_p2), %v1342_v0  ;;  %v1363_v3 = vld [vmem:[%s1664_s1 + $0x8] sm:$0xff] (!%p166_p2)   ;;  %v1386_v7 = vld [vmem:[%s1664_s1 + $0x10] sm:$0xff] (!%p166_p2)   ;;  %s1300_s10 = smov (!%p166_p2), 64   ;;  %vm370_vm1 = vcmask (!%p166_p2), 261120  }
   0x7   : > { %1169 = vmatpush3.bf16.msra.mxu0 (!%p166_p2), %v1347_v1  ;;  %1191 = vmatpush3.bf16.msra.mxu1 (!%p166_p2), %v1347_v1  ;;  %v1397_v9 = vld [vmem:[%s1664_s1 + $0x58] sm:$0xff] (!%p166_p2)   ;;  %s1301_s13 = smov (!%p166_p2), 80   ;;  %v1428_v20 = vld [vmem:[%s1664_s1 + $0x60] sm:$0xff] (!%p166_p2)   ;;  %v1445_v32 = vld [vmem:[%s1664_s1 + $0x68] sm:$0xff] (!%p166_p2)   ;;  %s1302_s22 = smov (!%p166_p2), 32   ;;  %vm373_vm2 = vcmask (!%p166_p2), 392192  }
   0x8   : > { %1170 = vmatprep.subr.bf16.mxu0 (!%p166_p2), %v1354_v2  ;;  %1192 = vmatprep.subr.bf16.mxu1 (!%p166_p2), %v1354_v2  ;;  %v1412_v13 = vld [vmem:[%s1664_s1 + $0x18] sm:$0xff] (!%p166_p2)   ;;  %v1439_v31 = vld [vmem:[%s1664_s1 + $0x20] sm:$0xff] (!%p166_p2)   ;;  %v1453_v37 = vld [vmem:[%s1664_s1 + $0x28] sm:$0xff] (!%p166_p2)   ;;  %s1303_s27 = smov (!%p166_p2), 48   ;;  %s1304_s28 = smov (!%p166_p2), 96   ;;  %vm376_vm3 = vcmask (!%p166_p2), 523264  }
   0x9   : > { %v1460_v42 = vld [vmem:[%s1664_s1 + $0x70] sm:$0xff] (!%p166_p2)   ;;  %s1305_s6 = smov (!%p166_p2), 112   ;;  %vm379_vm4 = vcmask (!%p166_p2), 654336   ;;  %vm382_vm5 = vcmask (!%p166_p2), 785408   ;;  %vm385_vm6 = vcmask (!%p166_p2), 916480   ;;  %vm566_vm7 = vcmask (!%p166_p2), 254976  }
   0xa   : > { %v1489_v60 = vld [vmem:[%s1664_s1 + $0x30] sm:$0xff] (!%p166_p2)   ;;  %vm567_vm8 = vsmask.f32 (!%p166_p2), 1280  ;;  %vm547_vm10 = vcmask (!%p166_p2), 256000   ;;  %vm1000_vm11 = vcmask (!%p166_p2), 1040384  }
   0xb   : > { %1171 = vmatpush3.bf16.msra.mxu0 (!%p166_p2), %v1363_v3  ;;  %1193 = vmatpush3.bf16.msra.mxu1 (!%p166_p2), %v1363_v3  ;;  %vm1633_vm9 = vmand (!%p166_p2), %vm566_vm7, %vm567_vm8 }
   0xc   : > { %1172 = vmatprep.subr.bf16.mxu0 (!%p166_p2), %v1370_v4  ;;  %1194 = vmatprep.subr.bf16.mxu1 (!%p166_p2), %v1370_v4 }
   0xd   : > { %s1671_s16 = smov (!%p195_p3, %s1090_s16), 1 }
   0xe   : > { %s1234_s23 = smul.u32 80, %s1671_s16  ;;  %s1097_s18 = sshll.u32 %s1671_s16, 1 }
   0xf   : > { %1173 = vmatpush3.bf16.msra.mxu0 %v1386_v7  ;;  %1195 = vmatpush3.bf16.msra.mxu1 %v1386_v7  ;;  %s208_s21 = scalar_lea.vmem %s1667_s4, %s1097_s18 }
  0x10   : > { %s1376_s30 = scalar_lea.vmem %s1663_s0, %s1234_s23  ;;  %1174 = vmatprep.subr.bf16.mxu0 %v1397_v9  ;;  %1196 = vmatprep.subr.bf16.mxu1 %v1397_v9 }
  0x11   : > { %v1251_v5 = vld [vmem:[%s1376_s30 + $0x18] ss:$0 sps:$4 sm:$0x33]   ;;  %v1380_v6 = vld [vmem:[%s1376_s30 + $0x28] ss:$0 sps:$4 sm:$0x33]  }
  0x12   : > { %315 = vrot.lane.b32.xlu0 %v1251_v5, %s1299_s7  ;;  %v1391_v8 = vld [vmem:[%s1376_s30 + $0x3c] ss:$0 sps:$4 sm:$0x33]   ;;  %287 = vrot.lane.b32.xlu1 %v1380_v6, %s1300_s10  ;;  %v1254_v10 = vld [vmem:[%s1376_s30 + $0x14] ss:$0 sps:$4 sm:$0x33]  }
  0x13   : > { %v1404_v11 = vld [vmem:[%s1376_s30 + $0x4] sm:$0x3]  ;;  %v1256_v14 = vld [vmem:[%s1376_s30 + $0x2c] ss:$0 sps:$4 sm:$0x33]   ;;  %v332_v16 = vshll.u32 %v1251_v5, 16  ;;  %1175 = vmatpush3.bf16.msra.mxu0 %v1412_v13  ;;  %1197 = vmatpush3.bf16.msra.mxu1 %v1412_v13 }
  0x14   : > { %v1110_v12 = vcombine.low %v1404_v11, %v1404_v11  ;;  %v1418_v15 = vld [vmem:[%s1376_s30] sm:$0x3]  ;;  %v278_v24 = vshll.u32 %v1254_v10, 16  ;;  %v330_v26 = vshrl.u32 %v1251_v5, 16  ;;  %v351_v28 = vshll.u32 %v1256_v14, 16  ;;  %1176 = vmatprep.subr.bf16.mxu0 %v1428_v20  ;;  %1198 = vmatprep.subr.bf16.mxu1 %v1428_v20 }
  0x15   : > { %v1106_v19 = vcombine.low %v1418_v15, %v1418_v15  ;;  %v1257_v25 = vld [vmem:[%s1376_s30 + $0x40] ss:$0 sps:$4 sm:$0x33]   ;;  %v334_v27 = vrot.slane %v332_v16, 1  ;;  %v276_v34 = vshrl.u32 %v1254_v10, 16  ;;  %v297_v36 = vshll.u32 %v1380_v6, 16 }
  0x16   : > { %261 = vrot.lane.b32.xlu0 %v1254_v10, %s1299_s7  ;;  %292 = vrot.lane.b32.xlu1 %v1391_v8, %s1301_s13  ;;  %v321_v17 = vshrl.u32 %v1110_v12, 16  ;;  %v323_v18 = vshll.u32 %v1110_v12, 16  ;;  %v280_v35 = vrot.slane %v278_v24, 1  ;;  %v349_v39 = vshrl.u32 %v1256_v14, 16  ;;  %v1463_v43 = vld [vmem:[%s1376_s30 + $0x8] sm:$0x3] }
  0x17   : > { %v267_v22 = vshrl.u32 %v1106_v19, 16  ;;  %v269_v23 = vshll.u32 %v1106_v19, 16  ;;  %1177 = vmatpush3.bf16.msra.mxu0 %v1439_v31  ;;  %v335_v38 = vor.u32 %v334_v27, %v330_v26  ;;  %v353_v40 = vrot.slane %v351_v28, 1  ;;  %1199 = vmatpush3.bf16.msra.mxu1 %v1439_v31  ;;  %v1475_v52 = vld [vmem:[%s1376_s30 + $0x4] sm:$0x3]  ;;  %v1498_v10 = vld [vmem:[%s1664_s1 + $0x78] sm:$0xff]  }
  0x18   : > { %v325_v21 = vrot.slane %v323_v18, 1  ;;  %v360_v41 = vshll.u32 %v1257_v25, 16  ;;  %1178 = vmatprep.subr.bf16.mxu0 %v1445_v32  ;;  %1200 = vmatprep.subr.bf16.mxu1 %v1445_v32  ;;  %v281_v44 = vor.u32 %v280_v35, %v276_v34  ;;  %v295_v45 = vshrl.u32 %v1380_v6, 16  ;;  %v1259_v59 = vld [vmem:[%s1376_s30 + $0x1c] ss:$0 sps:$4 sm:$0x33]  }
  0x19   : > { %v271_v30 = vrot.slane %v269_v23, 1  ;;  %v299_v46 = vrot.slane %v297_v36, 1  ;;  %v306_v47 = vshll.u32 %v1391_v8, 16  ;;  %v354_v48 = vor.u32 %v353_v40, %v349_v39  ;;  %v1260_v62 = vld [vmem:[%s1376_s30 + $0x18] ss:$0 sps:$4 sm:$0x33]  }
  0x1a   : > { %341 = vrot.lane.b32.xlu0 %v1256_v14, %s1300_s10  ;;  %v326_v29 = vor.u32 %v325_v21, %v321_v17  ;;  %v358_v49 = vshrl.u32 %v1257_v25, 16  ;;  %v362_v50 = vrot.slane %v360_v41, 1  ;;  %v1143_v51 = vcombine.low %v1463_v43, %v1463_v43  ;;  %v1503_v17 = vld [vmem:[%s1376_s30 + $0xc] sm:$0x3]  ;;  %v1509_v18 = vld [vmem:[%s1664_s1 + $0x38] sm:$0xff]  }
  0x1b   : > { %v272_v33 = vor.u32 %v271_v30, %v267_v22  ;;  %1179 = vmatpush3.bf16.msra.mxu0 %v1453_v37  ;;  %1201 = vmatpush3.bf16.msra.mxu1 %v1453_v37  ;;  %v300_v53 = vor.u32 %v299_v46, %v295_v45  ;;  %v304_v54 = vshrl.u32 %v1391_v8, 16  ;;  %v308_v55 = vrot.slane %v306_v47, 1  ;;  %v1520_v27 = vld [vmem:[%s1376_s30 + $0x8] sm:$0x3] }
  0x1c   : > { %327 = vrot.lane.b32.xlu1 %v326_v29, %s1302_s22  ;;  %1180 = vmatprep.subr.bf16.mxu0 %v1460_v42  ;;  %v1139_v56 = vcombine.low %v1475_v52, %v1475_v52  ;;  %v363_v57 = vor.u32 %v362_v50, %v358_v49  ;;  %v649_v58 = vshll.u32 %v1143_v51, 16  ;;  %v647_v5 = vshrl.u32 %v1143_v51, 16  ;;  %v1263_v29 = vld [vmem:[%s1376_s30 + $0x20] ss:$0 sps:$4 sm:$0x33]  }
  0x1d   : > { %1202 = vmatprep.subr.bf16.mxu1 %v1460_v42  ;;  %v309_v61 = vor.u32 %v308_v55, %v304_v54  ;;  %v658_v8 = vshll.u32 %v1259_v59, 16  ;;  %v604_v14 = vshll.u32 %v1260_v62, 16  ;;  %v656_v21 = vshrl.u32 %v1259_v59, 16  ;;  %v1264_v34 = vld [vmem:[%s1376_s30 + $0x30] ss:$0 sps:$4 sm:$0x33]  }
  0x1e   : > { %346 = vrot.lane.b32.xlu0 %v1257_v25, %s1301_s13  ;;  %v595_v63 = vshll.u32 %v1139_v56, 16  ;;  %v651_v6 = vrot.slane %v649_v58, 1  ;;  %v593_v12 = vshrl.u32 %v1139_v56, 16  ;;  %v602_v23 = vshrl.u32 %v1260_v62, 16 }
  0x1f   : > { %1181 = vmatpush3.bf16.msra.mxu0 %v1489_v60  ;;  %1203 = vmatpush3.bf16.msra.mxu1 %v1489_v60  ;;  %v660_v22 = vrot.slane %v658_v8, 1  ;;  %v606_v24 = vrot.slane %v604_v14, 1  ;;  %v1161_v25 = vcombine.low %v1503_v17, %v1503_v17  ;;  %v872_v41 = vshll.u32 %v1263_v29, 16  ;;  %v1268_v47 = vld [vmem:[%s1376_s30 + $0x44] ss:$0 sps:$4 sm:$0x33]  }
  0x20   : > { %273 = vrot.lane.b32.xlu1 %v272_v33, %s1302_s22  ;;  %v597_v16 = vrot.slane %v595_v63, 1  ;;  %1182 = vmatprep.subr.bf16.mxu0 %v1498_v10  ;;  %v652_v19 = vor.u32 %v651_v6, %v647_v5  ;;  %v677_v50 = vshll.u32 %v1264_v34, 16  ;;  %v675_v55 = vshrl.u32 %v1264_v34, 16 }
  0x21   : > { %1204 = vmatprep.subr.bf16.mxu1 %v1498_v10  ;;  %v661_v28 = vor.u32 %v660_v22, %v656_v21  ;;  %v863_v30 = vshll.u32 %v1161_v25, 16  ;;  %v607_v33 = vor.u32 %v606_v24, %v602_v23  ;;  %v861_v35 = vshrl.u32 %v1161_v25, 16  ;;  %v1272_v23 = vld [vmem:[%s1376_s30 + $0x30] ss:$0 sps:$4 sm:$0x33]  }
  0x22   : > { %336 = vrot.lane.b32.xlu0 %v335_v38, %s1303_s27  ;;  %v598_v26 = vor.u32 %v597_v16, %v593_v12  ;;  %v1265_v38 = vld [vmem:[%s1376_s30 + $0x1c] ss:$0 sps:$4 sm:$0x33]   ;;  %v874_v49 = vrot.slane %v872_v41, 1  ;;  %v679_v56 = vrot.slane %v677_v50, 1  ;;  %v686_v63 = vshll.u32 %v1268_v47, 16 }
  0x23   : > { %1183 = vmatpush3.bf16.msra.mxu0 %v1509_v18  ;;  %1205 = vmatpush3.bf16.msra.mxu1 %v1509_v18  ;;  %v865_v36 = vrot.slane %v863_v30, 1  ;;  %v816_v58 = vshrl.u32 %v1265_v38, 16  ;;  %v1271_v12 = vld [vmem:[%s1376_s30 + $0x34] ss:$0 sps:$4 sm:$0x33]   ;;  %v684_v14 = vshrl.u32 %v1268_v47, 16 }
  0x24   : > { %282 = vrot.lane.b32.xlu1 %v281_v44, %s1303_s27  ;;  %1212 = vmatprep.subr.bf16.mxu0 %v1342_v0  ;;  %v1157_v0 = vcombine.low %v1520_v27, %v1520_v27  ;;  %v1267_v44 = vld [vmem:[%s1376_s30 + $0x2c] ss:$0 sps:$4 sm:$0x33]   ;;  %v688_v16 = vrot.slane %v686_v63, 1 }
  0x25   : > { %v866_v40 = vor.u32 %v865_v36, %v861_v35  ;;  %v621_v6 = vshrl.u32 %v1267_v44, 16  ;;  %v1274_v35 = vld [vmem:[%s1376_s30 + $0x44] ss:$0 sps:$4 sm:$0x33]   ;;  %v835_v36 = vshrl.u32 %v1272_v23, 16 }
  0x26   : > { %355 = vrot.lane.b32.xlu0 %v354_v48, %s1304_s28  ;;  %v809_v39 = vshll.u32 %v1157_v0, 16  ;;  %v807_v45 = vshrl.u32 %v1157_v0, 16  ;;  %v870_v48 = vshrl.u32 %v1263_v29, 16  ;;  %v689_v22 = vor.u32 %v688_v16, %v684_v14 }
  0x28   : > { %301 = vrot.lane.b32.xlu1 %v300_v53, %s1304_s28  ;;  %v811_v46 = vrot.slane %v809_v39, 1  ;;  %v818_v53 = vshll.u32 %v1265_v38, 16  ;;  %v875_v54 = vor.u32 %v874_v49, %v870_v48  ;;  %v846_v39 = vshll.u32 %v1274_v35, 16 }
  0x2a   : > { %364 = vrot.lane.b32.xlu0 %v363_v57, %s1305_s6  ;;  %v812_v51 = vor.u32 %v811_v46, %v807_v45  ;;  %v1270_v57 = vld [vmem:[%s1376_s30 + $0x40] ss:$0 sps:$4 sm:$0x33]   ;;  %v844_v46 = vshrl.u32 %v1274_v35, 16 }
  0x2b   : > { %v632_v21 = vshll.u32 %v1270_v57, 16  ;;  %v630_v24 = vshrl.u32 %v1270_v57, 16 }
  0x2c   : > { %310 = vrot.lane.b32.xlu1 %v309_v61, %s1305_s6  ;;  %v623_v61 = vshll.u32 %v1267_v44, 16 }
  0x2d   : > { %v634_v25 = vrot.slane %v632_v21, 1 }
  0x2e   : > { %641 = vrot.lane.b32.xlu0 %v1259_v59, %s1299_s7  ;;  %v820_v59 = vrot.slane %v818_v53, 1  ;;  %v625_v8 = vrot.slane %v623_v61, 1 }
  0x2f   : > { %v635_v30 = vor.u32 %v634_v25, %v630_v24 }
  0x30   : > { %587 = vrot.lane.b32.xlu1 %v1260_v62, %s1299_s7  ;;  %v680_v62 = vor.u32 %v679_v56, %v675_v55  ;;  %v821_v5 = vor.u32 %v820_v59, %v816_v58 }
  0x32   : > { %653 = vrot.lane.b32.xlu0 %v652_v19, %s1302_s22  ;;  %v626_v19 = vor.u32 %v625_v8, %v621_v6 }
  0x34   : > { %599 = vrot.lane.b32.xlu1 %v598_v26, %s1302_s22  ;;  %v891_v26 = vshll.u32 %v1271_v12, 16 }
  0x36   : > { %662 = vrot.lane.b32.xlu0 %v661_v28, %s1303_s27  ;;  %v1273_v28 = vld [vmem:[%s1376_s30 + $0x48] ss:$0 sps:$4 sm:$0x33]   ;;  %v893_v0 = vrot.slane %v891_v26, 1  ;;  %s1235_s30 = smul.u32 6, %s1671_s16 }
  0x37   : > { %v898_v41 = vshrl.u32 %v1273_v28, 16 }
  0x38   : > { %855 = vrot.lane.b32.xlu1 %v1263_v29, %s1299_s7  ;;  %v837_v29 = vshll.u32 %v1272_v23, 16  ;;  %s1630_s17 = scalar_lea.vmem %s1666_s3, %s1235_s30 }
  0x3a   : > { %608 = vrot.lane.b32.xlu0 %v607_v33, %s1303_s27  ;;  %v889_v33 = vshrl.u32 %v1271_v12, 16 }
  0x3c   : > { %667 = vrot.lane.b32.xlu1 %v1264_v34, %s1300_s10  ;;  %v900_v34 = vshll.u32 %v1273_v28, 16 }
  0x3e   : > { %801 = vrot.lane.b32.xlu0 %v1265_v38, %s1299_s7  ;;  %v839_v38 = vrot.slane %v837_v29, 1 }
  0x40   : > { %867 = vrot.lane.b32.xlu1 %v866_v40, %s1302_s22  ;;  %v894_v40 = vor.u32 %v893_v0, %v889_v33  ;;  %v840_v45 = vor.u32 %v839_v38, %v835_v36 }
  0x42   : > { %613 = vrot.lane.b32.xlu0 %v1267_v44, %s1300_s10  ;;  %v902_v44 = vrot.slane %v900_v34, 1 }
  0x44   : > { %672 = vrot.lane.b32.xlu1 %v1268_v47, %s1301_s13  ;;  %v848_v47 = vrot.slane %v846_v39, 1  ;;  %v903_v48 = vor.u32 %v902_v44, %v898_v41 }
  0x46   : > { %813 = vrot.lane.b32.xlu0 %v812_v51, %s1302_s22  ;;  %v849_v49 = vor.u32 %v848_v47, %v844_v46 }
  0x48   : > { %876 = vrot.lane.b32.xlu1 %v875_v54, %s1303_s27 }
  0x4a   : > { %618 = vrot.lane.b32.xlu0 %v1270_v57, %s1301_s13 }
  0x4c   : > { %681 = vrot.lane.b32.xlu1 %v680_v62, %s1304_s28 }
  0x4e   : > { %822 = vrot.lane.b32.xlu0 %v821_v5, %s1303_s27 }
  0x50   : > { %881 = vrot.lane.b32.xlu1 %v1271_v12, %s1300_s10 }
  0x52   : > { %627 = vrot.lane.b32.xlu0 %v626_v19, %s1304_s28 }
  0x54   : > { %690 = vrot.lane.b32.xlu1 %v689_v22, %s1305_s6 }
  0x56   : > { %827 = vrot.lane.b32.xlu0 %v1272_v23, %s1300_s10 }
  0x58   : > { %886 = vrot.lane.b32.xlu1 %v1273_v28, %s1301_s13 }
  0x5a   : > { %636 = vrot.lane.b32.xlu0 %v635_v30, %s1305_s6 }
  0x5c   : > { %832 = vrot.lane.b32.xlu1 %v1274_v35, %s1301_s13 }
  0x5e   : > { %895 = vrot.lane.b32.xlu0 %v894_v40, %s1304_s28 }
  0x60   : > { %841 = vrot.lane.b32.xlu1 %v840_v45, %s1304_s28 }
  0x62   : > { %904 = vrot.lane.b32.xlu0 %v903_v48, %s1305_s6 }
  0x64   : > { %850 = vrot.lane.b32.xlu1 %v849_v49, %s1305_s6 }
  0x84   : > { %v316_v50 = vpop.permute.xlu0 %315  ;;  %v288_v51 = vpop.permute.xlu1 %287 }
  0x85   : > { %v391_v58 = vsel %vm366_vm0, %v1404_v11, %v316_v50 }
  0x88   : > { %v262_v53 = vpop.permute.xlu0 %261  ;;  %v293_v54 = vpop.permute.xlu1 %292 }
  0x89   : > { %v369_v5 = vsel %vm366_vm0, %v1418_v15, %v262_v53 }
  0x8c   : > { %v342_v55 = vpop.permute.xlu0 %341 }
  0x8e   : > { %v328_v56 = vpop.permute.xlu1 %327 }
  0x8f   : > { %v393_v61 = vsel %vm370_vm1, %v391_v58, %v328_v56 }
  0x90   : > { %v347_v57 = vpop.permute.xlu0 %346 }
  0x92   : > { %v274_v59 = vpop.permute.xlu1 %273 }
  0x93   : > { %v372_v8 = vsel %vm370_vm1, %v369_v5, %v274_v59 }
  0x94   : > { %v337_v62 = vpop.permute.xlu0 %336 }
  0x95   : > { %v395_v63 = vsel %vm373_vm2, %v393_v61, %v337_v62 }
  0x96   : > { %v397_v6 = vsel %vm376_vm3, %v395_v63, %v342_v55  ;;  %v283_v12 = vpop.permute.xlu1 %282 }
  0x97   : > { %v375_v14 = vsel %vm373_vm2, %v372_v8, %v283_v12  ;;  %v399_v19 = vsel %vm379_vm4, %v397_v6, %v347_v57 }
  0x98   : > { %v356_v16 = vpop.permute.xlu0 %355  ;;  %v378_v11 = vsel %vm376_vm3, %v375_v14, %v288_v51 }
  0x99   : > { %v401_v22 = vsel %vm382_vm5, %v399_v19, %v356_v16  ;;  %v381_v15 = vsel %vm379_vm4, %v378_v11, %v293_v54 }
  0x9a   : > { %v302_v21 = vpop.permute.xlu1 %301 }
  0x9b   : > { %v384_v25 = vsel %vm382_vm5, %v381_v15, %v302_v21 }
  0x9c   : > { %v365_v23 = vpop.permute.xlu0 %364 }
  0x9d   : > { %v403_v24 = vsel %vm385_vm6, %v401_v22, %v365_v23  ;;  %v1113_v22 = vld [vmem:[%s1665_s2] ss:$0 sm:$0xff] }
  0x9e   : > { %539 = vmatprep.mubr.bf16.mxu0 %v403_v24  ;;  %v311_v26 = vpop.permute.xlu1 %310 }
  0x9f   : > { %v387_v28 = vsel %vm385_vm6, %v384_v25, %v311_v26 }
  0xa0   : > { %v642_v29 = vpop.permute.xlu0 %641  ;;  %540 = vmatmul.mubr.bf16.vlgmr.msra.gmra.mrb[0].mxu0 %v387_v28 }
  0xa1   : > { %1213 = vmatpush3.bf16.msra.mxu0 %v1347_v1 }
  0xa2   : > { %v588_v30 = vpop.permute.xlu1 %587  ;;  %1214 = vmatprep.subr.bf16.mxu0 %v1354_v2 }
  0xa4   : > { %v654_v33 = vpop.permute.xlu0 %653 }
  0xa5   : > { %1215 = vmatpush3.bf16.msra.mxu0 %v1363_v3 }
  0xa6   : > { %v600_v0 = vpop.permute.xlu1 %599  ;;  %1216 = vmatprep.subr.bf16.mxu0 %v1370_v4 }
  0xa8   : > { %v663_v34 = vpop.permute.xlu0 %662 }
  0xa9   : > { %1217 = vmatpush3.bf16.msra.mxu0 %v1386_v7 }
  0xaa   : > { %v856_v35 = vpop.permute.xlu1 %855  ;;  %1218 = vmatprep.subr.bf16.mxu0 %v1397_v9 }
  0xab   : > { %v924_v54 = vsel %vm366_vm0, %v1503_v17, %v856_v35 }
  0xac   : > { %v609_v36 = vpop.permute.xlu0 %608 }
  0xad   : > { %1219 = vmatpush3.bf16.msra.mxu0 %v1412_v13 }
  0xae   : > { %v668_v38 = vpop.permute.xlu1 %667  ;;  %1220 = vmatprep.subr.bf16.mxu0 %v1428_v20 }
  0xb0   : > { %v802_v1 = vpop.permute.xlu0 %801 }
  0xb1   : > { %1221 = vmatpush3.bf16.msra.mxu0 %v1439_v31  ;;  %v908_v59 = vsel %vm366_vm0, %v1520_v27, %v802_v1 }
  0xb2   : > { %v868_v2 = vpop.permute.xlu1 %867  ;;  %1222 = vmatprep.subr.bf16.mxu0 %v1445_v32  ;;  %v710_v32 = vsel %vm366_vm0, %v1463_v43, %v642_v29  ;;  %v569_v29 = vld [vmem:[%s1630_s17] sm:$0x3] }
  0xb3   : > { %v712_v39 = vsel %vm370_vm1, %v710_v32, %v654_v33  ;;  %v926_v56 = vsel %vm370_vm1, %v924_v54, %v868_v2  ;;  %v1146_v32 = vld [vmem:[%s1630_s17 + $0x2] sm:$0x3] }
  0xb4   : > { %v614_v3 = vpop.permute.xlu0 %613  ;;  %v714_v40 = vsel %vm373_vm2, %v712_v39, %v663_v34 }
  0xb5   : > { %1223 = vmatpush3.bf16.msra.mxu0 %v1453_v37  ;;  %v716_v41 = vsel %vm376_vm3, %v714_v40, %v668_v38 }
  0xb6   : > { %v673_v4 = vpop.permute.xlu1 %672  ;;  %1224 = vmatprep.subr.bf16.mxu0 %v1460_v42 }
  0xb8   : > { %v814_v7 = vpop.permute.xlu0 %813 }
  0xb9   : > { %1225 = vmatpush3.bf16.msra.mxu0 %v1489_v60  ;;  %v718_v60 = vsel %vm379_vm4, %v716_v41, %v673_v4  ;;  %v910_v62 = vsel %vm370_vm1, %v908_v59, %v814_v7 }
  0xba   : > { %v877_v9 = vpop.permute.xlu1 %876  ;;  %1226 = vmatprep.subr.bf16.mxu0 %v1498_v10  ;;  %v694_v10 = vsel %vm366_vm0, %v1475_v52, %v588_v30 }
  0xbb   : > { %v696_v45 = vsel %vm370_vm1, %v694_v10, %v600_v0  ;;  %v928_v58 = vsel %vm373_vm2, %v926_v56, %v877_v9 }
  0xbc   : > { %v619_v13 = vpop.permute.xlu0 %618  ;;  %v698_v47 = vsel %vm373_vm2, %v696_v45, %v609_v36 }
  0xbd   : > { %1227 = vmatpush3.bf16.msra.mxu0 %v1509_v18  ;;  %v700_v48 = vsel %vm376_vm3, %v698_v47, %v614_v3 }
  0xbe   : > { %v682_v20 = vpop.permute.xlu1 %681  ;;  %v702_v49 = vsel %vm379_vm4, %v700_v48, %v619_v13 }
  0xbf   : > { %v720_v18 = vsel %vm382_vm5, %v718_v60, %v682_v20 }
  0xc0   : > { %v823_v31 = vpop.permute.xlu0 %822 }
  0xc1   : > { %v912_v6 = vsel %vm373_vm2, %v910_v62, %v823_v31 }
  0xc2   : > { %v882_v37 = vpop.permute.xlu1 %881 }
  0xc3   : > { %v930_v61 = vsel %vm376_vm3, %v928_v58, %v882_v37 }
  0xc4   : > { %v628_v42 = vpop.permute.xlu0 %627 }
  0xc5   : > { %v704_v51 = vsel %vm382_vm5, %v702_v49, %v628_v42 }
  0xc6   : > { %v691_v44 = vpop.permute.xlu1 %690 }
  0xc7   : > { %v722_v43 = vsel %vm385_vm6, %v720_v18, %v691_v44 }
  0xc8   : > { %v828_v46 = vpop.permute.xlu0 %827  ;;  %756 = vmatprep.mubr.bf16.mxu1 %v722_v43 }
  0xc9   : > { %v914_v12 = vsel %vm376_vm3, %v912_v6, %v828_v46 }
  0xca   : > { %v887_v50 = vpop.permute.xlu1 %886 }
  0xcb   : > { %v932_v63 = vsel %vm379_vm4, %v930_v61, %v887_v50 }
  0xcc   : > { %v637_v53 = vpop.permute.xlu0 %636 }
  0xcd   : > { %v706_v52 = vsel %vm385_vm6, %v704_v51, %v637_v53 }
  0xce   : > { %757 = vmatmul.mubr.bf16.vlgmr.msra.gmra.mrb[0].mxu1 %v706_v52  ;;  %v833_v55 = vpop.permute.xlu1 %832 }
  0xcf   : > { %v916_v16 = vsel %vm379_vm4, %v914_v12, %v833_v55 }
  0xd0   : > { %v896_v57 = vpop.permute.xlu0 %895 }
  0xd1   : > { %v934_v17 = vsel %vm382_vm5, %v932_v63, %v896_v57 }
  0xd2   : > { %v842_v5 = vpop.permute.xlu1 %841 }
  0xd3   : > { %v918_v27 = vsel %vm382_vm5, %v916_v16, %v842_v5 }
  0xd4   : > { %v905_v8 = vpop.permute.xlu0 %904 }
  0xd5   : > { %v936_v14 = vsel %vm385_vm6, %v934_v17, %v905_v8  ;;  %v1164_v17 = vld [vmem:[%s1630_s17 + $0x4] sm:$0x3] }
  0xd6   : > { %970 = vmatprep.mubr.bf16.mxu0 %v936_v14  ;;  %v851_v11 = vpop.permute.xlu1 %850 }
  0xd7   : > { %v920_v19 = vsel %vm385_vm6, %v918_v27, %v851_v11 }
  0xd8   : > { %971 = vmatmul.mubr.bf16.vlgmr.msra.gmra.mrb[4].mxu0 %v920_v19 }
 0x173   : > { %v1184_v21 = vpop.f32.mrb[0].mxu0 }
 0x174   : > { %v1185_v15 = vpop.f32.mrb[1].mxu0 }
 0x175   : > { %v1186_v23 = vadd.f32 %v1185_v15, %v1184_v21  ;;  %v1187_v24 = vpop.f32.mrb[2].mxu0 }
 0x176   : > { %v1188_v25 = vpop.f32.mrb[3].mxu0 }
 0x177   : > { %v542_v26 = vadd.f32 %v1186_v23, %v1113_v22 }
 0x179   : > { %v565_v30 = vpack.c.bf16 %v542_v26, %v542_v26  ;;  %v556_v0 = vmul.f32 %v542_v26, %v542_v26  ;;  %v548_v34 = vsel %vm547_vm10, %v542_v26, 0.0 }
 0x17a   : > { %v549_v35 = vrot.slane %v548_v34, 4 }
 0x17b   : > { %v570_v33 = vsel %vm1633_vm9, %v565_v30, %v569_v29  ;;  %v557_v36 = vsel %vm547_vm10, %v556_v0, 0.0 }
 0x17c   : > { %571 = vst [vmem:[%s1630_s17] sm:$0x3] %v570_v33  ;;  %v558_v38 = vrot.slane %v557_v36, 4  ;;  %v550_v1 = vadd.f32 %v549_v35, %v548_v34 }
 0x17e   : > { %v559_v9 = vadd.f32 %v558_v38, %v557_v36  ;;  %v551_v20 = vrot.slane %v550_v1, 2 }
 0x180   : > { %v560_v42 = vrot.slane %v559_v9, 2  ;;  %v552_v60 = vadd.f32 %v551_v20, %v550_v1 }
 0x182   : > { %v561_v43 = vadd.f32 %v560_v42, %v559_v9  ;;  %v553_v49 = vrot.slane %v552_v60, 1 }
 0x184   : > { %v562_v56 = vrot.slane %v561_v43, 1  ;;  %v554_v61 = vadd.f32 %v553_v49, %v552_v60 }
 0x186   : > { %v563_v14 = vadd.f32 %v562_v56, %v561_v43 }
 0x1a1   : > { %v1206_v2 = vpop.f32.mrb[0].mxu1 }
 0x1a2   : > { %v1207_v3 = vpop.f32.mrb[1].mxu1 }
 0x1a3   : > { %v1208_v4 = vadd.f32 %v1207_v3, %v1206_v2  ;;  %v1209_v7 = vpop.f32.mrb[2].mxu1 }
 0x1a4   : > { %v1210_v13 = vpop.f32.mrb[3].mxu1 }
 0x1a5   : > { %v759_v31 = vadd.f32 %v1208_v4, %v1113_v22 }
 0x1a7   : > { %v764_v39 = vsel %vm547_vm10, %v759_v31, 0.0  ;;  %v772_v37 = vmul.f32 %v759_v31, %v759_v31  ;;  %v781_v40 = vpack.c.bf16 %v759_v31, %v759_v31 }
 0x1a8   : > { %v765_v41 = vrot.slane %v764_v39, 4 }
 0x1a9   : > { %v773_v10 = vsel %vm547_vm10, %v772_v37, 0.0  ;;  %v784_v18 = vsel %vm1633_vm9, %v781_v40, %v1146_v32 }
 0x1aa   : > { %v766_v44 = vadd.f32 %v765_v41, %v764_v39  ;;  %v774_v45 = vrot.slane %v773_v10, 4  ;;  %1147 = vst [vmem:[%s1630_s17 + $0x2] sm:$0x3] %v784_v18 }
 0x1ab   : > { %v1228_v48 = vpop.f32.mrb[4].mxu0 }
 0x1ac   : > { %v767_v46 = vrot.slane %v766_v44, 2  ;;  %v775_v47 = vadd.f32 %v774_v45, %v773_v10  ;;  %v1229_v50 = vpop.f32.mrb[5].mxu0 }
 0x1ad   : > { %v1230_v52 = vadd.f32 %v1229_v50, %v1228_v48  ;;  %v1231_v54 = vpop.f32.mrb[6].mxu0 }
 0x1ae   : > { %v768_v51 = vadd.f32 %v767_v46, %v766_v44  ;;  %v776_v53 = vrot.slane %v775_v47, 2  ;;  %v1232_v55 = vpop.f32.mrb[7].mxu0 }
 0x1af   : > { %v973_v59 = vadd.f32 %v1230_v52, %v1113_v22 }
 0x1b0   : > { %v769_v57 = vrot.slane %v768_v51, 1  ;;  %v777_v58 = vadd.f32 %v776_v53, %v775_v47 }
 0x1b1   : > { %v978_v5 = vsel %vm547_vm10, %v973_v59, 0.0  ;;  %v986_v6 = vmul.f32 %v973_v59, %v973_v59  ;;  %v995_v12 = vpack.c.bf16 %v973_v59, %v973_v59 }
 0x1b2   : > { %v770_v62 = vadd.f32 %v769_v57, %v768_v51  ;;  %v778_v63 = vrot.slane %v777_v58, 1  ;;  %v979_v8 = vrot.slane %v978_v5, 4 }
 0x1b3   : > { %v987_v11 = vsel %vm547_vm10, %v986_v6, 0.0  ;;  %v998_v22 = vsel %vm1633_vm9, %v995_v12, %v1164_v17 }
 0x1b4   : > { %v771_v16 = vadd.f32 %v770_v62, %v554_v61  ;;  %v779_v27 = vadd.f32 %v778_v63, %v777_v58  ;;  %v980_v19 = vadd.f32 %v979_v8, %v978_v5  ;;  %v988_v21 = vrot.slane %v987_v11, 4  ;;  %1165 = vst [vmem:[%s1630_s17 + $0x4] sm:$0x3] %v998_v22 }
 0x1b6   : > { %v780_v15 = vadd.f32 %v779_v27, %v563_v14  ;;  %v981_v23 = vrot.slane %v980_v19, 2  ;;  %v989_v24 = vadd.f32 %v988_v21, %v987_v11 }
 0x1b8   : > { %v982_v25 = vadd.f32 %v981_v23, %v980_v19  ;;  %v990_v26 = vrot.slane %v989_v24, 2 }
 0x1ba   : > { %v983_v29 = vrot.slane %v982_v25, 1  ;;  %v991_v30 = vadd.f32 %v990_v26, %v989_v24 }
 0x1bc   : > { %v984_v33 = vadd.f32 %v983_v29, %v982_v25  ;;  %v992_v0 = vrot.slane %v991_v30, 1 }
 0x1be   : > { %v985_v34 = vadd.f32 %v984_v33, %v771_v16  ;;  %v993_v35 = vadd.f32 %v992_v0, %v991_v30 }
 0x1c0   : > { %v994_v28 = vadd.f32 %v993_v35, %v780_v15 }
 0x1c2   : > { %v1001_v36 = vsel %vm1000_vm11, %v985_v34, %v994_v28 }
 0x1c3   : > { %1003 = vst.msk [vmem:[%s208_s21] sm:$0x3] %vm566_vm7, %v1001_v36 }
 0x1c4 PF: > { %s15_s15 = sadd.s32 1, %s1297_s15  }
 0x1c5   : > { %p12_p4 = scmp.ge.s32.totalorder %s15_s15, 4  }
 0x1c7   :  { %14 = sbr.rel (!%p12_p4) target bundleno = 1 (0x1), region = 91 }

// kernel: _lambda_.8
= control target key start
LH: loop header
LB: loop body
LE: loop exit
PB: predicated region body
PF: predicated region fallthrough
CT: control target
= control target key end

     0   :  { %s2133_s15 = smov 0   ;;  %s2696_s0 = inlined_call_operand.vmem [shape: bf16[2,7,7,32], index: 0, kind: input, shape index: {}]   ;;  %s2697_s1 = inlined_call_operand.vmem [shape: bf16[512,64], index: 1, kind: input, shape index: {}]   ;;  %s2698_s2 = inlined_call_operand.vmem [shape: f32[1,64], index: 2, kind: input, shape index: {}]   ;;  %s2699_s3 = inlined_call_operand.vmem [shape: bf16[2,4,4,64], index: 3, kind: output, shape index: {0}]   ;;  %s2700_s4 = inlined_call_operand.vmem [shape: f32[2,2,64], index: 4, kind: output, shape index: {1}]  }
   0x1 LB: > { %s1660_s16 = sadd.s32 4294967295, %s2103_s15   ;;  %p1664_p0 = scmp.ge.s32.totalorder %s2103_s15, 1  ;;  %s2103_s15 = sphi %s2133_s15, %s15_s15  }
   0x2   : > { %p165_p1 = scmp.lt.s32.totalorder %s2103_s15, 3 }
   0x4   : > { %p166_p2 = pnand %p1664_p0, %p165_p1 }
   0x5   : > { %p195_p3 = scmp.lt.s32.totalorder (!%p166_p2), %s1660_s16, 1  ;;  %v2144_v0 = vld [vmem:[%s2697_s1 + $0x40] sm:$0xff] (!%p166_p2)   ;;  %v2156_v2 = vld [vmem:[%s2697_s1 + $0x48] sm:$0xff] (!%p166_p2)   ;;  %v2187_v7 = vld [vmem:[%s2697_s1 + $0x50] sm:$0xff] (!%p166_p2)   ;;  %s2105_s11 = smov (!%p166_p2), 64   ;;  %vm418_vm0 = vcmask (!%p166_p2), 261120  }
   0x6   : > { %169 = sbr.rel (%p166_p2) target bundleno = 490 (0x1ea), region = 32  ;;  %v2149_v1 = vld [vmem:[%s2697_s1] sm:$0xff] (!%p166_p2)   ;;  %1816 = vmatprep.subr.bf16.mxu0 (!%p166_p2), %v2144_v0  ;;  %v2164_v3 = vld [vmem:[%s2697_s1 + $0x8] sm:$0xff] (!%p166_p2)   ;;  %v2195_v9 = vld [vmem:[%s2697_s1 + $0x10] sm:$0xff] (!%p166_p2)   ;;  %s2106_s18 = smov (!%p166_p2), 32   ;;  %vm422_vm1 = vcmask (!%p166_p2), 523264  }
   0x7   : > { %1817 = vmatpush3.bf16.msra.mxu0 (!%p166_p2), %v2149_v1  ;;  %v2170_v4 = vld [vmem:[%s2697_s1 + $0xc0] sm:$0xff] (!%p166_p2)   ;;  %v2210_v26 = vld [vmem:[%s2697_s1 + $0xc8] sm:$0xff] (!%p166_p2)   ;;  %v2224_v34 = vld [vmem:[%s2697_s1 + $0x58] sm:$0xff] (!%p166_p2)   ;;  %s2107_s25 = smov (!%p166_p2), 96   ;;  %vm425_vm2 = vcmask (!%p166_p2), 785408   ;;  %vm750_vm3 = vcmask (!%p166_p2), 517120  }
   0x8   : > { %1818 = vmatprep.subr.bf16.mxu0 (!%p166_p2), %v2156_v2  ;;  %v2180_v5 = vld [vmem:[%s2697_s1 + $0x80] sm:$0xff] (!%p166_p2)   ;;  %1838 = vmatprep.subr.bf16.mxu1 (!%p166_p2), %v2170_v4  ;;  %v2217_v30 = vld [vmem:[%s2697_s1 + $0x88] sm:$0xff] (!%p166_p2)   ;;  %v2236_v49 = vld [vmem:[%s2697_s1 + $0x18] sm:$0xff] (!%p166_p2)   ;;  %vm731_vm4 = vcmask (!%p166_p2), 519168   ;;  %vm1571_vm5 = vcmask (!%p166_p2), 1040384  }
   0x9   : > { %1839 = vmatpush3.bf16.msra.mxu1 (!%p166_p2), %v2180_v5  ;;  %v2243_v57 = vld [vmem:[%s2697_s1 + $0xd0] sm:$0xff] (!%p166_p2)  }
   0xa   : > { %1840 = vmatprep.subr.bf16.mxu1 (!%p166_p2), %v2210_v26 }
   0xb   : > { %1819 = vmatpush3.bf16.msra.mxu0 (!%p166_p2), %v2164_v3 }
   0xc   : > { %1820 = vmatprep.subr.bf16.mxu0 (!%p166_p2), %v2187_v7 }
   0xd   : > { %s2702_s16 = smov (!%p195_p3, %s1660_s16), 1  ;;  %1841 = vmatpush3.bf16.msra.mxu1 %v2217_v30 }
   0xe   : > { %s1992_s23 = smul.u32 28, %s2702_s16  ;;  %1842 = vmatprep.subr.bf16.mxu1 %v2243_v57  ;;  %s1815_s24 = sshll.u32 %s2702_s16, 3 }
   0xf   : > { %1821 = vmatpush3.bf16.msra.mxu0 %v2195_v9  ;;  %s2667_s28 = scalar_lea.vmem %s2699_s3, %s1815_s24  ;;  %s1668_s29 = sshll.u32 %s2702_s16, 1 }
  0x10   : > { %s2175_s30 = scalar_lea.vmem %s2696_s0, %s1992_s23  ;;  %1822 = vmatprep.subr.bf16.mxu0 %v2224_v34  ;;  %s208_s7 = scalar_lea.vmem %s2700_s4, %s1668_s29 }
  0x11   : > { %v2004_v6 = vld [vmem:[%s2175_s30 + $0xc] ss:$0 sps:$4 sm:$0x66]   ;;  %v2005_v8 = vld [vmem:[%s2175_s30 + $0x4] ss:$0 sps:$4 sm:$0x66]  }
  0x12   : > { %v402_v10 = vrot.slane %v2004_v6, 1  ;;  %v2006_v11 = vld [vmem:[%s2175_s30 + $0x4] ss:$0 sps:$4 sm:$0x77]   ;;  %v340_v12 = vrot.slane %v2005_v8, 1 }
  0x13   : > { %v2007_v13 = vld [vmem:[%s2175_s30] ss:$0 sps:$4 sm:$0x66]   ;;  %v329_v14 = vshrl.u32 %v2006_v11, 16  ;;  %v331_v15 = vshll.u32 %v2006_v11, 16  ;;  %1823 = vmatpush3.bf16.msra.mxu0 %v2236_v49 }
  0x14   : > { %403 = vrot.lane.b32.xlu0 %v402_v10, %s2105_s11  ;;  %341 = vrot.lane.b32.xlu1 %v340_v12, %s2105_s11  ;;  %v309_v16 = vrot.slane %v2007_v13, 1  ;;  %v2008_v17 = vld [vmem:[%s2175_s30 + $0x8] ss:$0 sps:$4 sm:$0x66]   ;;  %v2252_v10 = vld [vmem:[%s2697_s1 + $0x90] sm:$0xff]  }
  0x15   : > { %v333_v18 = vrot.slane %v331_v15, 1  ;;  %v2009_v19 = vld [vmem:[%s2175_s30] ss:$0 sps:$4 sm:$0x77]   ;;  %v371_v20 = vrot.slane %v2008_v17, 1  ;;  %1843 = vmatpush3.bf16.msra.mxu1 %v2252_v10 }
  0x16   : > { %v2010_v21 = vld [vmem:[%s2175_s30 + $0xc] ss:$0 sps:$4 sm:$0x77]   ;;  %v298_v23 = vshrl.u32 %v2009_v19, 16  ;;  %v300_v24 = vshll.u32 %v2009_v19, 16  ;;  %v2258_v13 = vld [vmem:[%s2697_s1 + $0x60] sm:$0xff]  }
  0x17   : > { %v334_v22 = vor.u32 %v333_v18, %v329_v14  ;;  %v2011_v25 = vld [vmem:[%s2175_s30 + $0x4] ss:$0 sps:$4 sm:$0xee]   ;;  %v391_v27 = vshrl.u32 %v2010_v21, 16  ;;  %v393_v28 = vshll.u32 %v2010_v21, 16  ;;  %1824 = vmatprep.subr.bf16.mxu0 %v2258_v13 }
  0x18   : > { %310 = vrot.lane.b32.xlu1 %v309_v16, %s2105_s11  ;;  %v2012_v29 = vld [vmem:[%s2175_s30 + $0x8] ss:$0 sps:$4 sm:$0x77]   ;;  %v302_v31 = vrot.slane %v300_v24, 1  ;;  %v347_v32 = vshrl.u32 %v2011_v25, 16  ;;  %v350_v33 = vshll.u32 %v2011_v25, 16 }
  0x19   : > { %335 = vrot.lane.b32.xlu0 %v334_v22, %s2106_s18  ;;  %v395_v35 = vrot.slane %v393_v28, 1  ;;  %v360_v36 = vshrl.u32 %v2012_v29, 16  ;;  %v362_v37 = vshll.u32 %v2012_v29, 16  ;;  %v2013_v38 = vld [vmem:[%s2175_s30] ss:$0 sps:$4 sm:$0xee]  }
  0x1a   : > { %v303_v39 = vor.u32 %v302_v31, %v298_v23  ;;  %v349_v40 = vrot.slane %v347_v32, 1  ;;  %v352_v41 = vrot.slane %v350_v33, 2  ;;  %v316_v44 = vshrl.u32 %v2013_v38, 16  ;;  %v2014_v46 = vld [vmem:[%s2175_s30 + $0x8] ss:$0 sps:$4 sm:$0xee]  }
  0x1b   : > { %v396_v42 = vor.u32 %v395_v35, %v391_v27  ;;  %v364_v43 = vrot.slane %v362_v37, 1  ;;  %v319_v45 = vshll.u32 %v2013_v38, 16  ;;  %v2015_v48 = vld [vmem:[%s2175_s30 + $0xc] ss:$0 sps:$4 sm:$0xee]   ;;  %v378_v52 = vshrl.u32 %v2014_v46, 16 }
  0x1c   : > { %372 = vrot.lane.b32.xlu1 %v371_v20, %s2105_s11  ;;  %v353_v47 = vor.u32 %v352_v41, %v349_v40  ;;  %v318_v50 = vrot.slane %v316_v44, 1  ;;  %v2016_v53 = vld [vmem:[%s2175_s30 + $0x8] ss:$0 sps:$4 sm:$0x77]   ;;  %v381_v54 = vshll.u32 %v2014_v46, 16  ;;  %v409_v55 = vshrl.u32 %v2015_v48, 16 }
  0x1d   : > { %304 = vrot.lane.b32.xlu0 %v303_v39, %s2106_s18  ;;  %v321_v51 = vrot.slane %v319_v45, 2  ;;  %v412_v56 = vshll.u32 %v2015_v48, 16  ;;  %v365_v58 = vor.u32 %v364_v43, %v360_v36  ;;  %v380_v59 = vrot.slane %v378_v52, 1  ;;  %v2017_v61 = vld [vmem:[%s2175_s30 + $0x4] ss:$0 sps:$4 sm:$0x77]  }
  0x1e   : > { %v806_v60 = vshll.u32 %v2016_v53, 16  ;;  %v383_v63 = vrot.slane %v381_v54, 2  ;;  %v411_v6 = vrot.slane %v409_v55, 1  ;;  %v775_v11 = vshll.u32 %v2017_v61, 16  ;;  %v2274_v32 = vld [vmem:[%s2697_s1 + $0x20] sm:$0xff]   ;;  %v2280_v37 = vld [vmem:[%s2697_s1 + $0xd8] sm:$0xff]  }
  0x1f   : > { %v322_v62 = vor.u32 %v321_v51, %v318_v50  ;;  %v414_v8 = vrot.slane %v412_v56, 2  ;;  %v804_v12 = vshrl.u32 %v2016_v53, 16  ;;  %v773_v15 = vshrl.u32 %v2017_v61, 16  ;;  %v2018_v19 = vld [vmem:[%s2175_s30 + $0x8] ss:$0 sps:$4 sm:$0x66]   ;;  %1825 = vmatpush3.bf16.msra.mxu0 %v2274_v32  ;;  %1844 = vmatprep.subr.bf16.mxu1 %v2280_v37 }
  0x20   : > { %397 = vrot.lane.b32.xlu1 %v396_v42, %s2106_s18  ;;  %v384_v14 = vor.u32 %v383_v63, %v380_v59  ;;  %v777_v16 = vrot.slane %v775_v11, 1  ;;  %v808_v18 = vrot.slane %v806_v60, 1  ;;  %v2020_v20 = vld [vmem:[%s2175_s30 + $0x8] ss:$0 sps:$4 sm:$0xee]   ;;  %v815_v33 = vrot.slane %v2018_v19, 1 }
  0x21   : > { %354 = vrot.lane.b32.xlu0 %v353_v47, %s2107_s25  ;;  %v415_v17 = vor.u32 %v414_v8, %v411_v6  ;;  %v2019_v21 = vld [vmem:[%s2175_s30 + $0x4] ss:$0 sps:$4 sm:$0x66]   ;;  %v2021_v22 = vld [vmem:[%s2175_s30 + $0x10] ss:$0 sps:$4 sm:$0x77]  }
  0x22   : > { %v778_v23 = vor.u32 %v777_v16, %v773_v15  ;;  %v868_v24 = vshll.u32 %v2021_v22, 16  ;;  %v2022_v25 = vld [vmem:[%s2175_s30 + $0x4] ss:$0 sps:$4 sm:$0xee]   ;;  %v809_v27 = vor.u32 %v808_v18, %v804_v12  ;;  %v822_v28 = vshrl.u32 %v2020_v20, 16  ;;  %v2289_v45 = vld [vmem:[%s2697_s1 + $0x98] sm:$0xff]  }
  0x23   : > { %v825_v29 = vshll.u32 %v2020_v20, 16  ;;  %v2023_v31 = vld [vmem:[%s2175_s30 + $0xc] ss:$0 sps:$4 sm:$0x77]   ;;  %v784_v35 = vrot.slane %v2019_v21, 1  ;;  %v866_v36 = vshrl.u32 %v2021_v22, 16  ;;  %1845 = vmatpush3.bf16.msra.mxu1 %v2289_v45 }
  0x24   : > { %366 = vrot.lane.b32.xlu1 %v365_v58, %s2106_s18  ;;  %v870_v38 = vrot.slane %v868_v24, 1  ;;  %v791_v39 = vshrl.u32 %v2022_v25, 16  ;;  %v794_v40 = vshll.u32 %v2022_v25, 16  ;;  %v837_v41 = vshll.u32 %v2023_v31, 16  ;;  %v2295_v47 = vld [vmem:[%s2697_s1 + $0x68] sm:$0xff]   ;;  %v2311_v60 = vld [vmem:[%s2697_s1 + $0xe0] sm:$0xff]  }
  0x25   : > { %323 = vrot.lane.b32.xlu0 %v322_v62, %s2107_s25  ;;  %v824_v42 = vrot.slane %v822_v28, 1  ;;  %v827_v43 = vrot.slane %v825_v29, 2  ;;  %v2026_v44 = vld [vmem:[%s2175_s30 + $0x10] ss:$0 sps:$4 sm:$0xee]   ;;  %v835_v50 = vshrl.u32 %v2023_v31, 16  ;;  %1826 = vmatprep.subr.bf16.mxu0 %v2295_v47 }
  0x26   : > { %v2027_v46 = vld [vmem:[%s2175_s30 + $0xc] ss:$0 sps:$4 sm:$0xee]   ;;  %v871_v48 = vor.u32 %v870_v38, %v866_v36  ;;  %v839_v51 = vrot.slane %v837_v41, 1  ;;  %v793_v53 = vrot.slane %v791_v39, 1  ;;  %v796_v54 = vrot.slane %v794_v40, 2  ;;  %1846 = vmatprep.subr.bf16.mxu1 %v2311_v60 }
  0x27   : > { %v828_v52 = vor.u32 %v827_v43, %v824_v42  ;;  %v2024_v55 = vld [vmem:[%s2175_s30 + $0x10] ss:$0 sps:$4 sm:$0x66]   ;;  %v2305_v56 = vld [vmem:[%s2697_s1 + $0x28] sm:$0xff]   ;;  %v884_v59 = vshrl.u32 %v2026_v44, 16  ;;  %v887_v61 = vshll.u32 %v2026_v44, 16 }
  0x28   : > { %385 = vrot.lane.b32.xlu1 %v384_v14, %s2107_s25  ;;  %v2025_v58 = vld [vmem:[%s2175_s30 + $0xc] ss:$0 sps:$4 sm:$0x66]   ;;  %v853_v62 = vshrl.u32 %v2027_v46, 16  ;;  %1827 = vmatpush3.bf16.msra.mxu0 %v2305_v56  ;;  %v2317_v63 = vld [vmem:[%s2697_s1 + $0xa0] sm:$0xff]   ;;  %v840_v6 = vor.u32 %v839_v51, %v835_v50  ;;  %v856_v8 = vshll.u32 %v2027_v46, 16  ;;  %v797_v12 = vor.u32 %v796_v54, %v793_v53 }
  0x29   : > { %416 = vrot.lane.b32.xlu0 %v415_v17, %s2107_s25  ;;  %v2029_v11 = vld [vmem:[%s2175_s30 + $0x8] ss:$0 sps:$4 sm:$0x77]   ;;  %v2028_v14 = vld [vmem:[%s2175_s30 + $0xc] ss:$0 sps:$4 sm:$0x77]   ;;  %1847 = vmatpush3.bf16.msra.mxu1 %v2317_v63 }
  0x2a   : > { %v877_v15 = vrot.slane %v2024_v55, 1  ;;  %v846_v16 = vrot.slane %v2025_v58, 1  ;;  %v886_v17 = vrot.slane %v884_v59, 1  ;;  %v889_v18 = vrot.slane %v887_v61, 2  ;;  %v2329_v21 = vld [vmem:[%s2697_s1 + $0x70] sm:$0xff]   ;;  %v2346_v40 = vld [vmem:[%s2697_s1 + $0xe8] sm:$0xff]  }
  0x2b   : > { %v855_v19 = vrot.slane %v853_v62, 1  ;;  %v2032_v20 = vld [vmem:[%s2175_s30 + $0xc] ss:$0 sps:$4 sm:$0xee]   ;;  %v858_v22 = vrot.slane %v856_v8, 2  ;;  %v1079_v24 = vshll.u32 %v2028_v14, 16  ;;  %1828 = vmatprep.subr.bf16.mxu0 %v2329_v21  ;;  %1848 = vmatprep.subr.bf16.mxu1 %v2346_v40 }
  0x2c   : > { %779 = vrot.lane.b32.xlu1 %v778_v23, %s2106_s18  ;;  %v1048_v23 = vshll.u32 %v2029_v11, 16  ;;  %v2030_v25 = vld [vmem:[%s2175_s30 + $0xc] ss:$0 sps:$4 sm:$0x66]   ;;  %v1077_v28 = vshrl.u32 %v2028_v14, 16  ;;  %v1046_v29 = vshrl.u32 %v2029_v11, 16  ;;  %v890_v41 = vor.u32 %v889_v18, %v886_v17 }
  0x2d   : > { %810 = vrot.lane.b32.xlu0 %v809_v27, %s2106_s18  ;;  %v2033_v27 = vld [vmem:[%s2175_s30 + $0x14] ss:$0 sps:$4 sm:$0x77]   ;;  %v2031_v31 = vld [vmem:[%s2175_s30 + $0x8] ss:$0 sps:$4 sm:$0x66]  }
  0x2e   : > { %v1050_v36 = vrot.slane %v1048_v23, 1  ;;  %v1095_v38 = vshrl.u32 %v2032_v20, 16  ;;  %v1098_v39 = vshll.u32 %v2032_v20, 16  ;;  %v1081_v42 = vrot.slane %v1079_v24, 1  ;;  %v2363_v58 = vld [vmem:[%s2697_s1 + $0x78] sm:$0xff]  }
  0x2f   : > { %v2034_v43 = vld [vmem:[%s2175_s30 + $0x8] ss:$0 sps:$4 sm:$0xee]   ;;  %v1088_v44 = vrot.slane %v2030_v25, 1  ;;  %v1141_v46 = vshll.u32 %v2033_v27, 16  ;;  %v1057_v50 = vrot.slane %v2031_v31, 1 }
  0x30   : > { %785 = vrot.lane.b32.xlu1 %v784_v35, %s2105_s11  ;;  %v859_v35 = vor.u32 %v858_v22, %v855_v19  ;;  %v1139_v51 = vshrl.u32 %v2033_v27, 16  ;;  %v1097_v53 = vrot.slane %v1095_v38, 1  ;;  %v1100_v54 = vrot.slane %v1098_v39, 2  ;;  %v2035_v55 = vld [vmem:[%s2175_s30 + $0x10] ss:$0 sps:$4 sm:$0x77]  }
  0x31   : > { %816 = vrot.lane.b32.xlu0 %v815_v33, %s2105_s11  ;;  %v2340_v33 = vld [vmem:[%s2697_s1 + $0x30] sm:$0xff]   ;;  %v1082_v59 = vor.u32 %v1081_v42, %v1077_v28  ;;  %v1064_v61 = vshrl.u32 %v2034_v43, 16  ;;  %v1067_v62 = vshll.u32 %v2034_v43, 16  ;;  %v2370_v8 = vld [vmem:[%s2697_s1 + $0x38] sm:$0xff]   ;;  %v1143_v11 = vrot.slane %v1141_v46, 1 }
  0x32   : > { %1829 = vmatpush3.bf16.msra.mxu0 %v2340_v33  ;;  %v2036_v14 = vld [vmem:[%s2175_s30 + $0x14] ss:$0 sps:$4 sm:$0x66]   ;;  %v2379_v17 = vld [vmem:[%s2175_s30 + $0x10] ss:$0 sps:$4 sm:$0x77]   ;;  %v1101_v25 = vor.u32 %v1100_v54, %v1097_v53 }
  0x33   : > { %1830 = vmatprep.subr.bf16.mxu0 %v2363_v58  ;;  %v2041_v22 = vld [vmem:[%s2175_s30 + $0xc] ss:$0 sps:$4 sm:$0x77]   ;;  %v1066_v23 = vrot.slane %v1064_v61, 1  ;;  %v1108_v24 = vshrl.u32 %v2035_v55, 16  ;;  %v1144_v27 = vor.u32 %v1143_v11, %v1139_v51  ;;  %v1150_v31 = vrot.slane %v2036_v14, 1 }
  0x34   : > { %872 = vrot.lane.b32.xlu1 %v871_v48, %s2106_s18  ;;  %v2355_v48 = vld [vmem:[%s2697_s1 + $0xa8] sm:$0xff]   ;;  %v1321_v42 = vshll.u32 %v2041_v22, 16  ;;  %v2390_v43 = vld [vmem:[%s2697_s1 + $0xf0] sm:$0xff]   ;;  %v2045_v61 = vld [vmem:[%s2175_s30 + $0x18] ss:$0 sps:$4 sm:$0x77]  }
  0x35   : > { %829 = vrot.lane.b32.xlu0 %v828_v52, %s2107_s25  ;;  %v1051_v52 = vor.u32 %v1050_v36, %v1046_v29  ;;  %1849 = vmatpush3.bf16.msra.mxu1 %v2355_v48  ;;  %v2042_v46 = vld [vmem:[%s2175_s30 + $0x10] ss:$0 sps:$4 sm:$0x66]  }
  0x36   : > { %1831 = vmatpush3.bf16.msra.mxu0 %v2370_v8  ;;  %v2044_v53 = vld [vmem:[%s2175_s30 + $0x10] ss:$0 sps:$4 sm:$0xee]   ;;  %1850 = vmatprep.subr.bf16.mxu1 %v2390_v43  ;;  %v1361_v11 = vrot.slane %v2042_v46, 1 }
  0x37   : > { %1860 = vmatprep.subr.bf16.mxu0 %v2144_v0  ;;  %v1069_v0 = vrot.slane %v1067_v62, 2  ;;  %v2401_v54 = vld [vmem:[%s2697_s1 + $0xb0] sm:$0xff]   ;;  %v1368_v14 = vshrl.u32 %v2044_v53, 16 }
  0x38   : > { %841 = vrot.lane.b32.xlu1 %v840_v6, %s2106_s18  ;;  %v2038_v6 = vld [vmem:[%s2175_s30 + $0x14] ss:$0 sps:$4 sm:$0xee]  }
  0x39   : > { %798 = vrot.lane.b32.xlu0 %v797_v12, %s2107_s25  ;;  %v2039_v12 = vld [vmem:[%s2175_s30 + $0x10] ss:$0 sps:$4 sm:$0xee]   ;;  %v1157_v18 = vshrl.u32 %v2038_v6, 16  ;;  %v1160_v19 = vshll.u32 %v2038_v6, 16  ;;  %v1323_v6 = vrot.slane %v1321_v42, 1  ;;  %1851 = vmatpush3.bf16.msra.mxu1 %v2401_v54 }
  0x3a   : > { %v1126_v20 = vshrl.u32 %v2039_v12, 16  ;;  %v1129_v29 = vshll.u32 %v2039_v12, 16 }
  0x3b   : > { %v1159_v36 = vrot.slane %v1157_v18, 1  ;;  %v1162_v38 = vrot.slane %v1160_v19, 2  ;;  %v2049_v18 = vld [vmem:[%s2175_s30 + $0x14] ss:$0 sps:$4 sm:$0x77]   ;;  %v1412_v19 = vshrl.u32 %v2045_v61, 16 }
  0x3c   : > { %847 = vrot.lane.b32.xlu1 %v846_v16, %s2105_s11  ;;  %v1110_v16 = vshll.u32 %v2035_v55, 16  ;;  %v1128_v39 = vrot.slane %v1126_v20, 1  ;;  %v1131_v51 = vrot.slane %v1129_v29, 2  ;;  %v1070_v55 = vor.u32 %v1069_v0, %v1066_v23 }
  0x3d   : > { %878 = vrot.lane.b32.xlu0 %v877_v15, %s2105_s11  ;;  %v2037_v15 = vld [vmem:[%s2175_s30 + $0x10] ss:$0 sps:$4 sm:$0x66]   ;;  %v1414_v20 = vshll.u32 %v2045_v61, 16  ;;  %v1163_v23 = vor.u32 %v1162_v38, %v1159_v36  ;;  %v1383_v29 = vshll.u32 %v2049_v18, 16 }
  0x3e   : > { %v1112_v28 = vrot.slane %v1110_v16, 1  ;;  %v2046_v16 = vld [vmem:[%s2175_s30 + $0xc] ss:$0 sps:$4 sm:$0xee]  }
  0x3f   : > { %v1416_v42 = vrot.slane %v1414_v20, 1  ;;  %v2061_v36 = vld [vmem:[%s2175_s30 + $0x14] ss:$0 sps:$4 sm:$0xee]  }
  0x40   : > { %860 = vrot.lane.b32.xlu1 %v859_v35, %s2107_s25  ;;  %v1119_v35 = vrot.slane %v2037_v15, 1  ;;  %v1371_v15 = vshll.u32 %v2044_v53, 16  ;;  %v2056_v38 = vld [vmem:[%s2175_s30 + $0x18] ss:$0 sps:$4 sm:$0xee]  }
  0x41   : > { %891 = vrot.lane.b32.xlu0 %v890_v41, %s2107_s25  ;;  %v1352_v41 = vshll.u32 %v2379_v17, 16  ;;  %v2055_v53 = vld [vmem:[%s2175_s30 + $0x14] ss:$0 sps:$4 sm:$0x66]  }
  0x43   : > { %v1354_v62 = vrot.slane %v1352_v41, 1  ;;  %v1373_v41 = vrot.slane %v1371_v15, 2 }
  0x44   : > { %1052 = vrot.lane.b32.xlu1 %v1051_v52, %s2106_s18  ;;  %v1350_v52 = vshrl.u32 %v2379_v17, 16  ;;  %v2412_v17 = vld [vmem:[%s2697_s1 + $0xf8] sm:$0xff]  }
  0x45   : > { %1083 = vrot.lane.b32.xlu0 %v1082_v59, %s2106_s18  ;;  %v1319_v59 = vshrl.u32 %v2041_v22, 16  ;;  %1852 = vmatprep.subr.bf16.mxu1 %v2412_v17  ;;  %v1132_v22 = vor.u32 %v1131_v51, %v1128_v39  ;;  %v1417_v39 = vor.u32 %v1416_v42, %v1412_v19  ;;  %v2429_v51 = vld [vmem:[%s2697_s1 + $0xb8] sm:$0xff]  }
  0x46   : > { %v1355_v0 = vor.u32 %v1354_v62, %v1350_v52  ;;  %1853 = vmatpush3.bf16.msra.mxu1 %v2429_v51  ;;  %v2050_v62 = vld [vmem:[%s2175_s30 + $0x18] ss:$0 sps:$4 sm:$0x66]  }
  0x47   : > { %1882 = vmatprep.subr.bf16.mxu1 %v2170_v4 }
  0x48   : > { %1058 = vrot.lane.b32.xlu1 %v1057_v50, %s2105_s11  ;;  %v2043_v50 = vld [vmem:[%s2175_s30 + $0xc] ss:$0 sps:$4 sm:$0x66]  }
  0x49   : > { %1089 = vrot.lane.b32.xlu0 %v1088_v44, %s2105_s11  ;;  %v1113_v44 = vor.u32 %v1112_v28, %v1108_v24  ;;  %v1330_v12 = vrot.slane %v2043_v50, 1  ;;  %v1337_v24 = vshrl.u32 %v2046_v16, 16  ;;  %v1370_v28 = vrot.slane %v1368_v14, 1 }
  0x4b   : > { %v1374_v46 = vor.u32 %v1373_v41, %v1370_v28  ;;  %v1339_v50 = vrot.slane %v1337_v24, 1  ;;  %v275_v41 = vld [vmem:[%s2175_s30] sm:$0x3] }
  0x4c   : > { %1145 = vrot.lane.b32.xlu1 %v1144_v27, %s2106_s18  ;;  %v1324_v27 = vor.u32 %v1323_v6, %v1319_v59  ;;  %v1402_v59 = vshll.u32 %v2061_v36, 16  ;;  %v1430_v6 = vshrl.u32 %v2056_v38, 16 }
  0x4d   : > { %1102 = vrot.lane.b32.xlu0 %v1101_v25, %s2107_s25  ;;  %v1340_v25 = vshll.u32 %v2046_v16, 16  ;;  %v1423_v16 = vrot.slane %v2050_v62, 1 }
  0x4e   : > { %v1404_v15 = vrot.slane %v1402_v59, 2 }
  0x50   : > { %1114 = vrot.lane.b32.xlu1 %v1113_v44, %s2106_s18  ;;  %v1342_v44 = vrot.slane %v1340_v25, 2 }
  0x51   : > { %1071 = vrot.lane.b32.xlu0 %v1070_v55, %s2107_s25  ;;  %v1399_v55 = vshrl.u32 %v2061_v36, 16 }
  0x52   : > { %v1343_v61 = vor.u32 %v1342_v44, %v1339_v50 }
  0x53   : > { %v1401_v14 = vrot.slane %v1399_v55, 1 }
  0x54   : > { %1120 = vrot.lane.b32.xlu1 %v1119_v35, %s2105_s11  ;;  %v1385_v35 = vrot.slane %v1383_v29, 1 }
  0x55   : > { %1151 = vrot.lane.b32.xlu0 %v1150_v31, %s2105_s11  ;;  %v1381_v31 = vshrl.u32 %v2049_v18, 16  ;;  %v1432_v18 = vrot.slane %v1430_v6, 1  ;;  %v1405_v20 = vor.u32 %v1404_v15, %v1401_v14 }
  0x57   : > { %v1386_v52 = vor.u32 %v1385_v35, %v1381_v31 }
  0x58   : > { %1133 = vrot.lane.b32.xlu1 %v1132_v22, %s2107_s25 }
  0x59   : > { %1164 = vrot.lane.b32.xlu0 %v1163_v23, %s2107_s25 }
  0x5c   : > { %1325 = vrot.lane.b32.xlu1 %v1324_v27, %s2106_s18  ;;  %v1669_v27 = vld [vmem:[%s2175_s30 + $0x4] sm:$0x3] }
  0x5d   : > { %1356 = vrot.lane.b32.xlu0 %v1355_v0, %s2106_s18 }
  0x60   : > { %1331 = vrot.lane.b32.xlu1 %v1330_v12, %s2105_s11  ;;  %v1392_v12 = vrot.slane %v2055_v53, 1 }
  0x61   : > { %1362 = vrot.lane.b32.xlu0 %v1361_v11, %s2105_s11  ;;  %v1433_v11 = vshll.u32 %v2056_v38, 16 }
  0x63   : > { %v1435_v19 = vrot.slane %v1433_v11, 2 }
  0x64   : > { %1418 = vrot.lane.b32.xlu1 %v1417_v39, %s2106_s18  ;;  %v1673_v39 = vld [vmem:[%s2175_s30 + $0x8] sm:$0x3] }
  0x65   : > { %1375 = vrot.lane.b32.xlu0 %v1374_v46, %s2107_s25  ;;  %v1436_v22 = vor.u32 %v1435_v19, %v1432_v18  ;;  %v1677_v46 = vld [vmem:[%s2175_s30 + $0xc] sm:$0x3] }
  0x68   : > { %1387 = vrot.lane.b32.xlu1 %v1386_v52, %s2106_s18 }
  0x69   : > { %1344 = vrot.lane.b32.xlu0 %v1343_v61, %s2107_s25 }
  0x6c   : > { %1393 = vrot.lane.b32.xlu1 %v1392_v12, %s2105_s11 }
  0x6d   : > { %1424 = vrot.lane.b32.xlu0 %v1423_v16, %s2105_s11 }
  0x70   : > { %1406 = vrot.lane.b32.xlu1 %v1405_v20, %s2107_s25 }
  0x71   : > { %1437 = vrot.lane.b32.xlu0 %v1436_v22, %s2107_s25  ;;  %v1738_v22 = vld [vmem:[%s2175_s30 + $0x10] sm:$0x3] }
  0x86   : > { %v404_v4 = vpop.permute.xlu0 %403  ;;  %v342_v23 = vpop.permute.xlu1 %341 }
  0x8a   : > { %v311_v24 = vpop.permute.xlu1 %310 }
  0x8b   : > { %v336_v25 = vpop.permute.xlu0 %335 }
  0x8c   : > { %v431_v0 = vsel %vm418_vm0, %v1669_v27, %v336_v25  ;;  %v1726_v25 = vld [vmem:[%s2175_s30 + $0x4] sm:$0x3] }
  0x8d   : > { %v433_v35 = vsel %vm422_vm1, %v431_v0, %v342_v23 }
  0x8e   : > { %v373_v28 = vpop.permute.xlu1 %372 }
  0x8f   : > { %v305_v29 = vpop.permute.xlu0 %304 }
  0x90   : > { %v421_v36 = vsel %vm418_vm0, %v275_v41, %v305_v29 }
  0x91   : > { %v424_v53 = vsel %vm422_vm1, %v421_v36, %v311_v24 }
  0x92   : > { %v398_v42 = vpop.permute.xlu1 %397 }
  0x93   : > { %v355_v31 = vpop.permute.xlu0 %354  ;;  %v447_v55 = vsel %vm418_vm0, %v1677_v46, %v398_v42  ;;  %v1734_v42 = vld [vmem:[%s2175_s30 + $0xc] sm:$0x3] }
  0x94   : > { %v435_v38 = vsel %vm425_vm2, %v433_v35, %v355_v31  ;;  %v449_v11 = vsel %vm422_vm1, %v447_v55, %v404_v4  ;;  %v1759_v46 = vld [vmem:[%s2175_s30 + $0xc] sm:$0x3] }
  0x95   : > { %683 = vmatprep.mubr.bf16.mxu0 %v435_v38 }
  0x96   : > { %v367_v50 = vpop.permute.xlu1 %366 }
  0x97   : > { %v439_v44 = vsel %vm418_vm0, %v1673_v39, %v367_v50  ;;  %v324_v52 = vpop.permute.xlu0 %323  ;;  %v2505_v39 = vld [vmem:[%s2697_s1 + $0x40] sm:$0xff]  }
  0x98   : > { %v427_v59 = vsel %vm425_vm2, %v424_v53, %v324_v52  ;;  %v441_v62 = vsel %vm422_vm1, %v439_v44, %v373_v28  ;;  %v2515_v53 = vld [vmem:[%s2697_s1] sm:$0xff]  }
  0x99   : > { %684 = vmatmul.mubr.bf16.vlgmr.msra.gmra.mrb[0].mxu0 %v427_v59 }
  0x9a   : > { %1861 = vmatpush3.bf16.msra.mxu0 %v2149_v1  ;;  %v386_v61 = vpop.permute.xlu1 %385  ;;  %v1730_v1 = vld [vmem:[%s2175_s30 + $0x8] sm:$0x3] }
  0x9b   : > { %v417_v6 = vpop.permute.xlu0 %416  ;;  %1862 = vmatprep.subr.bf16.mxu0 %v2156_v2  ;;  %v443_v12 = vsel %vm425_vm2, %v441_v62, %v386_v61  ;;  %v2523_v61 = vld [vmem:[%s2697_s1 + $0x48] sm:$0xff]  }
  0x9c   : > { %v451_v14 = vsel %vm425_vm2, %v449_v11, %v417_v6  ;;  %v2529_v6 = vld [vmem:[%s2697_s1 + $0xc0] sm:$0xff]  }
  0x9d   : > { %723 = vmatprep.mubr.bf16.mxu1 %v451_v14  ;;  %v2537_v14 = vld [vmem:[%s2697_s1 + $0x8] sm:$0xff]  }
  0x9e   : > { %1863 = vmatpush3.bf16.msra.mxu0 %v2164_v3  ;;  %724 = vmatmul.mubr.bf16.vlgmr.msra.gmra.mrb[0].mxu1 %v443_v12  ;;  %v780_v15 = vpop.permute.xlu1 %779 }
  0x9f   : > { %1883 = vmatpush3.bf16.msra.mxu1 %v2180_v5  ;;  %v811_v16 = vpop.permute.xlu0 %810  ;;  %1864 = vmatprep.subr.bf16.mxu0 %v2187_v7  ;;  %v895_v29 = vsel %vm418_vm0, %v1726_v25, %v780_v15 }
  0xa0   : > { %1884 = vmatprep.subr.bf16.mxu1 %v2210_v26  ;;  %v903_v2 = vsel %vm418_vm0, %v1730_v1, %v811_v16  ;;  %v2543_v1 = vld [vmem:[%s2697_s1 + $0x80] sm:$0xff]   ;;  %v2549_v16 = vld [vmem:[%s2697_s1 + $0x50] sm:$0xff]  }
  0xa2   : > { %1865 = vmatpush3.bf16.msra.mxu0 %v2195_v9  ;;  %v786_v18 = vpop.permute.xlu1 %785 }
  0xa3   : > { %1885 = vmatpush3.bf16.msra.mxu1 %v2217_v30  ;;  %v817_v19 = vpop.permute.xlu0 %816  ;;  %1866 = vmatprep.subr.bf16.mxu0 %v2224_v34  ;;  %v897_v35 = vsel %vm422_vm1, %v895_v29, %v786_v18  ;;  %v1763_v29 = vld [vmem:[%s2175_s30 + $0x10] sm:$0x3] }
  0xa4   : > { %1886 = vmatprep.subr.bf16.mxu1 %v2243_v57  ;;  %v905_v3 = vsel %vm422_vm1, %v903_v2, %v817_v19  ;;  %v2557_v19 = vld [vmem:[%s2697_s1 + $0x10] sm:$0xff]  }
  0xa6   : > { %1867 = vmatpush3.bf16.msra.mxu0 %v2236_v49  ;;  %v873_v5 = vpop.permute.xlu1 %872 }
  0xa7   : > { %1887 = vmatpush3.bf16.msra.mxu1 %v2252_v10  ;;  %v830_v7 = vpop.permute.xlu0 %829  ;;  %1868 = vmatprep.subr.bf16.mxu0 %v2258_v13  ;;  %v919_v23 = vsel %vm418_vm0, %v1738_v22, %v873_v5  ;;  %v1767_v5 = vld [vmem:[%s2175_s30 + $0x14] sm:$0x3]  ;;  %v1755_v22 = vld [vmem:[%s2175_s30 + $0x8] sm:$0x3] }
  0xa8   : > { %1888 = vmatprep.subr.bf16.mxu1 %v2280_v37  ;;  %v907_v9 = vsel %vm425_vm2, %v905_v3, %v830_v7 }
  0xa9   : > { %957 = vmatprep.mubr.bf16.mxu0 %v907_v9 }
  0xaa   : > { %1869 = vmatpush3.bf16.msra.mxu0 %v2274_v32  ;;  %v842_v20 = vpop.permute.xlu1 %841 }
  0xab   : > { %1889 = vmatpush3.bf16.msra.mxu1 %v2289_v45  ;;  %v799_v4 = vpop.permute.xlu0 %798  ;;  %1870 = vmatprep.subr.bf16.mxu0 %v2295_v47  ;;  %v911_v38 = vsel %vm418_vm0, %v1734_v42, %v842_v20 }
  0xac   : > { %1890 = vmatprep.subr.bf16.mxu1 %v2311_v60  ;;  %v899_v44 = vsel %vm425_vm2, %v897_v35, %v799_v4  ;;  %v1788_v4 = vld [vmem:[%s2175_s30 + $0x10] sm:$0x3] }
  0xae   : > { %1871 = vmatpush3.bf16.msra.mxu0 %v2305_v56  ;;  %v848_v24 = vpop.permute.xlu1 %847 }
  0xaf   : > { %1891 = vmatpush3.bf16.msra.mxu1 %v2317_v63  ;;  %v879_v27 = vpop.permute.xlu0 %878  ;;  %1872 = vmatprep.subr.bf16.mxu0 %v2329_v21  ;;  %v913_v52 = vsel %vm422_vm1, %v911_v38, %v848_v24 }
  0xb0   : > { %1892 = vmatprep.subr.bf16.mxu1 %v2346_v40  ;;  %v921_v28 = vsel %vm422_vm1, %v919_v23, %v879_v27 }
  0xb2   : > { %1873 = vmatpush3.bf16.msra.mxu0 %v2340_v33  ;;  %v861_v0 = vpop.permute.xlu1 %860 }
  0xb3   : > { %1893 = vmatpush3.bf16.msra.mxu1 %v2355_v48  ;;  %v892_v41 = vpop.permute.xlu0 %891  ;;  %1874 = vmatprep.subr.bf16.mxu0 %v2363_v58  ;;  %v915_v11 = vsel %vm425_vm2, %v913_v52, %v861_v0 }
  0xb4   : > { %1894 = vmatprep.subr.bf16.mxu1 %v2390_v43  ;;  %v923_v31 = vsel %vm425_vm2, %v921_v28, %v892_v41 }
  0xb5   : > { %997 = vmatprep.mubr.bf16.mxu1 %v923_v31 }
  0xb6   : > { %1875 = vmatpush3.bf16.msra.mxu0 %v2370_v8  ;;  %v2498_v36 = vpop.permute.xlu1 %1052 }
  0xb7   : > { %1895 = vmatpush3.bf16.msra.mxu1 %v2401_v54  ;;  %1904 = vmatprep.subr.bf16.mxu0 %v2505_v39  ;;  %v1084_v50 = vpop.permute.xlu0 %1083  ;;  %v1168_v25 = vsel %vm418_vm0, %v1755_v22, %v2498_v36 }
  0xb8   : > { %1896 = vmatprep.subr.bf16.mxu1 %v2412_v17  ;;  %v1176_v55 = vsel %vm418_vm0, %v1759_v46, %v1084_v50  ;;  %v1796_v50 = vld [vmem:[%s2175_s30 + $0x18] sm:$0x3] }
  0xb9   : > { %958 = vmatmul.mubr.bf16.vlgmr.msra.gmra.mrb[4].mxu0 %v899_v44 }
  0xba   : > { %1905 = vmatpush3.bf16.msra.mxu0 %v2515_v53  ;;  %v1059_v59 = vpop.permute.xlu1 %1058 }
  0xbb   : > { %1897 = vmatpush3.bf16.msra.mxu1 %v2429_v51  ;;  %1906 = vmatprep.subr.bf16.mxu0 %v2523_v61  ;;  %v1090_v62 = vpop.permute.xlu0 %1089  ;;  %v1170_v0 = vsel %vm422_vm1, %v1168_v25, %v1059_v59  ;;  %v2092_v59 = vld [vmem:[%s2697_s1 + $0xc8] sm:$0xff]  }
  0xbc   : > { %1926 = vmatprep.subr.bf16.mxu1 %v2529_v6  ;;  %v1178_v12 = vsel %vm422_vm1, %v1176_v55, %v1090_v62  ;;  %v2093_v62 = vld [vmem:[%s2697_s1 + $0x88] sm:$0xff]  }
  0xbe   : > { %998 = vmatmul.mubr.bf16.vlgmr.msra.gmra.mrb[4].mxu1 %v915_v11  ;;  %1907 = vmatpush3.bf16.msra.mxu0 %v2537_v14  ;;  %v1146_v15 = vpop.permute.xlu1 %1145 }
  0xbf   : > { %1927 = vmatpush3.bf16.msra.mxu1 %v2543_v1  ;;  %1908 = vmatprep.subr.bf16.mxu0 %v2549_v16  ;;  %v1103_v2 = vpop.permute.xlu0 %1102 }
  0xc0   : > { %1928 = vmatprep.subr.bf16.mxu1 %v2210_v26  ;;  %v1180_v18 = vsel %vm425_vm2, %v1178_v12, %v1103_v2  ;;  %v1192_v26 = vsel %vm418_vm0, %v1767_v5, %v1146_v15  ;;  %v2095_v12 = vld [vmem:[%s2697_s1 + $0xd0] sm:$0xff]   ;;  %v2096_v15 = vld [vmem:[%s2697_s1 + $0x18] sm:$0xff]  }
  0xc1   : > { %1230 = vmatprep.mubr.bf16.mxu0 %v1180_v18 }
  0xc2   : > { %1909 = vmatpush3.bf16.msra.mxu0 %v2557_v19  ;;  %v1115_v3 = vpop.permute.xlu1 %1114 }
  0xc3   : > { %1929 = vmatpush3.bf16.msra.mxu1 %v2217_v30  ;;  %1910 = vmatprep.subr.bf16.mxu0 %v2224_v34  ;;  %v1072_v7 = vpop.permute.xlu0 %1071  ;;  %v1184_v42 = vsel %vm418_vm0, %v1763_v29, %v1115_v3 }
  0xc4   : > { %1930 = vmatprep.subr.bf16.mxu1 %v2243_v57  ;;  %v1172_v36 = vsel %vm425_vm2, %v1170_v0, %v1072_v7 }
  0xc6   : > { %1911 = vmatpush3.bf16.msra.mxu0 %v2236_v49  ;;  %v1121_v20 = vpop.permute.xlu1 %1120 }
  0xc7   : > { %1931 = vmatpush3.bf16.msra.mxu1 %v2252_v10  ;;  %1912 = vmatprep.subr.bf16.mxu0 %v2258_v13  ;;  %v1152_v9 = vpop.permute.xlu0 %1151  ;;  %v1186_v46 = vsel %vm422_vm1, %v1184_v42, %v1121_v20 }
  0xc8   : > { %1932 = vmatprep.subr.bf16.mxu1 %v2280_v37  ;;  %v1194_v30 = vsel %vm422_vm1, %v1192_v26, %v1152_v9 }
  0xca   : > { %1913 = vmatpush3.bf16.msra.mxu0 %v2274_v32  ;;  %v1134_v57 = vpop.permute.xlu1 %1133 }
  0xcb   : > { %1933 = vmatpush3.bf16.msra.mxu1 %v2289_v45  ;;  %1914 = vmatprep.subr.bf16.mxu0 %v2295_v47  ;;  %v1165_v34 = vpop.permute.xlu0 %1164  ;;  %v1188_v44 = vsel %vm425_vm2, %v1186_v46, %v1134_v57 }
  0xcc   : > { %1934 = vmatprep.subr.bf16.mxu1 %v2311_v60  ;;  %v1196_v49 = vsel %vm425_vm2, %v1194_v30, %v1165_v34 }
  0xcd   : > { %1270 = vmatprep.mubr.bf16.mxu1 %v1196_v49 }
  0xce   : > { %1915 = vmatpush3.bf16.msra.mxu0 %v2305_v56  ;;  %v2581_v24 = vpop.permute.xlu1 %1325 }
  0xcf   : > { %1935 = vmatpush3.bf16.msra.mxu1 %v2317_v63  ;;  %1916 = vmatprep.subr.bf16.mxu0 %v2329_v21  ;;  %v1357_v23 = vpop.permute.xlu0 %1356 }
  0xd0   : > { %1936 = vmatprep.subr.bf16.mxu1 %v2346_v40  ;;  %v1449_v27 = vsel %vm418_vm0, %v1788_v4, %v1357_v23 }
  0xd2   : > { %1917 = vmatpush3.bf16.msra.mxu0 %v2340_v33  ;;  %v1332_v31 = vpop.permute.xlu1 %1331 }
  0xd3   : > { %1937 = vmatpush3.bf16.msra.mxu1 %v2355_v48  ;;  %1918 = vmatprep.subr.bf16.mxu0 %v2363_v58  ;;  %v1363_v28 = vpop.permute.xlu0 %1362 }
  0xd4   : > { %1938 = vmatprep.subr.bf16.mxu1 %v2390_v43  ;;  %v1451_v41 = vsel %vm422_vm1, %v1449_v27, %v1363_v28 }
  0xd6   : > { %1919 = vmatpush3.bf16.msra.mxu0 %v2370_v8  ;;  %v1419_v52 = vpop.permute.xlu1 %1418 }
  0xd7   : > { %1939 = vmatpush3.bf16.msra.mxu1 %v2401_v54  ;;  %1948 = vmatprep.subr.bf16.mxu0 %v2505_v39  ;;  %v1376_v35 = vpop.permute.xlu0 %1375  ;;  %v1465_v55 = vsel %vm418_vm0, %v1796_v50, %v1419_v52 }
  0xd8   : > { %1940 = vmatprep.subr.bf16.mxu1 %v2412_v17  ;;  %v1453_v38 = vsel %vm425_vm2, %v1451_v41, %v1376_v35 }
  0xd9   : > { %1231 = vmatmul.mubr.bf16.vlgmr.msra.gmra.mrb[8].mxu0 %v1172_v36 }
  0xda   : > { %1949 = vmatpush3.bf16.msra.mxu0 %v2515_v53  ;;  %1503 = vmatprep.mubr.bf16.mxu0 %v1453_v38 }
  0xdb   : > { %1941 = vmatpush3.bf16.msra.mxu1 %v2429_v51  ;;  %1950 = vmatprep.subr.bf16.mxu0 %v2523_v61  ;;  %v1345_v39 = vpop.permute.xlu0 %1344 }
  0xdc   : > { %1970 = vmatprep.subr.bf16.mxu1 %v2529_v6  ;;  %v2094_v6 = vld [vmem:[%s2697_s1 + $0x58] sm:$0xff]  }
  0xde   : > { %1271 = vmatmul.mubr.bf16.vlgmr.msra.gmra.mrb[8].mxu1 %v1188_v44  ;;  %1951 = vmatpush3.bf16.msra.mxu0 %v2537_v14 }
  0xdf   : > { %1971 = vmatpush3.bf16.msra.mxu1 %v2543_v1  ;;  %1952 = vmatprep.subr.bf16.mxu0 %v2549_v16  ;;  %v1425_v53 = vpop.permute.xlu0 %1424  ;;  %v1388_v1 = vpop.permute.xlu1 %1387  ;;  %v1784_v16 = vld [vmem:[%s2175_s30 + $0xc] sm:$0x3] }
  0xe0   : > { %1972 = vmatprep.subr.bf16.mxu1 %v2092_v59  ;;  %v1467_v61 = vsel %vm422_vm1, %v1465_v55, %v1425_v53 }
  0xe2   : > { %1953 = vmatpush3.bf16.msra.mxu0 %v2557_v19 }
  0xe3   : > { %1973 = vmatpush3.bf16.msra.mxu1 %v2093_v62  ;;  %1954 = vmatprep.subr.bf16.mxu0 %v2094_v6  ;;  %v1438_v11 = vpop.permute.xlu0 %1437 }
  0xe4   : > { %1974 = vmatprep.subr.bf16.mxu1 %v2095_v12  ;;  %v1469_v14 = vsel %vm425_vm2, %v1467_v61, %v1438_v11 }
  0xe5   : > { %1543 = vmatprep.mubr.bf16.mxu1 %v1469_v14 }
  0xe6   : > { %1955 = vmatpush3.bf16.msra.mxu0 %v2096_v15 }
  0xe7   : > { %1975 = vmatpush3.bf16.msra.mxu1 %v2252_v10  ;;  %1956 = vmatprep.subr.bf16.mxu0 %v2258_v13  ;;  %v1441_v10 = vsel %vm418_vm0, %v1784_v16, %v2581_v24  ;;  %v1792_v13 = vld [vmem:[%s2175_s30 + $0x14] sm:$0x3] }
  0xe8   : > { %1976 = vmatprep.subr.bf16.mxu1 %v2280_v37  ;;  %v1443_v37 = vsel %vm422_vm1, %v1441_v10, %v1332_v31 }
  0xea   : > { %1957 = vmatpush3.bf16.msra.mxu0 %v2274_v32  ;;  %v1394_v32 = vpop.permute.xlu1 %1393 }
  0xeb   : > { %1977 = vmatpush3.bf16.msra.mxu1 %v2289_v45  ;;  %1958 = vmatprep.subr.bf16.mxu0 %v2295_v47  ;;  %v1457_v45 = vsel %vm418_vm0, %v1792_v13, %v1388_v1  ;;  %v1445_v47 = vsel %vm425_vm2, %v1443_v37, %v1345_v39 }
  0xec   : > { %1978 = vmatprep.subr.bf16.mxu1 %v2311_v60 }
  0xee   : > { %1959 = vmatpush3.bf16.msra.mxu0 %v2305_v56  ;;  %v1459_v56 = vsel %vm422_vm1, %v1457_v45, %v1394_v32  ;;  %v1407_v60 = vpop.permute.xlu1 %1406 }
  0xef   : > { %1979 = vmatpush3.bf16.msra.mxu1 %v2317_v63  ;;  %1960 = vmatprep.subr.bf16.mxu0 %v2329_v21  ;;  %v1461_v63 = vsel %vm425_vm2, %v1459_v56, %v1407_v60 }
  0xf0   : > { %1980 = vmatprep.subr.bf16.mxu1 %v2346_v40 }
  0xf2   : > { %1961 = vmatpush3.bf16.msra.mxu0 %v2340_v33 }
  0xf3   : > { %1981 = vmatpush3.bf16.msra.mxu1 %v2355_v48  ;;  %1962 = vmatprep.subr.bf16.mxu0 %v2363_v58 }
  0xf4   : > { %1982 = vmatprep.subr.bf16.mxu1 %v2390_v43 }
  0xf6   : > { %1963 = vmatpush3.bf16.msra.mxu0 %v2370_v8  ;;  %v2660_v8 = vld [vmem:[%s2698_s2] ss:$0 sm:$0xff] }
  0xf7   : > { %1983 = vmatpush3.bf16.msra.mxu1 %v2401_v54 }
  0xf8   : > { %1984 = vmatprep.subr.bf16.mxu1 %v2412_v17 }
  0xf9   : > { %1504 = vmatmul.mubr.bf16.vlgmr.msra.gmra.mrb[12].mxu0 %v1445_v47 }
  0xfb   : > { %1985 = vmatpush3.bf16.msra.mxu1 %v2429_v51 }
  0xfe   : > { %1544 = vmatmul.mubr.bf16.vlgmr.msra.gmra.mrb[12].mxu1 %v1461_v63 }
 0x16c   : > { %v1832_v21 = vpop.f32.mrb[0].mxu0 }
 0x16d   : > { %v1833_v33 = vpop.f32.mrb[1].mxu0 }
 0x16e   : > { %v1834_v40 = vadd.f32 %v1833_v33, %v1832_v21  ;;  %v1835_v48 = vpop.f32.mrb[2].mxu0 }
 0x16f   : > { %v1836_v58 = vpop.f32.mrb[3].mxu0 }
 0x170   : > { %v686_v17 = vadd.f32 %v1834_v40, %v2660_v8 }
 0x171   : > { %v1854_v43 = vpop.f32.mrb[0].mxu1 }
 0x172   : > { %v1855_v54 = vpop.f32.mrb[1].mxu1 }
 0x173   : > { %v1856_v2 = vadd.f32 %v1855_v54, %v1854_v43  ;;  %v1857_v51 = vpop.f32.mrb[2].mxu1 }
 0x174   : > { %v1858_v18 = vpop.f32.mrb[3].mxu1 }
 0x175   : > { %v726_v19 = vadd.f32 %v1856_v2, %v686_v17 }
 0x177   : > { %v749_v3 = vpack.c.bf16 %v726_v19, %v726_v19  ;;  %v740_v5 = vmul.f32 %v726_v19, %v726_v19  ;;  %v732_v7 = vsel %vm731_vm4, %v726_v19, 0.0 }
 0x178   : > { %v733_v30 = vrot.slane %v732_v7, 4 }
 0x179   : > { %751 = vst.msk [vmem:[%s2667_s28] sm:$0x3] %vm750_vm3, %v749_v3  ;;  %v741_v9 = vsel %vm731_vm4, %v740_v5, 0.0 }
 0x17a   : > { %v742_v22 = vrot.slane %v741_v9, 4  ;;  %v734_v23 = vadd.f32 %v733_v30, %v732_v7 }
 0x17c   : > { %v743_v29 = vadd.f32 %v742_v22, %v741_v9  ;;  %v735_v42 = vrot.slane %v734_v23, 2 }
 0x17e   : > { %v744_v38 = vrot.slane %v743_v29, 2  ;;  %v736_v39 = vadd.f32 %v735_v42, %v734_v23 }
 0x180   : > { %v745_v55 = vadd.f32 %v744_v38, %v743_v29  ;;  %v737_v61 = vrot.slane %v736_v39, 1 }
 0x182   : > { %v746_v11 = vrot.slane %v745_v55, 1  ;;  %v738_v15 = vadd.f32 %v737_v61, %v736_v39 }
 0x184   : > { %v747_v10 = vadd.f32 %v746_v11, %v745_v55 }
 0x18c   : > { %v1876_v26 = vpop.f32.mrb[4].mxu0 }
 0x18d   : > { %v1877_v20 = vpop.f32.mrb[5].mxu0 }
 0x18e   : > { %v1878_v34 = vadd.f32 %v1877_v20, %v1876_v26  ;;  %v1879_v49 = vpop.f32.mrb[6].mxu0 }
 0x18f   : > { %v1880_v57 = vpop.f32.mrb[7].mxu0 }
 0x190   : > { %v960_v25 = vadd.f32 %v1878_v34, %v2660_v8 }
 0x191   : > { %v1898_v4 = vpop.f32.mrb[4].mxu1 }
 0x192   : > { %v1899_v24 = vpop.f32.mrb[5].mxu1 }
 0x193   : > { %v1900_v27 = vadd.f32 %v1899_v24, %v1898_v4  ;;  %v1901_v28 = vpop.f32.mrb[6].mxu1 }
 0x194   : > { %v1902_v0 = vpop.f32.mrb[7].mxu1 }
 0x195   : > { %v1000_v41 = vadd.f32 %v1900_v27, %v960_v25 }
 0x197   : > { %v1005_v31 = vsel %vm731_vm4, %v1000_v41, 0.0  ;;  %v1013_v35 = vmul.f32 %v1000_v41, %v1000_v41  ;;  %v1022_v36 = vpack.c.bf16 %v1000_v41, %v1000_v41 }
 0x198   : > { %v1006_v46 = vrot.slane %v1005_v31, 4 }
 0x199   : > { %v1014_v50 = vsel %vm731_vm4, %v1013_v35, 0.0  ;;  %1754 = vst.msk [vmem:[%s2667_s28 + $0x2] sm:$0x3] %vm750_vm3, %v1022_v36 }
 0x19a   : > { %v1007_v44 = vadd.f32 %v1006_v46, %v1005_v31  ;;  %v1015_v52 = vrot.slane %v1014_v50, 4 }
 0x19c   : > { %v1008_v53 = vrot.slane %v1007_v44, 2  ;;  %v1016_v59 = vadd.f32 %v1015_v52, %v1014_v50 }
 0x19e   : > { %v1009_v62 = vadd.f32 %v1008_v53, %v1007_v44  ;;  %v1017_v6 = vrot.slane %v1016_v59, 2 }
 0x1a0   : > { %v1010_v12 = vrot.slane %v1009_v62, 1  ;;  %v1018_v14 = vadd.f32 %v1017_v6, %v1016_v59 }
 0x1a2   : > { %v1011_v1 = vadd.f32 %v1010_v12, %v1009_v62  ;;  %v1019_v16 = vrot.slane %v1018_v14, 1 }
 0x1a4   : > { %v1012_v13 = vadd.f32 %v1011_v1, %v738_v15  ;;  %v1020_v32 = vadd.f32 %v1019_v16, %v1018_v14 }
 0x1a6   : > { %v1021_v37 = vadd.f32 %v1020_v32, %v747_v10 }
 0x1ac   : > { %v1920_v45 = vpop.f32.mrb[8].mxu0 }
 0x1ad   : > { %v1921_v47 = vpop.f32.mrb[9].mxu0 }
 0x1ae   : > { %v1922_v56 = vadd.f32 %v1921_v47, %v1920_v45  ;;  %v1923_v60 = vpop.f32.mrb[10].mxu0 }
 0x1af   : > { %v1924_v63 = vpop.f32.mrb[11].mxu0 }
 0x1b0   : > { %v1233_v40 = vadd.f32 %v1922_v56, %v2660_v8 }
 0x1b1   : > { %v1942_v21 = vpop.f32.mrb[8].mxu1 }
 0x1b2   : > { %v1943_v33 = vpop.f32.mrb[9].mxu1 }
 0x1b3   : > { %v1944_v48 = vadd.f32 %v1943_v33, %v1942_v21  ;;  %v1945_v58 = vpop.f32.mrb[10].mxu1 }
 0x1b4   : > { %v1946_v43 = vpop.f32.mrb[11].mxu1 }
 0x1b5   : > { %v1273_v54 = vadd.f32 %v1944_v48, %v1233_v40 }
 0x1b7   : > { %v1278_v17 = vsel %vm731_vm4, %v1273_v54, 0.0  ;;  %v1286_v2 = vmul.f32 %v1273_v54, %v1273_v54  ;;  %v1295_v51 = vpack.c.bf16 %v1273_v54, %v1273_v54 }
 0x1b8   : > { %v1279_v18 = vrot.slane %v1278_v17, 4 }
 0x1b9   : > { %v1287_v19 = vsel %vm731_vm4, %v1286_v2, 0.0  ;;  %1783 = vst.msk [vmem:[%s2667_s28 + $0x4] sm:$0x3] %vm750_vm3, %v1295_v51 }
 0x1ba   : > { %v1280_v3 = vadd.f32 %v1279_v18, %v1278_v17  ;;  %v1288_v5 = vrot.slane %v1287_v19, 4 }
 0x1bc   : > { %v1281_v7 = vrot.slane %v1280_v3, 2  ;;  %v1289_v26 = vadd.f32 %v1288_v5, %v1287_v19 }
 0x1be   : > { %v1282_v9 = vadd.f32 %v1281_v7, %v1280_v3  ;;  %v1290_v20 = vrot.slane %v1289_v26, 2 }
 0x1c0   : > { %v1283_v30 = vrot.slane %v1282_v9, 1  ;;  %v1291_v34 = vadd.f32 %v1290_v20, %v1289_v26 }
 0x1c2   : > { %v1284_v49 = vadd.f32 %v1283_v30, %v1282_v9  ;;  %v1292_v57 = vrot.slane %v1291_v34, 1 }
 0x1c4   : > { %v1285_v22 = vadd.f32 %v1284_v49, %v1012_v13  ;;  %v1293_v4 = vadd.f32 %v1292_v57, %v1291_v34 }
 0x1c6   : > { %v1294_v23 = vadd.f32 %v1293_v4, %v1021_v37 }
 0x1cc   : > { %v1964_v24 = vpop.f32.mrb[12].mxu0 }
 0x1cd   : > { %v1965_v25 = vpop.f32.mrb[13].mxu0 }
 0x1ce   : > { %v1966_v27 = vadd.f32 %v1965_v25, %v1964_v24  ;;  %v1967_v28 = vpop.f32.mrb[14].mxu0 }
 0x1cf   : > { %v1968_v29 = vpop.f32.mrb[15].mxu0 }
 0x1d0   : > { %v1506_v42 = vadd.f32 %v1966_v27, %v2660_v8 }
 0x1d1   : > { %v1986_v0 = vpop.f32.mrb[12].mxu1 }
 0x1d2   : > { %v1987_v41 = vpop.f32.mrb[13].mxu1 }
 0x1d3   : > { %v1988_v31 = vadd.f32 %v1987_v41, %v1986_v0  ;;  %v1989_v35 = vpop.f32.mrb[14].mxu1 }
 0x1d4   : > { %v1990_v36 = vpop.f32.mrb[15].mxu1 }
 0x1d5   : > { %v1546_v38 = vadd.f32 %v1988_v31, %v1506_v42 }
 0x1d7   : > { %v1551_v46 = vsel %vm731_vm4, %v1546_v38, 0.0  ;;  %v1559_v50 = vmul.f32 %v1546_v38, %v1546_v38  ;;  %v1568_v39 = vpack.c.bf16 %v1546_v38, %v1546_v38 }
 0x1d8   : > { %v1552_v44 = vrot.slane %v1551_v46, 4 }
 0x1d9   : > { %v1560_v52 = vsel %vm731_vm4, %v1559_v50, 0.0  ;;  %1812 = vst.msk [vmem:[%s2667_s28 + $0x6] sm:$0x3] %vm750_vm3, %v1568_v39 }
 0x1da   : > { %v1553_v55 = vadd.f32 %v1552_v44, %v1551_v46  ;;  %v1561_v53 = vrot.slane %v1560_v52, 4 }
 0x1dc   : > { %v1554_v59 = vrot.slane %v1553_v55, 2  ;;  %v1562_v61 = vadd.f32 %v1561_v53, %v1560_v52 }
 0x1de   : > { %v1555_v62 = vadd.f32 %v1554_v59, %v1553_v55  ;;  %v1563_v8 = vrot.slane %v1562_v61, 2 }
 0x1e0   : > { %v1556_v6 = vrot.slane %v1555_v62, 1  ;;  %v1564_v11 = vadd.f32 %v1563_v8, %v1562_v61 }
 0x1e2   : > { %v1557_v12 = vadd.f32 %v1556_v6, %v1555_v62  ;;  %v1565_v14 = vrot.slane %v1564_v11, 1 }
 0x1e4   : > { %v1558_v15 = vadd.f32 %v1557_v12, %v1285_v22  ;;  %v1566_v1 = vadd.f32 %v1565_v14, %v1564_v11 }
 0x1e6   : > { %v1567_v16 = vadd.f32 %v1566_v1, %v1294_v23 }
 0x1e8   : > { %v1572_v10 = vsel %vm1571_vm5, %v1558_v15, %v1567_v16 }
 0x1e9   : > { %1573 = vst.msk [vmem:[%s208_s7] sm:$0x3] %vm750_vm3, %v1572_v10 }
 0x1ea PF: > { %s15_s15 = sadd.s32 1, %s2103_s15  }
 0x1eb   : > { %p12_p4 = scmp.ge.s32.totalorder %s15_s15, 4  }
 0x1ed   :  { %14 = sbr.rel (!%p12_p4) target bundleno = 1 (0x1), region = 83 }

// kernel: _lambda_.9
= control target key start
LH: loop header
LB: loop body
LE: loop exit
PB: predicated region body
PF: predicated region fallthrough
CT: control target
= control target key end

     0   :  { %s3070_s14 = smov 0   ;;  %s4191_s0 = inlined_call_operand.vmem [shape: bf16[2,8,8,64], index: 0, kind: input, shape index: {}]   ;;  %s4192_s1 = inlined_call_operand.vmem [shape: bf16[1024,1], index: 1, kind: input, shape index: {}]   ;;  %s4193_s2 = inlined_call_operand.<no memory space> [shape: f32[1,1], index: 2, kind: input, shape index: {}]   ;;  %s4194_s3 = inlined_call_operand.vmem [shape: f32[2,5,5,1], index: 3, kind: output, shape index: {}]  }
   0x1   :  { %v8_v0 = vstv %s4193_s2 }
   0x2   :  { %9 = vst [vmem:[#allocation2] sm:$0x1] %v8_v0 }
   0x3 LB: > { %s2286_s15 = sadd.s32 4294967295, %s3044_s14   ;;  %p2290_p0 = scmp.ge.s32.totalorder %s3044_s14, 1  ;;  %s3044_s14 = sphi %s3070_s14, %s15_s14  }
   0x4   : > { %p139_p1 = scmp.lt.s32.totalorder %s3044_s14, 3 }
   0x6   : > { %p140_p2 = pnand %p2290_p0, %p139_p1 }
   0x8   : > { %143 = sbr.rel (%p140_p2) target bundleno = 656 (0x290), region = 32 }
   0xf   : > { %p163_p3 = scmp.lt.s32.totalorder %s2286_s15, 1  ;;  %v2906_v1 = vld [vmem:[%s4192_s1 + $0x40] sm:$0xff]   ;;  %v2910_v5 = vld [vmem:[%s4192_s1 + $0x48] sm:$0xff]   ;;  %v2915_v38 = vld [vmem:[%s4192_s1 + $0x50] sm:$0xff]   ;;  %s3046_s10 = smov 64   ;;  %vm418_vm0 = vcmask 523264  }
  0x10   : > { %v2907_v2 = vld [vmem:[%s4192_s1 + $0xc0] sm:$0xff]   ;;  %2444 = vmatprep.subr.bf16.mxu0 %v2906_v1  ;;  %v2911_v7 = vld [vmem:[%s4192_s1 + $0xc8] sm:$0xff]   ;;  %v3157_v48 = vld [vmem:[%s4192_s1 + $0xd0] sm:$0xff]   ;;  %vm1001_vm1 = vcmask 4096  }
  0x11   : > { %s4385_s15 = smov (!%p163_p3, %s2286_s15), 1  ;;  %v2908_v3 = vld [vmem:[%s4192_s1] sm:$0xff]   ;;  %2466 = vmatprep.subr.bf16.mxu1 %v2907_v2  ;;  %v2912_v9 = vld [vmem:[%s4192_s1 + $0x8] sm:$0xff]   ;;  %v3174_v2 = vld [vmem:[%s4192_s1 + $0x10] sm:$0xff]  }
  0x12   : > { %s2443_s21 = sshll.u32 %s4385_s15, 5  ;;  %v2909_v4 = vld [vmem:[%s4192_s1 + $0x80] sm:$0xff]   ;;  %2445 = vmatpush3.bf16.msra.mxu0 %v2908_v3  ;;  %v2913_v23 = vld [vmem:[%s4192_s1 + $0x88] sm:$0xff]   ;;  %s2884_s18 = smul.u32 40, %s4385_s15 }
  0x13   : > { %s3096_s26 = scalar_lea.vmem %s4191_s0, %s2443_s21  ;;  %2467 = vmatpush3.bf16.msra.mxu1 %v2909_v4  ;;  %2446 = vmatprep.subr.bf16.mxu0 %v2910_v5 }
  0x14   : > { %v3102_v6 = vld [vmem:[%s3096_s26 + $0x4] ss:$0 sps:$4 sm:$0xee]   ;;  %v3108_v8 = vld [vmem:[%s3096_s26] ss:$0 sps:$4 sm:$0xee]   ;;  %2468 = vmatprep.subr.bf16.mxu1 %v2911_v7  ;;  %s4122_s15 = scalar_lea.vmem %s4194_s3, %s2884_s18 }
  0x15   : > { %v357_v10 = vshrl.u32 %v3102_v6, 16  ;;  %v360_v11 = vshll.u32 %v3102_v6, 16  ;;  %v3116_v12 = vld [vmem:[%s3096_s26 + $0x4] sm:$0x7]  ;;  %v3119_v13 = vld [vmem:[%s3096_s26] sm:$0x7] }
  0x16   : > { %v331_v14 = vshrl.u32 %v3108_v8, 16  ;;  %v334_v15 = vshll.u32 %v3108_v8, 16  ;;  %v2302_v16 = vcombine.low %v3116_v12, %v3116_v12  ;;  %v2300_v17 = vcombine.low %v3119_v13, %v3119_v13  ;;  %v2296_v18 = vld [vmem:[%s3096_s26 + $0x8] sm:$0x7]  ;;  %2447 = vmatpush3.bf16.msra.mxu0 %v2912_v9  ;;  %v3140_v37 = vld [vmem:[%s3096_s26 + $0xc] sm:$0x7] }
  0x17   : > { %v359_v19 = vrot.slane %v357_v10, 1  ;;  %v362_v20 = vrot.slane %v360_v11, 2  ;;  %v3129_v21 = vld [vmem:[%s3096_s26 + $0x8] ss:$0 sps:$4 sm:$0xee]   ;;  %v2304_v22 = vcombine.low %v2296_v18, %v2296_v18  ;;  %2469 = vmatpush3.bf16.msra.mxu1 %v2913_v23  ;;  %v2306_v46 = vcombine.low %v3140_v37, %v3140_v37  ;;  %2448 = vmatprep.subr.bf16.mxu0 %v2915_v38 }
  0x18   : > { %v333_v24 = vrot.slane %v331_v14, 1  ;;  %v336_v25 = vrot.slane %v334_v15, 2  ;;  %v344_v26 = vshrl.u32 %v2302_v16, 16  ;;  %v346_v27 = vshll.u32 %v2302_v16, 16  ;;  %v2373_v52 = vld [vmem:[%s3096_s26 + $0x4] sm:$0x7]  ;;  %2470 = vmatprep.subr.bf16.mxu1 %v3157_v48 }
  0x19   : > { %v363_v28 = vor.u32 %v362_v20, %v359_v19  ;;  %v318_v29 = vshrl.u32 %v2300_v17, 16  ;;  %v320_v30 = vshll.u32 %v2300_v17, 16  ;;  %v383_v31 = vshrl.u32 %v3129_v21, 16  ;;  %v3136_v32 = vld [vmem:[%s3096_s26 + $0xc] ss:$0 sps:$4 sm:$0xee]  }
  0x1a   : > { %v337_v33 = vor.u32 %v336_v25, %v333_v24  ;;  %v348_v34 = vrot.slane %v346_v27, 1  ;;  %v386_v35 = vshll.u32 %v3129_v21, 16  ;;  %v370_v36 = vshrl.u32 %v2304_v22, 16  ;;  %v3152_v47 = vld [vmem:[%s3096_s26 + $0x4] ss:$0 sps:$4 sm:$0xee]   ;;  %2449 = vmatpush3.bf16.msra.mxu0 %v3174_v2 }
  0x1b   : > { %364 = vrot.lane.b32.xlu1 %v363_v28, %s3046_s10  ;;  %v322_v39 = vrot.slane %v320_v30, 1  ;;  %v385_v40 = vrot.slane %v383_v31, 1  ;;  %v372_v41 = vshll.u32 %v2304_v22, 16  ;;  %v409_v42 = vshrl.u32 %v3136_v32, 16  ;;  %v2375_v61 = vld [vmem:[%s3096_s26 + $0x8] sm:$0x7] }
  0x1c   : > { %338 = vrot.lane.b32.xlu0 %v337_v33, %s3046_s10  ;;  %v349_v43 = vor.u32 %v348_v34, %v344_v26  ;;  %v388_v44 = vrot.slane %v386_v35, 2  ;;  %v412_v45 = vshll.u32 %v3136_v32, 16  ;;  %v396_v54 = vshrl.u32 %v2306_v46, 16  ;;  %v3161_v56 = vld [vmem:[%s3096_s26 + $0x8] ss:$0 sps:$4 sm:$0xee]  }
  0x1d   : > { %v323_v49 = vor.u32 %v322_v39, %v318_v29  ;;  %v374_v50 = vrot.slane %v372_v41, 1  ;;  %v411_v51 = vrot.slane %v409_v42, 1  ;;  %v398_v55 = vshll.u32 %v2306_v46, 16  ;;  %v2914_v15 = vld [vmem:[%s3096_s26 + $0xc] ss:$0 sps:$4 sm:$0xee]  }
  0x1e   : > { %v414_v53 = vrot.slane %v412_v45, 2  ;;  %v1029_v58 = vshrl.u32 %v3152_v47, 16  ;;  %v1032_v59 = vshll.u32 %v3152_v47, 16  ;;  %v2381_v60 = vcombine.low %v2373_v52, %v2373_v52  ;;  %v2377_v22 = vld [vmem:[%s3096_s26 + $0xc] sm:$0x7]  ;;  %v3184_v25 = vld [vmem:[%s4192_s1 + $0x90] sm:$0xff]  }
  0x1f   : > { %350 = vrot.lane.b32.xlu1 %v349_v43, %s3046_s10  ;;  %v375_v57 = vor.u32 %v374_v50, %v370_v36  ;;  %v389_v62 = vor.u32 %v388_v44, %v385_v40  ;;  %v400_v63 = vrot.slane %v398_v55, 1  ;;  %v1055_v0 = vshrl.u32 %v3161_v56, 16  ;;  %2471 = vmatpush3.bf16.msra.mxu1 %v3184_v25  ;;  %v3190_v33 = vld [vmem:[%s3096_s26 + $0x10] ss:$0 sps:$4 sm:$0xee]   ;;  %v3195_v34 = vld [vmem:[%s4192_s1 + $0x58] sm:$0xff]  }
  0x20   : > { %324 = vrot.lane.b32.xlu0 %v323_v49, %s3046_s10  ;;  %v1058_v1 = vshll.u32 %v3161_v56, 16  ;;  %v1031_v3 = vrot.slane %v1029_v58, 1  ;;  %v1034_v4 = vrot.slane %v1032_v59, 2  ;;  %v1018_v5 = vshll.u32 %v2381_v60, 16  ;;  %v3200_v36 = vld [vmem:[%s4192_s1 + $0xd8] sm:$0xff]   ;;  %2450 = vmatprep.subr.bf16.mxu0 %v3195_v34  ;;  %v3222_v50 = vld [vmem:[%s4192_s1 + $0x60] sm:$0xff]  }
  0x21   : > { %v1016_v7 = vshrl.u32 %v2381_v60, 16  ;;  %v1057_v9 = vrot.slane %v1055_v0, 1  ;;  %v2383_v10 = vcombine.low %v2375_v61, %v2375_v61  ;;  %v401_v11 = vor.u32 %v400_v63, %v396_v54  ;;  %v2379_v41 = vld [vmem:[%s3096_s26 + $0x10] sm:$0x7]  ;;  %2472 = vmatprep.subr.bf16.mxu1 %v3200_v36  ;;  %v3212_v45 = vld [vmem:[%s4192_s1 + $0x18] sm:$0xff]   ;;  %v3230_v55 = vld [vmem:[%s4192_s1 + $0xe0] sm:$0xff]  }
  0x22   : > { %v1020_v14 = vrot.slane %v1018_v5, 1  ;;  %v415_v16 = vor.u32 %v414_v53, %v411_v51  ;;  %v1060_v17 = vrot.slane %v1058_v1, 2  ;;  %v1081_v20 = vshrl.u32 %v2914_v15, 16  ;;  %v3217_v49 = vld [vmem:[%s4192_s1 + $0x98] sm:$0xff]   ;;  %2451 = vmatpush3.bf16.msra.mxu0 %v3212_v45  ;;  %v3237_v59 = vld [vmem:[%s4192_s1 + $0x20] sm:$0xff]   ;;  %v3249_v61 = vld [vmem:[%s4192_s1 + $0x68] sm:$0xff]  }
  0x23   : > { %376 = vrot.lane.b32.xlu1 %v375_v57, %s3046_s10  ;;  %v1044_v18 = vshll.u32 %v2383_v10, 16  ;;  %v1042_v19 = vshrl.u32 %v2383_v10, 16  ;;  %v1084_v23 = vshll.u32 %v2914_v15, 16  ;;  %v2385_v24 = vcombine.low %v2377_v22, %v2377_v22  ;;  %2473 = vmatpush3.bf16.msra.mxu1 %v3217_v49  ;;  %v3243_v60 = vld [vmem:[%s4192_s1 + $0xa0] sm:$0xff]   ;;  %v3256_v63 = vld [vmem:[%s4192_s1 + $0xe8] sm:$0xff]   ;;  %v3282_v5 = vld [vmem:[%s4192_s1 + $0xf0] sm:$0xff]  }
  0x24   : > { %390 = vrot.lane.b32.xlu0 %v389_v62, %s3046_s10  ;;  %v1021_v26 = vor.u32 %v1020_v14, %v1016_v7  ;;  %v1083_v28 = vrot.slane %v1081_v20, 1  ;;  %v1035_v29 = vor.u32 %v1034_v4, %v1031_v3  ;;  %v1107_v39 = vshrl.u32 %v3190_v33, 16  ;;  %2452 = vmatprep.subr.bf16.mxu0 %v3222_v50  ;;  %v3263_v1 = vld [vmem:[%s4192_s1 + $0x28] sm:$0xff]   ;;  %v3275_v4 = vld [vmem:[%s4192_s1 + $0x70] sm:$0xff]   ;;  %v3301_v10 = vld [vmem:[%s4192_s1 + $0x78] sm:$0xff]  }
  0x25   : > { %v1046_v27 = vrot.slane %v1044_v18, 1  ;;  %v1068_v30 = vshrl.u32 %v2385_v24, 16  ;;  %v1070_v31 = vshll.u32 %v2385_v24, 16  ;;  %v1110_v40 = vshll.u32 %v3190_v33, 16  ;;  %2474 = vmatprep.subr.bf16.mxu1 %v3230_v55  ;;  %v3269_v3 = vld [vmem:[%s4192_s1 + $0xa8] sm:$0xff]   ;;  %v3289_v7 = vld [vmem:[%s4192_s1 + $0x30] sm:$0xff]  }
  0x26   : > { %v1061_v42 = vor.u32 %v1060_v17, %v1057_v9  ;;  %v1086_v43 = vrot.slane %v1084_v23, 2  ;;  %v2387_v44 = vcombine.low %v2379_v41, %v2379_v41  ;;  %v1109_v46 = vrot.slane %v1107_v39, 1  ;;  %2453 = vmatpush3.bf16.msra.mxu0 %v3237_v59  ;;  %v3295_v9 = vld [vmem:[%s4192_s1 + $0xb0] sm:$0xff]   ;;  %v3313_v14 = vld [vmem:[%s4192_s1 + $0x38] sm:$0xff]   ;;  %v3331_v17 = vld [vmem:[%s4192_s1 + $0x1c0] sm:$0xff]  }
  0x27   : > { %402 = vrot.lane.b32.xlu1 %v401_v11, %s3046_s10  ;;  %v1072_v35 = vrot.slane %v1070_v31, 1  ;;  %v1047_v38 = vor.u32 %v1046_v27, %v1042_v19  ;;  %v1112_v51 = vrot.slane %v1110_v40, 2  ;;  %2475 = vmatpush3.bf16.msra.mxu1 %v3243_v60  ;;  %v3307_v11 = vld [vmem:[%s4192_s1 + $0xf8] sm:$0xff]   ;;  %v3336_v18 = vld [vmem:[%s3096_s26 + $0x8] ss:$0 sps:$4 sm:$0xee]  }
  0x28   : > { %416 = vrot.lane.b32.xlu0 %v415_v16, %s3046_s10  ;;  %v1096_v52 = vshll.u32 %v2387_v44, 16  ;;  %v1094_v54 = vshrl.u32 %v2387_v44, 16  ;;  %v1087_v57 = vor.u32 %v1086_v43, %v1083_v28  ;;  %2454 = vmatprep.subr.bf16.mxu0 %v3249_v61  ;;  %v3319_v15 = vld [vmem:[%s4192_s1 + $0xb8] sm:$0xff]   ;;  %v3325_v16 = vld [vmem:[%s4192_s1 + $0x140] sm:$0xff]   ;;  %4270 = vst [vmem:[#allocation3_spill] sm:$0xff] %v3336_v18  ;;  %v1336_v20 = vshrl.u32 %v3336_v18, 16 }
  0x29   : > { %v1073_v53 = vor.u32 %v1072_v35, %v1068_v30  ;;  %v1113_v0 = vor.u32 %v1112_v51, %v1109_v46  ;;  %2476 = vmatprep.subr.bf16.mxu1 %v3256_v63  ;;  %v3339_v19 = vld [vmem:[%s3096_s26 + $0x8] sm:$0x7]  ;;  %v1339_v22 = vshll.u32 %v3336_v18, 16  ;;  %v3346_v31 = vld [vmem:[%s3096_s26 + $0xc] ss:$0 sps:$4 sm:$0xee]  }
  0x2a   : > { %v1098_v58 = vrot.slane %v1096_v52, 1  ;;  %2455 = vmatpush3.bf16.msra.mxu0 %v3263_v1  ;;  %4271 = vst [vmem:[#allocation4_spill] sm:$0xff] %v3339_v19  ;;  %v2398_v23 = vcombine.low %v3339_v19, %v3339_v19  ;;  %v1338_v24 = vrot.slane %v1336_v20, 1  ;;  %4272 = vst [vmem:[#allocation5_spill] sm:$0xff] %v3346_v31  ;;  %v3349_v35 = vld [vmem:[%s3096_s26 + $0xc] sm:$0x7] }
  0x2b   : > { %1022 = vrot.lane.b32.xlu1 %v1021_v26, %s3046_s10  ;;  %2477 = vmatpush3.bf16.msra.mxu1 %v3269_v3  ;;  %v1341_v26 = vrot.slane %v1339_v22, 2  ;;  %4273 = vst [vmem:[#allocation6_spill] sm:$0xff] %v3349_v35  ;;  %v1362_v40 = vshrl.u32 %v3346_v31, 16  ;;  %v1365_v41 = vshll.u32 %v3346_v31, 16  ;;  %v3373_v22 = vld [vmem:[%s3096_s26 + $0x14] sm:$0x7] }
  0x2c   : > { %1036 = vrot.lane.b32.xlu0 %v1035_v29, %s3046_s10  ;;  %v1099_v62 = vor.u32 %v1098_v58, %v1094_v54  ;;  %2456 = vmatprep.subr.bf16.mxu0 %v3275_v4  ;;  %v1323_v27 = vshrl.u32 %v2398_v23, 16  ;;  %v1325_v28 = vshll.u32 %v2398_v23, 16  ;;  %v3360_v54 = vld [vmem:[%s3096_s26 + $0x10] ss:$0 sps:$4 sm:$0xee]   ;;  %4277 = vst [vmem:[#allocation10_spill] sm:$0xff] %v3373_v22 }
  0x2d   : > { %2478 = vmatprep.subr.bf16.mxu1 %v3282_v5  ;;  %v1342_v29 = vor.u32 %v1341_v26, %v1338_v24  ;;  %v1364_v44 = vrot.slane %v1362_v40, 1  ;;  %v1367_v46 = vrot.slane %v1365_v41, 2  ;;  %4274 = vst [vmem:[#allocation7_spill] sm:$0xff] %v3360_v54  ;;  %v1391_v20 = vshll.u32 %v3360_v54, 16 }
  0x2e   : > { %2457 = vmatpush3.bf16.msra.mxu0 %v3289_v7  ;;  %v1327_v30 = vrot.slane %v1325_v28, 1  ;;  %v3378_v28 = vld [vmem:[%s3096_s26 + $0xc] sm:$0x7]  ;;  %v1027_v31 = vrot.slane %v3152_v47, 1 }
  0x2f   : > { %1048 = vrot.lane.b32.xlu1 %v1047_v38, %s3046_s10  ;;  %2479 = vmatpush3.bf16.msra.mxu1 %v3295_v9  ;;  %v2400_v38 = vcombine.low %v3349_v35, %v3349_v35  ;;  %v1368_v52 = vor.u32 %v1367_v46, %v1364_v44  ;;  %4278 = vst [vmem:[#allocation11_spill] sm:$0xff] %v3378_v28  ;;  %v3642_v35 = vld [vmem:[%s4192_s1 + $0x138] sm:$0xff]  }
  0x30   : > { %1062 = vrot.lane.b32.xlu0 %v1061_v42, %s3046_s10  ;;  %2458 = vmatprep.subr.bf16.mxu0 %v3301_v10  ;;  %v1328_v39 = vor.u32 %v1327_v30, %v1323_v27  ;;  %v1393_v30 = vrot.slane %v1391_v20, 2  ;;  %v2415_v40 = vcombine.low %v3378_v28, %v3378_v28  ;;  %4301 = vst [vmem:[#allocation34_spill] sm:$0xff] %v3642_v35 }
  0x31   : > { %2480 = vmatprep.subr.bf16.mxu1 %v3307_v11  ;;  %v1349_v42 = vshrl.u32 %v2400_v38, 16  ;;  %v1351_v43 = vshll.u32 %v2400_v38, 16  ;;  %v2404_v38 = vcombine.low %v3373_v22, %v3373_v22  ;;  %v3393_v22 = vld [vmem:[%s3096_s26 + $0x10] sm:$0x7] }
  0x32   : > { %2459 = vmatpush3.bf16.msra.mxu0 %v3313_v14  ;;  %4281 = vst [vmem:[#allocation14_spill] sm:$0xff] %v3393_v22 }
  0x33   : > { %1074 = vrot.lane.b32.xlu1 %v1073_v53, %s3046_s10  ;;  %2481 = vmatpush3.bf16.msra.mxu1 %v3319_v15  ;;  %v1353_v51 = vrot.slane %v1351_v43, 1  ;;  %v1401_v46 = vshrl.u32 %v2404_v38, 16 }
  0x34   : > { %1088 = vrot.lane.b32.xlu0 %v1087_v57, %s3046_s10  ;;  %2488 = vmatprep.subr.bf16.mxu0 %v3325_v16  ;;  %v3363_v57 = vld [vmem:[%s3096_s26 + $0x10] sm:$0x7] }
  0x35   : > { %2510 = vmatprep.subr.bf16.mxu1 %v3331_v17  ;;  %v1354_v53 = vor.u32 %v1353_v51, %v1349_v42  ;;  %4275 = vst [vmem:[#allocation8_spill] sm:$0xff] %v3363_v57  ;;  %v2402_v58 = vcombine.low %v3363_v57, %v3363_v57  ;;  %v1403_v51 = vshll.u32 %v2404_v38, 16  ;;  %v1630_v57 = vshrl.u32 %v2415_v40, 16 }
  0x37   : > { %1100 = vrot.lane.b32.xlu1 %v1099_v62, %s3046_s10  ;;  %v3368_v62 = vld [vmem:[%s3096_s26 + $0x14] ss:$0 sps:$4 sm:$0xee]   ;;  %v1375_v23 = vshrl.u32 %v2402_v58, 16  ;;  %v1377_v24 = vshll.u32 %v2402_v58, 16  ;;  %v1405_v28 = vrot.slane %v1403_v51, 1 }
  0x38   : > { %1114 = vrot.lane.b32.xlu0 %v1113_v0, %s3046_s10  ;;  %4276 = vst [vmem:[#allocation9_spill] sm:$0xff] %v3368_v62  ;;  %v1388_v0 = vshrl.u32 %v3360_v54, 16  ;;  %v1414_v26 = vshrl.u32 %v3368_v62, 16  ;;  %v1417_v27 = vshll.u32 %v3368_v62, 16  ;;  %v3635_v62 = vld [vmem:[%s4192_s1 + $0x1b8] sm:$0xff]  }
  0x39   : > { %v1379_v41 = vrot.slane %v1377_v24, 1  ;;  %v1406_v38 = vor.u32 %v1405_v28, %v1401_v46  ;;  %v3406_v46 = vld [vmem:[%s3096_s26 + $0x14] ss:$0 sps:$4 sm:$0xee]   ;;  %4300 = vst [vmem:[#allocation33_spill] sm:$0xff] %v3635_v62 }
  0x3a   : > { %v1416_v42 = vrot.slane %v1414_v26, 1  ;;  %v1419_v43 = vrot.slane %v1417_v27, 2  ;;  %v1632_v26 = vshll.u32 %v2415_v40, 16  ;;  %4282 = vst [vmem:[#allocation15_spill] sm:$0xff] %v3406_v46 }
  0x3b   : > { %1329 = vrot.lane.b32.xlu1 %v1328_v39, %s3046_s10  ;;  %v3383_v39 = vld [vmem:[%s3096_s26 + $0xc] ss:$0 sps:$4 sm:$0xee]   ;;  %v1380_v58 = vor.u32 %v1379_v41, %v1375_v23  ;;  %v2417_v23 = vcombine.low %v3393_v22, %v3393_v22 }
  0x3c   : > { %1343 = vrot.lane.b32.xlu0 %v1342_v29, %s3046_s10  ;;  %v1390_v29 = vrot.slane %v1388_v0, 1  ;;  %4279 = vst [vmem:[#allocation12_spill] sm:$0xff] %v3383_v39  ;;  %v1420_v0 = vor.u32 %v1419_v43, %v1416_v42  ;;  %v1646_v20 = vshll.u32 %v3383_v39, 16  ;;  %v1634_v41 = vrot.slane %v1632_v26, 1  ;;  %v3409_v26 = vld [vmem:[%s3096_s26 + $0x14] sm:$0x7] }
  0x3d   : > { %v1658_v42 = vshll.u32 %v2417_v23, 16  ;;  %4283 = vst [vmem:[#allocation16_spill] sm:$0xff] %v3409_v26 }
  0x3e   : > { %v1394_v44 = vor.u32 %v1393_v30, %v1390_v29  ;;  %v1648_v29 = vrot.slane %v1646_v20, 2  ;;  %v1635_v51 = vor.u32 %v1634_v41, %v1630_v57  ;;  %v1698_v57 = vshll.u32 %v3406_v46, 16 }
  0x3f   : > { %1355 = vrot.lane.b32.xlu1 %v1354_v53, %s3046_s10  ;;  %v3389_v53 = vld [vmem:[%s3096_s26 + $0x10] ss:$0 sps:$4 sm:$0xee]  }
  0x40   : > { %1369 = vrot.lane.b32.xlu0 %v1368_v52, %s3046_s10  ;;  %v1643_v52 = vshrl.u32 %v3383_v39, 16  ;;  %4280 = vst [vmem:[#allocation13_spill] sm:$0xff] %v3389_v53  ;;  %v1669_v27 = vshrl.u32 %v3389_v53, 16  ;;  %v1672_v30 = vshll.u32 %v3389_v53, 16  ;;  %v3623_v53 = vld [vmem:[%s4192_s1 + $0x1f8] sm:$0xff]  }
  0x41   : > { %4299 = vst [vmem:[#allocation32_spill] sm:$0xff] %v3623_v53  ;;  %v3629_v39 = vld [vmem:[%s4192_s1 + $0x178] sm:$0xff]  }
  0x42   : > { %v1645_v24 = vrot.slane %v1643_v52, 1  ;;  %v1674_v40 = vrot.slane %v1672_v30, 2  ;;  %v1656_v52 = vshrl.u32 %v2417_v23, 16  ;;  %v1700_v30 = vrot.slane %v1698_v57, 2 }
  0x43   : > { %1381 = vrot.lane.b32.xlu1 %v1380_v58, %s3046_s10  ;;  %v1660_v58 = vrot.slane %v1658_v42, 1  ;;  %v3418_v23 = vld [vmem:[%s3096_s26 + $0x18] ss:$0 sps:$4 sm:$0xee]  }
  0x44   : > { %1395 = vrot.lane.b32.xlu0 %v1394_v44, %s3046_s10  ;;  %v1649_v43 = vor.u32 %v1648_v29, %v1645_v24  ;;  %v1671_v44 = vrot.slane %v1669_v27, 1  ;;  %v1695_v24 = vshrl.u32 %v3406_v46, 16  ;;  %4284 = vst [vmem:[#allocation17_spill] sm:$0xff] %v3418_v23  ;;  %v3421_v42 = vld [vmem:[%s3096_s26 + $0x18] sm:$0x7] }
  0x45   : > { %v1661_v28 = vor.u32 %v1660_v58, %v1656_v52  ;;  %4285 = vst [vmem:[#allocation18_spill] sm:$0xff] %v3421_v42 }
  0x46   : > { %v1675_v20 = vor.u32 %v1674_v40, %v1671_v44  ;;  %v1697_v29 = vrot.slane %v1695_v24, 1  ;;  %v1721_v44 = vshrl.u32 %v3418_v23, 16  ;;  %v1724_v40 = vshll.u32 %v3418_v23, 16 }
  0x47   : > { %1407 = vrot.lane.b32.xlu1 %v1406_v38, %s3046_s10 }
  0x48   : > { %1421 = vrot.lane.b32.xlu0 %v1420_v0, %s3046_s10  ;;  %v2419_v0 = vcombine.low %v3409_v26, %v3409_v26  ;;  %v1723_v58 = vrot.slane %v1721_v44, 1 }
  0x4a   : > { %v1684_v27 = vshll.u32 %v2419_v0, 16  ;;  %v1682_v38 = vshrl.u32 %v2419_v0, 16 }
  0x4b   : > { %1636 = vrot.lane.b32.xlu1 %v1635_v51, %s3046_s10  ;;  %v2421_v51 = vcombine.low %v3421_v42, %v3421_v42 }
  0x4c   : > { %1650 = vrot.lane.b32.xlu0 %v1649_v43, %s3046_s10  ;;  %v1686_v41 = vrot.slane %v1684_v27, 1  ;;  %v1701_v43 = vor.u32 %v1700_v30, %v1697_v29  ;;  %v355_v29 = vrot.slane %v3102_v6, 1  ;;  %v329_v30 = vrot.slane %v3108_v8, 1  ;;  %v3443_v6 = vld [vmem:[%s4192_s1 + $0x100] sm:$0xff]   ;;  %v3448_v8 = vld [vmem:[%s4192_s1 + $0x1c8] sm:$0xff]  }
  0x4d   : > { %v1708_v0 = vshrl.u32 %v2421_v51, 16 }
  0x4e   : > { %v1687_v52 = vor.u32 %v1686_v41, %v1682_v38 }
  0x4f   : > { %1662 = vrot.lane.b32.xlu1 %v1661_v28, %s3046_s10  ;;  %v1710_v28 = vshll.u32 %v2421_v51, 16 }
  0x50   : > { %1676 = vrot.lane.b32.xlu0 %v1675_v20, %s3046_s10  ;;  %v1726_v20 = vrot.slane %v1724_v40, 2  ;;  %v3438_v40 = vld [vmem:[%s4192_s1 + $0x180] sm:$0xff]  }
  0x51   : > { %v1712_v57 = vrot.slane %v1710_v28, 1 }
  0x52   : > { %v1727_v24 = vor.u32 %v1726_v20, %v1723_v58  ;;  %v3455_v20 = vld [vmem:[%s4192_s1 + $0x148] sm:$0xff]  }
  0x53   : > { %1688 = vrot.lane.b32.xlu1 %v1687_v52, %s3046_s10  ;;  %v1713_v27 = vor.u32 %v1712_v57, %v1708_v0  ;;  %v381_v0 = vrot.slane %v3129_v21, 1  ;;  %v3464_v57 = vld [vmem:[%s3096_s26 + $0x10] sm:$0x7] }
  0x54   : > { %1702 = vrot.lane.b32.xlu0 %v1701_v43, %s3046_s10  ;;  %4287 = vst [vmem:[#allocation20_spill] sm:$0xff] %v3464_v57  ;;  %v3484_v21 = vld [vmem:[%s4192_s1 + $0x1d0] sm:$0xff]  }
  0x57   : > { %1714 = vrot.lane.b32.xlu1 %v1713_v27, %s3046_s10  ;;  %v2432_v27 = vcombine.low %v3464_v57, %v3464_v57  ;;  %v3503_v57 = vld [vmem:[%s4192_s1 + $0x190] sm:$0xff]  }
  0x58   : > { %1728 = vrot.lane.b32.xlu0 %v1727_v24, %s3046_s10  ;;  %v3461_v24 = vld [vmem:[%s3096_s26 + $0x10] ss:$0 sps:$4 sm:$0xee]  }
  0x59   : > { %4286 = vst [vmem:[#allocation19_spill] sm:$0xff] %v3461_v24  ;;  %v1937_v26 = vshrl.u32 %v2432_v27, 16 }
  0x8d   : > { %v365_v38 = vpop.permute.xlu1 %364 }
  0x8e   : > { %v339_v41 = vpop.permute.xlu0 %338  ;;  %v433_v43 = vsel %vm418_vm0, %v355_v29, %v365_v38  ;;  %v1950_v29 = vshrl.u32 %v3461_v24, 16  ;;  %v3492_v38 = vld [vmem:[%s4192_s1 + $0x150] sm:$0xff]  }
  0x8f   : > { %v425_v44 = vsel %vm418_vm0, %v329_v30, %v339_v41  ;;  %913 = vmatprep.mubr.bf16.mxu1 %v433_v43  ;;  %v1953_v30 = vshll.u32 %v3461_v24, 16  ;;  %v1939_v43 = vshll.u32 %v2432_v27, 16  ;;  %v3506_v24 = vld [vmem:[%s3096_s26 + $0x14] sm:$0x7] }
  0x90   : > { %873 = vmatprep.mubr.bf16.mxu0 %v425_v44  ;;  %4289 = vst [vmem:[#allocation22_spill] sm:$0xff] %v3506_v24 }
  0x91   : > { %v351_v51 = vpop.permute.xlu1 %350  ;;  %v1941_v42 = vrot.slane %v1939_v43, 1  ;;  %v3528_v43 = vld [vmem:[%s4192_s1 + $0x158] sm:$0xff]  }
  0x92   : > { %v325_v52 = vpop.permute.xlu0 %324  ;;  %v429_v58 = vsel %vm418_vm0, %v3116_v12, %v351_v51  ;;  %v3470_v12 = vld [vmem:[%s4192_s1 + $0x188] sm:$0xff]   ;;  %v407_v51 = vrot.slane %v3136_v32, 1  ;;  %v3513_v32 = vld [vmem:[%s4192_s1 + $0x110] sm:$0xff]  }
  0x93   : > { %v421_v28 = vsel %vm418_vm0, %v3119_v13, %v325_v52  ;;  %914 = vmatmul.mubr.bf16.vlgmr.msra.gmra.mrb[0].mxu1 %v429_v58  ;;  %v3479_v13 = vld [vmem:[%s4192_s1 + $0x108] sm:$0xff]   ;;  %v1952_v52 = vrot.slane %v1950_v29, 1  ;;  %v1955_v58 = vrot.slane %v1953_v30, 2  ;;  %v1942_v23 = vor.u32 %v1941_v42, %v1937_v26  ;;  %v3543_v26 = vld [vmem:[%s4192_s1 + $0x118] sm:$0xff]   ;;  %v3548_v42 = vld [vmem:[%s4192_s1 + $0x1e0] sm:$0xff]  }
  0x94   : > { %874 = vmatmul.mubr.bf16.vlgmr.msra.gmra.mrb[0].mxu0 %v421_v28  ;;  %2511 = vmatpush3.bf16.msra.mxu1 %v3438_v40  ;;  %v3497_v28 = vld [vmem:[%s3096_s26 + $0x14] ss:$0 sps:$4 sm:$0xee]   ;;  %4290 = vst [vmem:[#allocation23_spill] sm:$0xff] %v3548_v42 }
  0x95   : > { %2489 = vmatpush3.bf16.msra.mxu0 %v3443_v6  ;;  %2512 = vmatprep.subr.bf16.mxu1 %v3448_v8  ;;  %4288 = vst [vmem:[#allocation21_spill] sm:$0xff] %v3497_v28  ;;  %v1956_v29 = vor.u32 %v1955_v58, %v1952_v52  ;;  %v1976_v27 = vshrl.u32 %v3497_v28, 16  ;;  %v1979_v30 = vshll.u32 %v3497_v28, 16 }
  0x96   : > { %2490 = vmatprep.subr.bf16.mxu0 %v3455_v20  ;;  %v391_v41 = vpop.permute.xlu0 %390  ;;  %1943 = vrot.lane.b32.xlu1 %v1942_v23, %s3046_s10  ;;  %v3574_v23 = vld [vmem:[%s4192_s1 + $0x1e8] sm:$0xff]  }
  0x97   : > { %v441_v44 = vsel %vm418_vm0, %v381_v0, %v391_v41  ;;  %v3518_v0 = vld [vmem:[%s4192_s1 + $0x1d8] sm:$0xff]   ;;  %v2434_v41 = vcombine.low %v3506_v24, %v3506_v24  ;;  %1957 = vrot.lane.b32.xlu0 %v1956_v29, %s3046_s10  ;;  %v1978_v52 = vrot.slane %v1976_v27, 1  ;;  %v1981_v58 = vrot.slane %v1979_v30, 2  ;;  %v3562_v30 = vld [vmem:[%s4192_s1 + $0x1a0] sm:$0xff]   ;;  %4294 = vst [vmem:[#allocation27_spill] sm:$0xff] %v3574_v23 }
  0x98   : > { %2513 = vmatpush3.bf16.msra.mxu1 %v3470_v12  ;;  %953 = vmatprep.mubr.bf16.mxu0 %v441_v44  ;;  %v3536_v24 = vld [vmem:[%s4192_s1 + $0x198] sm:$0xff]   ;;  %4292 = vst [vmem:[#allocation25_spill] sm:$0xff] %v3562_v30 }
  0x99   : > { %2491 = vmatpush3.bf16.msra.mxu0 %v3479_v13  ;;  %2514 = vmatprep.subr.bf16.mxu1 %v3484_v21  ;;  %v1965_v46 = vshll.u32 %v2434_v41, 16  ;;  %v1963_v28 = vshrl.u32 %v2434_v41, 16  ;;  %v3587_v41 = vld [vmem:[%s4192_s1 + $0x1a8] sm:$0xff]  }
  0x9a   : > { %2492 = vmatprep.subr.bf16.mxu0 %v3492_v38  ;;  %v417_v44 = vpop.permute.xlu0 %416 }
  0x9b   : > { %v449_v22 = vsel %vm418_vm0, %v407_v51, %v417_v44  ;;  %v1982_v51 = vor.u32 %v1981_v58, %v1978_v52  ;;  %v1967_v29 = vrot.slane %v1965_v46, 1  ;;  %v3569_v46 = vld [vmem:[%s4192_s1 + $0x120] sm:$0xff]   ;;  %v3594_v44 = vld [vmem:[%s4192_s1 + $0x128] sm:$0xff]   ;;  %v3599_v52 = vld [vmem:[%s4192_s1 + $0x1f0] sm:$0xff]  }
  0x9c   : > { %2515 = vmatpush3.bf16.msra.mxu1 %v3503_v57  ;;  %993 = vmatprep.mubr.bf16.mxu1 %v449_v22  ;;  %v3554_v22 = vld [vmem:[%s4192_s1 + $0x160] sm:$0xff]   ;;  %4293 = vst [vmem:[#allocation26_spill] sm:$0xff] %v3569_v46  ;;  %v3605_v58 = vld [vmem:[%s4192_s1 + $0x170] sm:$0xff]  }
  0x9d   : > { %2493 = vmatpush3.bf16.msra.mxu0 %v3513_v32  ;;  %2516 = vmatprep.subr.bf16.mxu1 %v3518_v0  ;;  %4291 = vst [vmem:[#allocation24_spill] sm:$0xff] %v3554_v22  ;;  %v1968_v27 = vor.u32 %v1967_v29, %v1963_v28  ;;  %v3580_v28 = vld [vmem:[%s4192_s1 + $0x168] sm:$0xff]   ;;  %4296 = vst [vmem:[#allocation29_spill] sm:$0xff] %v3605_v58  ;;  %v3611_v29 = vld [vmem:[%s4192_s1 + $0x1b0] sm:$0xff]  }
  0x9e   : > { %2494 = vmatprep.subr.bf16.mxu0 %v3528_v43  ;;  %1983 = vrot.lane.b32.xlu0 %v1982_v51, %s3046_s10  ;;  %4295 = vst [vmem:[#allocation28_spill] sm:$0xff] %v3580_v28  ;;  %v377_v51 = vpop.permute.xlu1 %376  ;;  %4297 = vst [vmem:[#allocation30_spill] sm:$0xff] %v3611_v29  ;;  %v1037_v19 = vpop.permute.xlu0 %1036 }
  0x9f   : > { %1969 = vrot.lane.b32.xlu1 %v1968_v27, %s3046_s10  ;;  %v3618_v27 = vld [vmem:[%s4192_s1 + $0x130] sm:$0xff]  }
  0xa0   : > { %2517 = vmatpush3.bf16.msra.mxu1 %v3536_v24  ;;  %4298 = vst [vmem:[#allocation31_spill] sm:$0xff] %v3618_v27 }
  0xa1   : > { %2495 = vmatpush3.bf16.msra.mxu0 %v3543_v26  ;;  %2518 = vmatprep.subr.bf16.mxu1 %v3548_v42 }
  0xa2   : > { %2496 = vmatprep.subr.bf16.mxu0 %v3554_v22  ;;  %v403_v54 = vpop.permute.xlu1 %402  ;;  %v1063_v47 = vpop.permute.xlu0 %1062 }
  0xa3   : > { %v445_v18 = vsel %vm418_vm0, %v3140_v37, %v403_v54  ;;  %v1122_v37 = vsel %vm418_vm0, %v1027_v31, %v1037_v19  ;;  %v3670_v54 = vld [vmem:[%s3096_s26 + $0x18] sm:$0x7]  ;;  %v3684_v19 = vld [vmem:[%s4192_s1] sm:$0xff]   ;;  %v3690_v31 = vld [vmem:[%s4192_s1 + $0xc8] sm:$0xff]  }
  0xa4   : > { %2519 = vmatpush3.bf16.msra.mxu1 %v3562_v30  ;;  %4305 = vst [vmem:[#allocation38_spill] sm:$0xff] %v3670_v54  ;;  %4307 = vst [vmem:[#allocation40_spill] sm:$0xff] %v3684_v19 }
  0xa5   : > { %2497 = vmatpush3.bf16.msra.mxu0 %v3569_v46  ;;  %2520 = vmatprep.subr.bf16.mxu1 %v3574_v23  ;;  %4308 = vst [vmem:[#allocation41_spill] sm:$0xff] %v3690_v31 }
  0xa6   : > { %2498 = vmatprep.subr.bf16.mxu0 %v3580_v28 }
  0xa8   : > { %2521 = vmatpush3.bf16.msra.mxu1 %v3587_v41 }
  0xa9   : > { %2499 = vmatpush3.bf16.msra.mxu0 %v3594_v44  ;;  %2522 = vmatprep.subr.bf16.mxu1 %v3599_v52 }
  0xaa   : > { %2500 = vmatprep.subr.bf16.mxu0 %v3605_v58  ;;  %v3656_v58 = vld [vmem:[%s4192_s1 + $0xc0] sm:$0xff]  }
  0xab   : > { %4302 = vst [vmem:[#allocation35_spill] sm:$0xff] %v3656_v58 }
  0xac   : > { %2523 = vmatpush3.bf16.msra.mxu1 %v3611_v29 }
  0xad   : > { %2501 = vmatpush3.bf16.msra.mxu0 %v3618_v27  ;;  %2524 = vmatprep.subr.bf16.mxu1 %v3623_v53  ;;  %v1053_v27 = vrot.slane %v3161_v56, 1  ;;  %v2998_v53 = vld [vmem:[%s3096_s26 + $0x8] sm:$0x7]  ;;  %v3667_v56 = vld [vmem:[%s3096_s26 + $0x18] ss:$0 sps:$4 sm:$0xee]  }
  0xae   : > { %2502 = vmatprep.subr.bf16.mxu0 %v3629_v39  ;;  %v437_v29 = vsel %vm418_vm0, %v2998_v53, %v377_v51  ;;  %4304 = vst [vmem:[#allocation37_spill] sm:$0xff] %v3667_v56  ;;  %v3675_v53 = vld [vmem:[%s4192_s1 + $0x80] sm:$0xff]  }
  0xaf   : > { %4306 = vst [vmem:[#allocation39_spill] sm:$0xff] %v3675_v53  ;;  %v1130_v51 = vsel %vm418_vm0, %v1053_v27, %v1063_v47  ;;  %v2005_v27 = vshll.u32 %v3667_v56, 16  ;;  %v3698_v47 = vld [vmem:[%s4192_s1 + $0x48] sm:$0xff]  }
  0xb0   : > { %2525 = vmatpush3.bf16.msra.mxu1 %v3635_v62  ;;  %v3662_v62 = vld [vmem:[%s4192_s1 + $0x40] sm:$0xff]  }
  0xb1   : > { %2503 = vmatpush3.bf16.msra.mxu0 %v3642_v35  ;;  %2554 = vmatprep.subr.bf16.mxu1 %v3656_v58  ;;  %4303 = vst [vmem:[#allocation36_spill] sm:$0xff] %v3662_v62  ;;  %v3711_v35 = vld [vmem:[%s3096_s26 + $0x1c] sm:$0x7] }
  0xb2   : > { %2532 = vmatprep.subr.bf16.mxu0 %v3662_v62  ;;  %v3702_v62 = vld [vmem:[%s3096_s26 + $0x1c] ss:$0 sps:$4 sm:$0xee]   ;;  %4311 = vst [vmem:[#allocation44_spill] sm:$0xff] %v3711_v35 }
  0xb3   : > { %994 = vmatmul.mubr.bf16.vlgmr.msra.gmra.mrb[4].mxu1 %v445_v18  ;;  %v2436_v18 = vcombine.low %v3670_v54, %v3670_v54  ;;  %4309 = vst [vmem:[#allocation42_spill] sm:$0xff] %v3702_v62 }
  0xb4   : > { %954 = vmatmul.mubr.bf16.vlgmr.msra.gmra.mrb[4].mxu0 %v437_v29  ;;  %2555 = vmatpush3.bf16.msra.mxu1 %v3675_v53  ;;  %v2002_v29 = vshrl.u32 %v3667_v56, 16  ;;  %v2007_v53 = vrot.slane %v2005_v27, 2  ;;  %v2031_v27 = vshll.u32 %v3702_v62, 16 }
  0xb5   : > { %2533 = vmatpush3.bf16.msra.mxu0 %v3684_v19  ;;  %2556 = vmatprep.subr.bf16.mxu1 %v3690_v31  ;;  %v1991_v54 = vshll.u32 %v2436_v18, 16  ;;  %v3707_v31 = vld [vmem:[%s4192_s1 + $0x88] sm:$0xff]   ;;  %v1989_v56 = vshrl.u32 %v2436_v18, 16  ;;  %v2438_v18 = vcombine.low %v3711_v35, %v3711_v35 }
  0xb6   : > { %2534 = vmatprep.subr.bf16.mxu0 %v3698_v47  ;;  %1180 = vmatprep.mubr.bf16.mxu0 %v1122_v37  ;;  %v2004_v19 = vrot.slane %v2002_v29, 1  ;;  %4310 = vst [vmem:[#allocation43_spill] sm:$0xff] %v3707_v31  ;;  %v3716_v37 = vld [vmem:[%s4192_s1 + $0x8] sm:$0xff]   ;;  %v2028_v29 = vshrl.u32 %v3702_v62, 16 }
  0xb7   : > { %1220 = vmatprep.mubr.bf16.mxu1 %v1130_v51  ;;  %v1993_v58 = vrot.slane %v1991_v54, 1  ;;  %4312 = vst [vmem:[#allocation45_spill] sm:$0xff] %v3716_v37  ;;  %v3727_v54 = vld [vmem:[%s4192_s1 + $0x50] sm:$0xff]  }
  0xb8   : > { %2557 = vmatpush3.bf16.msra.mxu1 %v3707_v31  ;;  %v2008_v51 = vor.u32 %v2007_v53, %v2004_v19  ;;  %v2017_v53 = vshll.u32 %v2438_v18, 16  ;;  %v2015_v19 = vshrl.u32 %v2438_v18, 16 }
  0xb9   : > { %2535 = vmatpush3.bf16.msra.mxu0 %v3716_v37  ;;  %2558 = vmatprep.subr.bf16.mxu1 %v3157_v48  ;;  %v1994_v31 = vor.u32 %v1993_v58, %v1989_v56  ;;  %v2030_v37 = vrot.slane %v2028_v29, 1  ;;  %v2033_v48 = vrot.slane %v2031_v27, 2  ;;  %v4315_v29 = vld [vmem:[#allocation31_spill] sm:$0xff]  ;;  %v4316_v27 = vld [vmem:[#allocation32_spill] sm:$0xff] }
  0xba   : > { %2536 = vmatprep.subr.bf16.mxu0 %v3727_v54  ;;  %2009 = vrot.lane.b32.xlu0 %v2008_v51, %s3046_s10  ;;  %v2019_v62 = vrot.slane %v2017_v53, 1  ;;  %v4314_v51 = vld [vmem:[#allocation30_spill] sm:$0xff] }
  0xbb   : > { %1995 = vrot.lane.b32.xlu1 %v1994_v31, %s3046_s10  ;;  %v2034_v35 = vor.u32 %v2033_v48, %v2030_v37  ;;  %v4313_v31 = vld [vmem:[#allocation29_spill] sm:$0xff]  ;;  %v4317_v48 = vld [vmem:[#allocation3_spill] sm:$0xff] }
  0xbc   : > { %2559 = vmatpush3.bf16.msra.mxu1 %v3184_v25  ;;  %v2020_v58 = vor.u32 %v2019_v62, %v2015_v19  ;;  %v1089_v25 = vpop.permute.xlu0 %1088  ;;  %v1334_v53 = vrot.slane %v4317_v48, 1  ;;  %v4318_v19 = vld [vmem:[#allocation33_spill] sm:$0xff] }
  0xbd   : > { %2537 = vmatpush3.bf16.msra.mxu0 %v3174_v2  ;;  %2560 = vmatprep.subr.bf16.mxu1 %v3200_v36  ;;  %v1023_v2 = vpop.permute.xlu1 %1022  ;;  %v3008_v36 = vld [vmem:[%s3096_s26 + $0xc] ss:$0 sps:$4 sm:$0xee]  }
  0xbe   : > { %2538 = vmatprep.subr.bf16.mxu0 %v3195_v34  ;;  %2035 = vrot.lane.b32.xlu0 %v2034_v35, %s3046_s10  ;;  %v4327_v48 = vld [vmem:[#allocation45_spill] sm:$0xff] }
  0xbf   : > { %2021 = vrot.lane.b32.xlu1 %v2020_v58, %s3046_s10  ;;  %v3011_v58 = vld [vmem:[%s3096_s26 + $0x10] sm:$0x7] }
  0xc0   : > { %2561 = vmatpush3.bf16.msra.mxu1 %v3217_v49  ;;  %v3009_v49 = vld [vmem:[%s3096_s26 + $0x8] sm:$0x7]  ;;  %v1115_v35 = vpop.permute.xlu0 %1114 }
  0xc1   : > { %2539 = vmatpush3.bf16.msra.mxu0 %v3212_v45  ;;  %2562 = vmatprep.subr.bf16.mxu1 %v3230_v55  ;;  %v1049_v34 = vpop.permute.xlu1 %1048  ;;  %v1079_v45 = vrot.slane %v3008_v36, 1  ;;  %v1105_v55 = vrot.slane %v3190_v33, 1  ;;  %v3012_v36 = vld [vmem:[%s3096_s26 + $0xc] sm:$0x7] }
  0xc2   : > { %2540 = vmatprep.subr.bf16.mxu0 %v3222_v50  ;;  %v1126_v50 = vsel %vm418_vm0, %v3009_v49, %v1049_v34  ;;  %v4320_v49 = vld [vmem:[#allocation34_spill] sm:$0xff] }
  0xc3   : > { %v1138_v62 = vsel %vm418_vm0, %v1079_v45, %v1089_v25  ;;  %v1146_v56 = vsel %vm418_vm0, %v1105_v55, %v1115_v35  ;;  %v4319_v25 = vld [vmem:[#allocation5_spill] sm:$0xff]  ;;  %v4323_v35 = vld [vmem:[#allocation39_spill] sm:$0xff] }
  0xc4   : > { %2563 = vmatpush3.bf16.msra.mxu1 %v3243_v60  ;;  %v1344_v37 = vpop.permute.xlu0 %1343  ;;  %v1360_v34 = vrot.slane %v4319_v25, 1  ;;  %v3840_v25 = vld [vmem:[%s4192_s1 + $0x58] sm:$0xff]  }
  0xc5   : > { %2541 = vmatpush3.bf16.msra.mxu0 %v3237_v59  ;;  %2564 = vmatprep.subr.bf16.mxu1 %v3256_v63  ;;  %v3010_v59 = vld [vmem:[%s3096_s26 + $0x4] sm:$0x7]  ;;  %v1075_v33 = vpop.permute.xlu1 %1074 }
  0xc6   : > { %2542 = vmatprep.subr.bf16.mxu0 %v3249_v61  ;;  %v1118_v60 = vsel %vm418_vm0, %v3010_v59, %v1023_v2  ;;  %v1134_v45 = vsel %vm418_vm0, %v3012_v36, %v1075_v33  ;;  %v4322_v59 = vld [vmem:[#allocation36_spill] sm:$0xff]  ;;  %v4326_v33 = vld [vmem:[#allocation43_spill] sm:$0xff]  ;;  %v3852_v36 = vld [vmem:[%s4192_s1 + $0x18] sm:$0xff]  }
  0xc7   : > { %4328 = vst [vmem:[#allocation29_spill] sm:$0xff] %v3852_v36 }
  0xc8   : > { %2565 = vmatpush3.bf16.msra.mxu1 %v3269_v3  ;;  %v1370_v55 = vpop.permute.xlu0 %1369 }
  0xc9   : > { %2543 = vmatpush3.bf16.msra.mxu0 %v3263_v1  ;;  %2566 = vmatprep.subr.bf16.mxu1 %v3282_v5  ;;  %v1101_v18 = vpop.permute.xlu1 %1100 }
  0xca   : > { %2544 = vmatprep.subr.bf16.mxu0 %v3275_v4  ;;  %v1142_v2 = vsel %vm418_vm0, %v3011_v58, %v1101_v18  ;;  %v4325_v18 = vld [vmem:[#allocation41_spill] sm:$0xff] }
  0xcb   : > { %v3828_v58 = vld [vmem:[%s4192_s1 + $0x10] sm:$0xff]  }
  0xcc   : > { %2567 = vmatpush3.bf16.msra.mxu1 %v3295_v9 }
  0xcd   : > { %2545 = vmatpush3.bf16.msra.mxu0 %v3289_v7  ;;  %2568 = vmatprep.subr.bf16.mxu1 %v3307_v11 }
  0xce   : > { %2546 = vmatprep.subr.bf16.mxu0 %v3301_v10 }
  0xd0   : > { %2569 = vmatpush3.bf16.msra.mxu1 %v3319_v15 }
  0xd1   : > { %2547 = vmatpush3.bf16.msra.mxu0 %v3313_v14  ;;  %2598 = vmatprep.subr.bf16.mxu1 %v3331_v17 }
  0xd2   : > { %2576 = vmatprep.subr.bf16.mxu0 %v3325_v16 }
  0xd3   : > { %1221 = vmatmul.mubr.bf16.vlgmr.msra.gmra.mrb[8].mxu1 %v1126_v50  ;;  %v4321_v50 = vld [vmem:[#allocation35_spill] sm:$0xff] }
  0xd4   : > { %1181 = vmatmul.mubr.bf16.vlgmr.msra.gmra.mrb[8].mxu0 %v1118_v60  ;;  %2599 = vmatpush3.bf16.msra.mxu1 %v3438_v40  ;;  %v1429_v60 = vsel %vm418_vm0, %v1334_v53, %v1344_v37  ;;  %v3815_v37 = vld [vmem:[%s4192_s1 + $0xd0] sm:$0xff]  }
  0xd5   : > { %2577 = vmatpush3.bf16.msra.mxu0 %v3443_v6  ;;  %2600 = vmatprep.subr.bf16.mxu1 %v3448_v8  ;;  %v3822_v53 = vld [vmem:[%s4192_s1 + $0x90] sm:$0xff]  }
  0xd6   : > { %2578 = vmatprep.subr.bf16.mxu0 %v3455_v20  ;;  %1260 = vmatprep.mubr.bf16.mxu0 %v1138_v62  ;;  %v1437_v62 = vsel %vm418_vm0, %v1360_v34, %v1370_v55  ;;  %v3846_v34 = vld [vmem:[%s4192_s1 + $0x98] sm:$0xff]   ;;  %v3864_v55 = vld [vmem:[%s4192_s1 + $0x60] sm:$0xff]  }
  0xd7   : > { %1300 = vmatprep.mubr.bf16.mxu1 %v1146_v56  ;;  %v4324_v56 = vld [vmem:[#allocation40_spill] sm:$0xff]  ;;  %4330 = vst [vmem:[#allocation31_spill] sm:$0xff] %v3864_v55 }
  0xd8   : > { %2601 = vmatpush3.bf16.msra.mxu1 %v3470_v12 }
  0xd9   : > { %2579 = vmatpush3.bf16.msra.mxu0 %v3479_v13  ;;  %2602 = vmatprep.subr.bf16.mxu1 %v3484_v21 }
  0xda   : > { %2580 = vmatprep.subr.bf16.mxu0 %v3492_v38 }
  0xdc   : > { %2603 = vmatpush3.bf16.msra.mxu1 %v3503_v57 }
  0xdd   : > { %2581 = vmatpush3.bf16.msra.mxu0 %v3513_v32  ;;  %2604 = vmatprep.subr.bf16.mxu1 %v3518_v0 }
  0xde   : > { %2582 = vmatprep.subr.bf16.mxu0 %v3528_v43 }
  0xe0   : > { %2605 = vmatpush3.bf16.msra.mxu1 %v3536_v24 }
  0xe1   : > { %2583 = vmatpush3.bf16.msra.mxu0 %v3543_v26  ;;  %2606 = vmatprep.subr.bf16.mxu1 %v3548_v42 }
  0xe2   : > { %2584 = vmatprep.subr.bf16.mxu0 %v3554_v22 }
  0xe4   : > { %2607 = vmatpush3.bf16.msra.mxu1 %v3562_v30 }
  0xe5   : > { %2585 = vmatpush3.bf16.msra.mxu0 %v3569_v46  ;;  %2608 = vmatprep.subr.bf16.mxu1 %v3574_v23 }
  0xe6   : > { %2586 = vmatprep.subr.bf16.mxu0 %v3580_v28 }
  0xe8   : > { %2609 = vmatpush3.bf16.msra.mxu1 %v3587_v41 }
  0xe9   : > { %2587 = vmatpush3.bf16.msra.mxu0 %v3594_v44  ;;  %2610 = vmatprep.subr.bf16.mxu1 %v3599_v52 }
  0xea   : > { %2588 = vmatprep.subr.bf16.mxu0 %v4313_v31 }
  0xec   : > { %2611 = vmatpush3.bf16.msra.mxu1 %v4314_v51 }
  0xed   : > { %2589 = vmatpush3.bf16.msra.mxu0 %v4315_v29  ;;  %2612 = vmatprep.subr.bf16.mxu1 %v4316_v27 }
  0xee   : > { %2590 = vmatprep.subr.bf16.mxu0 %v3629_v39 }
  0xf0   : > { %2613 = vmatpush3.bf16.msra.mxu1 %v4318_v19 }
  0xf1   : > { %2591 = vmatpush3.bf16.msra.mxu0 %v4320_v49  ;;  %2642 = vmatprep.subr.bf16.mxu1 %v4321_v50 }
  0xf2   : > { %2620 = vmatprep.subr.bf16.mxu0 %v4322_v59 }
  0xf3   : > { %1301 = vmatmul.mubr.bf16.vlgmr.msra.gmra.mrb[12].mxu1 %v1142_v2  ;;  %v3834_v2 = vld [vmem:[%s4192_s1 + $0xd8] sm:$0xff]  }
  0xf4   : > { %1261 = vmatmul.mubr.bf16.vlgmr.msra.gmra.mrb[12].mxu0 %v1134_v45  ;;  %2643 = vmatpush3.bf16.msra.mxu1 %v4323_v35  ;;  %v3858_v45 = vld [vmem:[%s4192_s1 + $0xe0] sm:$0xff]  }
  0xf5   : > { %2621 = vmatpush3.bf16.msra.mxu0 %v4324_v56  ;;  %2644 = vmatprep.subr.bf16.mxu1 %v4325_v18  ;;  %4329 = vst [vmem:[#allocation30_spill] sm:$0xff] %v3858_v45 }
  0xf6   : > { %2622 = vmatprep.subr.bf16.mxu0 %v3698_v47  ;;  %1487 = vmatprep.mubr.bf16.mxu0 %v1429_v60  ;;  %v3870_v60 = vld [vmem:[%s4192_s1 + $0xa0] sm:$0xff]  }
  0xf7   : > { %1527 = vmatprep.mubr.bf16.mxu1 %v1437_v62  ;;  %4331 = vst [vmem:[#allocation32_spill] sm:$0xff] %v3870_v60  ;;  %v3876_v62 = vld [vmem:[%s4192_s1 + $0x20] sm:$0xff]  }
  0xf8   : > { %2645 = vmatpush3.bf16.msra.mxu1 %v4326_v33  ;;  %4332 = vst [vmem:[#allocation3_spill] sm:$0xff] %v3876_v62 }
  0xf9   : > { %2623 = vmatpush3.bf16.msra.mxu0 %v4327_v48  ;;  %2646 = vmatprep.subr.bf16.mxu1 %v3815_v37 }
  0xfa   : > { %2624 = vmatprep.subr.bf16.mxu0 %v3727_v54 }
  0xfc   : > { %2647 = vmatpush3.bf16.msra.mxu1 %v3822_v53 }
  0xfd   : > { %2625 = vmatpush3.bf16.msra.mxu0 %v3828_v58  ;;  %2648 = vmatprep.subr.bf16.mxu1 %v3834_v2 }
  0xfe   : > { %2626 = vmatprep.subr.bf16.mxu0 %v3840_v25 }
 0x100   : > { %2649 = vmatpush3.bf16.msra.mxu1 %v3846_v34 }
 0x101   : > { %2627 = vmatpush3.bf16.msra.mxu0 %v3852_v36  ;;  %2650 = vmatprep.subr.bf16.mxu1 %v3858_v45  ;;  %v1330_v45 = vpop.permute.xlu1 %1329 }
 0x102   : > { %2628 = vmatprep.subr.bf16.mxu0 %v3864_v55 }
 0x104   : > { %2651 = vmatpush3.bf16.msra.mxu1 %v3870_v60  ;;  %v1396_v60 = vpop.permute.xlu0 %1395 }
 0x105   : > { %2629 = vmatpush3.bf16.msra.mxu0 %v3876_v62  ;;  %2652 = vmatprep.subr.bf16.mxu1 %v3256_v63  ;;  %v1356_v62 = vpop.permute.xlu1 %1355 }
 0x106   : > { %2630 = vmatprep.subr.bf16.mxu0 %v3249_v61  ;;  %v4333_v61 = vld [vmem:[#allocation7_spill] sm:$0xff] }
 0x107   : > { %v1386_v63 = vrot.slane %v4333_v61, 1 }
 0x108   : > { %2653 = vmatpush3.bf16.msra.mxu1 %v3269_v3  ;;  %v4334_v3 = vld [vmem:[#allocation6_spill] sm:$0xff] }
 0x109   : > { %2631 = vmatpush3.bf16.msra.mxu0 %v3263_v1  ;;  %2654 = vmatprep.subr.bf16.mxu1 %v3282_v5  ;;  %v1433_v1 = vsel %vm418_vm0, %v4334_v3, %v1356_v62  ;;  %v4335_v5 = vld [vmem:[#allocation9_spill] sm:$0xff]  ;;  %v4340_v62 = vld [vmem:[#allocation8_spill] sm:$0xff] }
 0x10a   : > { %2632 = vmatprep.subr.bf16.mxu0 %v3275_v4  ;;  %v1412_v55 = vrot.slane %v4335_v5, 1  ;;  %v4336_v4 = vld [vmem:[#allocation4_spill] sm:$0xff]  ;;  %v4341_v5 = vld [vmem:[#allocation29_spill] sm:$0xff] }
 0x10b   : > { %v1425_v36 = vsel %vm418_vm0, %v4336_v4, %v1330_v45  ;;  %v4342_v4 = vld [vmem:[#allocation30_spill] sm:$0xff] }
 0x10c   : > { %2655 = vmatpush3.bf16.msra.mxu1 %v3295_v9  ;;  %v1445_v9 = vsel %vm418_vm0, %v1386_v63, %v1396_v60 }
 0x10d   : > { %2633 = vmatpush3.bf16.msra.mxu0 %v3289_v7  ;;  %2656 = vmatprep.subr.bf16.mxu1 %v3307_v11  ;;  %v1422_v7 = vpop.permute.xlu0 %1421  ;;  %v1382_v11 = vpop.permute.xlu1 %1381 }
 0x10e   : > { %2634 = vmatprep.subr.bf16.mxu0 %v3301_v10  ;;  %v1453_v10 = vsel %vm418_vm0, %v1412_v55, %v1422_v7  ;;  %v4339_v55 = vld [vmem:[#allocation13_spill] sm:$0xff]  ;;  %v1441_v61 = vsel %vm418_vm0, %v4340_v62, %v1382_v11  ;;  %v4343_v7 = vld [vmem:[#allocation31_spill] sm:$0xff] }
 0x10f   : > { %v1667_v60 = vrot.slane %v4339_v55, 1  ;;  %v3962_v11 = vld [vmem:[%s4192_s1 + $0xe8] sm:$0xff]   ;;  %v4004_v62 = vld [vmem:[%s4192_s1 + $0x30] sm:$0xff]  }
 0x110   : > { %2657 = vmatpush3.bf16.msra.mxu1 %v3319_v15  ;;  %4352 = vst [vmem:[#allocation40_spill] sm:$0xff] %v4004_v62 }
 0x111   : > { %2635 = vmatpush3.bf16.msra.mxu0 %v3313_v14  ;;  %2686 = vmatprep.subr.bf16.mxu1 %v3331_v17  ;;  %v1651_v14 = vpop.permute.xlu0 %1650  ;;  %v1408_v15 = vpop.permute.xlu1 %1407 }
 0x112   : > { %2664 = vmatprep.subr.bf16.mxu0 %v3325_v16  ;;  %v4337_v16 = vld [vmem:[#allocation12_spill] sm:$0xff] }
 0x113   : > { %1528 = vmatmul.mubr.bf16.vlgmr.msra.gmra.mrb[16].mxu1 %v1433_v1  ;;  %v1641_v17 = vrot.slane %v4337_v16, 1  ;;  %v3974_v16 = vld [vmem:[%s4192_s1 + $0xa8] sm:$0xff]  }
 0x114   : > { %1488 = vmatmul.mubr.bf16.vlgmr.msra.gmra.mrb[16].mxu0 %v1425_v36  ;;  %2687 = vmatpush3.bf16.msra.mxu1 %v3438_v40  ;;  %v4338_v36 = vld [vmem:[#allocation10_spill] sm:$0xff]  ;;  %4347 = vst [vmem:[#allocation5_spill] sm:$0xff] %v3974_v16 }
 0x115   : > { %2665 = vmatpush3.bf16.msra.mxu0 %v3443_v6  ;;  %2688 = vmatprep.subr.bf16.mxu1 %v3448_v8  ;;  %v1449_v45 = vsel %vm418_vm0, %v4338_v36, %v1408_v15  ;;  %v1677_v63 = vpop.permute.xlu0 %1676  ;;  %v1736_v3 = vsel %vm418_vm0, %v1641_v17, %v1651_v14  ;;  %v3968_v14 = vld [vmem:[%s4192_s1 + $0x68] sm:$0xff]   ;;  %v1637_v15 = vpop.permute.xlu1 %1636  ;;  %v3986_v36 = vld [vmem:[%s4192_s1 + $0xf0] sm:$0xff]  }
 0x116   : > { %2666 = vmatprep.subr.bf16.mxu0 %v3455_v20  ;;  %1567 = vmatprep.mubr.bf16.mxu0 %v1445_v9  ;;  %v1744_v1 = vsel %vm418_vm0, %v1667_v60, %v1677_v63  ;;  %v4344_v9 = vld [vmem:[#allocation32_spill] sm:$0xff]  ;;  %4346 = vst [vmem:[#allocation33_spill] sm:$0xff] %v3968_v14  ;;  %4349 = vst [vmem:[#allocation35_spill] sm:$0xff] %v3986_v36 }
 0x117   : > { %1607 = vmatprep.mubr.bf16.mxu1 %v1453_v10  ;;  %v4345_v10 = vld [vmem:[#allocation3_spill] sm:$0xff]  ;;  %v3998_v60 = vld [vmem:[%s4192_s1 + $0xb0] sm:$0xff]  }
 0x118   : > { %2689 = vmatpush3.bf16.msra.mxu1 %v3470_v12  ;;  %v3980_v17 = vld [vmem:[%s4192_s1 + $0x28] sm:$0xff]   ;;  %4351 = vst [vmem:[#allocation39_spill] sm:$0xff] %v3998_v60 }
 0x119   : > { %2667 = vmatpush3.bf16.msra.mxu0 %v3479_v13  ;;  %2690 = vmatprep.subr.bf16.mxu1 %v3484_v21  ;;  %4348 = vst [vmem:[#allocation34_spill] sm:$0xff] %v3980_v17  ;;  %v1703_v55 = vpop.permute.xlu0 %1702  ;;  %v1663_v63 = vpop.permute.xlu1 %1662 }
 0x11a   : > { %2668 = vmatprep.subr.bf16.mxu0 %v3492_v38 }
 0x11c   : > { %2691 = vmatpush3.bf16.msra.mxu1 %v3503_v57 }
 0x11d   : > { %2669 = vmatpush3.bf16.msra.mxu0 %v3513_v32  ;;  %2692 = vmatprep.subr.bf16.mxu1 %v3518_v0 }
 0x11e   : > { %2670 = vmatprep.subr.bf16.mxu0 %v3528_v43 }
 0x120   : > { %2693 = vmatpush3.bf16.msra.mxu1 %v3536_v24 }
 0x121   : > { %2671 = vmatpush3.bf16.msra.mxu0 %v3543_v26  ;;  %2694 = vmatprep.subr.bf16.mxu1 %v3548_v42 }
 0x122   : > { %2672 = vmatprep.subr.bf16.mxu0 %v3554_v22 }
 0x124   : > { %2695 = vmatpush3.bf16.msra.mxu1 %v3562_v30 }
 0x125   : > { %2673 = vmatpush3.bf16.msra.mxu0 %v3569_v46  ;;  %2696 = vmatprep.subr.bf16.mxu1 %v3574_v23 }
 0x126   : > { %2674 = vmatprep.subr.bf16.mxu0 %v3580_v28 }
 0x128   : > { %2697 = vmatpush3.bf16.msra.mxu1 %v3587_v41 }
 0x129   : > { %2675 = vmatpush3.bf16.msra.mxu0 %v3594_v44  ;;  %2698 = vmatprep.subr.bf16.mxu1 %v3599_v52 }
 0x12a   : > { %2676 = vmatprep.subr.bf16.mxu0 %v4313_v31 }
 0x12c   : > { %2699 = vmatpush3.bf16.msra.mxu1 %v4314_v51 }
 0x12d   : > { %2677 = vmatpush3.bf16.msra.mxu0 %v4315_v29  ;;  %2700 = vmatprep.subr.bf16.mxu1 %v4316_v27 }
 0x12e   : > { %2678 = vmatprep.subr.bf16.mxu0 %v3629_v39 }
 0x130   : > { %2701 = vmatpush3.bf16.msra.mxu1 %v4318_v19 }
 0x131   : > { %2679 = vmatpush3.bf16.msra.mxu0 %v4320_v49  ;;  %2730 = vmatprep.subr.bf16.mxu1 %v4321_v50 }
 0x132   : > { %2708 = vmatprep.subr.bf16.mxu0 %v4322_v59 }
 0x133   : > { %1608 = vmatmul.mubr.bf16.vlgmr.msra.gmra.mrb[20].mxu1 %v1449_v45  ;;  %v3992_v45 = vld [vmem:[%s4192_s1 + $0x70] sm:$0xff]  }
 0x134   : > { %1568 = vmatmul.mubr.bf16.vlgmr.msra.gmra.mrb[20].mxu0 %v1441_v61  ;;  %2731 = vmatpush3.bf16.msra.mxu1 %v4323_v35  ;;  %4350 = vst [vmem:[#allocation36_spill] sm:$0xff] %v3992_v45  ;;  %v4010_v61 = vld [vmem:[%s4192_s1 + $0xf8] sm:$0xff]  }
 0x135   : > { %2709 = vmatpush3.bf16.msra.mxu0 %v4324_v56  ;;  %2732 = vmatprep.subr.bf16.mxu1 %v4325_v18  ;;  %4353 = vst [vmem:[#allocation41_spill] sm:$0xff] %v4010_v61 }
 0x136   : > { %2710 = vmatprep.subr.bf16.mxu0 %v3698_v47  ;;  %1794 = vmatprep.mubr.bf16.mxu0 %v1736_v3  ;;  %v4016_v3 = vld [vmem:[%s4192_s1 + $0x78] sm:$0xff]  }
 0x137   : > { %1834 = vmatprep.mubr.bf16.mxu1 %v1744_v1  ;;  %4354 = vst [vmem:[#allocation43_spill] sm:$0xff] %v4016_v3  ;;  %v4355_v1 = vld [vmem:[#allocation15_spill] sm:$0xff] }
 0x138   : > { %2733 = vmatpush3.bf16.msra.mxu1 %v4326_v33 }
 0x139   : > { %2711 = vmatpush3.bf16.msra.mxu0 %v4327_v48  ;;  %2734 = vmatprep.subr.bf16.mxu1 %v3815_v37 }
 0x13a   : > { %2712 = vmatprep.subr.bf16.mxu0 %v3727_v54 }
 0x13c   : > { %2735 = vmatpush3.bf16.msra.mxu1 %v3822_v53 }
 0x13d   : > { %2713 = vmatpush3.bf16.msra.mxu0 %v3828_v58  ;;  %2736 = vmatprep.subr.bf16.mxu1 %v3834_v2 }
 0x13e   : > { %2714 = vmatprep.subr.bf16.mxu0 %v3840_v25 }
 0x140   : > { %2737 = vmatpush3.bf16.msra.mxu1 %v3846_v34 }
 0x141   : > { %2715 = vmatpush3.bf16.msra.mxu0 %v4341_v5  ;;  %2738 = vmatprep.subr.bf16.mxu1 %v4342_v4 }
 0x142   : > { %2716 = vmatprep.subr.bf16.mxu0 %v4343_v7 }
 0x144   : > { %2739 = vmatpush3.bf16.msra.mxu1 %v4344_v9 }
 0x145   : > { %2717 = vmatpush3.bf16.msra.mxu0 %v4345_v10  ;;  %2740 = vmatprep.subr.bf16.mxu1 %v3962_v11 }
 0x146   : > { %2718 = vmatprep.subr.bf16.mxu0 %v3968_v14 }
 0x148   : > { %2741 = vmatpush3.bf16.msra.mxu1 %v3974_v16  ;;  %v4358_v16 = vld [vmem:[#allocation11_spill] sm:$0xff] }
 0x149   : > { %2719 = vmatpush3.bf16.msra.mxu0 %v3980_v17  ;;  %2742 = vmatprep.subr.bf16.mxu1 %v3986_v36  ;;  %v4357_v36 = vld [vmem:[#allocation17_spill] sm:$0xff]  ;;  %v1732_v14 = vsel %vm418_vm0, %v4358_v16, %v1637_v15 }
 0x14a   : > { %2720 = vmatprep.subr.bf16.mxu0 %v3992_v45  ;;  %v4356_v45 = vld [vmem:[#allocation14_spill] sm:$0xff]  ;;  %v1719_v17 = vrot.slane %v4357_v36, 1 }
 0x14b   : > { %v4046_v36 = vld [vmem:[%s4192_s1 + $0x140] sm:$0xff]  }
 0x14c   : > { %2743 = vmatpush3.bf16.msra.mxu1 %v3998_v60  ;;  %v1693_v60 = vrot.slane %v4355_v1, 1  ;;  %v4040_v1 = vld [vmem:[%s4192_s1 + $0x1c0] sm:$0xff]  }
 0x14d   : > { %2721 = vmatpush3.bf16.msra.mxu0 %v4004_v62  ;;  %2744 = vmatprep.subr.bf16.mxu1 %v4010_v61  ;;  %v4023_v62 = vld [vmem:[%s4192_s1 + $0xb8] sm:$0xff]   ;;  %v1740_v61 = vsel %vm418_vm0, %v4356_v45, %v1663_v63  ;;  %v1729_v45 = vpop.permute.xlu0 %1728 }
 0x14e   : > { %2722 = vmatprep.subr.bf16.mxu0 %v4016_v3  ;;  %v4034_v3 = vld [vmem:[%s4192_s1 + $0x38] sm:$0xff]   ;;  %v1752_v15 = vsel %vm418_vm0, %v1693_v60, %v1703_v55  ;;  %v1760_v16 = vsel %vm418_vm0, %v1719_v17, %v1729_v45  ;;  %v1689_v17 = vpop.permute.xlu1 %1688 }
 0x150   : > { %2745 = vmatpush3.bf16.msra.mxu1 %v4023_v62 }
 0x151   : > { %2723 = vmatpush3.bf16.msra.mxu0 %v4034_v3  ;;  %2774 = vmatprep.subr.bf16.mxu1 %v4040_v1 }
 0x152   : > { %2752 = vmatprep.subr.bf16.mxu0 %v4046_v36 }
 0x153   : > { %1835 = vmatmul.mubr.bf16.vlgmr.msra.gmra.mrb[24].mxu1 %v1740_v61  ;;  %v4071_v61 = vld [vmem:[#allocation2] ss:$0 sm:$0xff] }
 0x154   : > { %1795 = vmatmul.mubr.bf16.vlgmr.msra.gmra.mrb[24].mxu0 %v1732_v14  ;;  %2775 = vmatpush3.bf16.msra.mxu1 %v3438_v40 }
 0x155   : > { %2753 = vmatpush3.bf16.msra.mxu0 %v3443_v6  ;;  %2776 = vmatprep.subr.bf16.mxu1 %v3448_v8 }
 0x156   : > { %2754 = vmatprep.subr.bf16.mxu0 %v3455_v20  ;;  %1874 = vmatprep.mubr.bf16.mxu0 %v1752_v15 }
 0x157   : > { %1914 = vmatprep.mubr.bf16.mxu1 %v1760_v16 }
 0x158   : > { %2777 = vmatpush3.bf16.msra.mxu1 %v3470_v12 }
 0x159   : > { %2755 = vmatpush3.bf16.msra.mxu0 %v3479_v13  ;;  %2778 = vmatprep.subr.bf16.mxu1 %v3484_v21 }
 0x15a   : > { %2756 = vmatprep.subr.bf16.mxu0 %v3492_v38 }
 0x15c   : > { %2779 = vmatpush3.bf16.msra.mxu1 %v3503_v57 }
 0x15d   : > { %2757 = vmatpush3.bf16.msra.mxu0 %v3513_v32  ;;  %2780 = vmatprep.subr.bf16.mxu1 %v3518_v0 }
 0x15e   : > { %2758 = vmatprep.subr.bf16.mxu0 %v3528_v43 }
 0x160   : > { %2781 = vmatpush3.bf16.msra.mxu1 %v3536_v24 }
 0x161   : > { %2759 = vmatpush3.bf16.msra.mxu0 %v3543_v26  ;;  %2782 = vmatprep.subr.bf16.mxu1 %v3548_v42 }
 0x162   : > { %2760 = vmatprep.subr.bf16.mxu0 %v3554_v22  ;;  %v1958_v22 = vpop.permute.xlu0 %1957 }
 0x164   : > { %2783 = vmatpush3.bf16.msra.mxu1 %v3562_v30 }
 0x165   : > { %2761 = vmatpush3.bf16.msra.mxu0 %v3569_v46  ;;  %2784 = vmatprep.subr.bf16.mxu1 %v3574_v23 }
 0x166   : > { %v2482_v14 = vpop.f32.mrb[0].mxu1  ;;  %2762 = vmatprep.subr.bf16.mxu0 %v3580_v28 }
 0x167   : > { %v2460_v55 = vpop.f32.mrb[0].mxu0  ;;  %v2483_v60 = vpop.f32.mrb[1].mxu1 }
 0x168   : > { %v2461_v63 = vpop.f32.mrb[1].mxu0  ;;  %v2484_v45 = vadd.f32 %v2483_v60, %v2482_v14  ;;  %2785 = vmatpush3.bf16.msra.mxu1 %v3587_v41  ;;  %v2485_v15 = vpop.f32.mrb[2].mxu1  ;;  %v4361_v60 = vld [vmem:[#allocation21_spill] sm:$0xff] }
 0x169   : > { %v2462_v16 = vadd.f32 %v2461_v63, %v2460_v55  ;;  %2763 = vmatpush3.bf16.msra.mxu0 %v3594_v44  ;;  %v2463_v30 = vpop.f32.mrb[2].mxu0  ;;  %v2486_v46 = vpop.f32.mrb[3].mxu1  ;;  %2786 = vmatprep.subr.bf16.mxu1 %v3599_v52  ;;  %v1974_v63 = vrot.slane %v4361_v60, 1  ;;  %v4362_v15 = vld [vmem:[#allocation16_spill] sm:$0xff]  ;;  %v4374_v60 = vld [vmem:[#allocation42_spill] sm:$0xff] }
 0x16a   : > { %v2464_v23 = vpop.f32.mrb[3].mxu0  ;;  %2764 = vmatprep.subr.bf16.mxu0 %v4313_v31  ;;  %v1715_v14 = vpop.permute.xlu1 %1714  ;;  %v4359_v30 = vld [vmem:[#allocation19_spill] sm:$0xff] }
 0x16b   : > { %v876_v28 = vadd.f32 %v2462_v16, %v4071_v61  ;;  %v1948_v46 = vrot.slane %v4359_v30, 1  ;;  %v4360_v23 = vld [vmem:[#allocation18_spill] sm:$0xff]  ;;  %v1748_v16 = vsel %vm418_vm0, %v4362_v15, %v1689_v17  ;;  %v4371_v30 = vld [vmem:[#allocation43_spill] sm:$0xff]  ;;  %v4375_v15 = vld [vmem:[#allocation20_spill] sm:$0xff] }
 0x16c   : > { %2787 = vmatpush3.bf16.msra.mxu1 %v4314_v51  ;;  %v1756_v55 = vsel %vm418_vm0, %v4360_v23, %v1715_v14  ;;  %v4373_v23 = vld [vmem:[#allocation22_spill] sm:$0xff] }
 0x16d   : > { %v916_v42 = vadd.f32 %v2484_v45, %v876_v28  ;;  %2765 = vmatpush3.bf16.msra.mxu0 %v4315_v29  ;;  %2788 = vmatprep.subr.bf16.mxu1 %v4316_v27  ;;  %v1984_v28 = vpop.permute.xlu0 %1983  ;;  %v2043_v45 = vsel %vm418_vm0, %v1948_v46, %v1958_v22 }
 0x16e   : > { %2766 = vmatprep.subr.bf16.mxu0 %v3629_v39  ;;  %v2051_v14 = vsel %vm418_vm0, %v1974_v63, %v1984_v28  ;;  %v2026_v63 = vrot.slane %v4374_v60, 1 }
 0x170   : > { %2789 = vmatpush3.bf16.msra.mxu1 %v4318_v19 }
 0x171   : > { %2767 = vmatpush3.bf16.msra.mxu0 %v4320_v49  ;;  %2818 = vmatprep.subr.bf16.mxu1 %v4321_v50 }
 0x172   : > { %2796 = vmatprep.subr.bf16.mxu0 %v4322_v59 }
 0x173   : > { %1915 = vmatmul.mubr.bf16.vlgmr.msra.gmra.mrb[28].mxu1 %v1756_v55 }
 0x174   : > { %1875 = vmatmul.mubr.bf16.vlgmr.msra.gmra.mrb[28].mxu0 %v1748_v16  ;;  %2819 = vmatpush3.bf16.msra.mxu1 %v4323_v35 }
 0x175   : > { %2797 = vmatpush3.bf16.msra.mxu0 %v4324_v56  ;;  %2820 = vmatprep.subr.bf16.mxu1 %v4325_v18 }
 0x176   : > { %2798 = vmatprep.subr.bf16.mxu0 %v3698_v47  ;;  %2101 = vmatprep.mubr.bf16.mxu0 %v2043_v45  ;;  %v4363_v47 = vld [vmem:[#allocation33_spill] sm:$0xff] }
 0x177   : > { %2141 = vmatprep.mubr.bf16.mxu1 %v2051_v14 }
 0x178   : > { %2821 = vmatpush3.bf16.msra.mxu1 %v4326_v33  ;;  %v4364_v33 = vld [vmem:[#allocation5_spill] sm:$0xff] }
 0x179   : > { %2799 = vmatpush3.bf16.msra.mxu0 %v4327_v48  ;;  %2822 = vmatprep.subr.bf16.mxu1 %v3815_v37 }
 0x17a   : > { %2800 = vmatprep.subr.bf16.mxu0 %v3727_v54  ;;  %v1944_v54 = vpop.permute.xlu1 %1943 }
 0x17b   : > { %v2039_v16 = vsel %vm418_vm0, %v4375_v15, %v1944_v54 }
 0x17c   : > { %2823 = vmatpush3.bf16.msra.mxu1 %v3822_v53  ;;  %v4365_v53 = vld [vmem:[#allocation34_spill] sm:$0xff] }
 0x17d   : > { %2801 = vmatpush3.bf16.msra.mxu0 %v3828_v58  ;;  %2824 = vmatprep.subr.bf16.mxu1 %v3834_v2  ;;  %v4366_v2 = vld [vmem:[#allocation35_spill] sm:$0xff] }
 0x17e   : > { %2802 = vmatprep.subr.bf16.mxu0 %v3840_v25  ;;  %v1970_v17 = vpop.permute.xlu1 %1969 }
 0x17f   : > { %v2047_v55 = vsel %vm418_vm0, %v4373_v23, %v1970_v17 }
 0x180   : > { %2825 = vmatpush3.bf16.msra.mxu1 %v3846_v34  ;;  %v4367_v34 = vld [vmem:[#allocation36_spill] sm:$0xff] }
 0x181   : > { %2803 = vmatpush3.bf16.msra.mxu0 %v4341_v5  ;;  %2826 = vmatprep.subr.bf16.mxu1 %v4342_v4  ;;  %v2010_v4 = vpop.permute.xlu0 %2009 }
 0x182   : > { %2804 = vmatprep.subr.bf16.mxu0 %v4343_v7  ;;  %v4368_v7 = vld [vmem:[#allocation39_spill] sm:$0xff] }
 0x184   : > { %2827 = vmatpush3.bf16.msra.mxu1 %v4344_v9 }
 0x185   : > { %2805 = vmatpush3.bf16.msra.mxu0 %v4345_v10  ;;  %2828 = vmatprep.subr.bf16.mxu1 %v3962_v11  ;;  %v4369_v10 = vld [vmem:[#allocation40_spill] sm:$0xff]  ;;  %v4370_v11 = vld [vmem:[#allocation41_spill] sm:$0xff]  ;;  %v2036_v28 = vpop.permute.xlu0 %2035 }
 0x186   : > { %v2526_v22 = vpop.f32.mrb[4].mxu1  ;;  %2806 = vmatprep.subr.bf16.mxu0 %v4363_v47 }
 0x187   : > { %v2504_v50 = vpop.f32.mrb[4].mxu0  ;;  %v2527_v59 = vpop.f32.mrb[5].mxu1 }
 0x188   : > { %v2505_v35 = vpop.f32.mrb[5].mxu0  ;;  %v2528_v56 = vadd.f32 %v2527_v59, %v2526_v22  ;;  %v2529_v18 = vpop.f32.mrb[6].mxu1  ;;  %2829 = vmatpush3.bf16.msra.mxu1 %v4364_v33 }
 0x189   : > { %v2506_v48 = vadd.f32 %v2505_v35, %v2504_v50  ;;  %v2507_v37 = vpop.f32.mrb[6].mxu0  ;;  %2807 = vmatpush3.bf16.msra.mxu0 %v4365_v53  ;;  %v2530_v58 = vpop.f32.mrb[7].mxu1  ;;  %2830 = vmatprep.subr.bf16.mxu1 %v4366_v2 }
 0x18a   : > { %v2508_v25 = vpop.f32.mrb[7].mxu0  ;;  %2808 = vmatprep.subr.bf16.mxu0 %v4367_v34 }
 0x18b   : > { %v956_v5 = vadd.f32 %v2506_v48, %v916_v42  ;;  %v4372_v42 = vld [vmem:[#allocation37_spill] sm:$0xff] }
 0x18c   : > { %2831 = vmatpush3.bf16.msra.mxu1 %v4368_v7  ;;  %v2000_v46 = vrot.slane %v4372_v42, 1 }
 0x18d   : > { %v996_v9 = vadd.f32 %v2528_v56, %v956_v5  ;;  %2809 = vmatpush3.bf16.msra.mxu0 %v4369_v10  ;;  %2832 = vmatprep.subr.bf16.mxu1 %v4370_v11 }
 0x18e   : > { %2810 = vmatprep.subr.bf16.mxu0 %v4371_v30  ;;  %v2059_v45 = vsel %vm418_vm0, %v2000_v46, %v2010_v4 }
 0x18f   : > { %1002 = vst.msk [vmem:[%s4122_s15] sm:$0x1f] %vm1001_vm1, %v996_v9 }
 0x190   : > { %2833 = vmatpush3.bf16.msra.mxu1 %v4023_v62  ;;  %v2067_v62 = vsel %vm418_vm0, %v2026_v63, %v2036_v28 }
 0x191   : > { %2811 = vmatpush3.bf16.msra.mxu0 %v4034_v3  ;;  %2862 = vmatprep.subr.bf16.mxu1 %v4040_v1 }
 0x192   : > { %2840 = vmatprep.subr.bf16.mxu0 %v4046_v36 }
 0x193   : > { %2142 = vmatmul.mubr.bf16.vlgmr.msra.gmra.mrb[32].mxu1 %v2047_v55 }
 0x194   : > { %2102 = vmatmul.mubr.bf16.vlgmr.msra.gmra.mrb[32].mxu0 %v2039_v16  ;;  %2863 = vmatpush3.bf16.msra.mxu1 %v3438_v40  ;;  %v4376_v40 = vld [vmem:[#allocation23_spill] sm:$0xff] }
 0x195   : > { %2841 = vmatpush3.bf16.msra.mxu0 %v3443_v6  ;;  %2864 = vmatprep.subr.bf16.mxu1 %v3448_v8  ;;  %v4377_v6 = vld [vmem:[#allocation24_spill] sm:$0xff]  ;;  %v4378_v8 = vld [vmem:[#allocation25_spill] sm:$0xff] }
 0x196   : > { %2842 = vmatprep.subr.bf16.mxu0 %v3455_v20  ;;  %2181 = vmatprep.mubr.bf16.mxu0 %v2059_v45  ;;  %v4379_v20 = vld [vmem:[#allocation26_spill] sm:$0xff] }
 0x197   : > { %2221 = vmatprep.mubr.bf16.mxu1 %v2067_v62 }
 0x198   : > { %2865 = vmatpush3.bf16.msra.mxu1 %v3470_v12  ;;  %v4380_v12 = vld [vmem:[#allocation27_spill] sm:$0xff] }
 0x199   : > { %2843 = vmatpush3.bf16.msra.mxu0 %v3479_v13  ;;  %2866 = vmatprep.subr.bf16.mxu1 %v3484_v21  ;;  %v4381_v13 = vld [vmem:[#allocation28_spill] sm:$0xff]  ;;  %v1996_v21 = vpop.permute.xlu1 %1995 }
 0x19a   : > { %2844 = vmatprep.subr.bf16.mxu0 %v3492_v38 }
 0x19c   : > { %2867 = vmatpush3.bf16.msra.mxu1 %v3503_v57 }
 0x19d   : > { %2845 = vmatpush3.bf16.msra.mxu0 %v3513_v32  ;;  %2868 = vmatprep.subr.bf16.mxu1 %v3518_v0 }
 0x19e   : > { %2846 = vmatprep.subr.bf16.mxu0 %v3528_v43 }
 0x1a0   : > { %2869 = vmatpush3.bf16.msra.mxu1 %v3536_v24 }
 0x1a1   : > { %2847 = vmatpush3.bf16.msra.mxu0 %v3543_v26  ;;  %2870 = vmatprep.subr.bf16.mxu1 %v4376_v40 }
 0x1a2   : > { %2848 = vmatprep.subr.bf16.mxu0 %v4377_v6 }
 0x1a4   : > { %2871 = vmatpush3.bf16.msra.mxu1 %v4378_v8 }
 0x1a5   : > { %2849 = vmatpush3.bf16.msra.mxu0 %v4379_v20  ;;  %2872 = vmatprep.subr.bf16.mxu1 %v4380_v12 }
 0x1a6   : > { %v2570_v57 = vpop.f32.mrb[8].mxu1  ;;  %2850 = vmatprep.subr.bf16.mxu0 %v4381_v13 }
 0x1a7   : > { %v2548_v38 = vpop.f32.mrb[8].mxu0  ;;  %v2571_v32 = vpop.f32.mrb[9].mxu1 }
 0x1a8   : > { %v2549_v0 = vpop.f32.mrb[9].mxu0  ;;  %v2572_v24 = vadd.f32 %v2571_v32, %v2570_v57  ;;  %v2573_v43 = vpop.f32.mrb[10].mxu1  ;;  %2873 = vmatpush3.bf16.msra.mxu1 %v3587_v41 }
 0x1a9   : > { %v2550_v26 = vadd.f32 %v2549_v0, %v2548_v38  ;;  %v2551_v3 = vpop.f32.mrb[10].mxu0  ;;  %2851 = vmatpush3.bf16.msra.mxu0 %v3594_v44  ;;  %v2574_v1 = vpop.f32.mrb[11].mxu1  ;;  %2874 = vmatprep.subr.bf16.mxu1 %v3599_v52  ;;  %v4382_v44 = vld [vmem:[#allocation44_spill] sm:$0xff] }
 0x1aa   : > { %v2552_v36 = vpop.f32.mrb[11].mxu0  ;;  %2852 = vmatprep.subr.bf16.mxu0 %v4313_v31  ;;  %v2022_v41 = vpop.permute.xlu1 %2021  ;;  %v4383_v31 = vld [vmem:[#allocation38_spill] sm:$0xff] }
 0x1ab   : > { %v1183_v14 = vadd.f32 %v2550_v26, %v4071_v61  ;;  %v2063_v52 = vsel %vm418_vm0, %v4382_v44, %v2022_v41  ;;  %v2055_v47 = vsel %vm418_vm0, %v4383_v31, %v1996_v21 }
 0x1ac   : > { %2875 = vmatpush3.bf16.msra.mxu1 %v4314_v51 }
 0x1ad   : > { %v1223_v22 = vadd.f32 %v2572_v24, %v1183_v14  ;;  %2853 = vmatpush3.bf16.msra.mxu0 %v4315_v29  ;;  %2876 = vmatprep.subr.bf16.mxu1 %v4316_v27 }
 0x1ae   : > { %2854 = vmatprep.subr.bf16.mxu0 %v3629_v39 }
 0x1b0   : > { %2877 = vmatpush3.bf16.msra.mxu1 %v4318_v19 }
 0x1b1   : > { %2855 = vmatpush3.bf16.msra.mxu0 %v4320_v49 }
 0x1b3   : > { %2222 = vmatmul.mubr.bf16.vlgmr.msra.gmra.mrb[36].mxu1 %v2063_v52 }
 0x1b4   : > { %2182 = vmatmul.mubr.bf16.vlgmr.msra.gmra.mrb[36].mxu0 %v2055_v47 }
 0x1c6   : > { %v2614_v51 = vpop.f32.mrb[12].mxu1 }
 0x1c7   : > { %v2592_v29 = vpop.f32.mrb[12].mxu0  ;;  %v2615_v54 = vpop.f32.mrb[13].mxu1 }
 0x1c8   : > { %v2593_v27 = vpop.f32.mrb[13].mxu0  ;;  %v2616_v50 = vadd.f32 %v2615_v54, %v2614_v51  ;;  %v2617_v59 = vpop.f32.mrb[14].mxu1 }
 0x1c9   : > { %v2594_v39 = vadd.f32 %v2593_v27, %v2592_v29  ;;  %v2595_v35 = vpop.f32.mrb[14].mxu0  ;;  %v2618_v19 = vpop.f32.mrb[15].mxu1 }
 0x1ca   : > { %v2596_v56 = vpop.f32.mrb[15].mxu0 }
 0x1cb   : > { %v1263_v18 = vadd.f32 %v2594_v39, %v1223_v22 }
 0x1cd   : > { %v1303_v33 = vadd.f32 %v2616_v50, %v1263_v18 }
 0x1cf   : > { %2389 = vst.msk [vmem:[%s4122_s15 + $0x8] sm:$0x1f] %vm1001_vm1, %v1303_v33 }
 0x1e6   : > { %v2658_v49 = vpop.f32.mrb[16].mxu1 }
 0x1e7   : > { %v2636_v48 = vpop.f32.mrb[16].mxu0  ;;  %v2659_v37 = vpop.f32.mrb[17].mxu1 }
 0x1e8   : > { %v2637_v53 = vpop.f32.mrb[17].mxu0  ;;  %v2660_v58 = vadd.f32 %v2659_v37, %v2658_v49  ;;  %v2661_v2 = vpop.f32.mrb[18].mxu1 }
 0x1e9   : > { %v2638_v25 = vadd.f32 %v2637_v53, %v2636_v48  ;;  %v2639_v34 = vpop.f32.mrb[18].mxu0  ;;  %v2662_v5 = vpop.f32.mrb[19].mxu1 }
 0x1ea   : > { %v2640_v4 = vpop.f32.mrb[19].mxu0 }
 0x1eb   : > { %v1490_v7 = vadd.f32 %v2638_v25, %v4071_v61 }
 0x1ed   : > { %v1530_v9 = vadd.f32 %v2660_v58, %v1490_v7 }
 0x206   : > { %v2702_v10 = vpop.f32.mrb[20].mxu1 }
 0x207   : > { %v2680_v11 = vpop.f32.mrb[20].mxu0  ;;  %v2703_v17 = vpop.f32.mrb[21].mxu1 }
 0x208   : > { %v2681_v30 = vpop.f32.mrb[21].mxu0  ;;  %v2704_v42 = vadd.f32 %v2703_v17, %v2702_v10  ;;  %v2705_v46 = vpop.f32.mrb[22].mxu1 }
 0x209   : > { %v2682_v23 = vadd.f32 %v2681_v30, %v2680_v11  ;;  %v2683_v55 = vpop.f32.mrb[22].mxu0  ;;  %v2706_v60 = vpop.f32.mrb[23].mxu1 }
 0x20a   : > { %v2684_v63 = vpop.f32.mrb[23].mxu0 }
 0x20b   : > { %v1570_v15 = vadd.f32 %v2682_v23, %v1530_v9 }
 0x20d   : > { %v1610_v16 = vadd.f32 %v2704_v42, %v1570_v15 }
 0x20f   : > { %2406 = vst.msk [vmem:[%s4122_s15 + $0x10] sm:$0x1f] %vm1001_vm1, %v1610_v16 }
 0x226   : > { %v2746_v28 = vpop.f32.mrb[24].mxu1 }
 0x227   : > { %v2724_v45 = vpop.f32.mrb[24].mxu0  ;;  %v2747_v62 = vpop.f32.mrb[25].mxu1 }
 0x228   : > { %v2725_v40 = vpop.f32.mrb[25].mxu0  ;;  %v2748_v6 = vadd.f32 %v2747_v62, %v2746_v28  ;;  %v2749_v8 = vpop.f32.mrb[26].mxu1 }
 0x229   : > { %v2726_v20 = vadd.f32 %v2725_v40, %v2724_v45  ;;  %v2727_v12 = vpop.f32.mrb[26].mxu0  ;;  %v2750_v57 = vpop.f32.mrb[27].mxu1 }
 0x22a   : > { %v2728_v13 = vpop.f32.mrb[27].mxu0 }
 0x22b   : > { %v1797_v21 = vadd.f32 %v2726_v20, %v4071_v61 }
 0x22d   : > { %v1837_v38 = vadd.f32 %v2748_v6, %v1797_v21 }
 0x246   : > { %v2790_v32 = vpop.f32.mrb[28].mxu1 }
 0x247   : > { %v2768_v0 = vpop.f32.mrb[28].mxu0  ;;  %v2791_v24 = vpop.f32.mrb[29].mxu1 }
 0x248   : > { %v2769_v43 = vpop.f32.mrb[29].mxu0  ;;  %v2792_v26 = vadd.f32 %v2791_v24, %v2790_v32  ;;  %v2793_v3 = vpop.f32.mrb[30].mxu1 }
 0x249   : > { %v2770_v1 = vadd.f32 %v2769_v43, %v2768_v0  ;;  %v2771_v36 = vpop.f32.mrb[30].mxu0  ;;  %v2794_v14 = vpop.f32.mrb[31].mxu1 }
 0x24a   : > { %v2772_v22 = vpop.f32.mrb[31].mxu0 }
 0x24b   : > { %v1877_v41 = vadd.f32 %v2770_v1, %v1837_v38 }
 0x24d   : > { %v1917_v44 = vadd.f32 %v2792_v26, %v1877_v41 }
 0x24f   : > { %2423 = vst.msk [vmem:[%s4122_s15 + $0x18] sm:$0x1f] %vm1001_vm1, %v1917_v44 }
 0x266   : > { %v2834_v52 = vpop.f32.mrb[32].mxu1 }
 0x267   : > { %v2812_v31 = vpop.f32.mrb[32].mxu0  ;;  %v2835_v47 = vpop.f32.mrb[33].mxu1 }
 0x268   : > { %v2813_v51 = vpop.f32.mrb[33].mxu0  ;;  %v2836_v29 = vadd.f32 %v2835_v47, %v2834_v52  ;;  %v2837_v54 = vpop.f32.mrb[34].mxu1 }
 0x269   : > { %v2814_v27 = vadd.f32 %v2813_v51, %v2812_v31  ;;  %v2815_v50 = vpop.f32.mrb[34].mxu0  ;;  %v2838_v59 = vpop.f32.mrb[35].mxu1 }
 0x26a   : > { %v2816_v39 = vpop.f32.mrb[35].mxu0 }
 0x26b   : > { %v2104_v35 = vadd.f32 %v2814_v27, %v4071_v61 }
 0x26d   : > { %v2144_v19 = vadd.f32 %v2836_v29, %v2104_v35 }
 0x286   : > { %v2878_v56 = vpop.f32.mrb[36].mxu1 }
 0x287   : > { %v2856_v18 = vpop.f32.mrb[36].mxu0  ;;  %v2879_v33 = vpop.f32.mrb[37].mxu1 }
 0x288   : > { %v2857_v49 = vpop.f32.mrb[37].mxu0  ;;  %v2880_v48 = vadd.f32 %v2879_v33, %v2878_v56  ;;  %v2881_v37 = vpop.f32.mrb[38].mxu1 }
 0x289   : > { %v2858_v53 = vadd.f32 %v2857_v49, %v2856_v18  ;;  %v2859_v58 = vpop.f32.mrb[38].mxu0  ;;  %v2882_v2 = vpop.f32.mrb[39].mxu1 }
 0x28a   : > { %v2860_v25 = vpop.f32.mrb[39].mxu0 }
 0x28b   : > { %v2184_v34 = vadd.f32 %v2858_v53, %v2144_v19 }
 0x28d   : > { %v2224_v5 = vadd.f32 %v2880_v48, %v2184_v34 }
 0x28f   : > { %2440 = vst.msk [vmem:[%s4122_s15 + $0x20] sm:$0x1f] %vm1001_vm1, %v2224_v5 }
 0x290 PF: > { %s15_s14 = sadd.s32 1, %s3044_s14  }
 0x291   : > { %p12_p4 = scmp.ge.s32.totalorder %s15_s14, 4  }
 0x293   :  { %14 = sbr.rel (!%p12_p4) target bundleno = 3 (0x3), region = 73 }

</bundles_post_ra>
